<compile_context>
chip_gen: v7x
topology: tpu7x:2x2x1
jax: 0.10.0
libtpu: 0.0.40
codegen_flags: <defaults>
</compile_context>

<pallas_src>
import functools

import jax
import jax.numpy as jnp
from jax import lax
from jax.experimental import pallas as pl
from jax.experimental.pallas import tpu as pltpu


def _round_up(x, m):
    return (x + m - 1) // m * m


def fused_resblock_kernel(x_ref, w1_ref, b1_ref, w2_ref, b2_ref, mask_ref,
                          alpha_ref, o_ref, xpad_ref, ypad_ref, *, H, W, C):
    """One image per grid step.

    x_ref    : (1, H, W, C)   f32   input block (also the residual source)
    w*_ref   : (9*C, C)       bf16  im2col weights (tap-major, channel-minor)
    b*_ref   : (1, C)         f32   biases
    mask_ref : (M, 1)         f32   {0,1} valid-column mask over the output run
    alpha_ref: (2,)           f32   PReLU alphas (SMEM)
    o_ref    : (1, H, W, C)   f32   output block
    xpad_ref : (R, C)         bf16  flattened zero-padded conv1 input (VMEM)
    ypad_ref : (R, C)         bf16  flattened zero-padded conv2 input (VMEM)
    """
    bf16 = jnp.bfloat16
    Wp = W + 2                      # padded width
    M = H * Wp                      # contiguous run covering every valid pixel
    base = Wp + 1                   # flat index of the first valid output pixel
    # Run row r <-> padded flat index base + r; image pixel (i, j) <-> r = i*Wp + j.

    def conv3x3_bias_prelu(src_ref, w_ref, b_ref, alpha):
        # Tap (dy, dx) of the 3x3 stencil is the contiguous window
        # src[dy*Wp + dx : dy*Wp + dx + M] of the flattened padded image.
        # Concatenate the 9 windows along channels and do ONE K = 9*C MXU
        # matmul with f32 accumulation (no per-row gathers, no K=64 loop).
        taps = [src_ref[dy * Wp + dx: dy * Wp + dx + M, :]
                for dy in range(3) for dx in range(3)]
        patches = jnp.concatenate(taps, axis=-1)            # (M, 9*C) bf16
        acc = jnp.dot(patches, w_ref[...],
                      preferred_element_type=jnp.float32)    # (M, C)   f32
        acc = acc + b_ref[...]
        return jnp.where(acc > 0, acc, alpha * acc)          # PReLU (scalar)

    # ---- stage the zero-padded conv1 input in VMEM --------------------------
    # The halo is re-zeroed every grid step (cheap) so correctness does not
    # depend on which core of a megacore split sees which batch index.
    xpad_ref[...] = jnp.zeros_like(xpad_ref)
    for i in range(H):                                       # interior scatter
        row0 = (i + 1) * Wp + 1
        xpad_ref[row0:row0 + W, :] = x_ref[0, i].astype(bf16)

    y1 = conv3x3_bias_prelu(xpad_ref, w1_ref, b1_ref, alpha_ref[0])

    # ---- y1 never leaves HBM: masked contiguous store into conv2's input ----
    # The mask zeroes the inter-row halo columns of the run so conv2 sees
    # proper zero padding; top/bottom halo rows come from the full zero-fill.
    ypad_ref[...] = jnp.zeros_like(ypad_ref)
    ypad_ref[base:base + M, :] = (y1 * mask_ref[...]).astype(bf16)

    y2 = conv3x3_bias_prelu(ypad_ref, w2_ref, b2_ref, alpha_ref[1])

    # ---- scaled residual in f32 against the original (unquantized) input ----
    for i in range(H):
        o_ref[0, i] = 0.01 * y2[i * Wp:i * Wp + W, :] + x_ref[0, i]


def _prep_weight(w_oihw):
    """(Cout, Cin, 3, 3) PyTorch layout -> (9*Cin, Cout) bf16 im2col layout."""
    co, ci, kh, kw = w_oihw.shape
    return (jnp.transpose(w_oihw, (2, 3, 1, 0))
            .reshape(kh * kw * ci, co).astype(jnp.bfloat16))


@jax.jit
def resblock_forward(x_nchw, w1, b1, a1, w2, b2, a2):
    """forward(i) = 0.01 * PReLU(conv(PReLU(conv(i)))) + i   (NCHW in / NCHW out)."""
    x = jnp.transpose(x_nchw, (0, 2, 3, 1)).astype(jnp.float32)   # -> NHWC
    N, H, W, C = x.shape
    Wp, Hp = W + 2, H + 2
    M = H * Wp                                   # output-run length
    R = _round_up(Hp * Wp + 2, 16)               # flat padded rows (+2 keeps the
                                                 # farthest tap window in bounds)

    w1p, w2p = _prep_weight(w1), _prep_weight(w2)
    b1p = b1.reshape(1, C).astype(jnp.float32)
    b2p = b2.reshape(1, C).astype(jnp.float32)
    alphas = jnp.concatenate([a1.reshape(-1), a2.reshape(-1)]).astype(jnp.float32)

    # {0,1} mask over the run: run row r is padded column (r+1) % Wp; halo
    # columns 0 and W+1 are invalid.  Computed once here (XLA), reused by the
    # kernel for every image.
    col = (jnp.arange(M, dtype=jnp.int32) + 1) % Wp
    mask = ((col >= 1) & (col <= W)).astype(jnp.float32).reshape(M, 1)

    kernel = functools.partial(fused_resblock_kernel, H=H, W=W, C=C)

    out = pl.pallas_call(
        kernel,
        out_shape=jax.ShapeDtypeStruct((N, H, W, C), jnp.float32),
        grid=(N,),
        in_specs=[
            pl.BlockSpec((1, H, W, C), lambda n: (n, 0, 0, 0)),   # x (per image)
            pl.BlockSpec((9 * C, C), lambda n: (0, 0)),           # w1 (resident)
            pl.BlockSpec((1, C), lambda n: (0, 0)),               # b1
            pl.BlockSpec((9 * C, C), lambda n: (0, 0)),           # w2 (resident)
            pl.BlockSpec((1, C), lambda n: (0, 0)),               # b2
            pl.BlockSpec((M, 1), lambda n: (0, 0)),               # run mask
            pl.BlockSpec(memory_space=pltpu.MemorySpace.SMEM),    # PReLU alphas
        ],
        out_specs=pl.BlockSpec((1, H, W, C), lambda n: (n, 0, 0, 0)),
        scratch_shapes=[
            pltpu.VMEM((R, C), jnp.bfloat16),                     # padded x
            pltpu.VMEM((R, C), jnp.bfloat16),                     # padded y1
        ],
        compiler_params=pltpu.CompilerParams(
            dimension_semantics=("parallel",)),
    )(x, w1p, b1p, w2p, b2p, mask, alphas)

    # TODO(synk): for very large H*W with small N, add an H row-block grid axis
    # (2-row input halo + 1 recomputed y1 halo row) so each block fits VMEM,
    # sized per generation (v7x 64 MiB vs v5e/v6e 128 MiB).

    return jnp.transpose(out, (0, 3, 1, 2))                       # -> NCHW


def _reference_resblock(x_nchw, w1, b1, a1, w2, b2, a2):
    """Pure-JAX f32 reference (NCHW, matching PyTorch semantics)."""
    def conv(x, w, b):
        y = lax.conv_general_dilated(
            x, w, window_strides=(1, 1), padding="SAME",
            dimension_numbers=("NCHW", "OIHW", "NCHW"))
        return y + b[None, :, None, None]

    y = conv(x_nchw, w1, b1)
    y = jnp.where(y > 0, y, a1[0] * y)
    y = conv(y, w2, b2)
    y = jnp.where(y > 0, y, a2[0] * y)
    return 0.01 * y + x_nchw


if __name__ == "__main__":
    key = jax.random.PRNGKey(0)
    kx, kw1, kb1, kw2, kb2 = jax.random.split(key, 5)

    C = 64          # fixed by the module: Conv2d(64, 64, 3, 1, 1)
    N, H, W = 2, 16, 16

    x = jax.random.normal(kx, (N, C, H, W), jnp.float32)

    # Deterministic synthetic parameters (shapes from ResBlock.__init__).
    w1 = jax.random.normal(kw1, (C, C, 3, 3), jnp.float32) * 0.05
    b1 = jax.random.normal(kb1, (C,), jnp.float32) * 0.05
    w2 = jax.random.normal(kw2, (C, C, 3, 3), jnp.float32) * 0.05
    b2 = jax.random.normal(kb2, (C,), jnp.float32) * 0.05
    a1 = jnp.array([0.1], jnp.float32)   # nn.PReLU(init=0.1), num_parameters=1
    a2 = jnp.array([0.1], jnp.float32)

    out = resblock_forward(x, w1, b1, a1, w2, b2, a2)
    out = jax.block_until_ready(out)

    ref = _reference_resblock(x, w1, b1, a1, w2, b2, a2)
    assert out.shape == (N, C, H, W)
    err = float(jnp.max(jnp.abs(out - ref)))
    # bf16 matmul operands with f32 accumulation; the conv branch is scaled by
    # 0.01 and the residual stays f32, so end-to-end error is well below 1e-3.
    assert jnp.allclose(out, ref, atol=2e-3, rtol=2e-3), f"max err {err}"

    print("KERNEL_OK")
</pallas_src>

<mosaic_0001>
module attributes {stable_mosaic.version = 11 : i64} {
  func.func @fused_resblock_kernel(%arg0: i32, %arg1: memref<1x16x16x64xf32, #tpu.memory_space<vmem>>, %arg2: memref<576x64xbf16, #tpu.memory_space<vmem>>, %arg3: memref<1x64xf32, #tpu.memory_space<vmem>>, %arg4: memref<576x64xbf16, #tpu.memory_space<vmem>>, %arg5: memref<1x64xf32, #tpu.memory_space<vmem>>, %arg6: memref<288x1xf32, #tpu.memory_space<vmem>>, %arg7: memref<2xf32, #tpu.memory_space<smem>>, %arg8: memref<1x16x16x64xf32, #tpu.memory_space<vmem>>, %arg9: memref<336x64xbf16, #tpu.memory_space<vmem>>, %arg10: memref<336x64xbf16, #tpu.memory_space<vmem>>) attributes {dimension_semantics = [#tpu.dimension_semantics<parallel>], iteration_bounds = array<i64: 2>, scalar_prefetch = 0 : i64, scratch_operands = 2 : i64, tpu.core_type = #tpu.core_type<tc>, window_params = [{transform_indices = @transform_0, window_bounds = array<i64: 1, 16, 16, 64>}, {pipeline_mode = #tpu.pipeline_mode<synchronous>, transform_indices = @transform_1, window_bounds = array<i64: 576, 64>}, {pipeline_mode = #tpu.pipeline_mode<synchronous>, transform_indices = @transform_2, window_bounds = array<i64: 1, 64>}, {pipeline_mode = #tpu.pipeline_mode<synchronous>, transform_indices = @transform_3, window_bounds = array<i64: 576, 64>}, {pipeline_mode = #tpu.pipeline_mode<synchronous>, transform_indices = @transform_4, window_bounds = array<i64: 1, 64>}, {pipeline_mode = #tpu.pipeline_mode<synchronous>, transform_indices = @transform_5, window_bounds = array<i64: 288, 1>}, {transform_indices = @transform_6, window_bounds = array<i64: 2>}, {transform_indices = @transform_7, window_bounds = array<i64: 1, 16, 16, 64>}]} {
    %cst = arith.constant 0.000000e+00 : bf16
    %0 = vector.broadcast %cst : bf16 to vector<336x64xbf16>
    %c0 = arith.constant 0 : index
    %c0_0 = arith.constant 0 : index
    %1 = vector.load %arg9[%c0, %c0_0] : memref<336x64xbf16, #tpu.memory_space<vmem>>, vector<336x64xbf16>
    tpu.vector_store %arg9[%c0, %c0_0], %0 {strides = array<i32>} : memref<336x64xbf16, #tpu.memory_space<vmem>>, vector<336x64xbf16>,
    %c0_1 = arith.constant 0 : index
    %c0_2 = arith.constant 0 : index
    %c0_3 = arith.constant 0 : index
    %c0_4 = arith.constant 0 : index
    %2 = vector.load %arg1[%c0_1, %c0_2, %c0_3, %c0_4] : memref<1x16x16x64xf32, #tpu.memory_space<vmem>>, vector<1x1x16x64xf32>
    %3 = vector.shape_cast %2 : vector<1x1x16x64xf32> to vector<16x64xf32>
    %4 = arith.truncf %3 : vector<16x64xf32> to vector<16x64xbf16>
    %c19 = arith.constant 19 : index
    %c0_5 = arith.constant 0 : index
    %5 = vector.load %arg9[%c19, %c0_5] : memref<336x64xbf16, #tpu.memory_space<vmem>>, vector<16x64xbf16>
    tpu.vector_store %arg9[%c19, %c0_5], %4 {strides = array<i32>} : memref<336x64xbf16, #tpu.memory_space<vmem>>, vector<16x64xbf16>,
    %c0_6 = arith.constant 0 : index
    %c1 = arith.constant 1 : index
    %c0_7 = arith.constant 0 : index
    %c0_8 = arith.constant 0 : index
    %6 = vector.load %arg1[%c0_6, %c1, %c0_7, %c0_8] : memref<1x16x16x64xf32, #tpu.memory_space<vmem>>, vector<1x1x16x64xf32>
    %7 = vector.shape_cast %6 : vector<1x1x16x64xf32> to vector<16x64xf32>
    %8 = arith.truncf %7 : vector<16x64xf32> to vector<16x64xbf16>
    %c37 = arith.constant 37 : index
    %c0_9 = arith.constant 0 : index
    %9 = vector.load %arg9[%c37, %c0_9] : memref<336x64xbf16, #tpu.memory_space<vmem>>, vector<16x64xbf16>
    tpu.vector_store %arg9[%c37, %c0_9], %8 {strides = array<i32>} : memref<336x64xbf16, #tpu.memory_space<vmem>>, vector<16x64xbf16>,
    %c0_10 = arith.constant 0 : index
    %c2 = arith.constant 2 : index
    %c0_11 = arith.constant 0 : index
    %c0_12 = arith.constant 0 : index
    %10 = vector.load %arg1[%c0_10, %c2, %c0_11, %c0_12] : memref<1x16x16x64xf32, #tpu.memory_space<vmem>>, vector<1x1x16x64xf32>
    %11 = vector.shape_cast %10 : vector<1x1x16x64xf32> to vector<16x64xf32>
    %12 = arith.truncf %11 : vector<16x64xf32> to vector<16x64xbf16>
    %c55 = arith.constant 55 : index
    %c0_13 = arith.constant 0 : index
    %13 = vector.load %arg9[%c55, %c0_13] : memref<336x64xbf16, #tpu.memory_space<vmem>>, vector<16x64xbf16>
    tpu.vector_store %arg9[%c55, %c0_13], %12 {strides = array<i32>} : memref<336x64xbf16, #tpu.memory_space<vmem>>, vector<16x64xbf16>,
    %c0_14 = arith.constant 0 : index
    %c3 = arith.constant 3 : index
    %c0_15 = arith.constant 0 : index
    %c0_16 = arith.constant 0 : index
    %14 = vector.load %arg1[%c0_14, %c3, %c0_15, %c0_16] : memref<1x16x16x64xf32, #tpu.memory_space<vmem>>, vector<1x1x16x64xf32>
    %15 = vector.shape_cast %14 : vector<1x1x16x64xf32> to vector<16x64xf32>
    %16 = arith.truncf %15 : vector<16x64xf32> to vector<16x64xbf16>
    %c73 = arith.constant 73 : index
    %c0_17 = arith.constant 0 : index
    %17 = vector.load %arg9[%c73, %c0_17] : memref<336x64xbf16, #tpu.memory_space<vmem>>, vector<16x64xbf16>
    tpu.vector_store %arg9[%c73, %c0_17], %16 {strides = array<i32>} : memref<336x64xbf16, #tpu.memory_space<vmem>>, vector<16x64xbf16>,
    %c0_18 = arith.constant 0 : index
    %c4 = arith.constant 4 : index
    %c0_19 = arith.constant 0 : index
    %c0_20 = arith.constant 0 : index
    %18 = vector.load %arg1[%c0_18, %c4, %c0_19, %c0_20] : memref<1x16x16x64xf32, #tpu.memory_space<vmem>>, vector<1x1x16x64xf32>
    %19 = vector.shape_cast %18 : vector<1x1x16x64xf32> to vector<16x64xf32>
    %20 = arith.truncf %19 : vector<16x64xf32> to vector<16x64xbf16>
    %c91 = arith.constant 91 : index
    %c0_21 = arith.constant 0 : index
    %21 = vector.load %arg9[%c91, %c0_21] : memref<336x64xbf16, #tpu.memory_space<vmem>>, vector<16x64xbf16>
    tpu.vector_store %arg9[%c91, %c0_21], %20 {strides = array<i32>} : memref<336x64xbf16, #tpu.memory_space<vmem>>, vector<16x64xbf16>,
    %c0_22 = arith.constant 0 : index
    %c5 = arith.constant 5 : index
    %c0_23 = arith.constant 0 : index
    %c0_24 = arith.constant 0 : index
    %22 = vector.load %arg1[%c0_22, %c5, %c0_23, %c0_24] : memref<1x16x16x64xf32, #tpu.memory_space<vmem>>, vector<1x1x16x64xf32>
    %23 = vector.shape_cast %22 : vector<1x1x16x64xf32> to vector<16x64xf32>
    %24 = arith.truncf %23 : vector<16x64xf32> to vector<16x64xbf16>
    %c109 = arith.constant 109 : index
    %c0_25 = arith.constant 0 : index
    %25 = vector.load %arg9[%c109, %c0_25] : memref<336x64xbf16, #tpu.memory_space<vmem>>, vector<16x64xbf16>
    tpu.vector_store %arg9[%c109, %c0_25], %24 {strides = array<i32>} : memref<336x64xbf16, #tpu.memory_space<vmem>>, vector<16x64xbf16>,
    %c0_26 = arith.constant 0 : index
    %c6 = arith.constant 6 : index
    %c0_27 = arith.constant 0 : index
    %c0_28 = arith.constant 0 : index
    %26 = vector.load %arg1[%c0_26, %c6, %c0_27, %c0_28] : memref<1x16x16x64xf32, #tpu.memory_space<vmem>>, vector<1x1x16x64xf32>
    %27 = vector.shape_cast %26 : vector<1x1x16x64xf32> to vector<16x64xf32>
    %28 = arith.truncf %27 : vector<16x64xf32> to vector<16x64xbf16>
    %c127 = arith.constant 127 : index
    %c0_29 = arith.constant 0 : index
    %29 = vector.load %arg9[%c127, %c0_29] : memref<336x64xbf16, #tpu.memory_space<vmem>>, vector<16x64xbf16>
    tpu.vector_store %arg9[%c127, %c0_29], %28 {strides = array<i32>} : memref<336x64xbf16, #tpu.memory_space<vmem>>, vector<16x64xbf16>,
    %c0_30 = arith.constant 0 : index
    %c7 = arith.constant 7 : index
    %c0_31 = arith.constant 0 : index
    %c0_32 = arith.constant 0 : index
    %30 = vector.load %arg1[%c0_30, %c7, %c0_31, %c0_32] : memref<1x16x16x64xf32, #tpu.memory_space<vmem>>, vector<1x1x16x64xf32>
    %31 = vector.shape_cast %30 : vector<1x1x16x64xf32> to vector<16x64xf32>
    %32 = arith.truncf %31 : vector<16x64xf32> to vector<16x64xbf16>
    %c145 = arith.constant 145 : index
    %c0_33 = arith.constant 0 : index
    %33 = vector.load %arg9[%c145, %c0_33] : memref<336x64xbf16, #tpu.memory_space<vmem>>, vector<16x64xbf16>
    tpu.vector_store %arg9[%c145, %c0_33], %32 {strides = array<i32>} : memref<336x64xbf16, #tpu.memory_space<vmem>>, vector<16x64xbf16>,
    %c0_34 = arith.constant 0 : index
    %c8 = arith.constant 8 : index
    %c0_35 = arith.constant 0 : index
    %c0_36 = arith.constant 0 : index
    %34 = vector.load %arg1[%c0_34, %c8, %c0_35, %c0_36] : memref<1x16x16x64xf32, #tpu.memory_space<vmem>>, vector<1x1x16x64xf32>
    %35 = vector.shape_cast %34 : vector<1x1x16x64xf32> to vector<16x64xf32>
    %36 = arith.truncf %35 : vector<16x64xf32> to vector<16x64xbf16>
    %c163 = arith.constant 163 : index
    %c0_37 = arith.constant 0 : index
    %37 = vector.load %arg9[%c163, %c0_37] : memref<336x64xbf16, #tpu.memory_space<vmem>>, vector<16x64xbf16>
    tpu.vector_store %arg9[%c163, %c0_37], %36 {strides = array<i32>} : memref<336x64xbf16, #tpu.memory_space<vmem>>, vector<16x64xbf16>,
    %c0_38 = arith.constant 0 : index
    %c9 = arith.constant 9 : index
    %c0_39 = arith.constant 0 : index
    %c0_40 = arith.constant 0 : index
    %38 = vector.load %arg1[%c0_38, %c9, %c0_39, %c0_40] : memref<1x16x16x64xf32, #tpu.memory_space<vmem>>, vector<1x1x16x64xf32>
    %39 = vector.shape_cast %38 : vector<1x1x16x64xf32> to vector<16x64xf32>
    %40 = arith.truncf %39 : vector<16x64xf32> to vector<16x64xbf16>
    %c181 = arith.constant 181 : index
    %c0_41 = arith.constant 0 : index
    %41 = vector.load %arg9[%c181, %c0_41] : memref<336x64xbf16, #tpu.memory_space<vmem>>, vector<16x64xbf16>
    tpu.vector_store %arg9[%c181, %c0_41], %40 {strides = array<i32>} : memref<336x64xbf16, #tpu.memory_space<vmem>>, vector<16x64xbf16>,
    %c0_42 = arith.constant 0 : index
    %c10 = arith.constant 10 : index
    %c0_43 = arith.constant 0 : index
    %c0_44 = arith.constant 0 : index
    %42 = vector.load %arg1[%c0_42, %c10, %c0_43, %c0_44] : memref<1x16x16x64xf32, #tpu.memory_space<vmem>>, vector<1x1x16x64xf32>
    %43 = vector.shape_cast %42 : vector<1x1x16x64xf32> to vector<16x64xf32>
    %44 = arith.truncf %43 : vector<16x64xf32> to vector<16x64xbf16>
    %c199 = arith.constant 199 : index
    %c0_45 = arith.constant 0 : index
    %45 = vector.load %arg9[%c199, %c0_45] : memref<336x64xbf16, #tpu.memory_space<vmem>>, vector<16x64xbf16>
    tpu.vector_store %arg9[%c199, %c0_45], %44 {strides = array<i32>} : memref<336x64xbf16, #tpu.memory_space<vmem>>, vector<16x64xbf16>,
    %c0_46 = arith.constant 0 : index
    %c11 = arith.constant 11 : index
    %c0_47 = arith.constant 0 : index
    %c0_48 = arith.constant 0 : index
    %46 = vector.load %arg1[%c0_46, %c11, %c0_47, %c0_48] : memref<1x16x16x64xf32, #tpu.memory_space<vmem>>, vector<1x1x16x64xf32>
    %47 = vector.shape_cast %46 : vector<1x1x16x64xf32> to vector<16x64xf32>
    %48 = arith.truncf %47 : vector<16x64xf32> to vector<16x64xbf16>
    %c217 = arith.constant 217 : index
    %c0_49 = arith.constant 0 : index
    %49 = vector.load %arg9[%c217, %c0_49] : memref<336x64xbf16, #tpu.memory_space<vmem>>, vector<16x64xbf16>
    tpu.vector_store %arg9[%c217, %c0_49], %48 {strides = array<i32>} : memref<336x64xbf16, #tpu.memory_space<vmem>>, vector<16x64xbf16>,
    %c0_50 = arith.constant 0 : index
    %c12 = arith.constant 12 : index
    %c0_51 = arith.constant 0 : index
    %c0_52 = arith.constant 0 : index
    %50 = vector.load %arg1[%c0_50, %c12, %c0_51, %c0_52] : memref<1x16x16x64xf32, #tpu.memory_space<vmem>>, vector<1x1x16x64xf32>
    %51 = vector.shape_cast %50 : vector<1x1x16x64xf32> to vector<16x64xf32>
    %52 = arith.truncf %51 : vector<16x64xf32> to vector<16x64xbf16>
    %c235 = arith.constant 235 : index
    %c0_53 = arith.constant 0 : index
    %53 = vector.load %arg9[%c235, %c0_53] : memref<336x64xbf16, #tpu.memory_space<vmem>>, vector<16x64xbf16>
    tpu.vector_store %arg9[%c235, %c0_53], %52 {strides = array<i32>} : memref<336x64xbf16, #tpu.memory_space<vmem>>, vector<16x64xbf16>,
    %c0_54 = arith.constant 0 : index
    %c13 = arith.constant 13 : index
    %c0_55 = arith.constant 0 : index
    %c0_56 = arith.constant 0 : index
    %54 = vector.load %arg1[%c0_54, %c13, %c0_55, %c0_56] : memref<1x16x16x64xf32, #tpu.memory_space<vmem>>, vector<1x1x16x64xf32>
    %55 = vector.shape_cast %54 : vector<1x1x16x64xf32> to vector<16x64xf32>
    %56 = arith.truncf %55 : vector<16x64xf32> to vector<16x64xbf16>
    %c253 = arith.constant 253 : index
    %c0_57 = arith.constant 0 : index
    %57 = vector.load %arg9[%c253, %c0_57] : memref<336x64xbf16, #tpu.memory_space<vmem>>, vector<16x64xbf16>
    tpu.vector_store %arg9[%c253, %c0_57], %56 {strides = array<i32>} : memref<336x64xbf16, #tpu.memory_space<vmem>>, vector<16x64xbf16>,
    %c0_58 = arith.constant 0 : index
    %c14 = arith.constant 14 : index
    %c0_59 = arith.constant 0 : index
    %c0_60 = arith.constant 0 : index
    %58 = vector.load %arg1[%c0_58, %c14, %c0_59, %c0_60] : memref<1x16x16x64xf32, #tpu.memory_space<vmem>>, vector<1x1x16x64xf32>
    %59 = vector.shape_cast %58 : vector<1x1x16x64xf32> to vector<16x64xf32>
    %60 = arith.truncf %59 : vector<16x64xf32> to vector<16x64xbf16>
    %c271 = arith.constant 271 : index
    %c0_61 = arith.constant 0 : index
    %61 = vector.load %arg9[%c271, %c0_61] : memref<336x64xbf16, #tpu.memory_space<vmem>>, vector<16x64xbf16>
    tpu.vector_store %arg9[%c271, %c0_61], %60 {strides = array<i32>} : memref<336x64xbf16, #tpu.memory_space<vmem>>, vector<16x64xbf16>,
    %c0_62 = arith.constant 0 : index
    %c15 = arith.constant 15 : index
    %c0_63 = arith.constant 0 : index
    %c0_64 = arith.constant 0 : index
    %62 = vector.load %arg1[%c0_62, %c15, %c0_63, %c0_64] : memref<1x16x16x64xf32, #tpu.memory_space<vmem>>, vector<1x1x16x64xf32>
    %63 = vector.shape_cast %62 : vector<1x1x16x64xf32> to vector<16x64xf32>
    %64 = arith.truncf %63 : vector<16x64xf32> to vector<16x64xbf16>
    %c289 = arith.constant 289 : index
    %c0_65 = arith.constant 0 : index
    %65 = vector.load %arg9[%c289, %c0_65] : memref<336x64xbf16, #tpu.memory_space<vmem>>, vector<16x64xbf16>
    tpu.vector_store %arg9[%c289, %c0_65], %64 {strides = array<i32>} : memref<336x64xbf16, #tpu.memory_space<vmem>>, vector<16x64xbf16>,
    %c0_66 = arith.constant 0 : index
    %66 = memref.load %arg7[%c0_66] : memref<2xf32, #tpu.memory_space<smem>>
    %c0_67 = arith.constant 0 : index
    %c0_68 = arith.constant 0 : index
    %67 = vector.load %arg9[%c0_67, %c0_68] : memref<336x64xbf16, #tpu.memory_space<vmem>>, vector<288x64xbf16>
    %c1_69 = arith.constant 1 : index
    %c0_70 = arith.constant 0 : index
    %68 = vector.load %arg9[%c1_69, %c0_70] : memref<336x64xbf16, #tpu.memory_space<vmem>>, vector<288x64xbf16>
    %c2_71 = arith.constant 2 : index
    %c0_72 = arith.constant 0 : index
    %69 = vector.load %arg9[%c2_71, %c0_72] : memref<336x64xbf16, #tpu.memory_space<vmem>>, vector<288x64xbf16>
    %c18 = arith.constant 18 : index
    %c0_73 = arith.constant 0 : index
    %70 = vector.load %arg9[%c18, %c0_73] : memref<336x64xbf16, #tpu.memory_space<vmem>>, vector<288x64xbf16>
    %c19_74 = arith.constant 19 : index
    %c0_75 = arith.constant 0 : index
    %71 = vector.load %arg9[%c19_74, %c0_75] : memref<336x64xbf16, #tpu.memory_space<vmem>>, vector<288x64xbf16>
    %c20 = arith.constant 20 : index
    %c0_76 = arith.constant 0 : index
    %72 = vector.load %arg9[%c20, %c0_76] : memref<336x64xbf16, #tpu.memory_space<vmem>>, vector<288x64xbf16>
    %c36 = arith.constant 36 : index
    %c0_77 = arith.constant 0 : index
    %73 = vector.load %arg9[%c36, %c0_77] : memref<336x64xbf16, #tpu.memory_space<vmem>>, vector<288x64xbf16>
    %c37_78 = arith.constant 37 : index
    %c0_79 = arith.constant 0 : index
    %74 = vector.load %arg9[%c37_78, %c0_79] : memref<336x64xbf16, #tpu.memory_space<vmem>>, vector<288x64xbf16>
    %c38 = arith.constant 38 : index
    %c0_80 = arith.constant 0 : index
    %75 = vector.load %arg9[%c38, %c0_80] : memref<336x64xbf16, #tpu.memory_space<vmem>>, vector<288x64xbf16>
    %76 = tpu.concatenate %67, %68, %69, %70, %71, %72, %73, %74, %75 in 1 : vector<288x64xbf16>, vector<288x64xbf16>, vector<288x64xbf16>, vector<288x64xbf16>, vector<288x64xbf16>, vector<288x64xbf16>, vector<288x64xbf16>, vector<288x64xbf16>, vector<288x64xbf16> -> vector<288x576xbf16>
    %c0_81 = arith.constant 0 : index
    %c0_82 = arith.constant 0 : index
    %77 = vector.load %arg2[%c0_81, %c0_82] : memref<576x64xbf16, #tpu.memory_space<vmem>>, vector<576x64xbf16>
    %cst_83 = arith.constant dense<0.000000e+00> : vector<288x64xf32>
    %78 = tpu.matmul %76, %77, %cst_83 {dimension_numbers = #tpu.dot_dimension_numbers<[1], [0], [0], [1], [0, 0, 1, 1], [], []>} : vector<288x576xbf16>, vector<576x64xbf16>, vector<288x64xf32> -> vector<288x64xf32>
    %c0_84 = arith.constant 0 : index
    %c0_85 = arith.constant 0 : index
    %79 = vector.load %arg3[%c0_84, %c0_85] : memref<1x64xf32, #tpu.memory_space<vmem>>, vector<1x64xf32>
    %80 = vector.broadcast %79 : vector<1x64xf32> to vector<288x64xf32>
    %81 = arith.addf %78, %80 : vector<288x64xf32>
    %cst_86 = arith.constant 0.000000e+00 : f32
    %82 = vector.broadcast %cst_86 : f32 to vector<288x64xf32>
    %83 = arith.cmpf ogt, %81, %82 : vector<288x64xf32>
    %84 = vector.broadcast %66 : f32 to vector<288x64xf32>
    %85 = arith.mulf %84, %81 : vector<288x64xf32>
    %86 = arith.select %83, %81, %85 : vector<288x64xi1>, vector<288x64xf32>
    %cst_87 = arith.constant 0.000000e+00 : bf16
    %87 = vector.broadcast %cst_87 : bf16 to vector<336x64xbf16>
    %c0_88 = arith.constant 0 : index
    %c0_89 = arith.constant 0 : index
    %88 = vector.load %arg10[%c0_88, %c0_89] : memref<336x64xbf16, #tpu.memory_space<vmem>>, vector<336x64xbf16>
    tpu.vector_store %arg10[%c0_88, %c0_89], %87 {strides = array<i32>} : memref<336x64xbf16, #tpu.memory_space<vmem>>, vector<336x64xbf16>,
    %c0_90 = arith.constant 0 : index
    %c0_91 = arith.constant 0 : index
    %89 = vector.load %arg6[%c0_90, %c0_91] : memref<288x1xf32, #tpu.memory_space<vmem>>, vector<288x1xf32>
    %90 = vector.broadcast %89 : vector<288x1xf32> to vector<288x64xf32>
    %91 = arith.mulf %86, %90 : vector<288x64xf32>
    %92 = arith.truncf %91 : vector<288x64xf32> to vector<288x64xbf16>
    %c19_92 = arith.constant 19 : index
    %c0_93 = arith.constant 0 : index
    %93 = vector.load %arg10[%c19_92, %c0_93] : memref<336x64xbf16, #tpu.memory_space<vmem>>, vector<288x64xbf16>
    tpu.vector_store %arg10[%c19_92, %c0_93], %92 {strides = array<i32>} : memref<336x64xbf16, #tpu.memory_space<vmem>>, vector<288x64xbf16>,
    %c1_94 = arith.constant 1 : index
    %94 = memref.load %arg7[%c1_94] : memref<2xf32, #tpu.memory_space<smem>>
    %c0_95 = arith.constant 0 : index
    %c0_96 = arith.constant 0 : index
    %95 = vector.load %arg10[%c0_95, %c0_96] : memref<336x64xbf16, #tpu.memory_space<vmem>>, vector<288x64xbf16>
    %c1_97 = arith.constant 1 : index
    %c0_98 = arith.constant 0 : index
    %96 = vector.load %arg10[%c1_97, %c0_98] : memref<336x64xbf16, #tpu.memory_space<vmem>>, vector<288x64xbf16>
    %c2_99 = arith.constant 2 : index
    %c0_100 = arith.constant 0 : index
    %97 = vector.load %arg10[%c2_99, %c0_100] : memref<336x64xbf16, #tpu.memory_space<vmem>>, vector<288x64xbf16>
    %c18_101 = arith.constant 18 : index
    %c0_102 = arith.constant 0 : index
    %98 = vector.load %arg10[%c18_101, %c0_102] : memref<336x64xbf16, #tpu.memory_space<vmem>>, vector<288x64xbf16>
    %c19_103 = arith.constant 19 : index
    %c0_104 = arith.constant 0 : index
    %99 = vector.load %arg10[%c19_103, %c0_104] : memref<336x64xbf16, #tpu.memory_space<vmem>>, vector<288x64xbf16>
    %c20_105 = arith.constant 20 : index
    %c0_106 = arith.constant 0 : index
    %100 = vector.load %arg10[%c20_105, %c0_106] : memref<336x64xbf16, #tpu.memory_space<vmem>>, vector<288x64xbf16>
    %c36_107 = arith.constant 36 : index
    %c0_108 = arith.constant 0 : index
    %101 = vector.load %arg10[%c36_107, %c0_108] : memref<336x64xbf16, #tpu.memory_space<vmem>>, vector<288x64xbf16>
    %c37_109 = arith.constant 37 : index
    %c0_110 = arith.constant 0 : index
    %102 = vector.load %arg10[%c37_109, %c0_110] : memref<336x64xbf16, #tpu.memory_space<vmem>>, vector<288x64xbf16>
    %c38_111 = arith.constant 38 : index
    %c0_112 = arith.constant 0 : index
    %103 = vector.load %arg10[%c38_111, %c0_112] : memref<336x64xbf16, #tpu.memory_space<vmem>>, vector<288x64xbf16>
    %104 = tpu.concatenate %95, %96, %97, %98, %99, %100, %101, %102, %103 in 1 : vector<288x64xbf16>, vector<288x64xbf16>, vector<288x64xbf16>, vector<288x64xbf16>, vector<288x64xbf16>, vector<288x64xbf16>, vector<288x64xbf16>, vector<288x64xbf16>, vector<288x64xbf16> -> vector<288x576xbf16>
    %c0_113 = arith.constant 0 : index
    %c0_114 = arith.constant 0 : index
    %105 = vector.load %arg4[%c0_113, %c0_114] : memref<576x64xbf16, #tpu.memory_space<vmem>>, vector<576x64xbf16>
    %cst_115 = arith.constant dense<0.000000e+00> : vector<288x64xf32>
    %106 = tpu.matmul %104, %105, %cst_115 {dimension_numbers = #tpu.dot_dimension_numbers<[1], [0], [0], [1], [0, 0, 1, 1], [], []>} : vector<288x576xbf16>, vector<576x64xbf16>, vector<288x64xf32> -> vector<288x64xf32>
    %c0_116 = arith.constant 0 : index
    %c0_117 = arith.constant 0 : index
    %107 = vector.load %arg5[%c0_116, %c0_117] : memref<1x64xf32, #tpu.memory_space<vmem>>, vector<1x64xf32>
    %108 = vector.broadcast %107 : vector<1x64xf32> to vector<288x64xf32>
    %109 = arith.addf %106, %108 : vector<288x64xf32>
    %cst_118 = arith.constant 0.000000e+00 : f32
    %110 = vector.broadcast %cst_118 : f32 to vector<288x64xf32>
    %111 = arith.cmpf ogt, %109, %110 : vector<288x64xf32>
    %112 = vector.broadcast %94 : f32 to vector<288x64xf32>
    %113 = arith.mulf %112, %109 : vector<288x64xf32>
    %114 = arith.select %111, %109, %113 : vector<288x64xi1>, vector<288x64xf32>
    %115 = vector.extract_strided_slice %114 {offsets = [0, 0], sizes = [16, 64], strides = [1, 1]} : vector<288x64xf32> to vector<16x64xf32>
    %cst_119 = arith.constant 0.00999999977 : f32
    %116 = vector.broadcast %cst_119 : f32 to vector<16x64xf32>
    %117 = arith.mulf %116, %115 : vector<16x64xf32>
    %c0_120 = arith.constant 0 : index
    %c0_121 = arith.constant 0 : index
    %c0_122 = arith.constant 0 : index
    %c0_123 = arith.constant 0 : index
    %118 = vector.load %arg1[%c0_120, %c0_121, %c0_122, %c0_123] : memref<1x16x16x64xf32, #tpu.memory_space<vmem>>, vector<1x1x16x64xf32>
    %119 = vector.shape_cast %118 : vector<1x1x16x64xf32> to vector<16x64xf32>
    %120 = arith.addf %117, %119 : vector<16x64xf32>
    %c0_124 = arith.constant 0 : index
    %c0_125 = arith.constant 0 : index
    %c0_126 = arith.constant 0 : index
    %c0_127 = arith.constant 0 : index
    %121 = vector.load %arg8[%c0_124, %c0_125, %c0_126, %c0_127] : memref<1x16x16x64xf32, #tpu.memory_space<vmem>>, vector<1x1x16x64xf32>
    %122 = vector.shape_cast %121 : vector<1x1x16x64xf32> to vector<16x64xf32>
    %123 = vector.shape_cast %120 : vector<16x64xf32> to vector<1x1x16x64xf32>
    tpu.vector_store %arg8[%c0_124, %c0_125, %c0_126, %c0_127], %123 {strides = array<i32>} : memref<1x16x16x64xf32, #tpu.memory_space<vmem>>, vector<1x1x16x64xf32>,
    %124 = vector.extract_strided_slice %114 {offsets = [18, 0], sizes = [16, 64], strides = [1, 1]} : vector<288x64xf32> to vector<16x64xf32>
    %cst_128 = arith.constant 0.00999999977 : f32
    %125 = vector.broadcast %cst_128 : f32 to vector<16x64xf32>
    %126 = arith.mulf %125, %124 : vector<16x64xf32>
    %c0_129 = arith.constant 0 : index
    %c1_130 = arith.constant 1 : index
    %c0_131 = arith.constant 0 : index
    %c0_132 = arith.constant 0 : index
    %127 = vector.load %arg1[%c0_129, %c1_130, %c0_131, %c0_132] : memref<1x16x16x64xf32, #tpu.memory_space<vmem>>, vector<1x1x16x64xf32>
    %128 = vector.shape_cast %127 : vector<1x1x16x64xf32> to vector<16x64xf32>
    %129 = arith.addf %126, %128 : vector<16x64xf32>
    %c0_133 = arith.constant 0 : index
    %c1_134 = arith.constant 1 : index
    %c0_135 = arith.constant 0 : index
    %c0_136 = arith.constant 0 : index
    %130 = vector.load %arg8[%c0_133, %c1_134, %c0_135, %c0_136] : memref<1x16x16x64xf32, #tpu.memory_space<vmem>>, vector<1x1x16x64xf32>
    %131 = vector.shape_cast %130 : vector<1x1x16x64xf32> to vector<16x64xf32>
    %132 = vector.shape_cast %129 : vector<16x64xf32> to vector<1x1x16x64xf32>
    tpu.vector_store %arg8[%c0_133, %c1_134, %c0_135, %c0_136], %132 {strides = array<i32>} : memref<1x16x16x64xf32, #tpu.memory_space<vmem>>, vector<1x1x16x64xf32>,
    %133 = vector.extract_strided_slice %114 {offsets = [36, 0], sizes = [16, 64], strides = [1, 1]} : vector<288x64xf32> to vector<16x64xf32>
    %cst_137 = arith.constant 0.00999999977 : f32
    %134 = vector.broadcast %cst_137 : f32 to vector<16x64xf32>
    %135 = arith.mulf %134, %133 : vector<16x64xf32>
    %c0_138 = arith.constant 0 : index
    %c2_139 = arith.constant 2 : index
    %c0_140 = arith.constant 0 : index
    %c0_141 = arith.constant 0 : index
    %136 = vector.load %arg1[%c0_138, %c2_139, %c0_140, %c0_141] : memref<1x16x16x64xf32, #tpu.memory_space<vmem>>, vector<1x1x16x64xf32>
    %137 = vector.shape_cast %136 : vector<1x1x16x64xf32> to vector<16x64xf32>
    %138 = arith.addf %135, %137 : vector<16x64xf32>
    %c0_142 = arith.constant 0 : index
    %c2_143 = arith.constant 2 : index
    %c0_144 = arith.constant 0 : index
    %c0_145 = arith.constant 0 : index
    %139 = vector.load %arg8[%c0_142, %c2_143, %c0_144, %c0_145] : memref<1x16x16x64xf32, #tpu.memory_space<vmem>>, vector<1x1x16x64xf32>
    %140 = vector.shape_cast %139 : vector<1x1x16x64xf32> to vector<16x64xf32>
    %141 = vector.shape_cast %138 : vector<16x64xf32> to vector<1x1x16x64xf32>
    tpu.vector_store %arg8[%c0_142, %c2_143, %c0_144, %c0_145], %141 {strides = array<i32>} : memref<1x16x16x64xf32, #tpu.memory_space<vmem>>, vector<1x1x16x64xf32>,
    %142 = vector.extract_strided_slice %114 {offsets = [54, 0], sizes = [16, 64], strides = [1, 1]} : vector<288x64xf32> to vector<16x64xf32>
    %cst_146 = arith.constant 0.00999999977 : f32
    %143 = vector.broadcast %cst_146 : f32 to vector<16x64xf32>
    %144 = arith.mulf %143, %142 : vector<16x64xf32>
    %c0_147 = arith.constant 0 : index
    %c3_148 = arith.constant 3 : index
    %c0_149 = arith.constant 0 : index
    %c0_150 = arith.constant 0 : index
    %145 = vector.load %arg1[%c0_147, %c3_148, %c0_149, %c0_150] : memref<1x16x16x64xf32, #tpu.memory_space<vmem>>, vector<1x1x16x64xf32>
    %146 = vector.shape_cast %145 : vector<1x1x16x64xf32> to vector<16x64xf32>
    %147 = arith.addf %144, %146 : vector<16x64xf32>
    %c0_151 = arith.constant 0 : index
    %c3_152 = arith.constant 3 : index
    %c0_153 = arith.constant 0 : index
    %c0_154 = arith.constant 0 : index
    %148 = vector.load %arg8[%c0_151, %c3_152, %c0_153, %c0_154] : memref<1x16x16x64xf32, #tpu.memory_space<vmem>>, vector<1x1x16x64xf32>
    %149 = vector.shape_cast %148 : vector<1x1x16x64xf32> to vector<16x64xf32>
    %150 = vector.shape_cast %147 : vector<16x64xf32> to vector<1x1x16x64xf32>
    tpu.vector_store %arg8[%c0_151, %c3_152, %c0_153, %c0_154], %150 {strides = array<i32>} : memref<1x16x16x64xf32, #tpu.memory_space<vmem>>, vector<1x1x16x64xf32>,
    %151 = vector.extract_strided_slice %114 {offsets = [72, 0], sizes = [16, 64], strides = [1, 1]} : vector<288x64xf32> to vector<16x64xf32>
    %cst_155 = arith.constant 0.00999999977 : f32
    %152 = vector.broadcast %cst_155 : f32 to vector<16x64xf32>
    %153 = arith.mulf %152, %151 : vector<16x64xf32>
    %c0_156 = arith.constant 0 : index
    %c4_157 = arith.constant 4 : index
    %c0_158 = arith.constant 0 : index
    %c0_159 = arith.constant 0 : index
    %154 = vector.load %arg1[%c0_156, %c4_157, %c0_158, %c0_159] : memref<1x16x16x64xf32, #tpu.memory_space<vmem>>, vector<1x1x16x64xf32>
    %155 = vector.shape_cast %154 : vector<1x1x16x64xf32> to vector<16x64xf32>
    %156 = arith.addf %153, %155 : vector<16x64xf32>
    %c0_160 = arith.constant 0 : index
    %c4_161 = arith.constant 4 : index
    %c0_162 = arith.constant 0 : index
    %c0_163 = arith.constant 0 : index
    %157 = vector.load %arg8[%c0_160, %c4_161, %c0_162, %c0_163] : memref<1x16x16x64xf32, #tpu.memory_space<vmem>>, vector<1x1x16x64xf32>
    %158 = vector.shape_cast %157 : vector<1x1x16x64xf32> to vector<16x64xf32>
    %159 = vector.shape_cast %156 : vector<16x64xf32> to vector<1x1x16x64xf32>
    tpu.vector_store %arg8[%c0_160, %c4_161, %c0_162, %c0_163], %159 {strides = array<i32>} : memref<1x16x16x64xf32, #tpu.memory_space<vmem>>, vector<1x1x16x64xf32>,
    %160 = vector.extract_strided_slice %114 {offsets = [90, 0], sizes = [16, 64], strides = [1, 1]} : vector<288x64xf32> to vector<16x64xf32>
    %cst_164 = arith.constant 0.00999999977 : f32
    %161 = vector.broadcast %cst_164 : f32 to vector<16x64xf32>
    %162 = arith.mulf %161, %160 : vector<16x64xf32>
    %c0_165 = arith.constant 0 : index
    %c5_166 = arith.constant 5 : index
    %c0_167 = arith.constant 0 : index
    %c0_168 = arith.constant 0 : index
    %163 = vector.load %arg1[%c0_165, %c5_166, %c0_167, %c0_168] : memref<1x16x16x64xf32, #tpu.memory_space<vmem>>, vector<1x1x16x64xf32>
    %164 = vector.shape_cast %163 : vector<1x1x16x64xf32> to vector<16x64xf32>
    %165 = arith.addf %162, %164 : vector<16x64xf32>
    %c0_169 = arith.constant 0 : index
    %c5_170 = arith.constant 5 : index
    %c0_171 = arith.constant 0 : index
    %c0_172 = arith.constant 0 : index
    %166 = vector.load %arg8[%c0_169, %c5_170, %c0_171, %c0_172] : memref<1x16x16x64xf32, #tpu.memory_space<vmem>>, vector<1x1x16x64xf32>
    %167 = vector.shape_cast %166 : vector<1x1x16x64xf32> to vector<16x64xf32>
    %168 = vector.shape_cast %165 : vector<16x64xf32> to vector<1x1x16x64xf32>
    tpu.vector_store %arg8[%c0_169, %c5_170, %c0_171, %c0_172], %168 {strides = array<i32>} : memref<1x16x16x64xf32, #tpu.memory_space<vmem>>, vector<1x1x16x64xf32>,
    %169 = vector.extract_strided_slice %114 {offsets = [108, 0], sizes = [16, 64], strides = [1, 1]} : vector<288x64xf32> to vector<16x64xf32>
    %cst_173 = arith.constant 0.00999999977 : f32
    %170 = vector.broadcast %cst_173 : f32 to vector<16x64xf32>
    %171 = arith.mulf %170, %169 : vector<16x64xf32>
    %c0_174 = arith.constant 0 : index
    %c6_175 = arith.constant 6 : index
    %c0_176 = arith.constant 0 : index
    %c0_177 = arith.constant 0 : index
    %172 = vector.load %arg1[%c0_174, %c6_175, %c0_176, %c0_177] : memref<1x16x16x64xf32, #tpu.memory_space<vmem>>, vector<1x1x16x64xf32>
    %173 = vector.shape_cast %172 : vector<1x1x16x64xf32> to vector<16x64xf32>
    %174 = arith.addf %171, %173 : vector<16x64xf32>
    %c0_178 = arith.constant 0 : index
    %c6_179 = arith.constant 6 : index
    %c0_180 = arith.constant 0 : index
    %c0_181 = arith.constant 0 : index
    %175 = vector.load %arg8[%c0_178, %c6_179, %c0_180, %c0_181] : memref<1x16x16x64xf32, #tpu.memory_space<vmem>>, vector<1x1x16x64xf32>
    %176 = vector.shape_cast %175 : vector<1x1x16x64xf32> to vector<16x64xf32>
    %177 = vector.shape_cast %174 : vector<16x64xf32> to vector<1x1x16x64xf32>
    tpu.vector_store %arg8[%c0_178, %c6_179, %c0_180, %c0_181], %177 {strides = array<i32>} : memref<1x16x16x64xf32, #tpu.memory_space<vmem>>, vector<1x1x16x64xf32>,
    %178 = vector.extract_strided_slice %114 {offsets = [126, 0], sizes = [16, 64], strides = [1, 1]} : vector<288x64xf32> to vector<16x64xf32>
    %cst_182 = arith.constant 0.00999999977 : f32
    %179 = vector.broadcast %cst_182 : f32 to vector<16x64xf32>
    %180 = arith.mulf %179, %178 : vector<16x64xf32>
    %c0_183 = arith.constant 0 : index
    %c7_184 = arith.constant 7 : index
    %c0_185 = arith.constant 0 : index
    %c0_186 = arith.constant 0 : index
    %181 = vector.load %arg1[%c0_183, %c7_184, %c0_185, %c0_186] : memref<1x16x16x64xf32, #tpu.memory_space<vmem>>, vector<1x1x16x64xf32>
    %182 = vector.shape_cast %181 : vector<1x1x16x64xf32> to vector<16x64xf32>
    %183 = arith.addf %180, %182 : vector<16x64xf32>
    %c0_187 = arith.constant 0 : index
    %c7_188 = arith.constant 7 : index
    %c0_189 = arith.constant 0 : index
    %c0_190 = arith.constant 0 : index
    %184 = vector.load %arg8[%c0_187, %c7_188, %c0_189, %c0_190] : memref<1x16x16x64xf32, #tpu.memory_space<vmem>>, vector<1x1x16x64xf32>
    %185 = vector.shape_cast %184 : vector<1x1x16x64xf32> to vector<16x64xf32>
    %186 = vector.shape_cast %183 : vector<16x64xf32> to vector<1x1x16x64xf32>
    tpu.vector_store %arg8[%c0_187, %c7_188, %c0_189, %c0_190], %186 {strides = array<i32>} : memref<1x16x16x64xf32, #tpu.memory_space<vmem>>, vector<1x1x16x64xf32>,
    %187 = vector.extract_strided_slice %114 {offsets = [144, 0], sizes = [16, 64], strides = [1, 1]} : vector<288x64xf32> to vector<16x64xf32>
    %cst_191 = arith.constant 0.00999999977 : f32
    %188 = vector.broadcast %cst_191 : f32 to vector<16x64xf32>
    %189 = arith.mulf %188, %187 : vector<16x64xf32>
    %c0_192 = arith.constant 0 : index
    %c8_193 = arith.constant 8 : index
    %c0_194 = arith.constant 0 : index
    %c0_195 = arith.constant 0 : index
    %190 = vector.load %arg1[%c0_192, %c8_193, %c0_194, %c0_195] : memref<1x16x16x64xf32, #tpu.memory_space<vmem>>, vector<1x1x16x64xf32>
    %191 = vector.shape_cast %190 : vector<1x1x16x64xf32> to vector<16x64xf32>
    %192 = arith.addf %189, %191 : vector<16x64xf32>
    %c0_196 = arith.constant 0 : index
    %c8_197 = arith.constant 8 : index
    %c0_198 = arith.constant 0 : index
    %c0_199 = arith.constant 0 : index
    %193 = vector.load %arg8[%c0_196, %c8_197, %c0_198, %c0_199] : memref<1x16x16x64xf32, #tpu.memory_space<vmem>>, vector<1x1x16x64xf32>
    %194 = vector.shape_cast %193 : vector<1x1x16x64xf32> to vector<16x64xf32>
    %195 = vector.shape_cast %192 : vector<16x64xf32> to vector<1x1x16x64xf32>
    tpu.vector_store %arg8[%c0_196, %c8_197, %c0_198, %c0_199], %195 {strides = array<i32>} : memref<1x16x16x64xf32, #tpu.memory_space<vmem>>, vector<1x1x16x64xf32>,
    %196 = vector.extract_strided_slice %114 {offsets = [162, 0], sizes = [16, 64], strides = [1, 1]} : vector<288x64xf32> to vector<16x64xf32>
    %cst_200 = arith.constant 0.00999999977 : f32
    %197 = vector.broadcast %cst_200 : f32 to vector<16x64xf32>
    %198 = arith.mulf %197, %196 : vector<16x64xf32>
    %c0_201 = arith.constant 0 : index
    %c9_202 = arith.constant 9 : index
    %c0_203 = arith.constant 0 : index
    %c0_204 = arith.constant 0 : index
    %199 = vector.load %arg1[%c0_201, %c9_202, %c0_203, %c0_204] : memref<1x16x16x64xf32, #tpu.memory_space<vmem>>, vector<1x1x16x64xf32>
    %200 = vector.shape_cast %199 : vector<1x1x16x64xf32> to vector<16x64xf32>
    %201 = arith.addf %198, %200 : vector<16x64xf32>
    %c0_205 = arith.constant 0 : index
    %c9_206 = arith.constant 9 : index
    %c0_207 = arith.constant 0 : index
    %c0_208 = arith.constant 0 : index
    %202 = vector.load %arg8[%c0_205, %c9_206, %c0_207, %c0_208] : memref<1x16x16x64xf32, #tpu.memory_space<vmem>>, vector<1x1x16x64xf32>
    %203 = vector.shape_cast %202 : vector<1x1x16x64xf32> to vector<16x64xf32>
    %204 = vector.shape_cast %201 : vector<16x64xf32> to vector<1x1x16x64xf32>
    tpu.vector_store %arg8[%c0_205, %c9_206, %c0_207, %c0_208], %204 {strides = array<i32>} : memref<1x16x16x64xf32, #tpu.memory_space<vmem>>, vector<1x1x16x64xf32>,
    %205 = vector.extract_strided_slice %114 {offsets = [180, 0], sizes = [16, 64], strides = [1, 1]} : vector<288x64xf32> to vector<16x64xf32>
    %cst_209 = arith.constant 0.00999999977 : f32
    %206 = vector.broadcast %cst_209 : f32 to vector<16x64xf32>
    %207 = arith.mulf %206, %205 : vector<16x64xf32>
    %c0_210 = arith.constant 0 : index
    %c10_211 = arith.constant 10 : index
    %c0_212 = arith.constant 0 : index
    %c0_213 = arith.constant 0 : index
    %208 = vector.load %arg1[%c0_210, %c10_211, %c0_212, %c0_213] : memref<1x16x16x64xf32, #tpu.memory_space<vmem>>, vector<1x1x16x64xf32>
    %209 = vector.shape_cast %208 : vector<1x1x16x64xf32> to vector<16x64xf32>
    %210 = arith.addf %207, %209 : vector<16x64xf32>
    %c0_214 = arith.constant 0 : index
    %c10_215 = arith.constant 10 : index
    %c0_216 = arith.constant 0 : index
    %c0_217 = arith.constant 0 : index
    %211 = vector.load %arg8[%c0_214, %c10_215, %c0_216, %c0_217] : memref<1x16x16x64xf32, #tpu.memory_space<vmem>>, vector<1x1x16x64xf32>
    %212 = vector.shape_cast %211 : vector<1x1x16x64xf32> to vector<16x64xf32>
    %213 = vector.shape_cast %210 : vector<16x64xf32> to vector<1x1x16x64xf32>
    tpu.vector_store %arg8[%c0_214, %c10_215, %c0_216, %c0_217], %213 {strides = array<i32>} : memref<1x16x16x64xf32, #tpu.memory_space<vmem>>, vector<1x1x16x64xf32>,
    %214 = vector.extract_strided_slice %114 {offsets = [198, 0], sizes = [16, 64], strides = [1, 1]} : vector<288x64xf32> to vector<16x64xf32>
    %cst_218 = arith.constant 0.00999999977 : f32
    %215 = vector.broadcast %cst_218 : f32 to vector<16x64xf32>
    %216 = arith.mulf %215, %214 : vector<16x64xf32>
    %c0_219 = arith.constant 0 : index
    %c11_220 = arith.constant 11 : index
    %c0_221 = arith.constant 0 : index
    %c0_222 = arith.constant 0 : index
    %217 = vector.load %arg1[%c0_219, %c11_220, %c0_221, %c0_222] : memref<1x16x16x64xf32, #tpu.memory_space<vmem>>, vector<1x1x16x64xf32>
    %218 = vector.shape_cast %217 : vector<1x1x16x64xf32> to vector<16x64xf32>
    %219 = arith.addf %216, %218 : vector<16x64xf32>
    %c0_223 = arith.constant 0 : index
    %c11_224 = arith.constant 11 : index
    %c0_225 = arith.constant 0 : index
    %c0_226 = arith.constant 0 : index
    %220 = vector.load %arg8[%c0_223, %c11_224, %c0_225, %c0_226] : memref<1x16x16x64xf32, #tpu.memory_space<vmem>>, vector<1x1x16x64xf32>
    %221 = vector.shape_cast %220 : vector<1x1x16x64xf32> to vector<16x64xf32>
    %222 = vector.shape_cast %219 : vector<16x64xf32> to vector<1x1x16x64xf32>
    tpu.vector_store %arg8[%c0_223, %c11_224, %c0_225, %c0_226], %222 {strides = array<i32>} : memref<1x16x16x64xf32, #tpu.memory_space<vmem>>, vector<1x1x16x64xf32>,
    %223 = vector.extract_strided_slice %114 {offsets = [216, 0], sizes = [16, 64], strides = [1, 1]} : vector<288x64xf32> to vector<16x64xf32>
    %cst_227 = arith.constant 0.00999999977 : f32
    %224 = vector.broadcast %cst_227 : f32 to vector<16x64xf32>
    %225 = arith.mulf %224, %223 : vector<16x64xf32>
    %c0_228 = arith.constant 0 : index
    %c12_229 = arith.constant 12 : index
    %c0_230 = arith.constant 0 : index
    %c0_231 = arith.constant 0 : index
    %226 = vector.load %arg1[%c0_228, %c12_229, %c0_230, %c0_231] : memref<1x16x16x64xf32, #tpu.memory_space<vmem>>, vector<1x1x16x64xf32>
    %227 = vector.shape_cast %226 : vector<1x1x16x64xf32> to vector<16x64xf32>
    %228 = arith.addf %225, %227 : vector<16x64xf32>
    %c0_232 = arith.constant 0 : index
    %c12_233 = arith.constant 12 : index
    %c0_234 = arith.constant 0 : index
    %c0_235 = arith.constant 0 : index
    %229 = vector.load %arg8[%c0_232, %c12_233, %c0_234, %c0_235] : memref<1x16x16x64xf32, #tpu.memory_space<vmem>>, vector<1x1x16x64xf32>
    %230 = vector.shape_cast %229 : vector<1x1x16x64xf32> to vector<16x64xf32>
    %231 = vector.shape_cast %228 : vector<16x64xf32> to vector<1x1x16x64xf32>
    tpu.vector_store %arg8[%c0_232, %c12_233, %c0_234, %c0_235], %231 {strides = array<i32>} : memref<1x16x16x64xf32, #tpu.memory_space<vmem>>, vector<1x1x16x64xf32>,
    %232 = vector.extract_strided_slice %114 {offsets = [234, 0], sizes = [16, 64], strides = [1, 1]} : vector<288x64xf32> to vector<16x64xf32>
    %cst_236 = arith.constant 0.00999999977 : f32
    %233 = vector.broadcast %cst_236 : f32 to vector<16x64xf32>
    %234 = arith.mulf %233, %232 : vector<16x64xf32>
    %c0_237 = arith.constant 0 : index
    %c13_238 = arith.constant 13 : index
    %c0_239 = arith.constant 0 : index
    %c0_240 = arith.constant 0 : index
    %235 = vector.load %arg1[%c0_237, %c13_238, %c0_239, %c0_240] : memref<1x16x16x64xf32, #tpu.memory_space<vmem>>, vector<1x1x16x64xf32>
    %236 = vector.shape_cast %235 : vector<1x1x16x64xf32> to vector<16x64xf32>
    %237 = arith.addf %234, %236 : vector<16x64xf32>
    %c0_241 = arith.constant 0 : index
    %c13_242 = arith.constant 13 : index
    %c0_243 = arith.constant 0 : index
    %c0_244 = arith.constant 0 : index
    %238 = vector.load %arg8[%c0_241, %c13_242, %c0_243, %c0_244] : memref<1x16x16x64xf32, #tpu.memory_space<vmem>>, vector<1x1x16x64xf32>
    %239 = vector.shape_cast %238 : vector<1x1x16x64xf32> to vector<16x64xf32>
    %240 = vector.shape_cast %237 : vector<16x64xf32> to vector<1x1x16x64xf32>
    tpu.vector_store %arg8[%c0_241, %c13_242, %c0_243, %c0_244], %240 {strides = array<i32>} : memref<1x16x16x64xf32, #tpu.memory_space<vmem>>, vector<1x1x16x64xf32>,
    %241 = vector.extract_strided_slice %114 {offsets = [252, 0], sizes = [16, 64], strides = [1, 1]} : vector<288x64xf32> to vector<16x64xf32>
    %cst_245 = arith.constant 0.00999999977 : f32
    %242 = vector.broadcast %cst_245 : f32 to vector<16x64xf32>
    %243 = arith.mulf %242, %241 : vector<16x64xf32>
    %c0_246 = arith.constant 0 : index
    %c14_247 = arith.constant 14 : index
    %c0_248 = arith.constant 0 : index
    %c0_249 = arith.constant 0 : index
    %244 = vector.load %arg1[%c0_246, %c14_247, %c0_248, %c0_249] : memref<1x16x16x64xf32, #tpu.memory_space<vmem>>, vector<1x1x16x64xf32>
    %245 = vector.shape_cast %244 : vector<1x1x16x64xf32> to vector<16x64xf32>
    %246 = arith.addf %243, %245 : vector<16x64xf32>
    %c0_250 = arith.constant 0 : index
    %c14_251 = arith.constant 14 : index
    %c0_252 = arith.constant 0 : index
    %c0_253 = arith.constant 0 : index
    %247 = vector.load %arg8[%c0_250, %c14_251, %c0_252, %c0_253] : memref<1x16x16x64xf32, #tpu.memory_space<vmem>>, vector<1x1x16x64xf32>
    %248 = vector.shape_cast %247 : vector<1x1x16x64xf32> to vector<16x64xf32>
    %249 = vector.shape_cast %246 : vector<16x64xf32> to vector<1x1x16x64xf32>
    tpu.vector_store %arg8[%c0_250, %c14_251, %c0_252, %c0_253], %249 {strides = array<i32>} : memref<1x16x16x64xf32, #tpu.memory_space<vmem>>, vector<1x1x16x64xf32>,
    %250 = vector.extract_strided_slice %114 {offsets = [270, 0], sizes = [16, 64], strides = [1, 1]} : vector<288x64xf32> to vector<16x64xf32>
    %cst_254 = arith.constant 0.00999999977 : f32
    %251 = vector.broadcast %cst_254 : f32 to vector<16x64xf32>
    %252 = arith.mulf %251, %250 : vector<16x64xf32>
    %c0_255 = arith.constant 0 : index
    %c15_256 = arith.constant 15 : index
    %c0_257 = arith.constant 0 : index
    %c0_258 = arith.constant 0 : index
    %253 = vector.load %arg1[%c0_255, %c15_256, %c0_257, %c0_258] : memref<1x16x16x64xf32, #tpu.memory_space<vmem>>, vector<1x1x16x64xf32>
    %254 = vector.shape_cast %253 : vector<1x1x16x64xf32> to vector<16x64xf32>
    %255 = arith.addf %252, %254 : vector<16x64xf32>
    %c0_259 = arith.constant 0 : index
    %c15_260 = arith.constant 15 : index
    %c0_261 = arith.constant 0 : index
    %c0_262 = arith.constant 0 : index
    %256 = vector.load %arg8[%c0_259, %c15_260, %c0_261, %c0_262] : memref<1x16x16x64xf32, #tpu.memory_space<vmem>>, vector<1x1x16x64xf32>
    %257 = vector.shape_cast %256 : vector<1x1x16x64xf32> to vector<16x64xf32>
    %258 = vector.shape_cast %255 : vector<16x64xf32> to vector<1x1x16x64xf32>
    tpu.vector_store %arg8[%c0_259, %c15_260, %c0_261, %c0_262], %258 {strides = array<i32>} : memref<1x16x16x64xf32, #tpu.memory_space<vmem>>, vector<1x1x16x64xf32>,
    return
  }
  func.func @transform_0(%arg0: i32) -> (i32, i32, i32, i32) {
    %c0_i32 = arith.constant 0 : i32
    %c0_i32_0 = arith.constant 0 : i32
    %c0_i32_1 = arith.constant 0 : i32
    %c0_i32_2 = arith.constant 0 : i32
    return %arg0, %c0_i32, %c0_i32_0, %c0_i32_1 : i32, i32, i32, i32
  }
  func.func @transform_1(%arg0: i32) -> (i32, i32) {
    %c0_i32 = arith.constant 0 : i32
    %c0_i32_0 = arith.constant 0 : i32
    %c0_i32_1 = arith.constant 0 : i32
    return %c0_i32, %c0_i32_0 : i32, i32
  }
  func.func @transform_2(%arg0: i32) -> (i32, i32) {
    %c0_i32 = arith.constant 0 : i32
    %c0_i32_0 = arith.constant 0 : i32
    %c0_i32_1 = arith.constant 0 : i32
    return %c0_i32, %c0_i32_0 : i32, i32
  }
  func.func @transform_3(%arg0: i32) -> (i32, i32) {
    %c0_i32 = arith.constant 0 : i32
    %c0_i32_0 = arith.constant 0 : i32
    %c0_i32_1 = arith.constant 0 : i32
    return %c0_i32, %c0_i32_0 : i32, i32
  }
  func.func @transform_4(%arg0: i32) -> (i32, i32) {
    %c0_i32 = arith.constant 0 : i32
    %c0_i32_0 = arith.constant 0 : i32
    %c0_i32_1 = arith.constant 0 : i32
    return %c0_i32, %c0_i32_0 : i32, i32
  }
  func.func @transform_5(%arg0: i32) -> (i32, i32) {
    %c0_i32 = arith.constant 0 : i32
    %c0_i32_0 = arith.constant 0 : i32
    %c0_i32_1 = arith.constant 0 : i32
    return %c0_i32, %c0_i32_0 : i32, i32
  }
  func.func @transform_6(%arg0: i32) -> i32 {
    %c0_i32 = arith.constant 0 : i32
    %c0_i32_0 = arith.constant 0 : i32
    return %c0_i32 : i32
  }
  func.func @transform_7(%arg0: i32) -> (i32, i32, i32, i32) {
    %c0_i32 = arith.constant 0 : i32
    %c0_i32_0 = arith.constant 0 : i32
    %c0_i32_1 = arith.constant 0 : i32
    %c0_i32_2 = arith.constant 0 : i32
    return %arg0, %c0_i32, %c0_i32_0, %c0_i32_1 : i32, i32, i32, i32
  }
}

</mosaic_0001>

<bundles_post_ra>
// kernel: resblock_forward.1
= control target key start
LH: loop header
LB: loop body
LE: loop exit
PB: predicated region body
PF: predicated region fallthrough
CT: control target
= control target key end

     0   :  { %12 = vsyncpa [#allocation6], 0  ;;  %s9295_s0 = inlined_call_operand.vmem [shape: f32[2,16,16,64], index: 0, kind: input, shape index: {}]   ;;  %s9296_s1 = inlined_call_operand.vmem [shape: bf16[576,64], index: 1, kind: input, shape index: {}]   ;;  %s9297_s2 = inlined_call_operand.vmem [shape: f32[1,64], index: 2, kind: input, shape index: {}]   ;;  %s9298_s3 = inlined_call_operand.vmem [shape: bf16[576,64], index: 3, kind: input, shape index: {}]   ;;  %s9299_s4 = inlined_call_operand.vmem [shape: f32[1,64], index: 4, kind: input, shape index: {}]   ;;  %s9300_s5 = inlined_call_operand.vmem [shape: f32[288,1], index: 5, kind: input, shape index: {}]   ;;  %s9301_s6 = inlined_call_operand.vmem [shape: f32[2], index: 6, kind: input, shape index: {}]   ;;  %s9302_s7 = inlined_call_operand.hbm [shape: f32[2,16,16,64], index: 7, kind: output, shape index: {}]  }
   0x1   :  { %13 = vsyncpa [#allocation5], 0 }
   0x2   :  { %15 = vsyncpa [#allocation5 + $0x1], 0  ;;  %s6236_s24 = smov 0   ;;  %s6238_s25 = smov 0  }
   0x3   :  { %s6240_s26 = smov 0   ;;  %s6242_s27 = smov 0  }
   0x4 LB: > { %s6257_s28 = sadd.s32 4294967295, %s6188_s27   ;;  %s5353_s29 = sadd.s32 4294967294, %s6188_s27   ;;  %s6188_s27 = sphi %s6242_s27, %s9933_s27   ;;  %s6184_s26 = sphi %s6240_s26, %s9932_s26   ;;  %s6180_s25 = sphi %s6238_s25, %s9931_s25   ;;  %s6176_s24 = sphi %s6236_s24, %s9930_s24  }
   0x5   : > { %s6261_s30 = sadd.s32 1, %s6188_s27   ;;  %s180_s8 = sadd.s32 1, %s6184_s26 }
   0x6   : > { %s177_s9 = ssub.s32 %s6188_s27, %s6261_s30  ;;  %p190_p0 = scmp.ne.s32.totalorder %s6184_s26, %s6180_s25 }
   0x7   : > { %p178_p1 = scmp.eq.s32.totalorder %s177_s9, 0  ;;  %p191_p2 = scmp.eq.s32.totalorder %s6257_s28, 1 }
   0x8   : > { %p196_p3 = scmp.ne.s32.totalorder %s6180_s25, %s6176_s24  ;;  %p197_p4 = scmp.eq.s32.totalorder %s5353_s29, 1 }
   0x9   : > { %s6272_s10 = scalar_select %p178_p1, %s6184_s26, %s180_s8  }
   0xa   : > { %p6274_p5 = por %p191_p2, %p190_p0  ;;  %p6278_p6 = por %p197_p4, %p196_p3 }
   0xb   : > { %p5354_p7 = scmp.ge.s32.totalorder %s6188_s27, 1  ;;  %p204_p8 = scmp.lt.s32.totalorder %s6188_s27, 3 }
   0xc   : > { %p5952_p9 = scmp.eq.s32.totalorder %s6257_s28, 0  ;;  %s232_s16 = sshll.u32 %s9301_s6, 4  ;;  %s233_s16 = int_to_ptr.vmem [resolvable:$true] %s232_s16 }
   0xd   : > { %p6285_p10 = pnand %p5354_p7, %p204_p8  ;;  %s6107_s17 = scalar_lea.vmem %s233_s16, 16 }
   0xe   : > { %p6108_p13 = scmp.ne.s32.totalorder %s233_s16, %s6107_s17  ;;  %p6115_p3 = scmp.lt.s32.totalorder %s233_s16, %s233_s16 }
   0xf   : > { %p5944_p11 = pneg %p6285_p10  ;;  %p6116_p4 = scmp.lt.s32.totalorder %s6107_s17, %s6107_s17 }
  0x11   : > { %p5945_p12 = pnand %p5952_p9, %p5944_p11  ;;  %p6117_p7 = por %p6116_p4, %p6115_p3 }
  0x13   : > { %p6109_p0 = pneg %p5945_p12 }
  0x15   : > { %p6110_p1 = pnand %p6109_p0, %p6108_p13 }
  0x17   : > { %p6111_p2 = pneg %p6110_p1 }
  0x19   : > { %p6118_p8 = pnand %p6117_p7, %p6111_p2 }
  0x1b   : > { %6121 = shalt.err (!%p6118_p8)
}
  0x1c   : > { %s6190_s18 = smov [#allocation4]   ;;  %253 = sbr.rel (%p6285_p10) target bundleno = 1319 (0x527), region = 48 }
  0x1d   : > { %5947 = dma.vmem_to_smem (!%p5945_p12), %s233_s16, 16, %s6190_s18, [#allocation6]  }
  0x23   : > { %6167 = dma.done.wait (%p5952_p9), [#allocation6], 16  }
  0x24   : > { %6169 = vsyncadd (%p5952_p9), [#allocation6], 4294967280 }
  0x25   : > { %259 = sfence }
  0x26   : > { %p286_p11 = scmp.lt.s32.totalorder %s6257_s28, 1  ;;  %vm9303_vm0 = vcmask 523264   ;;  %v9316_v0 = vmov 0   ;;  %vm326_vm1 = vcmask 523265   ;;  %vm327_vm2 = vsmask.f32 7942 }
  0x27   : > { %294 = vst.msk [vmem:[#allocation2 + $0x8] sm:$0xff] %vm9303_vm0, %v9316_v0  ;;  %295 = vst.msk [vmem:[#allocation2 + $0x10] sm:$0xff] %vm9303_vm0, %v9316_v0  ;;  %1941 = vmatprep.subr.bf16.mxu0 %v9316_v0  ;;  %5992 = vset.pattern.permute.xlu0 %v9316_v0  ;;  %vm9304_vm3 = vcmask 517120   ;;  %vm9306_vm4 = vsmask.f32 1280  ;;  %vm9305_vm5 = vcmask 523266  }
  0x28   : > { %303 = vst.msk [vmem:[#allocation2 + $0x50] sm:$0xff] %vm9303_vm0, %v9316_v0  ;;  %293 = vst.msk [vmem:[#allocation2] sm:$0xff] %vm9303_vm0, %v9316_v0  ;;  %s287_s19 = scalar_select %p286_p11, %s6257_s28, 1  ;;  %5993 = vset.pattern.permute.xlu1 %v9316_v0  ;;  %vm352_vm6 = vsmask.f32 7946  ;;  %vm357_vm7 = vcmask 518144  }
  0x29   : > { %296 = vst.msk [vmem:[#allocation2 + $0x18] sm:$0xff] %vm9303_vm0, %v9316_v0  ;;  %297 = vst.msk [vmem:[#allocation2 + $0x20] sm:$0xff] %vm9303_vm0, %v9316_v0  ;;  %vm358_vm8 = vsmask.f32 2304  ;;  %vm376_vm9 = vcmask 523267   ;;  %v9368_v8 = vmov 0 }
  0x2a   : > { %298 = vst.msk [vmem:[#allocation2 + $0x28] sm:$0xff] %vm9303_vm0, %v9316_v0  ;;  %299 = vst.msk [vmem:[#allocation2 + $0x30] sm:$0xff] %vm9303_vm0, %v9316_v0  ;;  %s5580_s20 = sshll.u32 %s287_s19, 8  ;;  %vm377_vm10 = vsmask.f32 7950  ;;  %vm9307_vm14 = vcmask 523268  }
  0x2b   : > { %300 = vst.msk [vmem:[#allocation2 + $0x38] sm:$0xff] %vm9303_vm0, %v9316_v0  ;;  %301 = vst.msk [vmem:[#allocation2 + $0x40] sm:$0xff] %vm9303_vm0, %v9316_v0  ;;  %s6396_s23 = scalar_lea.vmem %s9295_s0, %s5580_s20  ;;  %vm383_vm12 = vsmask.f32 3328  ;;  %vm402_vm15 = vsmask.f32 7954 }
  0x2c   : > { %302 = vst.msk [vmem:[#allocation2 + $0x48] sm:$0xff] %vm9303_vm0, %v9316_v0  ;;  %304 = vst.msk [vmem:[#allocation2 + $0x58] sm:$0xff] %vm9303_vm0, %v9316_v0  ;;  %v314_v1 = vld [vmem:[%s6396_s23] sm:$0xff]  ;;  %v315_v2 = vld [vmem:[%s6396_s23 + $0x8] sm:$0xff]  ;;  %v9371_v13 = vmov 0  ;;  %vm407_vm11 = vcmask 520192  }
  0x2d   : > { %305 = vst.msk [vmem:[#allocation2 + $0x60] sm:$0xff] %vm9303_vm0, %v9316_v0  ;;  %306 = vst.msk [vmem:[#allocation2 + $0x68] sm:$0xff] %vm9303_vm0, %v9316_v0  ;;  %v5362_v3 = vld [vmem:[%s6396_s23 + $0x10] sm:$0xff]  ;;  %v316_v4 = vpack.c.bf16 %v315_v2, %v314_v1  ;;  %v5363_v5 = vld [vmem:[%s6396_s23 + $0x18] sm:$0xff]  ;;  %s6192_s16 = smov 64   ;;  %s664_s29 = sld [smem:[#allocation4]] }
  0x2e   : > { %307 = vst.msk [vmem:[#allocation2 + $0x70] sm:$0xff] %vm9303_vm0, %v9316_v0  ;;  %308 = vst.msk [vmem:[#allocation2 + $0x78] sm:$0xff] %vm9303_vm0, %v9316_v0  ;;  %v5376_v6 = vld [vmem:[%s6396_s23 + $0x80] sm:$0xff]  ;;  %v5377_v7 = vld [vmem:[%s6396_s23 + $0x88] sm:$0xff]  ;;  %v341_v9 = vpack.c.bf16 %v5363_v5, %v5362_v3  ;;  %s283_s13 = sand.u32 1, %s6180_s25   ;;  %s6193_s21 = smov [#allocation7]  }
  0x2f   : > { %309 = vst.msk [vmem:[#allocation2 + $0x80] sm:$0xff] %vm9303_vm0, %v9316_v0  ;;  %310 = vst.msk [vmem:[#allocation2 + $0x88] sm:$0xff] %vm9303_vm0, %v9316_v0  ;;  %v515_v10 = vpack.c.bf16 %v5377_v7, %v5376_v6  ;;  %v318_v11 = vshrl.u32 %v316_v4, 16  ;;  %v321_v12 = vshll.u32 %v316_v4, 16  ;;  %v329_v14 = vld [vmem:[#allocation2 + $0x8] sm:$0xfe] }
  0x30   : > { %311 = vst.msk [vmem:[#allocation2 + $0x90] sm:$0xff] %vm9303_vm0, %v9316_v0  ;;  %312 = vst.msk [vmem:[#allocation2 + $0x98] sm:$0xff] %vm9303_vm0, %v9316_v0  ;;  %v335_v15 = vld [vmem:[#allocation2 + $0x10] sm:$0x3]  ;;  %v343_v16 = vshrl.u32 %v341_v9, 16  ;;  %v346_v17 = vshll.u32 %v341_v9, 16 }
  0x31   : > { %313 = vst.msk [vmem:[#allocation2 + $0xa0] sm:$0xff] %vm9303_vm0, %v9316_v0  ;;  %2581 = vst.msk [vmem:[#allocation3] sm:$0xff] %vm9303_vm0, %v9316_v0  ;;  %v517_v19 = vshrl.u32 %v515_v10, 16  ;;  %v520_v20 = vshll.u32 %v515_v10, 16  ;;  %v5364_v21 = vld [vmem:[%s6396_s23 + $0x20] sm:$0xff]  ;;  %v320_v22 = vrot.slane %v318_v11, 6 }
  0x32   : > { %2582 = vst.msk [vmem:[#allocation3 + $0x8] sm:$0xff] %vm9303_vm0, %v9316_v0  ;;  %2583 = vst.msk [vmem:[#allocation3 + $0x10] sm:$0xff] %vm9303_vm0, %v9316_v0  ;;  %v323_v23 = vrot.slane %v321_v12, 7  ;;  %v354_v24 = vld [vmem:[#allocation2 + $0x10] sm:$0xfc]  ;;  %v5365_v25 = vld [vmem:[%s6396_s23 + $0x28] sm:$0xff] }
  0x33   : > { %2584 = vst.msk [vmem:[#allocation3 + $0x18] sm:$0xff] %vm9303_vm0, %v9316_v0  ;;  %2585 = vst.msk [vmem:[#allocation3 + $0x20] sm:$0xff] %vm9303_vm0, %v9316_v0  ;;  %v5366_v26 = vld [vmem:[%s6396_s23 + $0x30] sm:$0xff]  ;;  %v345_v27 = vrot.slane %v343_v16, 5  ;;  %v348_v28 = vrot.slane %v346_v17, 6  ;;  %v519_v29 = vrot.slane %v517_v19, 6  ;;  %v366_v36 = vpack.c.bf16 %v5365_v25, %v5364_v21 }
  0x34   : > { %2586 = vst.msk [vmem:[#allocation3 + $0x28] sm:$0xff] %vm9303_vm0, %v9316_v0  ;;  %2587 = vst.msk [vmem:[#allocation3 + $0x30] sm:$0xff] %vm9303_vm0, %v9316_v0  ;;  %v522_v30 = vrot.slane %v520_v20, 7  ;;  %v6425_v31 = vld [vmem:[#allocation2] sm:$0xff]  ;;  %v324_v33 = vor.u32 %v323_v23, %v320_v22  ;;  %v525_v34 = vld [vmem:[#allocation2 + $0x50] sm:$0xfe] }
  0x35   : > { %2588 = vst.msk [vmem:[#allocation3 + $0x38] sm:$0xff] %vm9303_vm0, %v9316_v0  ;;  %2589 = vst.msk [vmem:[#allocation3 + $0x40] sm:$0xff] %vm9303_vm0, %v9316_v0  ;;  %v360_v35 = vld [vmem:[#allocation2 + $0x18] sm:$0x7]  ;;  %v349_v38 = vor.u32 %v348_v28, %v345_v27  ;;  %v5368_v41 = vld [vmem:[%s6396_s23 + $0x40] sm:$0xff]  ;;  %v698_v45 = vshll.u32 %v6425_v31, 16 }
  0x36   : > { %2590 = vst.msk [vmem:[#allocation3 + $0x48] sm:$0xff] %vm9303_vm0, %v9316_v0  ;;  %2591 = vst.msk [vmem:[#allocation3 + $0x50] sm:$0xff] %vm9303_vm0, %v9316_v0  ;;  %v5367_v37 = vld [vmem:[%s6396_s23 + $0x38] sm:$0xff]  ;;  %v6434_v39 = vor.u32 %v522_v30, %v519_v29  ;;  %v5369_v42 = vld [vmem:[%s6396_s23 + $0x48] sm:$0xff]  ;;  %v368_v46 = vshrl.u32 %v366_v36, 16  ;;  %v371_v50 = vshll.u32 %v366_v36, 16 }
  0x37   : > { %2592 = vst.msk [vmem:[#allocation3 + $0x58] sm:$0xff] %vm9303_vm0, %v9316_v0  ;;  %2593 = vst.msk [vmem:[#allocation3 + $0x60] sm:$0xff] %vm9303_vm0, %v9316_v0  ;;  %v391_v40 = vpack.c.bf16 %v5367_v37, %v5366_v26  ;;  %v5370_v52 = vld [vmem:[%s6396_s23 + $0x50] sm:$0xff]  ;;  %v5371_v53 = vld [vmem:[%s6396_s23 + $0x58] sm:$0xff]  ;;  %v416_v60 = vpack.c.bf16 %v5369_v42, %v5368_v41  ;;  %v696_v61 = vshrl.u32 %v6425_v31, 16  ;;  %v700_v11 = vrot.slane %v698_v45, 1 }
  0x38   : > { %2594 = vst.msk [vmem:[#allocation3 + $0x68] sm:$0xff] %vm9303_vm0, %v9316_v0  ;;  %2595 = vst.msk [vmem:[#allocation3 + $0x70] sm:$0xff] %vm9303_vm0, %v9316_v0  ;;  %v370_v54 = vrot.slane %v368_v46, 4  ;;  %v379_v55 = vld [vmem:[#allocation2 + $0x18] sm:$0xf8]  ;;  %v373_v62 = vrot.slane %v371_v50, 5  ;;  %v441_v1 = vpack.c.bf16 %v5371_v53, %v5370_v52 }
  0x39   : > { %2596 = vst.msk [vmem:[#allocation3 + $0x78] sm:$0xff] %vm9303_vm0, %v9316_v0  ;;  %2597 = vst.msk [vmem:[#allocation3 + $0x80] sm:$0xff] %vm9303_vm0, %v9316_v0  ;;  %v385_v57 = vld [vmem:[#allocation2 + $0x20] sm:$0xf]  ;;  %v393_v58 = vshrl.u32 %v391_v40, 16  ;;  %v396_v59 = vshll.u32 %v391_v40, 16  ;;  %v701_v42 = vor.u32 %v700_v11, %v696_v61 }
  0x3a   : > { %2598 = vst.msk [vmem:[#allocation3 + $0x88] sm:$0xff] %vm9303_vm0, %v9316_v0  ;;  %2599 = vst.msk [vmem:[#allocation3 + $0x90] sm:$0xff] %vm9303_vm0, %v9316_v0  ;;  %v404_v63 = vld [vmem:[#allocation2 + $0x20] sm:$0xf0]  ;;  %v5373_v3 = vld [vmem:[%s6396_s23 + $0x68] sm:$0xff]  ;;  %v418_v9 = vshrl.u32 %v416_v60, 16  ;;  %v374_v12 = vor.u32 %v373_v62, %v370_v54 }
  0x3b   : > { %2600 = vst.msk [vmem:[#allocation3 + $0x98] sm:$0xff] %vm9303_vm0, %v9316_v0  ;;  %2601 = vst.msk [vmem:[#allocation3 + $0xa0] sm:$0xff] %vm9303_vm0, %v9316_v0  ;;  %v5372_v2 = vld [vmem:[%s6396_s23 + $0x60] sm:$0xff]  ;;  %v395_v4 = vrot.slane %v393_v58, 3  ;;  %v398_v5 = vrot.slane %v396_v59, 4  ;;  %v421_v10 = vshll.u32 %v416_v60, 16 }
  0x3c   : > { %vm6406_vm13 = vmand %vm326_vm1, %vm327_vm2  ;;  %vm408_vm1 = vsmask.f32 4352  ;;  %v410_v7 = vld [vmem:[#allocation2 + $0x28] sm:$0x1f]  ;;  %v446_v16 = vshll.u32 %v441_v1, 16  ;;  %v5994_v17 = vld [vmem:[%s9296_s1] sm:$0xff]   ;;  %v6482_v22 = vpack.c.bf16 %v5373_v3, %v5372_v2 }
  0x3d   : > { %v9369_v8 = vsel %vm6406_vm13, 4294967295, %v9368_v8  ;;  %vm6412_vm0 = vmand %vm9304_vm3, %vm9306_vm4  ;;  %v330_v43 = vsel %vm6406_vm13, %v324_v33, %v329_v14  ;;  %v526_v48 = vsel %vm6406_vm13, %v6434_v39, %v525_v34  ;;  %vm9380_vm4 = vcmask 519168   ;;  %v429_v26 = vld [vmem:[#allocation2 + $0x28] sm:$0xe0]  ;;  %1942 = vmatpush1.bf16.msra.mxu0 %v5994_v17  ;;  %v460_v45 = vld [vmem:[#allocation2 + $0x38] sm:$0x7f] }
  0x3e   : > { %9370 = vst [vmem:[#allocation10_spill] sm:$0xff] %v9369_v8  ;;  %v9372_v13 = vsel %vm6412_vm0, 4294967295, %v9371_v13  ;;  %vm6418_vm2 = vmand %vm9305_vm5, %vm352_vm6  ;;  %vm426_vm5 = vcmask 523269   ;;  %v336_v44 = vsel %vm6412_vm0, %v324_v33, %v335_v15  ;;  %v443_v15 = vshrl.u32 %v441_v1, 16  ;;  %v435_v33 = vld [vmem:[#allocation2 + $0x30] sm:$0x3f]  ;;  %1943 = vmatprep.subr.bf16.mxu0 %v9316_v0 }
  0x3f   : > { %9373 = vst [vmem:[#allocation11_spill] sm:$0xff] %v9372_v13  ;;  %vm6429_vm6 = vmand %vm357_vm7, %vm358_vm8  ;;  %vm452_vm8 = vsmask.f32 7962  ;;  %v355_v47 = vsel %vm6418_vm2, %v349_v38, %v354_v24  ;;  %v399_v19 = vor.u32 %v398_v5, %v395_v4  ;;  %v420_v20 = vrot.slane %v418_v9, 2  ;;  %v5995_v40 = vld [vmem:[%s9296_s1 + $0x8] sm:$0xff]   ;;  %v5996_v53 = vld [vmem:[%s9296_s1 + $0x10] sm:$0xff]  }
  0x40   : > { %331 = vst [vmem:[#allocation2 + $0x8] sm:$0xfe] %v330_v43  ;;  %337 = vst [vmem:[#allocation2 + $0x10] sm:$0x3] %v336_v44  ;;  %v361_v49 = vsel %vm6429_vm6, %v349_v38, %v360_v35  ;;  %v423_v21 = vrot.slane %v421_v10, 3  ;;  %v445_v37 = vrot.slane %v443_v15, 1 }
  0x41   : > { %vm6452_vm3 = vmand %vm376_vm9, %vm377_vm10  ;;  %356 = vst [vmem:[#allocation2 + $0x10] sm:$0xfc] %v355_v47  ;;  %v448_v38 = vrot.slane %v446_v16, 2  ;;  %v454_v44 = vld [vmem:[#allocation2 + $0x30] sm:$0xc0]  ;;  %v468_v46 = vshll.u32 %v6482_v22, 16  ;;  %1944 = vmatpush1.bf16.msra.mxu0 %v5995_v40 }
  0x42   : > { %527 = vst [vmem:[#allocation2 + $0x50] sm:$0xfe] %v526_v48  ;;  %362 = vst [vmem:[#allocation2 + $0x18] sm:$0x7] %v361_v49  ;;  %v380_v23 = vsel %vm6452_vm3, %v374_v12, %v379_v55  ;;  %v424_v31 = vor.u32 %v423_v21, %v420_v20  ;;  %vm9395_vm9 = vcmask 523270   ;;  %v9400_v58 = vmov 0  ;;  %1945 = vmatprep.subr.bf16.mxu0 %v9316_v0 }
  0x43   : > { %vm6460_vm7 = vmand %vm9380_vm4, %vm383_vm12  ;;  %381 = vst [vmem:[#allocation2 + $0x18] sm:$0xf8] %v380_v23  ;;  %v479_v52 = vld [vmem:[#allocation2 + $0x38] sm:$0x80]  ;;  %v5374_v59 = vld [vmem:[%s6396_s23 + $0x70] sm:$0xff]  ;;  %v449_v62 = vor.u32 %v448_v38, %v445_v37  ;;  %v470_v1 = vrot.slane %v468_v46, 1 }
  0x44   : > { %vm6469_vm4 = vmand %vm9307_vm14, %vm402_vm15  ;;  %v386_v24 = vsel %vm6460_vm7, %v374_v12, %v385_v57  ;;  %vm9309_vm15 = vsmask.f32 6400  ;;  %v5375_v60 = vld [vmem:[%s6396_s23 + $0x78] sm:$0xff]  ;;  %v471_v2 = vshrl.u32 %v6482_v22, 16  ;;  %v9403_v9 = vmov 0  ;;  %v485_v21 = vld [vmem:[#allocation2 + $0x40] sm:$0xff] }
  0x45   : > { %vm6475_vm10 = vmand %vm407_vm11, %vm408_vm1  ;;  %vm9387_vm11 = vsmask.f32 7958  ;;  %387 = vst [vmem:[#allocation2 + $0x20] sm:$0xf] %v386_v24  ;;  %v405_v29 = vsel %vm6469_vm4, %v399_v19, %v404_v63  ;;  %v491_v10 = vpack.c.bf16 %v5375_v60, %v5374_v59  ;;  %1946 = vmatpush1.bf16.msra.mxu0 %v5996_v53  ;;  %v5997_v11 = vld [vmem:[%s9296_s1 + $0x18] sm:$0xff]   ;;  %v9408_v20 = vmov 0 }
  0x46   : > { %vm6490_vm12 = vmand %vm426_vm5, %vm9387_vm11  ;;  %v411_v30 = vsel %vm6475_vm10, %v399_v19, %v410_v7  ;;  %406 = vst [vmem:[#allocation2 + $0x20] sm:$0xf0] %v405_v29  ;;  %vm9391_vm5 = vsmask.f32 5376  ;;  %vm9392_vm11 = vcmask 521216   ;;  %1947 = vmatprep.subr.bf16.mxu0 %v9316_v0  ;;  %v473_v23 = vor.u32 %v471_v2, %v470_v1  ;;  %v5998_v29 = vld [vmem:[%s9296_s1 + $0x20] sm:$0xff]  }
  0x47   : > { %v685_v27 = vld [vmem:[#allocation2 + $0x8] sm:$0xfe]  ;;  %412 = vst [vmem:[#allocation2 + $0x28] sm:$0x1f] %v411_v30  ;;  %vm6509_vm14 = vmand %vm9392_vm11, %vm9391_vm5  ;;  %v430_v49 = vsel %vm6490_vm12, %v424_v31, %v429_v26  ;;  %vm9398_vm5 = vcmask 1046528   ;;  %vm9399_vm11 = vcmask 522240  }
  0x48   : > { %v666_v28 = vld [vmem:[#allocation2 + $0x8] sm:$0xff]  ;;  %v6499_v34 = vld [vmem:[#allocation2 + $0x10] sm:$0xff]  ;;  %v939_v35 = vrot.slane %v685_v27, 1  ;;  %vm6519_vm1 = vmand %vm9395_vm9, %vm452_vm8  ;;  %431 = vst [vmem:[#allocation2 + $0x28] sm:$0xe0] %v430_v49  ;;  %vm476_vm8 = vcmask 523271   ;;  %v436_v61 = vsel %vm6509_vm14, %v424_v31, %v435_v33 }
  0x49   : > { %v703_v36 = vshll.u32 %v666_v28, 16  ;;  %v6505_v41 = vrot.slane %v6499_v34, 1  ;;  %v9314_v48 = vshll.u32 %v6499_v34, 16  ;;  %v707_v55 = vshrl.u32 %v666_v28, 16  ;;  %vm6531_vm13 = vmand %vm9399_vm11, %vm9309_vm15  ;;  %437 = vst [vmem:[#allocation2 + $0x30] sm:$0x3f] %v436_v61  ;;  %1948 = vmatpush1.bf16.msra.mxu0 %v5997_v11 }
  0x4a   : > { %v9313_v57 = vshrl.u32 %v6499_v34, 16  ;;  %v9401_v58 = vsel %vm6531_vm13, 4294967295, %v9400_v58  ;;  %vm9402_vm9 = vsmask.f32 7424  ;;  %v6543_v3 = vld [vmem:[#allocation2 + $0x18] sm:$0xff]  ;;  %v455_v5 = vsel %vm6519_vm1, %v449_v62, %v454_v44  ;;  %1949 = vmatprep.subr.bf16.mxu0 %v9316_v0  ;;  %v503_v49 = vld [vmem:[#allocation2 + $0x48] sm:$0xff] }
  0x4b   : > { %9390 = vst [vmem:[#allocation12_spill] sm:$0xff] %v6505_v41  ;;  %v705_v47 = vrot.slane %v703_v36, 1  ;;  %v940_v54 = vsel %vm9398_vm5, %v939_v35, %v6505_v41  ;;  %vm477_vm5 = vsmask.f32 7966  ;;  %v713_v4 = vrot.slane %v9314_v48, 1  ;;  %v5378_v11 = vld [vmem:[%s6396_s23 + $0x90] sm:$0xff] }
  0x4c   : > { %945 = vrot.lane.b32.xlu0 %v940_v54, %s6192_s16  ;;  %v461_v7 = vsel %vm6531_vm13, %v449_v62, %v460_v45  ;;  %vm6552_vm11 = vmand %vm476_vm8, %vm477_vm5  ;;  %v904_v12 = vrot.slane %v6543_v3, 1  ;;  %v6563_v17 = vshll.u32 %v6543_v3, 16  ;;  %456 = vst [vmem:[#allocation2 + $0x30] sm:$0xc0] %v455_v5  ;;  %vm9410_vm15 = vcmask 1046528   ;;  %v5385_v13 = vld [vmem:[%s6396_s23 + $0xc8] sm:$0xff] }
  0x4d   : > { %v706_v63 = vsel %vm9402_vm9, %v701_v42, %v705_v47  ;;  %v9404_v9 = vsel %vm6552_vm11, 4294967295, %v9403_v9  ;;  %v709_v15 = vor.u32 %v707_v55, %v705_v47  ;;  %v6560_v16 = vld [vmem:[#allocation2 + $0x20] sm:$0xff]  ;;  %462 = vst [vmem:[#allocation2 + $0x38] sm:$0x7f] %v461_v7  ;;  %v480_v19 = vsel %vm6552_vm11, %v470_v1, %v479_v52  ;;  %vm9406_vm8 = vmmov %vm9402_vm9  ;;  %1950 = vmatpush1.bf16.msra.mxu0 %v5998_v29  ;;  %v5999_v55 = vld [vmem:[%s9296_s1 + $0x28] sm:$0xff]   ;;  %s5359_s14 = sshll.u32 %s283_s13, 8 }
  0x4e   : > { %9405 = vst [vmem:[#allocation13_spill] sm:$0xff] %v6563_v17  ;;  %vm9407_vm9 = vcmask 523264   ;;  %v906_v22 = vrot.slane %v6560_v16, 1  ;;  %481 = vst [vmem:[#allocation2 + $0x38] sm:$0x80] %v480_v19  ;;  %v6578_v24 = vsel %vm9410_vm15, %v6505_v41, %v904_v12  ;;  %v6581_v26 = vshrl.u32 %v6543_v3, 16  ;;  %1951 = vmatprep.subr.bf16.mxu0 %v9316_v0 }
  0x4f   : > { %vm6569_vm5 = vmand %vm9407_vm9, %vm9406_vm8  ;;  %9411 = vst [vmem:[#allocation14_spill] sm:$0xff] %v6578_v24  ;;  %v6584_v27 = vshll.u32 %v6560_v16, 16  ;;  %v493_v28 = vshrl.u32 %v491_v10, 16  ;;  %947 = vrot.lane.b32.xlu1 %v6578_v24, %s6192_s16  ;;  %v6594_v31 = vld [vmem:[#allocation2 + $0x28] sm:$0xff]  ;;  %v496_v35 = vshll.u32 %v491_v10, 16  ;;  %v717_v37 = vor.u32 %v9313_v57, %v713_v4  ;;  %s8974_s15 = scalar_lea.vmem [#allocation7], %s5359_s14 }
  0x50   : > { %v9409_v20 = vsel %vm6569_vm5, 4294967295, %v9408_v20  ;;  %843 = vrot.lane.b32.xlu0 %v706_v63, %s6192_s16  ;;  %vm9413_vm8 = vmmov %vm9410_vm15  ;;  %v6598_v33 = vsel %vm6569_vm5, %v473_v23, %v485_v21  ;;  %vm501_vm15 = vsmask.f32 7938  ;;  %vm9416_vm9 = vsmask.f32 7424  ;;  %v6003_v32 = vld [vmem:[%s9296_s1 + $0x48] sm:$0xff]  }
  0x51   : > { %9412 = vst [vmem:[#allocation15_spill] sm:$0xff] %v6584_v27  ;;  %v6592_v30 = vsel %vm9413_vm8, %v904_v12, %v906_v22  ;;  %9415 = vst [vmem:[#allocation17_spill] sm:$0xff] %v6598_v33  ;;  %v714_v36 = vsel %vm9416_vm9, %v709_v15, %v713_v4  ;;  %v721_v38 = vrot.slane %v6563_v17, 1  ;;  %v908_v40 = vrot.slane %v6594_v31, 1  ;;  %v509_v63 = vld [vmem:[#allocation2 + $0x50] sm:$0x1]  ;;  %1952 = vmatpush1.bf16.msra.mxu0 %v5999_v55 }
  0x52   : > { %9414 = vst [vmem:[#allocation16_spill] sm:$0xff] %v6592_v30  ;;  %487 = vst [vmem:[#allocation2 + $0x40] sm:$0xff] %v6598_v33  ;;  %v6610_v42 = vshrl.u32 %v6560_v16, 16  ;;  %v6613_v44 = vshll.u32 %v6594_v31, 16  ;;  %v495_v45 = vrot.slane %v493_v28, 7  ;;  %vm9419_vm9 = vcmask 523264   ;;  %1953 = vmatprep.subr.bf16.mxu0 %v9316_v0 }
  0x53   : > { %v6616_v46 = vsel %vm9413_vm8, %v906_v22, %v908_v40  ;;  %vm6619_vm5 = vmand %vm9419_vm9, %vm501_vm15  ;;  %845 = vrot.lane.b32.xlu1 %v714_v36, %s6192_s16  ;;  %v729_v52 = vrot.slane %v6584_v27, 1  ;;  %v6625_v53 = vld [vmem:[#allocation2 + $0x30] sm:$0xff]  ;;  %vm506_vm11 = vcmask 516096   ;;  %vm507_vm13 = vsmask.f32 256  ;;  %v5379_v12 = vld [vmem:[%s6396_s23 + $0x98] sm:$0xff] }
  0x54   : > { %949 = vrot.lane.b32.xlu0 %v6592_v30, %s6192_s16  ;;  %9417 = vst [vmem:[#allocation18_spill] sm:$0xff] %v6610_v42  ;;  %9418 = vst [vmem:[#allocation19_spill] sm:$0xff] %v6616_v46  ;;  %v498_v54 = vor.u32 %v496_v35, %v495_v45  ;;  %vm9422_vm15 = vsmask.f32 7424  ;;  %v725_v60 = vor.u32 %v6581_v26, %v721_v38  ;;  %v910_v61 = vrot.slane %v6625_v53, 1  ;;  %v6000_v15 = vld [vmem:[%s9296_s1 + $0x30] sm:$0xff]  }
  0x55   : > { %v722_v59 = vsel %vm9422_vm15, %v717_v37, %v721_v38  ;;  %v6633_v62 = vld [vmem:[#allocation2 + $0x38] sm:$0xff]  ;;  %v733_v2 = vor.u32 %v6610_v42, %v729_v52  ;;  %v737_v4 = vrot.slane %v6613_v44, 1  ;;  %v6641_v5 = vshrl.u32 %v6594_v31, 16  ;;  %vm6649_vm8 = vmand %vm506_vm11, %vm507_vm13  ;;  %v5380_v28 = vld [vmem:[%s6396_s23 + $0xa0] sm:$0xff]  ;;  %1954 = vmatpush1.bf16.msra.mxu0 %v6000_v15  ;;  %s5279_s17 = sshll.u32 %s8974_s15, 4  ;;  %s6126_s22 = sshll.u32 %s6193_s21, 4  ;;  %s9240_s17 = int_to_ptr.vmem [resolvable:$true] %s5279_s17  ;;  %s6127_s22 = int_to_ptr.vmem [resolvable:$false] %s6126_s22 }
  0x56   : > { %v528_v1 = vld [vmem:[#allocation2 + $0x58] sm:$0x3]  ;;  %v6645_v7 = vsel %vm6619_vm5, %v498_v54, %v503_v49  ;;  %vm9426_vm9 = vcmask 1046528   ;;  %v912_v21 = vrot.slane %v6633_v62, 1  ;;  %v6663_v22 = vshll.u32 %v6625_v53, 16  ;;  %v5381_v35 = vld [vmem:[%s6396_s23 + $0xa8] sm:$0xff]  ;;  %vm9428_vm13 = vmmov %vm9422_vm15  ;;  %1955 = vmatprep.subr.bf16.mxu0 %v9316_v0  ;;  %p6129_p13 = scmp.lt.s32.totalorder %s9240_s17, %s6127_s22 }
  0x57   : > { %9423 = vst [vmem:[#allocation20_spill] sm:$0xff] %v6641_v5  ;;  %v6659_v19 = vsel %vm9426_vm9, %v908_v40, %v910_v61  ;;  %v914_v23 = vrot.slane %v6598_v33, 1  ;;  %505 = vst [vmem:[#allocation2 + $0x48] sm:$0xff] %v6645_v7  ;;  %847 = vrot.lane.b32.xlu1 %v722_v59, %s6192_s16  ;;  %v6670_v29 = vshll.u32 %v6633_v62, 16  ;;  %v730_v36 = vsel %vm9428_vm13, %v725_v60, %v729_v52  ;;  %v5382_v49 = vld [vmem:[%s6396_s23 + $0xb0] sm:$0xff]  ;;  %v5383_v54 = vld [vmem:[%s6396_s23 + $0xb8] sm:$0xff] }
  0x58   : > { %951 = vrot.lane.b32.xlu0 %v6616_v46, %s6192_s16  ;;  %9427 = vst [vmem:[#allocation21_spill] sm:$0xff] %v6659_v19  ;;  %v6675_v37 = vshll.u32 %v6598_v33, 16  ;;  %v510_v38 = vsel %vm6649_vm8, %v495_v45, %v509_v63  ;;  %v6680_v40 = vshrl.u32 %v6598_v33, 16  ;;  %vm9429_vm11 = vmmov %vm9428_vm13  ;;  %v741_v52 = vor.u32 %v6641_v5, %v737_v4  ;;  %v544_v15 = vld [vmem:[#allocation2 + $0x58] sm:$0xfc]  ;;  %v5389_v6 = vld [vmem:[%s6396_s23 + $0xe8] sm:$0xff] }
  0x59   : > { %v738_v55 = vsel %vm9429_vm11, %v733_v2, %v737_v4  ;;  %v6690_v59 = vshrl.u32 %v6625_v53, 16  ;;  %511 = vst [vmem:[#allocation2 + $0x50] sm:$0x1] %v510_v38  ;;  %v529_v45 = vsel %vm6412_vm0, %v6434_v39, %v528_v1  ;;  %vm9430_vm15 = vmmov %vm9426_vm9  ;;  %v745_v63 = vrot.slane %v6663_v22, 1  ;;  %v6001_v39 = vld [vmem:[%s9296_s1 + $0x38] sm:$0xff]   ;;  %v6002_v4 = vld [vmem:[%s9296_s1 + $0x40] sm:$0xff]  }
  0x5a   : > { %v6696_v60 = vsel %vm9430_vm15, %v910_v61, %v912_v21  ;;  %530 = vst [vmem:[#allocation2 + $0x58] sm:$0x3] %v529_v45  ;;  %v534_v57 = vpack.c.bf16 %v5379_v12, %v5378_v11  ;;  %v553_v48 = vpack.c.bf16 %v5381_v35, %v5380_v28  ;;  %v753_v2 = vrot.slane %v6670_v29, 1  ;;  %v563_v45 = vld [vmem:[#allocation2 + $0x60] sm:$0xf8]  ;;  %vm9433_vm13 = vmmov %vm9429_vm11  ;;  %1956 = vmatpush1.bf16.msra.mxu0 %v6001_v39  ;;  %v5387_v33 = vld [vmem:[%s6396_s23 + $0xd8] sm:$0xff] }
  0x5b   : > { %9431 = vst [vmem:[#allocation22_spill] sm:$0xff] %v6696_v60  ;;  %849 = vrot.lane.b32.xlu1 %v730_v36, %s6192_s16  ;;  %v6703_v38 = vshrl.u32 %v6633_v62, 16  ;;  %v572_v61 = vpack.c.bf16 %v5383_v54, %v5382_v49  ;;  %v6712_v35 = vsel %vm9426_vm9, %v912_v21, %v914_v23  ;;  %v547_v36 = vld [vmem:[#allocation2 + $0x60] sm:$0x7]  ;;  %v746_v21 = vsel %vm9433_vm13, %v741_v52, %v745_v63  ;;  %v566_v46 = vld [vmem:[#allocation2 + $0x68] sm:$0xf]  ;;  %vm9435_vm11 = vmmov %vm9426_vm9 }
  0x5c   : > { %953 = vrot.lane.b32.xlu0 %v6659_v19, %s6192_s16  ;;  %v536_v1 = vshrl.u32 %v534_v57, 16  ;;  %v539_v11 = vshll.u32 %v534_v57, 16  ;;  %v555_v12 = vshrl.u32 %v553_v48, 16  ;;  %v558_v28 = vshll.u32 %v553_v48, 16  ;;  %9432 = vst [vmem:[#allocation23_spill] sm:$0xff] %v6712_v35  ;;  %v5384_v57 = vld [vmem:[%s6396_s23 + $0xc0] sm:$0xff]  ;;  %vm9438_vm15 = vmmov %vm9433_vm13 }
  0x5d   : > { %v574_v49 = vshrl.u32 %v572_v61, 16  ;;  %v577_v54 = vshll.u32 %v572_v61, 16  ;;  %v9434_v61 = vrot.slane %v6645_v7, 1  ;;  %v582_v52 = vld [vmem:[#allocation2 + $0x68] sm:$0xf0]  ;;  %v757_v39 = vor.u32 %v6703_v38, %v753_v2  ;;  %s6122_s20 = scalar_lea.vmem %s9240_s17, 4096 }
  0x5e   : > { %v538_v0 = vrot.slane %v536_v1, 5  ;;  %v541_v8 = vrot.slane %v539_v11, 6  ;;  %v557_v48 = vrot.slane %v555_v12, 4  ;;  %v560_v19 = vrot.slane %v558_v28, 5  ;;  %v585_v28 = vld [vmem:[#allocation2 + $0x70] sm:$0x1f]  ;;  %p6123_p9 = scmp.ne.s32.totalorder %s9240_s17, %s6122_s20 }
  0x5f   : > { %851 = vrot.lane.b32.xlu1 %v738_v55, %s6192_s16  ;;  %v576_v30 = vrot.slane %v574_v49, 3  ;;  %v579_v24 = vrot.slane %v577_v54, 4  ;;  %v6725_v41 = vsel %vm9435_vm11, %v914_v23, %v9434_v61  ;;  %v9437_v55 = vmov 0   ;;  %v5386_v61 = vld [vmem:[%s6396_s23 + $0xd0] sm:$0xff]  ;;  %v623_v25 = vld [vmem:[#allocation2 + $0x80] sm:$0x7f] }
  0x60   : > { %955 = vrot.lane.b32.xlu0 %v6696_v60, %s6192_s16  ;;  %v749_v60 = vor.u32 %v6690_v59, %v745_v63  ;;  %9436 = vst [vmem:[#allocation24_spill] sm:$0xff] %v6725_v41  ;;  %v6727_v1 = vld [vmem:[#allocation2 + $0x50] sm:$0xff]  ;;  %v542_v11 = vor.u32 %v541_v8, %v538_v0  ;;  %v561_v12 = vor.u32 %v560_v19, %v557_v48  ;;  %v6735_v54 = vshll.u32 %v6645_v7, 16  ;;  %p6124_p10 = pnand %p6123_p9, %p6274_p5 }
  0x61   : > { %1957 = vmatprep.subr.bf16.mxu0 %v9437_v55  ;;  %v591_v63 = vpack.c.bf16 %v5385_v13, %v5384_v57  ;;  %v918_v49 = vrot.slane %v6727_v1, 1  ;;  %v580_v23 = vor.u32 %v579_v24, %v576_v30  ;;  %v761_v24 = vrot.slane %v6675_v37, 1 }
  0x62   : > { %v545_v0 = vsel %vm6418_vm2, %v542_v11, %v544_v15  ;;  %v548_v8 = vsel %vm6429_vm6, %v542_v11, %v547_v36  ;;  %v564_v13 = vsel %vm6452_vm3, %v561_v12, %v563_v45  ;;  %v567_v19 = vsel %vm6460_vm7, %v561_v12, %v566_v46  ;;  %1958 = vmatpush1.bf16.msra.mxu0 %v6002_v4  ;;  %vm9440_vm3 = vmmov %vm9426_vm9  ;;  %v601_v11 = vld [vmem:[#allocation2 + $0x70] sm:$0xe0]  ;;  %p6125_p12 = pneg %p6124_p10 }
  0x63   : > { %853 = vrot.lane.b32.xlu1 %v746_v21, %s6192_s16  ;;  %v754_v57 = vsel %vm9438_vm15, %v749_v60, %v753_v2  ;;  %546 = vst [vmem:[#allocation2 + $0x58] sm:$0xfc] %v545_v0  ;;  %549 = vst [vmem:[#allocation2 + $0x60] sm:$0x7] %v548_v8  ;;  %v583_v18 = vsel %vm6469_vm4, %v580_v23, %v582_v52  ;;  %v586_v51 = vsel %vm6475_vm10, %v580_v23, %v585_v28  ;;  %v5388_v2 = vld [vmem:[%s6396_s23 + $0xe0] sm:$0xff] }
  0x64   : > { %957 = vrot.lane.b32.xlu0 %v6712_v35, %s6192_s16  ;;  %565 = vst [vmem:[#allocation2 + $0x60] sm:$0xf8] %v564_v13  ;;  %568 = vst [vmem:[#allocation2 + $0x68] sm:$0xf] %v567_v19  ;;  %v6758_v56 = vshrl.u32 %v6645_v7, 16  ;;  %1959 = vmatprep.subr.bf16.mxu0 %v9437_v55  ;;  %v593_v30 = vshrl.u32 %v591_v63, 16  ;;  %v610_v60 = vpack.c.bf16 %v5387_v33, %v5386_v61  ;;  %vm9449_vm10 = vnez %v9401_v58 }
  0x65   : > { %584 = vst [vmem:[#allocation2 + $0x68] sm:$0xf0] %v583_v18  ;;  %587 = vst [vmem:[#allocation2 + $0x70] sm:$0x1f] %v586_v51  ;;  %v596_v46 = vshll.u32 %v591_v63, 16  ;;  %v9439_v14 = vrot.slane %v6645_v7, 1  ;;  %v6779_v45 = vpack.c.bf16 %v5389_v6, %v5388_v2  ;;  %v765_v63 = vor.u32 %v6680_v40, %v761_v24 }
  0x66   : > { %v769_v15 = vrot.slane %v6735_v54, 1  ;;  %v6774_v36 = vshll.u32 %v6727_v1, 16  ;;  %v6004_v33 = vld [vmem:[%s9296_s1 + $0x50] sm:$0xff]   ;;  %v595_v48 = vrot.slane %v593_v30, 2  ;;  %v612_v12 = vshrl.u32 %v610_v60, 16  ;;  %vm9442_vm2 = vmmov %vm9433_vm13  ;;  %1960 = vmatpush1.bf16.msra.mxu0 %v6003_v32  ;;  %v6005_v6 = vld [vmem:[%s9296_s1 + $0x58] sm:$0xff]  }
  0x67   : > { %v6770_v4 = vsel %vm9440_vm3, %v9439_v14, %v918_v49  ;;  %v598_v21 = vrot.slane %v596_v46, 3  ;;  %v615_v52 = vshll.u32 %v610_v60, 16  ;;  %855 = vrot.lane.b32.xlu1 %v754_v57, %s6192_s16  ;;  %v762_v28 = vsel %vm9442_vm2, %v757_v39, %v761_v24  ;;  %v604_v23 = vld [vmem:[#allocation2 + $0x78] sm:$0x3f]  ;;  %1961 = vmatprep.subr.bf16.mxu0 %v9437_v55  ;;  %v620_v46 = vld [vmem:[#allocation2 + $0x78] sm:$0xc0]  ;;  %vm9443_vm6 = vmmov %vm9442_vm2 }
  0x68   : > { %959 = vrot.lane.b32.xlu0 %v6725_v41, %s6192_s16  ;;  %9441 = vst [vmem:[#allocation25_spill] sm:$0xff] %v6770_v4  ;;  %v614_v0 = vrot.slane %v612_v12, 1  ;;  %v631_v13 = vshll.u32 %v6779_v45, 16  ;;  %v773_v19 = vor.u32 %v6758_v56, %v769_v15  ;;  %v6790_v57 = vshrl.u32 %v6727_v1, 16  ;;  %vm9446_vm7 = vmmov %vm9442_vm2 }
  0x69   : > { %v599_v61 = vor.u32 %v598_v21, %v595_v48  ;;  %v617_v8 = vrot.slane %v615_v52, 2  ;;  %v777_v24 = vrot.slane %v6774_v36, 1  ;;  %v770_v43 = vsel %vm9443_vm6, %v765_v63, %v769_v15  ;;  %v6006_v15 = vld [vmem:[%s9296_s1 + $0x60] sm:$0xff]   ;;  %v642_v63 = vld [vmem:[#allocation2 + $0x88] sm:$0xff]  ;;  %vm9447_vm4 = vmmov %vm9440_vm3 }
  0x6a   : > { %v6792_v39 = vld [vmem:[#allocation2 + $0x58] sm:$0xff]  ;;  %1962 = vmatpush1.bf16.msra.mxu0 %v6004_v33  ;;  %v633_v21 = vrot.slane %v631_v13, 1  ;;  %v634_v33 = vshrl.u32 %v6779_v45, 16  ;;  %v639_v52 = vld [vmem:[#allocation2 + $0x80] sm:$0x80]  ;;  %vm9453_vm9 = vmmov %vm9440_vm3 }
  0x6b   : > { %v6795_v18 = vld [vmem:[#allocation2 + $0x60] sm:$0xff]  ;;  %v602_v32 = vsel %vm6490_vm12, %v599_v61, %v601_v11  ;;  %v605_v51 = vsel %vm6509_vm14, %v599_v61, %v604_v23  ;;  %v618_v30 = vor.u32 %v617_v8, %v614_v0  ;;  %857 = vrot.lane.b32.xlu1 %v762_v28, %s6192_s16  ;;  %v920_v60 = vrot.slane %v6792_v39, 1  ;;  %1963 = vmatprep.subr.bf16.mxu0 %v9437_v55  ;;  %vm9444_vm14 = vmmov %vm9440_vm3  ;;  %v5390_v23 = vld [vmem:[%s6396_s23 + $0xf0] sm:$0xff] }
  0x6c   : > { %961 = vrot.lane.b32.xlu0 %v6770_v4, %s6192_s16  ;;  %v922_v2 = vrot.slane %v6795_v18, 1  ;;  %603 = vst [vmem:[#allocation2 + $0x70] sm:$0xe0] %v602_v32  ;;  %606 = vst [vmem:[#allocation2 + $0x78] sm:$0x3f] %v605_v51  ;;  %v6809_v14 = vshll.u32 %v6792_v39, 16  ;;  %v778_v28 = vsel %vm9446_vm7, %v773_v19, %v777_v24  ;;  %v781_v45 = vor.u32 %v6790_v57, %v777_v24 }
  0x6d   : > { %v6811_v48 = vld [vmem:[#allocation2 + $0x68] sm:$0xff]  ;;  %v6818_v11 = vsel %vm9444_vm14, %v918_v49, %v920_v60  ;;  %v621_v12 = vsel %vm6519_vm1, %v618_v30, %v620_v46  ;;  %v5391_v49 = vld [vmem:[%s6396_s23 + $0xf8] sm:$0xff]  ;;  %v6837_v0 = vshll.u32 %v6795_v18, 16  ;;  %v624_v8 = vsel %vm9449_vm10, %v618_v30, %v623_v25  ;;  %vm9455_vm13 = vmmov %vm9442_vm2 }
  0x6e   : > { %9445 = vst [vmem:[#allocation26_spill] sm:$0xff] %v6818_v11  ;;  %622 = vst [vmem:[#allocation2 + $0x78] sm:$0xc0] %v621_v12  ;;  %v6833_v61 = vsel %vm9447_vm4, %v920_v60, %v922_v2  ;;  %v924_v50 = vrot.slane %v6811_v48, 1  ;;  %1964 = vmatpush1.bf16.msra.mxu0 %v6005_v6  ;;  %v785_v13 = vrot.slane %v6809_v14, 1  ;;  %v6843_v19 = vshrl.u32 %v6792_v39, 16 }
  0x6f   : > { %859 = vrot.lane.b32.xlu1 %v770_v43, %s6192_s16  ;;  %9448 = vst [vmem:[#allocation27_spill] sm:$0xff] %v6833_v61  ;;  %1965 = vmatprep.subr.bf16.mxu0 %v9437_v55  ;;  %625 = vst [vmem:[#allocation2 + $0x80] sm:$0x7f] %v624_v8  ;;  %vm9450_vm12 = vnez %v9404_v9  ;;  %v636_v32 = vor.u32 %v634_v33, %v633_v21  ;;  %v648_v51 = vpack.c.bf16 %v5391_v49, %v5390_v23  ;;  %v6007_v60 = vld [vmem:[%s9296_s1 + $0x68] sm:$0xff]   ;;  %v658_v49 = vld [vmem:[#allocation2 + $0x90] sm:$0xff]  ;;  %vm1073_vm10 = vcmask 1045504  }
  0x70   : > { %963 = vrot.lane.b32.xlu0 %v6818_v11, %s6192_s16  ;;  %v640_v24 = vsel %vm9450_vm12, %v633_v21, %v639_v52  ;;  %v6853_v58 = vshrl.u32 %v6795_v18, 16  ;;  %v6856_v30 = vshll.u32 %v6811_v48, 16  ;;  %vm9451_vm1 = vnez %v9409_v20  ;;  %v6872_v21 = vld [vmem:[#allocation2 + $0x10] sm:$0xfc]  ;;  %vm9456_vm11 = vmmov %vm9440_vm3  ;;  %v6909_v11 = vld [vmem:[#allocation2 + $0x8] sm:$0xfc] }
  0x71   : > { %641 = vst [vmem:[#allocation2 + $0x80] sm:$0x80] %v640_v24  ;;  %v6863_v9 = vsel %vm9451_vm1, %v636_v32, %v642_v63  ;;  %v6867_v6 = vsel %vm9453_vm9, %v922_v2, %v924_v50  ;;  %v793_v25 = vrot.slane %v6837_v0, 1  ;;  %v786_v33 = vsel %vm9455_vm13, %v781_v45, %v785_v13  ;;  %v6008_v2 = vld [vmem:[%s9296_s1 + $0x70] sm:$0xff]   ;;  %v661_v63 = vld [vmem:[#allocation2 + $0x98] sm:$0x1]  ;;  %vm9458_vm15 = vmmov %vm9442_vm2 }
  0x72   : > { %9452 = vst [vmem:[#allocation28_spill] sm:$0xff] %v6863_v9  ;;  %9454 = vst [vmem:[#allocation29_spill] sm:$0xff] %v6867_v6  ;;  %1966 = vmatpush1.bf16.msra.mxu0 %v6006_v15  ;;  %v789_v20 = vor.u32 %v6843_v19, %v785_v13  ;;  %v650_v12 = vshrl.u32 %v648_v51, 16  ;;  %v653_v52 = vshll.u32 %v648_v51, 16  ;;  %v801_v45 = vrot.slane %v6856_v30, 1 }
  0x73   : > { %v6850_v46 = vld [vmem:[#allocation2 + $0x70] sm:$0xff]  ;;  %861 = vrot.lane.b32.xlu1 %v778_v28, %s6192_s16  ;;  %644 = vst [vmem:[#allocation2 + $0x88] sm:$0xff] %v6863_v9  ;;  %1967 = vmatprep.subr.bf16.mxu0 %v9437_v55  ;;  %v1157_v8 = vshrl.u32 %v6872_v21, 16  ;;  %v797_v24 = vor.u32 %v6853_v58, %v793_v25  ;;  %v6894_v51 = vshrl.u32 %v6811_v48, 16  ;;  %v1160_v47 = vshll.u32 %v6872_v21, 16  ;;  %vm9468_vm6 = vmmov %vm9440_vm3 }
  0x74   : > { %965 = vrot.lane.b32.xlu0 %v6833_v61, %s6192_s16  ;;  %v926_v43 = vrot.slane %v6850_v46, 1  ;;  %v652_v23 = vrot.slane %v650_v12, 7  ;;  %v794_v15 = vsel %vm9458_vm15, %v789_v20, %v793_v25  ;;  %v6898_v12 = vshll.u32 %v6850_v46, 16  ;;  %vm9469_vm14 = vmmov %vm9442_vm2 }
  0x75   : > { %v6877_v28 = vld [vmem:[#allocation2 + $0x78] sm:$0xff]  ;;  %v1165_v61 = vrot.slane %v6563_v17, 3  ;;  %v6917_v20 = vrot.slane %v1157_v8, 2  ;;  %v6955_v10 = vshrl.u32 %v6863_v9, 16  ;;  %v1169_v4 = vrot.slane %v6584_v27, 3  ;;  %vm9470_vm7 = vmmov %vm9440_vm3 }
  0x76   : > { %v6889_v13 = vsel %vm9456_vm11, %v924_v50, %v926_v43  ;;  %v928_v32 = vrot.slane %v6877_v28, 1  ;;  %1968 = vmatpush1.bf16.msra.mxu0 %v6007_v60  ;;  %v662_v50 = vsel %vm6649_vm8, %v652_v23, %v661_v63  ;;  %v6009_v60 = vld [vmem:[%s9296_s1 + $0x78] sm:$0xff]   ;;  %vm9461_vm8 = vmmov %vm9440_vm3  ;;  %v805_v63 = vor.u32 %v6894_v51, %v801_v45 }
  0x77   : > { %863 = vrot.lane.b32.xlu1 %v786_v33, %s6192_s16  ;;  %9457 = vst [vmem:[#allocation30_spill] sm:$0xff] %v6889_v13  ;;  %1969 = vmatprep.subr.bf16.mxu0 %v9437_v55  ;;  %v655_v33 = vor.u32 %v653_v52, %v652_v23  ;;  %663 = vst [vmem:[#allocation2 + $0x98] sm:$0x1] %v662_v50  ;;  %v809_v8 = vrot.slane %v6898_v12, 1  ;;  %v6952_v50 = vrot.slane %v6863_v9, 1 }
  0x78   : > { %967 = vrot.lane.b32.xlu0 %v6867_v6, %s6192_s16  ;;  %v6901_v6 = vld [vmem:[#allocation2 + $0x80] sm:$0xff]  ;;  %v6922_v52 = vsel %vm9461_vm8, %v926_v43, %v928_v32  ;;  %v6935_v43 = vshll.u32 %v6877_v28, 16  ;;  %9467 = vst [vmem:[#allocation37_spill] sm:$0xff] %v6955_v10  ;;  %vm9471_vm4 = vmmov %vm9442_vm2  ;;  %vm9475_vm9 = vsmask.f32 5376 }
  0x79   : > { %9459 = vst [vmem:[#allocation31_spill] sm:$0xff] %v6901_v6  ;;  %v6915_v25 = vsel %vm6619_vm5, %v655_v33, %v658_v49  ;;  %9462 = vst [vmem:[#allocation33_spill] sm:$0xff] %v6922_v52  ;;  %v930_v23 = vrot.slane %v6901_v6, 1  ;;  %v1074_v33 = vrot.slane %v6909_v11, 2  ;;  %v6944_v21 = vshll.u32 %v6901_v6, 16 }
  0x7a   : > { %9460 = vst [vmem:[#allocation32_spill] sm:$0xff] %v6915_v25  ;;  %1970 = vmatpush1.bf16.msra.mxu0 %v6008_v2  ;;  %660 = vst [vmem:[#allocation2 + $0x90] sm:$0xff] %v6915_v25  ;;  %v6938_v2 = vshll.u32 %v6863_v9, 16  ;;  %v810_v11 = vsel %vm9442_vm2, %v805_v63, %v809_v8  ;;  %v6970_v63 = vshrl.u32 %v6901_v6, 16 }
  0x7b   : > { %865 = vrot.lane.b32.xlu1 %v794_v15, %s6192_s16  ;;  %vm9463_vm5 = vmmov %vm9442_vm2  ;;  %1971 = vmatprep.subr.bf16.mxu0 %v9437_v55  ;;  %v6932_v15 = vshrl.u32 %v6850_v46, 16  ;;  %9466 = vst [vmem:[#allocation36_spill] sm:$0xff] %v6952_v50  ;;  %v6976_v41 = vsel %vm9468_vm6, %v930_v23, %v6952_v50 }
  0x7c   : > { %969 = vrot.lane.b32.xlu0 %v6889_v13, %s6192_s16  ;;  %v802_v49 = vsel %vm9463_vm5, %v797_v24, %v801_v45  ;;  %9464 = vst [vmem:[#allocation34_spill] sm:$0xff] %v6938_v2  ;;  %v1168_v45 = vrot.slane %v6610_v42, 2  ;;  %v6949_v24 = vsel %vm9440_vm3, %v928_v32, %v930_v23  ;;  %v833_v32 = vrot.slane %v6938_v2, 1  ;;  %vm9472_vm12 = vmmov %vm9440_vm3 }
  0x7d   : > { %9465 = vst [vmem:[#allocation35_spill] sm:$0xff] %v6949_v24  ;;  %v813_v17 = vor.u32 %v6932_v15, %v809_v8  ;;  %v825_v42 = vrot.slane %v6944_v21, 1  ;;  %v941_v13 = vrot.slane %v6915_v25, 1  ;;  %v6981_v25 = vrot.slane %v6543_v3, 2  ;;  %vm9474_vm1 = vmmov %vm9442_vm2 }
  0x7e   : > { %1972 = vmatpush1.bf16.msra.mxu0 %v6009_v60  ;;  %v1162_v60 = vrot.slane %v1160_v47, 3  ;;  %v687_v47 = vld [vmem:[#allocation2 + $0x98] sm:$0x1]  ;;  %v1172_v23 = vrot.slane %v6641_v5, 2  ;;  %v1173_v3 = vrot.slane %v6613_v44, 3  ;;  %vm9476_vm13 = vmmov %vm9474_vm1 }
  0x7f   : > { %867 = vrot.lane.b32.xlu1 %v802_v49, %s6192_s16  ;;  %2118 = vmatprep.subr.bf16.mxu0 %v9437_v55  ;;  %v6962_v49 = vshrl.u32 %v6877_v28, 16  ;;  %v943_v27 = vrot.slane %v687_v47, 1  ;;  %v9473_v47 = vrot.slane %v6581_v26, 2  ;;  %vm9477_vm11 = vmmov %vm9475_vm9 }
  0x80   : > { %971 = vrot.lane.b32.xlu0 %v6922_v52, %s6192_s16  ;;  %v817_v52 = vrot.slane %v6935_v43, 1  ;;  %vm9479_vm15 = vmmov %vm9475_vm9 }
  0x81   : > { %v683_v8 = vld [vmem:[#allocation2 + $0x90] sm:$0x1]  ;;  %vm9481_vm8 = vmmov %vm9475_vm9 }
  0x82   : > { %v818_v35 = vsel %vm9469_vm14, %v813_v17, %v817_v52  ;;  %v839_v9 = vshll.u32 %v683_v8, 16  ;;  %v829_v17 = vor.u32 %v6970_v63, %v825_v42  ;;  %v1163_v8 = vor.u32 %v1162_v60, %v6917_v20  ;;  %vm9482_vm5 = vmmov %vm9481_vm8 }
  0x83   : > { %869 = vrot.lane.b32.xlu1 %v810_v11, %s6192_s16  ;;  %v942_v11 = vsel %vm9470_vm7, %v6952_v50, %v941_v13  ;;  %v1166_v50 = vor.u32 %v1165_v61, %v9473_v47  ;;  %v1177_v20 = vrot.slane %v6663_v22, 3  ;;  %v1081_v61 = vrot.slane %v6594_v31, 2  ;;  %vm9483_vm3 = vmmov %vm9482_vm5 }
  0x84   : > { %973 = vrot.lane.b32.xlu0 %v6949_v24, %s6192_s16  ;;  %v821_v24 = vor.u32 %v6962_v49, %v817_v52  ;;  %v841_v52 = vrot.slane %v839_v9, 1  ;;  %v834_v5 = vsel %vm9474_vm1, %v829_v17, %v833_v32  ;;  %v1170_v9 = vor.u32 %v1169_v4, %v1168_v45  ;;  %vm9484_vm2 = vmmov %vm9483_vm3 }
  0x85   : > { %v9478_v60 = vrot.slane %v6499_v34, 2  ;;  %v1180_v31 = vrot.slane %v6703_v38, 2  ;;  %vm9486_vm6 = vmmov %vm9484_vm2 }
  0x86   : > { %v826_v6 = vsel %vm9471_vm4, %v821_v24, %v825_v42  ;;  %v837_v24 = vor.u32 %v6955_v10, %v833_v32  ;;  %v1167_v42 = vsel %vm9475_vm9, %v1163_v8, %v1166_v50  ;;  %v1171_v32 = vsel %vm9477_vm11, %v1166_v50, %v1170_v9  ;;  %vm9487_vm14 = vmmov %vm9484_vm2 }
  0x87   : > { %871 = vrot.lane.b32.xlu1 %v818_v35, %s6192_s16  ;;  %v944_v35 = vsel %vm9472_vm12, %v941_v13, %v943_v27  ;;  %v1176_v27 = vrot.slane %v6690_v59, 2  ;;  %v1076_v4 = vsel %vm1073_vm10, %v1074_v33, %v9478_v60  ;;  %v9480_v17 = vmov %v9478_v60  ;;  %vm9488_vm7 = vmmov %vm9484_vm2 }
  0x88   : > { %975 = vrot.lane.b32.xlu0 %v6976_v41, %s6192_s16  ;;  %v842_v13 = vsel %vm9476_vm13, %v837_v24, %v841_v52  ;;  %v1078_v50 = vsel %vm1073_vm10, %v9480_v17, %v6981_v25  ;;  %v1185_v33 = vrot.slane %v6675_v37, 3  ;;  %v1188_v24 = vrot.slane %v6758_v56, 2  ;;  %vm9489_vm4 = vmmov %vm9484_vm2 }
  0x89   : > { %v1178_v45 = vor.u32 %v1177_v20, %v1176_v27  ;;  %v1083_v27 = vrot.slane %v6625_v53, 2  ;;  %vm9490_vm1 = vmmov %vm9484_vm2  ;;  %vm9491_vm9 = vcmask 523264  }
  0x8a   : > { %vm9493_vm13 = vmmov %vm9472_vm12 }
  0x8b   : > { %873 = vrot.lane.b32.xlu1 %v826_v6, %s6192_s16  ;;  %v1079_v6 = vrot.slane %v6560_v16, 2  ;;  %v7049_v60 = vsel %vm1073_vm10, %v1081_v61, %v1083_v27  ;;  %vm9494_vm11 = vmmov %vm9490_vm1 }
  0x8c   : > { %977 = vrot.lane.b32.xlu0 %v942_v11, %s6192_s16  ;;  %v1181_v11 = vrot.slane %v6670_v29, 3 }
  0x8f   : > { %875 = vrot.lane.b32.xlu1 %v834_v5, %s6192_s16  ;;  %v1174_v5 = vor.u32 %v1173_v3, %v1172_v23  ;;  %v1184_v23 = vrot.slane %v6680_v40, 2  ;;  %v1182_v3 = vor.u32 %v1181_v11, %v1180_v31  ;;  %v9485_v11 = vld [vmem:[#allocation17_spill] sm:$0xff] }
  0x90   : > { %979 = vrot.lane.b32.xlu0 %v944_v35, %s6192_s16  ;;  %v7030_v35 = vsel %vm1073_vm10, %v6981_v25, %v1079_v6 }
  0x91   : > { %v1175_v16 = vsel %vm9479_vm15, %v1170_v9, %v1174_v5  ;;  %v1179_v52 = vsel %vm9481_vm8, %v1174_v5, %v1178_v45  ;;  %v1183_v8 = vsel %vm9482_vm5, %v1178_v45, %v1182_v3  ;;  %v1186_v47 = vor.u32 %v1185_v33, %v1184_v23  ;;  %vm9495_vm15 = vmmov %vm9491_vm9 }
  0x92   : > { %v7039_v9 = vsel %vm1073_vm10, %v1079_v6, %v1081_v61  ;;  %v1193_v5 = vrot.slane %v6774_v36, 3  ;;  %v1085_v6 = vrot.slane %v6633_v62, 2  ;;  %v1197_v45 = vrot.slane %v6809_v14, 3  ;;  %vm9496_vm8 = vmmov %vm9491_vm9 }
  0x93   : > { %877 = vrot.lane.b32.xlu1 %v842_v13, %s6192_s16  ;;  %v1187_v13 = vsel %vm9483_vm3, %v1182_v3, %v1186_v47  ;;  %v1087_v61 = vrot.slane %v9485_v11, 2  ;;  %v1201_v23 = vrot.slane %v6837_v0, 3  ;;  %vm9497_vm5 = vmmov %vm9490_vm1 }
  0x94   : > { %1246 = vrot.lane.b32.xlu0 %v1167_v42, %s6192_s16  ;;  %v1189_v42 = vrot.slane %v6735_v54, 3  ;;  %v7059_v31 = vsel %vm1073_vm10, %v1083_v27, %v1085_v6  ;;  %v1091_v27 = vrot.slane %v6727_v1, 2  ;;  %v6066_v1 = vld [vmem:[#allocation2 + $0x8] sm:$0xff]  ;;  %vm9500_vm3 = vmmov %vm9496_vm8 }
  0x95   : > { %v7069_v33 = vsel %vm1073_vm10, %v1085_v6, %v1087_v61 }
  0x96   : > { %v1190_v20 = vor.u32 %v1189_v42, %v1188_v24  ;;  %v1205_v24 = vrot.slane %v6856_v30, 3 }
  0x97   : > { %1111 = vrot.lane.b32.xlu1 %v1076_v4, %s6192_s16 }
  0x98   : > { %1248 = vrot.lane.b32.xlu0 %v1171_v32, %s6192_s16  ;;  %v1192_v32 = vrot.slane %v6790_v57, 2  ;;  %v1191_v53 = vsel %vm9484_vm2, %v1186_v47, %v1190_v20  ;;  %v1204_v47 = vrot.slane %v6894_v51, 2  ;;  %vm9502_vm2 = vmmov %vm9500_vm3 }
  0x9a   : > { %v1194_v4 = vor.u32 %v1193_v5, %v1192_v32  ;;  %v1208_v32 = vrot.slane %v6932_v15, 2  ;;  %v1209_v5 = vrot.slane %v6898_v12, 3 }
  0x9b   : > { %1113 = vrot.lane.b32.xlu1 %v1078_v50, %s6192_s16  ;;  %v1200_v50 = vrot.slane %v6853_v58, 2 }
  0x9c   : > { %1250 = vrot.lane.b32.xlu0 %v1175_v16, %s6192_s16  ;;  %v1196_v16 = vrot.slane %v6843_v19, 2  ;;  %v1195_v62 = vsel %vm9486_vm6, %v1190_v20, %v1194_v4  ;;  %v1206_v20 = vor.u32 %v1205_v24, %v1204_v47  ;;  %v1210_v11 = vor.u32 %v1209_v5, %v1208_v32  ;;  %vm9504_vm6 = vmmov %vm9490_vm1 }
  0x9d   : > { %v1097_v24 = vrot.slane %v6811_v48, 2  ;;  %v1216_v32 = vrot.slane %v6970_v63, 2  ;;  %v1217_v5 = vrot.slane %v6944_v21, 3  ;;  %v6067_v48 = vld [vmem:[#allocation2 + $0x8] sm:$0xfe] }
  0x9e   : > { %v1198_v17 = vor.u32 %v1197_v45, %v1196_v16  ;;  %v900_v16 = vrot.slane %v6066_v1, 1 }
  0x9f   : > { %1115 = vrot.lane.b32.xlu1 %v7030_v35, %s6192_s16 }
  0xa0   : > { %1252 = vrot.lane.b32.xlu0 %v1179_v52, %s6192_s16  ;;  %v1089_v52 = vrot.slane %v6645_v7, 2  ;;  %v1199_v3 = vsel %vm9487_vm14, %v1194_v4, %v1198_v17  ;;  %vm9505_vm14 = vsmask.f32 6400 }
  0xa2   : > { %v7079_v42 = vsel %vm1073_vm10, %v1087_v61, %v1089_v52  ;;  %v7089_v6 = vsel %vm1073_vm10, %v1089_v52, %v1091_v27  ;;  %v1212_v61 = vrot.slane %v6962_v49, 2  ;;  %v1211_v52 = vsel %vm9490_vm1, %v1206_v20, %v1210_v11  ;;  %vm9511_vm1 = vmmov %vm9502_vm2 }
  0xa3   : > { %1117 = vrot.lane.b32.xlu1 %v7039_v9, %s6192_s16 }
  0xa4   : > { %1254 = vrot.lane.b32.xlu0 %v1183_v8, %s6192_s16  ;;  %v1202_v8 = vor.u32 %v1201_v23, %v1200_v50 }
  0xa6   : > { %v1203_v7 = vsel %vm9488_vm7, %v1198_v17, %v1202_v8  ;;  %v1207_v45 = vsel %vm9489_vm4, %v1202_v8, %v1206_v20  ;;  %vm9507_vm7 = vmmov %vm9502_vm2 }
  0xa7   : > { %1119 = vrot.lane.b32.xlu1 %v7049_v60, %s6192_s16  ;;  %vm9509_vm4 = vmmov %vm9502_vm2 }
  0xa8   : > { %1256 = vrot.lane.b32.xlu0 %v1187_v13, %s6192_s16  ;;  %v684_v13 = vld [vmem:[#allocation2] sm:$0xfe] }
  0xa9   : > { %v899_v4 = vrot.slane %v684_v13, 1  ;;  %v9492_v13 = vld [vmem:[#allocation12_spill] sm:$0xff] }
  0xab   : > { %1121 = vrot.lane.b32.xlu1 %v7059_v31, %s6192_s16  ;;  %v901_v50 = vsel %vm9472_vm12, %v899_v4, %v900_v16  ;;  %v6068_v4 = vld [vmem:[#allocation2] sm:$0xff]  ;;  %vm1284_vm12 = vcmask 1044480  }
  0xac   : > { %1258 = vrot.lane.b32.xlu0 %v1191_v53, %s6192_s16  ;;  %v1093_v53 = vrot.slane %v6792_v39, 2  ;;  %v1095_v39 = vrot.slane %v6795_v18, 2  ;;  %v6010_v18 = vld [vmem:[%s9296_s1 + $0x80] sm:$0xff]  }
  0xae   : > { %v7099_v17 = vsel %vm1073_vm10, %v1091_v27, %v1093_v53  ;;  %v7109_v47 = vsel %vm1073_vm10, %v1093_v53, %v1095_v39  ;;  %v982_v53 = vshrl.u32 %v6067_v48, 16 }
  0xaf   : > { %1123 = vrot.lane.b32.xlu1 %v7069_v33, %s6192_s16 }
  0xb0   : > { %1260 = vrot.lane.b32.xlu0 %v1195_v62, %s6192_s16  ;;  %v1213_v62 = vrot.slane %v6935_v43, 3 }
  0xb3   : > { %1125 = vrot.lane.b32.xlu1 %v7079_v42, %s6192_s16 }
  0xb4   : > { %1262 = vrot.lane.b32.xlu0 %v1199_v3, %s6192_s16  ;;  %v1214_v3 = vor.u32 %v1213_v62, %v1212_v61  ;;  %v6025_v61 = vld [vmem:[%s9296_s1 + $0x100] sm:$0xff]   ;;  %v985_v62 = vshll.u32 %v6067_v48, 16 }
  0xb5   : > { %5626 = vmatprep.subr.bf16.mxu1 %v6025_v61 }
  0xb6   : > { %v1215_v20 = vsel %vm9494_vm11, %v1210_v11, %v1214_v3  ;;  %v1099_v11 = vrot.slane %v6850_v46, 2  ;;  %v984_v46 = vrot.slane %v982_v53, 1  ;;  %5627 = vmatpush3.bf16.msra.mxu1 %v6025_v61  ;;  %v6028_v61 = vld [vmem:[%s9296_s1 + $0x110] sm:$0xff]   ;;  %vm9515_vm11 = vmmov %vm9511_vm1 }
  0xb7   : > { %1127 = vrot.lane.b32.xlu1 %v7089_v6, %s6192_s16 }
  0xb8   : > { %1264 = vrot.lane.b32.xlu0 %v1203_v7, %s6192_s16  ;;  %v903_v7 = vsel %vm9493_vm13, %v900_v16, %v9492_v13  ;;  %vm9514_vm13 = vmmov %vm9511_vm1 }
  0xbb   : > { %1129 = vrot.lane.b32.xlu1 %v7099_v17, %s6192_s16 }
  0xbc   : > { %1266 = vrot.lane.b32.xlu0 %v1207_v45, %s6192_s16 }
  0xbe   : > { %v946_v23 = vpop.permute.xlu0 %945 }
  0xbf   : > { %v1378_v8 = vsel %vm9491_vm9, %v901_v50, %v946_v23  ;;  %1131 = vrot.lane.b32.xlu1 %v7109_v47, %s6192_s16  ;;  %v7128_v50 = vsel %vm1073_vm10, %v1095_v39, %v1097_v24  ;;  %v1218_v23 = vor.u32 %v1217_v5, %v1216_v32  ;;  %v6026_v39 = vld [vmem:[%s9296_s1 + $0x108] sm:$0xff]   ;;  %v9499_v5 = vshrl.u32 %v6499_v34, 16  ;;  %vm9512_vm9 = vmmov %vm9497_vm5 }
  0xc0   : > { %1973 = vmatprep.mubr.bf16.mxu0 %v1378_v8  ;;  %1268 = vrot.lane.b32.xlu0 %v1211_v52, %s6192_s16  ;;  %v6011_v8 = vld [vmem:[%s9296_s1 + $0x88] sm:$0xff]  }
  0xc1   : > { %v948_v16 = vpop.permute.xlu1 %947  ;;  %v989_v48 = vrot.slane %v9499_v5, 1  ;;  %5628 = vmatprep.subr.bf16.mxu1 %v6026_v39 }
  0xc2   : > { %v844_v27 = vpop.permute.xlu0 %843  ;;  %v1382_v52 = vsel %vm9496_vm8, %v903_v7, %v948_v16  ;;  %v987_v7 = vrot.slane %v985_v62, 2  ;;  %5629 = vmatpush3.bf16.msra.mxu1 %v6026_v39  ;;  %vm9518_vm8 = vmmov %vm9497_vm5 }
  0xc3   : > { %v1323_v45 = vsel %vm9495_vm15, %v6068_v4, %v844_v27  ;;  %v1219_v27 = vsel %vm9497_vm5, %v1214_v3, %v1218_v23  ;;  %1133 = vrot.lane.b32.xlu1 %v7128_v50, %s6192_s16  ;;  %v7149_v4 = vsel %vm1073_vm10, %v1097_v24, %v1099_v11  ;;  %v1221_v24 = vrot.slane %v6938_v2, 3  ;;  %5630 = vmatprep.subr.bf16.mxu1 %v6028_v61  ;;  %vm9517_vm15 = vmmov %vm9511_vm1 }
  0xc4   : > { %1974 = vmatmul.mubr.bf16.vlgmr.msra.gmra.mrb[0].mxu0 %v1323_v45  ;;  %1270 = vrot.lane.b32.xlu0 %v1215_v20, %s6192_s16  ;;  %v9498_v20 = vshll.u32 %v6499_v34, 16  ;;  %v6012_v45 = vld [vmem:[%s9296_s1 + $0x90] sm:$0xff]   ;;  %v1220_v34 = vrot.slane %v6955_v10, 2  ;;  %vm9520_vm5 = vmmov %vm9511_vm1 }
  0xc5   : > { %2119 = vmatpush1.bf16.msra.mxu0 %v6010_v18  ;;  %1981 = vmatprep.mubr.bf16.mxu0 %v1382_v52  ;;  %v1101_v18 = vrot.slane %v6877_v28, 2  ;;  %v846_v3 = vpop.permute.xlu1 %845  ;;  %v9501_v28 = vld [vmem:[#allocation14_spill] sm:$0xff]  ;;  %v9503_v52 = vld [vmem:[#allocation31_spill] sm:$0xff] }
  0xc6   : > { %2120 = vmatprep.subr.bf16.mxu0 %v9437_v55  ;;  %v950_v13 = vpop.permute.xlu0 %949  ;;  %v990_v32 = vrot.slane %v9498_v20, 2  ;;  %v1326_v53 = vsel %vm9500_vm3, %v6066_v1, %v846_v3  ;;  %v1222_v16 = vor.u32 %v1221_v24, %v1220_v34  ;;  %v6013_v20 = vld [vmem:[%s9296_s1 + $0x98] sm:$0xff]   ;;  %5631 = vmatpush3.bf16.msra.mxu1 %v6028_v61  ;;  %v6014_v24 = vld [vmem:[%s9296_s1 + $0xa0] sm:$0xff]   ;;  %vm9521_vm3 = vmmov %vm9511_vm1 }
  0xc7   : > { %v1386_v62 = vsel %vm9502_vm2, %v9501_v28, %v950_v13  ;;  %1135 = vrot.lane.b32.xlu1 %v7149_v4, %s6192_s16  ;;  %v7164_v1 = vsel %vm1073_vm10, %v1099_v11, %v1101_v18  ;;  %v6029_v11 = vld [vmem:[%s9296_s1 + $0x118] sm:$0xff]   ;;  %v6069_v28 = vld [vmem:[#allocation2 + $0x10] sm:$0xff]  ;;  %vm9522_vm2 = vmmov %vm9511_vm1 }
  0xc8   : > { %1272 = vrot.lane.b32.xlu0 %v1219_v27, %s6192_s16  ;;  %v988_v27 = vor.u32 %v987_v7, %v984_v46  ;;  %v7170_v13 = vor.u32 %v990_v32, %v989_v48  ;;  %v1223_v39 = vsel %vm9504_vm6, %v1218_v23, %v1222_v16  ;;  %v694_v32 = vld [vmem:[#allocation2 + $0x10] sm:$0xf8]  ;;  %v9506_v48 = vld [vmem:[#allocation32_spill] sm:$0xff]  ;;  %5632 = vmatprep.subr.bf16.mxu1 %v6029_v11  ;;  %vm9524_vm6 = vmmov %vm9511_vm1 }
  0xc9   : > { %2121 = vmatpush1.bf16.msra.mxu0 %v6011_v8  ;;  %v1103_v8 = vrot.slane %v9503_v52, 2  ;;  %v848_v5 = vpop.permute.xlu1 %847  ;;  %v1285_v61 = vrot.slane %v694_v32, 3 }
  0xca   : > { %2122 = vmatprep.subr.bf16.mxu0 %v9437_v55  ;;  %v952_v3 = vpop.permute.xlu0 %951  ;;  %v7182_v46 = vsel %vm9505_vm14, %v988_v27, %v7170_v13  ;;  %v1329_v23 = vsel %vm9507_vm7, %v6069_v28, %v848_v5  ;;  %v6071_v27 = vld [vmem:[#allocation2 + $0x20] sm:$0xff]  ;;  %5633 = vmatpush3.bf16.msra.mxu1 %v6029_v11  ;;  %vm9525_vm14 = vmmov %vm9518_vm8 }
  0xcb   : > { %1137 = vrot.lane.b32.xlu1 %v7164_v1, %s6192_s16  ;;  %v7188_v7 = vsel %vm1073_vm10, %v1101_v18, %v1103_v8  ;;  %v6070_v18 = vld [vmem:[#allocation2 + $0x18] sm:$0xff]  ;;  %4349 = vmatprep.subr.bf16.mxu1 %v9437_v55  ;;  %vm9526_vm7 = vmmov %vm9511_vm1 }
  0xcc   : > { %1982 = vmatmul.mubr.bf16.gmra.mrb[4].mxu0 %v1326_v53  ;;  %1274 = vrot.lane.b32.xlu0 %v1223_v39, %s6192_s16  ;;  %v9345_v53 = vshrl.u32 %v9506_v48, 16  ;;  %v1286_v52 = vrot.slane %v6070_v18, 3  ;;  %v1288_v39 = vrot.slane %v6071_v27, 3 }
  0xcd   : > { %1989 = vmatprep.mubr.bf16.mxu0 %v1386_v62  ;;  %2123 = vmatpush1.bf16.msra.mxu0 %v6012_v45  ;;  %v9347_v45 = vshll.u32 %v9506_v48, 16  ;;  %v9508_v62 = vld [vmem:[#allocation16_spill] sm:$0xff]  ;;  %v850_v10 = vpop.permute.xlu1 %849 }
  0xce   : > { %2124 = vmatprep.subr.bf16.mxu0 %v9437_v55  ;;  %v1390_v34 = vsel %vm9509_vm4, %v9508_v62, %v952_v3  ;;  %v1224_v5 = vrot.slane %v9345_v53, 2  ;;  %v1289_v32 = vsel %vm1284_vm12, %v1286_v52, %v1288_v39  ;;  %v9510_v62 = vld [vmem:[#allocation28_spill] sm:$0xff]  ;;  %v6015_v53 = vld [vmem:[%s9296_s1 + $0xa8] sm:$0xff]   ;;  %vm9528_vm4 = vmmov %vm9511_vm1 }
  0xcf   : > { %v1225_v3 = vrot.slane %v9347_v45, 3  ;;  %1139 = vrot.lane.b32.xlu1 %v7188_v7, %s6192_s16  ;;  %v1105_v2 = vrot.slane %v9510_v62, 2  ;;  %v6072_v45 = vld [vmem:[#allocation2 + $0x28] sm:$0xff] }
  0xd1   : > { %2125 = vmatpush1.bf16.msra.mxu0 %v6013_v20  ;;  %v1287_v20 = vsel %vm1284_vm12, %v1285_v61, %v1286_v52  ;;  %v1226_v28 = vor.u32 %v1225_v3, %v1224_v5  ;;  %v7215_v11 = vsel %vm1073_vm10, %v1103_v8, %v1105_v2  ;;  %v6016_v8 = vld [vmem:[%s9296_s1 + $0xb0] sm:$0xff]   ;;  %v9516_v5 = vld [vmem:[#allocation19_spill] sm:$0xff] }
  0xd2   : > { %2126 = vmatprep.subr.bf16.mxu0 %v9437_v55  ;;  %5634 = vmatprep.mubr.msk.bf16.mxu1 %vm9511_vm1, %v1287_v20  ;;  %9513 = vst [vmem:[#allocation17_spill] sm:$0xff] %v7215_v11 }
  0xd3   : > { %v1227_v61 = vsel %vm9512_vm9, %v1222_v16, %v1226_v28  ;;  %5635 = vmatmul.mubr.msk.bf16.vlgmr.msra.gmra.mrb[0].mxu1 %vm9514_vm13, %v1289_v32  ;;  %1141 = vrot.lane.b32.xlu1 %v7215_v11, %s6192_s16  ;;  %v1332_v16 = vsel %vm9515_vm11, %v6070_v18, %v850_v10  ;;  %v1290_v11 = vrot.slane %v6072_v45, 3  ;;  %v6073_v10 = vld [vmem:[#allocation2 + $0x30] sm:$0xff]  ;;  %v6017_v18 = vld [vmem:[%s9296_s1 + $0xb8] sm:$0xff]   ;;  %vm9529_vm9 = vmmov %vm9511_vm1 }
  0xd4   : > { %1990 = vmatmul.mubr.bf16.gmra.mrb[8].mxu0 %v1329_v23  ;;  %v954_v23 = vpop.permute.xlu0 %953  ;;  %1276 = vrot.lane.b32.xlu0 %v1227_v61, %s6192_s16  ;;  %v7234_v61 = vrot.slane %v9506_v48, 2  ;;  %vm9530_vm13 = vmmov %vm9511_vm1 }
  0xd5   : > { %1997 = vmatprep.mubr.bf16.mxu0 %v1390_v34  ;;  %2127 = vmatpush1.bf16.msra.mxu0 %v6014_v24  ;;  %v7219_v34 = vld [vmem:[#allocation2 + $0x98] sm:$0xff]  ;;  %v1394_v3 = vsel %vm9517_vm15, %v9516_v5, %v954_v23  ;;  %v852_v23 = vpop.permute.xlu1 %851  ;;  %vm9532_vm11 = vmmov %vm9511_vm1 }
  0xd6   : > { %2128 = vmatprep.subr.bf16.mxu0 %v9437_v55  ;;  %v1229_v24 = vshrl.u32 %v7219_v34, 16  ;;  %v1232_v52 = vshll.u32 %v7219_v34, 16  ;;  %vm9533_vm15 = vmmov %vm9511_vm1 }
  0xd8   : > { %v1231_v20 = vrot.slane %v1229_v24, 2  ;;  %v1234_v32 = vrot.slane %v1232_v52, 3  ;;  %v7243_v52 = vsel %vm1073_vm10, %v1105_v2, %v7234_v61  ;;  %v1335_v2 = vsel %vm9521_vm3, %v6071_v27, %v852_v23  ;;  %v6019_v27 = vld [vmem:[%s9296_s1 + $0xc8] sm:$0xff]   ;;  %vm9537_vm3 = vmmov %vm9511_vm1 }
  0xd9   : > { %2129 = vmatpush1.bf16.msra.mxu0 %v6015_v53  ;;  %v1292_v53 = vrot.slane %v6073_v10, 3  ;;  %9519 = vst [vmem:[#allocation12_spill] sm:$0xff] %v7243_v52  ;;  %1143 = vrot.lane.b32.xlu1 %v7243_v52, %s6192_s16  ;;  %v7263_v52 = vld [vmem:[#allocation2 + $0x98] sm:$0x3]  ;;  %v854_v23 = vpop.permute.xlu1 %853 }
  0xda   : > { %2130 = vmatprep.subr.bf16.mxu0 %v9437_v55  ;;  %v1235_v62 = vor.u32 %v1234_v32, %v1231_v20  ;;  %v956_v20 = vpop.permute.xlu0 %955 }
  0xdb   : > { %v1293_v5 = vsel %vm1284_vm12, %v1290_v11, %v1292_v53 }
  0xdc   : > { %1998 = vmatmul.mubr.bf16.gmra.mrb[12].mxu0 %v1332_v16  ;;  %v1236_v24 = vsel %vm9518_vm8, %v1226_v28, %v1235_v62  ;;  %v1291_v16 = vsel %vm1284_vm12, %v1288_v39, %v1290_v11  ;;  %v6018_v39 = vld [vmem:[%s9296_s1 + $0xc0] sm:$0xff]   ;;  %v9523_v11 = vld [vmem:[#allocation21_spill] sm:$0xff]  ;;  %vm9535_vm8 = vmmov %vm9511_vm1 }
  0xdd   : > { %2005 = vmatprep.mubr.bf16.mxu0 %v1394_v3  ;;  %2131 = vmatpush1.bf16.msra.mxu0 %v6016_v8  ;;  %v7250_v8 = vld [vmem:[#allocation2 + $0xa0] sm:$0x7]  ;;  %v1398_v32 = vsel %vm9524_vm6, %v9523_v11, %v956_v20  ;;  %vm9540_vm6 = vmmov %vm9511_vm1 }
  0xde   : > { %2132 = vmatprep.subr.bf16.mxu0 %v9437_v55  ;;  %1278 = vrot.lane.b32.xlu0 %v1236_v24, %s6192_s16  ;;  %v1238_v28 = vshrl.u32 %v7250_v8, 16  ;;  %v1241_v3 = vshll.u32 %v7250_v8, 16  ;;  %v958_v20 = vpop.permute.xlu0 %957 }
  0xdf   : > { %5638 = vmatprep.mubr.msk.bf16.mxu1 %vm9520_vm5, %v1291_v16  ;;  %vm9536_vm5 = vmmov %vm9511_vm1 }
  0xe0   : > { %5639 = vmatmul.mubr.msk.bf16.gmra.mrb[4].mxu1 %vm9522_vm2, %v1293_v5  ;;  %v1240_v24 = vrot.slane %v1238_v28, 2  ;;  %v1243_v16 = vrot.slane %v1241_v3, 3  ;;  %v1338_v3 = vsel %vm9526_vm7, %v6072_v45, %v854_v23  ;;  %v6021_v45 = vld [vmem:[%s9296_s1 + $0xd8] sm:$0xff]   ;;  %vm9538_vm2 = vmmov %vm9511_vm1 }
  0xe1   : > { %2133 = vmatpush1.bf16.msra.mxu0 %v6017_v18  ;;  %v1109_v18 = vrot.slane %v7263_v52, 2  ;;  %vm9543_vm7 = vmmov %vm9511_vm1 }
  0xe2   : > { %2134 = vmatprep.subr.bf16.mxu0 %v9437_v55  ;;  %v1244_v48 = vor.u32 %v1243_v16, %v1240_v24  ;;  %v856_v16 = vpop.permute.xlu1 %855  ;;  %v960_v23 = vpop.permute.xlu0 %959 }
  0xe3   : > { %v1110_v28 = vsel %vm1073_vm10, %v7234_v61, %v1109_v18 }
  0xe4   : > { %2006 = vmatmul.mubr.bf16.gmra.mrb[16].mxu0 %v1335_v2  ;;  %v1245_v5 = vsel %vm9525_vm14, %v1235_v62, %v1244_v48  ;;  %1145 = vrot.lane.b32.xlu1 %v1110_v28, %s6192_s16  ;;  %v6020_v2 = vld [vmem:[%s9296_s1 + $0xd0] sm:$0xff]   ;;  %v6074_v48 = vld [vmem:[#allocation2 + $0x38] sm:$0xff]  ;;  %vm9541_vm14 = vmmov %vm9511_vm1 }
  0xe5   : > { %2013 = vmatprep.mubr.bf16.mxu0 %v1398_v32  ;;  %2135 = vmatpush1.bf16.msra.mxu0 %v6018_v39  ;;  %v9527_v39 = vld [vmem:[#allocation22_spill] sm:$0xff]  ;;  %v1294_v62 = vrot.slane %v6074_v48, 3  ;;  %v6075_v32 = vld [vmem:[#allocation2 + $0x40] sm:$0xff]  ;;  %v9531_v28 = vld [vmem:[#allocation23_spill] sm:$0xff] }
  0xe6   : > { %2136 = vmatprep.subr.bf16.mxu0 %v9437_v55  ;;  %1280 = vrot.lane.b32.xlu0 %v1245_v5, %s6192_s16  ;;  %v1402_v11 = vsel %vm9528_vm4, %v9527_v39, %v958_v20  ;;  %v1296_v24 = vrot.slane %v6075_v32, 3  ;;  %v1341_v5 = vsel %vm9530_vm13, %v6073_v10, %v856_v16  ;;  %v6022_v20 = vld [vmem:[%s9296_s1 + $0xe0] sm:$0xff]   ;;  %v962_v10 = vpop.permute.xlu0 %961  ;;  %v6076_v16 = vld [vmem:[#allocation2 + $0x48] sm:$0xff]  ;;  %vm9544_vm4 = vmmov %vm9511_vm1 }
  0xe7   : > { %vm9547_vm13 = vmmov %vm9511_vm1 }
  0xe8   : > { %v1297_v18 = vsel %vm1284_vm12, %v1294_v62, %v1296_v24 }
  0xe9   : > { %2137 = vmatpush1.bf16.msra.mxu0 %v6019_v27  ;;  %v1295_v27 = vsel %vm1284_vm12, %v1292_v53, %v1294_v62  ;;  %v6023_v53 = vld [vmem:[%s9296_s1 + $0xe8] sm:$0xff]   ;;  %v9534_v62 = vld [vmem:[#allocation24_spill] sm:$0xff] }
  0xea   : > { %2138 = vmatprep.subr.bf16.mxu0 %v9437_v55  ;;  %5642 = vmatprep.mubr.msk.bf16.mxu1 %vm9511_vm1, %v1295_v27  ;;  %v1298_v27 = vrot.slane %v6076_v16, 3 }
  0xeb   : > { %5643 = vmatmul.mubr.msk.bf16.gmra.mrb[8].mxu1 %vm9529_vm9, %v1297_v18  ;;  %v6077_v18 = vld [vmem:[#allocation2 + $0x50] sm:$0xff]  ;;  %vm9546_vm9 = vmmov %vm9511_vm1 }
  0xec   : > { %2014 = vmatmul.mubr.bf16.gmra.mrb[20].mxu0 %v1338_v3  ;;  %v1406_v3 = vsel %vm9532_vm11, %v9531_v28, %v960_v23  ;;  %v1300_v23 = vrot.slane %v6077_v18, 3  ;;  %vm9548_vm11 = vmmov %vm9511_vm1 }
  0xed   : > { %2021 = vmatprep.mubr.bf16.mxu0 %v1402_v11  ;;  %2139 = vmatpush1.bf16.msra.mxu0 %v6020_v2  ;;  %v858_v2 = vpop.permute.xlu1 %857  ;;  %v6024_v11 = vld [vmem:[%s9296_s1 + $0xf0] sm:$0xff]  }
  0xee   : > { %2140 = vmatprep.subr.bf16.mxu0 %v9437_v55  ;;  %v1344_v39 = vsel %vm9533_vm15, %v6074_v48, %v858_v2  ;;  %v6027_v48 = vld [vmem:[%s9296_s1 + $0xf8] sm:$0xff]   ;;  %v1301_v28 = vsel %vm1284_vm12, %v1298_v27, %v1300_v23  ;;  %v9539_v2 = vld [vmem:[#allocation25_spill] sm:$0xff]  ;;  %vm9550_vm15 = vmmov %vm9511_vm1 }
  0xf1   : > { %2141 = vmatpush1.bf16.msra.mxu0 %v6021_v45  ;;  %v1410_v45 = vsel %vm9535_vm8, %v9534_v62, %v962_v10  ;;  %vm9551_vm8 = vmmov %vm9511_vm1 }
  0xf2   : > { %2142 = vmatprep.subr.bf16.mxu0 %v9437_v55 }
  0xf4   : > { %2022 = vmatmul.mubr.bf16.gmra.mrb[24].mxu0 %v1341_v5  ;;  %v860_v5 = vpop.permute.xlu1 %859 }
  0xf5   : > { %2029 = vmatprep.mubr.bf16.mxu0 %v1406_v3  ;;  %2143 = vmatpush1.bf16.msra.mxu0 %v6022_v20  ;;  %v1299_v20 = vsel %vm1284_vm12, %v1296_v24, %v1298_v27  ;;  %v964_v3 = vpop.permute.xlu0 %963  ;;  %v2603_v24 = vld [vmem:[%s9300_s5 + $0x8] sm:$0xff]  ;;  %v9542_v27 = vld [vmem:[#allocation26_spill] sm:$0xff] }
  0xf6   : > { %2144 = vmatprep.subr.bf16.mxu0 %v9437_v55  ;;  %5646 = vmatprep.mubr.msk.bf16.mxu1 %vm9536_vm5, %v1299_v20  ;;  %v1414_v10 = vsel %vm9540_vm6, %v9539_v2, %v964_v3  ;;  %v2607_v20 = vld [vmem:[%s9300_s5 + $0x28] sm:$0xff]  ;;  %vm9553_vm5 = vmmov %vm9511_vm1 }
  0xf7   : > { %5647 = vmatmul.mubr.msk.bf16.gmra.mrb[12].mxu1 %vm9537_vm3, %v1301_v28  ;;  %2645 = vperm.xlu1 %5993, %v2603_v24   ;;  %v9545_v24 = vld [vmem:[#allocation27_spill] sm:$0xff]  ;;  %vm9554_vm3 = vmmov %vm9511_vm1 }
  0xf8   : > { %vm9556_vm6 = vmmov %vm9511_vm1 }
  0xf9   : > { %2145 = vmatpush1.bf16.msra.mxu0 %v6023_v53  ;;  %v1347_v53 = vsel %vm9538_vm2, %v6075_v32, %v860_v5  ;;  %v2605_v32 = vld [vmem:[%s9300_s5 + $0x18] sm:$0xff]  ;;  %v966_v62 = vpop.permute.xlu0 %965  ;;  %v2604_v5 = vld [vmem:[%s9300_s5 + $0x10] sm:$0xff]  ;;  %vm9555_vm2 = vmmov %vm9511_vm1 }
  0xfa   : > { %2146 = vmatprep.subr.bf16.mxu0 %v9437_v55 }
  0xfb   : > { %2650 = vperm.xlu1 %5993, %v2604_v5  }
  0xfc   : > { %2030 = vmatmul.mubr.bf16.gmra.mrb[28].mxu0 %v1344_v39  ;;  %v2602_v39 = vld [vmem:[%s9300_s5] sm:$0xff] }
  0xfd   : > { %2037 = vmatprep.mubr.bf16.mxu0 %v1410_v45  ;;  %2147 = vmatpush1.bf16.msra.mxu0 %v6024_v11  ;;  %v862_v11 = vpop.permute.xlu1 %861  ;;  %v968_v3 = vpop.permute.xlu0 %967 }
  0xfe   : > { %2148 = vmatprep.subr.bf16.mxu0 %v9437_v55  ;;  %2640 = vperm.xlu0 %5992, %v2602_v39   ;;  %v1350_v45 = vsel %vm9541_vm14, %v6076_v16, %v862_v11  ;;  %v2606_v16 = vld [vmem:[%s9300_s5 + $0x20] sm:$0xff]  ;;  %v1422_v11 = vsel %vm9511_vm1, %v9545_v24, %v968_v3  ;;  %v9549_v3 = vld [vmem:[#allocation29_spill] sm:$0xff]  ;;  %vm9558_vm14 = vmmov %vm9511_vm1 }
  0xff   : > { %2660 = vperm.xlu1 %5993, %v2606_v16  }
 0x101   : > { %2149 = vmatpush1.bf16.msra.mxu0 %v6027_v48  ;;  %v1418_v48 = vsel %vm9543_vm7, %v9542_v27, %v966_v62  ;;  %v864_v28 = vpop.permute.xlu1 %863  ;;  %vm9559_vm7 = vmmov %vm9511_vm1 }
 0x102   : > { %2655 = vperm.xlu0 %5992, %v2605_v32   ;;  %v1353_v2 = vsel %vm9544_vm4, %v6077_v18, %v864_v28  ;;  %v6079_v32 = vld [vmem:[#allocation2 + $0x60] sm:$0xff]  ;;  %v2608_v18 = vld [vmem:[%s9300_s5 + $0x30] sm:$0xff]  ;;  %v2613_v28 = vld [vmem:[%s9300_s5 + $0x58] sm:$0xff] }
 0x103   : > { %v1304_v62 = vrot.slane %v6079_v32, 3  ;;  %2670 = vperm.xlu1 %5993, %v2608_v18   ;;  %v6080_v18 = vld [vmem:[#allocation2 + $0x68] sm:$0xff]  ;;  %vm9561_vm4 = vmmov %vm9511_vm1 }
 0x104   : > { %2038 = vmatmul.mubr.bf16.gmra.mrb[32].mxu0 %v1347_v53  ;;  %v2609_v53 = vld [vmem:[%s9300_s5 + $0x38] sm:$0xff] }
 0x105   : > { %2045 = vmatprep.mubr.bf16.mxu0 %v1414_v10  ;;  %v6078_v10 = vld [vmem:[#allocation2 + $0x58] sm:$0xff]  ;;  %v866_v5 = vpop.permute.xlu1 %865 }
 0x106   : > { %2665 = vperm.xlu0 %5992, %v2607_v20   ;;  %v1302_v39 = vrot.slane %v6078_v10, 3  ;;  %v2610_v20 = vld [vmem:[%s9300_s5 + $0x40] sm:$0xff]  ;;  %v1356_v16 = vsel %vm9548_vm11, %v6078_v10, %v866_v5  ;;  %v9552_v5 = vld [vmem:[#allocation30_spill] sm:$0xff]  ;;  %vm9564_vm11 = vmmov %vm9511_vm1 }
 0x107   : > { %2680 = vperm.xlu1 %5993, %v2610_v20   ;;  %v2614_v10 = vld [vmem:[%s9300_s5 + $0x60] sm:$0xff]  ;;  %v6081_v20 = vld [vmem:[#allocation2 + $0x70] sm:$0xff] }
 0x108   : > { %v1305_v27 = vsel %vm1284_vm12, %v1302_v39, %v1304_v62 }
 0x109   : > { %v868_v24 = vpop.permute.xlu1 %867 }
 0x10a   : > { %2675 = vperm.xlu0 %5992, %v2609_v53  }
 0x10c   : > { %2046 = vmatmul.mubr.bf16.gmra.mrb[36].mxu0 %v1350_v45  ;;  %v1303_v45 = vsel %vm1284_vm12, %v1300_v23, %v1302_v39  ;;  %v970_v23 = vpop.permute.xlu0 %969  ;;  %v2615_v39 = vld [vmem:[%s9300_s5 + $0x68] sm:$0xff] }
 0x10d   : > { %2053 = vmatprep.mubr.bf16.mxu0 %v1418_v48  ;;  %5650 = vmatprep.mubr.msk.bf16.mxu1 %vm9546_vm9, %v1303_v45  ;;  %v2611_v48 = vld [vmem:[%s9300_s5 + $0x48] sm:$0xff]  ;;  %v1426_v53 = vsel %vm9550_vm15, %v9549_v3, %v970_v23  ;;  %v2617_v45 = vld [vmem:[%s9300_s5 + $0x78] sm:$0xff]  ;;  %vm9562_vm9 = vmmov %vm9511_vm1  ;;  %vm9566_vm15 = vcmask 1046528  }
 0x10e   : > { %5651 = vmatmul.mubr.msk.bf16.gmra.mrb[16].mxu1 %vm9547_vm13, %v1305_v27  ;;  %2685 = vperm.xlu0 %5992, %v2611_v48   ;;  %v1359_v27 = vsel %vm9551_vm8, %v6079_v32, %v868_v24  ;;  %v1306_v48 = vrot.slane %v6080_v18, 3  ;;  %v2616_v32 = vld [vmem:[%s9300_s5 + $0x70] sm:$0xff]  ;;  %v2621_v24 = vld [vmem:[%s9300_s5 + $0x98] sm:$0xff]  ;;  %vm9563_vm13 = vmmov %vm9511_vm1 }
 0x10f   : > { %vm9567_vm8 = vmmov %vm9511_vm1 }
 0x112   : > { %2695 = vperm.xlu0 %5992, %v2613_v28   ;;  %v1308_v28 = vrot.slane %v6081_v20, 3 }
 0x114   : > { %2054 = vmatmul.mubr.bf16.gmra.mrb[40].mxu0 %v1353_v2  ;;  %v2612_v2 = vld [vmem:[%s9300_s5 + $0x50] sm:$0xff]  ;;  %v1309_v3 = vsel %vm1284_vm12, %v1306_v48, %v1308_v28 }
 0x115   : > { %2061 = vmatprep.mubr.bf16.mxu0 %v1422_v11  ;;  %2690 = vperm.xlu1 %5993, %v2612_v2   ;;  %v972_v11 = vpop.permute.xlu0 %971  ;;  %v870_v2 = vpop.permute.xlu1 %869 }
 0x116   : > { %2705 = vperm.xlu0 %5992, %v2615_v39   ;;  %v1430_v23 = vsel %vm9553_vm5, %v9552_v5, %v972_v11  ;;  %v2618_v39 = vld [vmem:[%s9300_s5 + $0x80] sm:$0xff]  ;;  %v1362_v11 = vsel %vm9556_vm6, %v6080_v18, %v870_v2  ;;  %v9560_v2 = vld [vmem:[#allocation35_spill] sm:$0xff]  ;;  %vm9568_vm5 = vmmov %vm9511_vm1 }
 0x117   : > { %v2622_v18 = vld [vmem:[%s9300_s5 + $0xa0] sm:$0xff]  ;;  %vm9571_vm6 = vmmov %vm9511_vm1 }
 0x119   : > { %2700 = vperm.xlu1 %5993, %v2614_v10   ;;  %v9557_v10 = vld [vmem:[#allocation33_spill] sm:$0xff]  ;;  %v872_v5 = vpop.permute.xlu1 %871 }
 0x11a   : > { %2715 = vperm.xlu0 %5992, %v2617_v45  }
 0x11c   : > { %2062 = vmatmul.mubr.bf16.gmra.mrb[44].mxu0 %v1356_v16  ;;  %v1307_v16 = vsel %vm1284_vm12, %v1304_v62, %v1306_v48  ;;  %v974_v62 = vpop.permute.xlu0 %973  ;;  %v2623_v48 = vld [vmem:[%s9300_s5 + $0xa8] sm:$0xff] }
 0x11d   : > { %2069 = vmatprep.mubr.bf16.mxu0 %v1426_v53  ;;  %5654 = vmatprep.mubr.msk.bf16.mxu1 %vm9554_vm3, %v1307_v16  ;;  %v2619_v53 = vld [vmem:[%s9300_s5 + $0x88] sm:$0xff]  ;;  %v1434_v45 = vsel %vm9558_vm14, %v9557_v10, %v974_v62  ;;  %v2625_v16 = vld [vmem:[%s9300_s5 + $0xb8] sm:$0xff]  ;;  %vm9569_vm3 = vmmov %vm9511_vm1 }
 0x11e   : > { %5655 = vmatmul.mubr.msk.bf16.gmra.mrb[20].mxu1 %vm9555_vm2, %v1309_v3  ;;  %2710 = vperm.xlu1 %5993, %v2616_v32   ;;  %v1365_v3 = vsel %vm9559_vm7, %v6081_v20, %v872_v5  ;;  %v6082_v32 = vld [vmem:[#allocation2 + $0x78] sm:$0xff]  ;;  %v2624_v20 = vld [vmem:[%s9300_s5 + $0xb0] sm:$0xff]  ;;  %vm9570_vm2 = vmmov %vm9511_vm1 }
 0x11f   : > { %2725 = vperm.xlu0 %5992, %v2619_v53   ;;  %v1310_v53 = vrot.slane %v6082_v32, 3  ;;  %vm9572_vm14 = vmmov %vm9511_vm1 }
 0x120   : > { %vm9574_vm7 = vmmov %vm9511_vm1 }
 0x122   : > { %2720 = vperm.xlu1 %5993, %v2618_v39   ;;  %v6083_v39 = vld [vmem:[#allocation2 + $0x80] sm:$0xff] }
 0x123   : > { %2735 = vperm.xlu0 %5992, %v2621_v24   ;;  %v1312_v24 = vrot.slane %v6083_v39, 3 }
 0x124   : > { %2070 = vmatmul.mubr.bf16.gmra.mrb[48].mxu0 %v1359_v27  ;;  %v2620_v27 = vld [vmem:[%s9300_s5 + $0x90] sm:$0xff] }
 0x125   : > { %2077 = vmatprep.mubr.bf16.mxu0 %v1430_v23  ;;  %v976_v23 = vpop.permute.xlu0 %975  ;;  %v1313_v10 = vsel %vm1284_vm12, %v1310_v53, %v1312_v24 }
 0x126   : > { %2730 = vperm.xlu1 %5993, %v2620_v27   ;;  %v1438_v62 = vsel %vm9561_vm4, %v9560_v2, %v976_v23  ;;  %v874_v27 = vpop.permute.xlu1 %873  ;;  %v6084_v23 = vld [vmem:[#allocation2 + $0x90] sm:$0x1]  ;;  %vm9575_vm4 = vmmov %vm9511_vm1 }
 0x127   : > { %2745 = vperm.xlu0 %5992, %v2623_v48   ;;  %v1368_v48 = vsel %vm9563_vm13, %v6082_v32, %v874_v27  ;;  %v6087_v27 = vld [vmem:[#allocation2 + $0x10] sm:$0xfc]  ;;  %vm9577_vm13 = vsmask.f32 6400 }
 0x128   : > { %v1150_v55 = vrot.slane %v6087_v27, 2  ;;  %v9578_v27 = vld [vmem:[#allocation18_spill] sm:$0xff] }
 0x12a   : > { %2740 = vperm.xlu1 %5993, %v2622_v18   ;;  %v934_v18 = vrot.slane %v6084_v23, 1 }
 0x12b   : > { %2755 = vperm.xlu0 %5992, %v2625_v16   ;;  %v876_v16 = vpop.permute.xlu1 %875 }
 0x12c   : > { %2078 = vmatmul.mubr.bf16.gmra.mrb[52].mxu0 %v1362_v11  ;;  %v1311_v11 = vsel %vm1284_vm12, %v1308_v28, %v1310_v53  ;;  %v978_v28 = vpop.permute.xlu0 %977  ;;  %v9565_v53 = vld [vmem:[#allocation36_spill] sm:$0xff] }
 0x12d   : > { %2085 = vmatprep.mubr.bf16.mxu0 %v1434_v45  ;;  %5658 = vmatprep.mubr.msk.bf16.mxu1 %vm9511_vm1, %v1311_v11  ;;  %v2626_v45 = vld [vmem:[%s9300_s5 + $0xc0] sm:$0xff]  ;;  %v1442_v5 = vsel %vm9564_vm11, %v6976_v41, %v978_v28  ;;  %v935_v2 = vsel %vm9566_vm15, %v9565_v53, %v934_v18  ;;  %v6085_v11 = vld [vmem:[#allocation2 + $0x88] sm:$0xff]  ;;  %vm9580_vm11 = vmmov %vm9511_vm1 }
 0x12e   : > { %5659 = vmatmul.mubr.msk.bf16.gmra.mrb[24].mxu1 %vm9562_vm9, %v1313_v10  ;;  %2750 = vperm.xlu1 %5993, %v2624_v20   ;;  %v1314_v10 = vrot.slane %v6085_v11, 3  ;;  %vm9576_vm9 = vmmov %vm9511_vm1 }
 0x12f   : > { %2760 = vperm.xlu0 %5992, %v2626_v45   ;;  %v6086_v45 = vld [vmem:[#allocation2 + $0x90] sm:$0xff]  ;;  %vm9581_vm15 = vmmov %vm9511_vm1 }
 0x130   : > { %v1316_v32 = vrot.slane %v6086_v45, 3  ;;  %v1315_v41 = vsel %vm1284_vm12, %v1312_v24, %v1314_v10 }
 0x131   : > { %5662 = vmatprep.mubr.msk.bf16.mxu1 %vm9569_vm3, %v1315_v41  ;;  %v997_v41 = vrot.slane %v9578_v27, 1  ;;  %vm9585_vm3 = vmmov %vm9511_vm1 }
 0x132   : > { %v1317_v28 = vsel %vm1284_vm12, %v1314_v10, %v1316_v32  ;;  %v1318_v10 = vrot.slane %v7219_v34, 3 }
 0x134   : > { %2086 = vmatmul.mubr.bf16.gmra.mrb[56].mxu0 %v1365_v3  ;;  %v980_v3 = vpop.permute.xlu0 %979 }
 0x135   : > { %2093 = vmatprep.mubr.bf16.mxu0 %v1438_v62  ;;  %v1371_v62 = vsel %vm9567_vm8, %v6083_v39, %v876_v16  ;;  %v1446_v20 = vsel %vm9568_vm5, %v935_v2, %v980_v3  ;;  %v993_v16 = vrot.slane %v6581_v26, 1  ;;  %v9573_v3 = vld [vmem:[#allocation13_spill] sm:$0xff]  ;;  %vm9582_vm8 = vmmov %vm9577_vm13 }
 0x136   : > { %5663 = vmatmul.mubr.msk.bf16.gmra.mrb[28].mxu1 %vm9570_vm2, %v1317_v28  ;;  %v994_v53 = vrot.slane %v9573_v3, 2  ;;  %vm9584_vm5 = vmmov %vm9511_vm1 }
 0x137   : > { %vm9586_vm2 = vmmov %vm9582_vm8 }
 0x138   : > { %v1247_v39 = vpop.permute.xlu0 %1246 }
 0x13c   : > { %2094 = vmatmul.mubr.bf16.gmra.mrb[60].mxu0 %v1368_v48  ;;  %v878_v48 = vpop.permute.xlu1 %877  ;;  %v1249_v2 = vpop.permute.xlu0 %1248 }
 0x13d   : > { %2101 = vmatprep.mubr.bf16.mxu0 %v1442_v5  ;;  %v1151_v5 = vsel %vm1073_vm10, %v1150_v55, %v6981_v25  ;;  %v1374_v23 = vsel %vm9571_vm6, %v6085_v11, %v878_v48  ;;  %v1526_v55 = vsel %vm9575_vm4, %v7030_v35, %v1249_v2  ;;  %v995_v25 = vor.u32 %v994_v53, %v993_v16  ;;  %v9579_v35 = vld [vmem:[#allocation15_spill] sm:$0xff]  ;;  %vm9587_vm6 = vmmov %vm9511_vm1 }
 0x13e   : > { %v1522_v18 = vsel %vm9572_vm14, %v1151_v5, %v1247_v39  ;;  %v1320_v11 = vrot.slane %v7250_v8, 3  ;;  %v998_v28 = vrot.slane %v9579_v35, 2  ;;  %vm9588_vm14 = vmmov %vm9511_vm1 }
 0x13f   : > { %vm9590_vm4 = vmmov %vm9511_vm1 }
 0x140   : > { %v1112_v24 = vpop.permute.xlu1 %1111  ;;  %v1321_v26 = vsel %vm1284_vm12, %v1318_v10, %v1320_v11  ;;  %v1251_v48 = vpop.permute.xlu0 %1250  ;;  %v999_v39 = vor.u32 %v998_v28, %v997_v41  ;;  %v1013_v28 = vrot.slane %v6680_v40, 1 }
 0x144   : > { %2102 = vmatmul.mubr.bf16.gmra.mrb[64].mxu0 %v1371_v62  ;;  %v1450_v62 = vsel %vm9574_vm7, %v7182_v46, %v1112_v24  ;;  %v1114_v45 = vpop.permute.xlu1 %1113  ;;  %v996_v46 = vsel %vm9577_vm13, %v7170_v13, %v995_v25  ;;  %v1002_v13 = vrot.slane %v6613_v44, 2  ;;  %v1253_v16 = vpop.permute.xlu0 %1252  ;;  %vm9589_vm7 = vmmov %vm9586_vm2 }
 0x145   : > { %2109 = vmatprep.mubr.bf16.mxu0 %v1446_v20  ;;  %v1319_v20 = vsel %vm1284_vm12, %v1316_v32, %v1318_v10  ;;  %v1454_v8 = vsel %vm9580_vm11, %v996_v46, %v1114_v45  ;;  %v1530_v32 = vsel %vm9581_vm15, %v7039_v9, %v1251_v48  ;;  %v1534_v53 = vsel %vm9585_vm3, %v7049_v60, %v1253_v16  ;;  %vm9592_vm13 = vmmov %vm9511_vm1 }
 0x146   : > { %5666 = vmatprep.mubr.msk.bf16.mxu1 %vm9511_vm1, %v1319_v20  ;;  %v1005_v10 = vrot.slane %v6690_v59, 1  ;;  %v1009_v45 = vrot.slane %v6703_v38, 1  ;;  %v1010_v46 = vrot.slane %v6670_v29, 2  ;;  %v1014_v48 = vrot.slane %v6675_v37, 2  ;;  %vm9593_vm11 = vmmov %vm9511_vm1 }
 0x147   : > { %5667 = vmatmul.mubr.msk.bf16.gmra.mrb[32].mxu1 %vm9576_vm9, %v1321_v26  ;;  %vm9591_vm9 = vmmov %vm9586_vm2  ;;  %v1021_v16 = vrot.slane %v6790_v57, 1 }
 0x148   : > { %v1116_v5 = vpop.permute.xlu1 %1115  ;;  %v1011_v41 = vor.u32 %v1010_v46, %v1009_v45  ;;  %vm9594_vm15 = vmmov %vm9586_vm2  ;;  %v1033_v46 = vrot.slane %v6894_v51, 1 }
 0x149   : > { %vm9597_vm3 = vmmov %vm9586_vm2 }
 0x14c   : > { %2110 = vmatmul.mubr.bf16.gmra.mrb[68].mxu0 %v1374_v23  ;;  %v1000_v23 = vsel %vm9582_vm8, %v995_v25, %v999_v39  ;;  %v1118_v9 = vpop.permute.xlu1 %1117  ;;  %v1255_v25 = vpop.permute.xlu0 %1254  ;;  %vm9595_vm8 = vmmov %vm9511_vm1 }
 0x14d   : > { %2150 = vmatprep.mubr.bf16.mxu0 %v1522_v18  ;;  %v9583_v18 = vld [vmem:[#allocation20_spill] sm:$0xff]  ;;  %v1458_v3 = vsel %vm9584_vm5, %v1000_v23, %v1116_v5  ;;  %v1538_v44 = vsel %vm9588_vm14, %v7059_v31, %v1255_v25  ;;  %v1017_v5 = vrot.slane %v6758_v56, 1  ;;  %v1018_v23 = vrot.slane %v6735_v54, 2  ;;  %vm9596_vm5 = vmmov %vm9511_vm1 }
 0x14e   : > { %v1001_v24 = vrot.slane %v9583_v18, 1  ;;  %vm9600_vm14 = vmmov %vm9597_vm3 }
 0x150   : > { %v1003_v2 = vor.u32 %v1002_v13, %v1001_v24  ;;  %v1120_v60 = vpop.permute.xlu1 %1119  ;;  %v1257_v27 = vpop.permute.xlu0 %1256  ;;  %v1019_v24 = vor.u32 %v1018_v23, %v1017_v5 }
 0x154   : > { %2151 = vmatmul.mubr.bf16.vlgmr.msra.gmra.mrb[0].mxu0 %v1450_v62  ;;  %v1004_v62 = vsel %vm9586_vm2, %v999_v39, %v1003_v2  ;;  %v1122_v31 = vpop.permute.xlu1 %1121  ;;  %vm9598_vm2 = vmmov %vm9511_vm1 }
 0x155   : > { %2158 = vmatprep.mubr.bf16.mxu0 %v1526_v55  ;;  %v1006_v55 = vrot.slane %v6663_v22, 2  ;;  %v1462_v11 = vsel %vm9587_vm6, %v1004_v62, %v1118_v9  ;;  %v1542_v22 = vsel %vm9511_vm1, %v7069_v33, %v1257_v27  ;;  %vm9599_vm6 = vmmov %vm9511_vm1  ;;  %v1025_v62 = vrot.slane %v6843_v19, 1 }
 0x156   : > { %v1034_v27 = vrot.slane %v6856_v30, 2 }
 0x157   : > { %v1007_v20 = vor.u32 %v1006_v55, %v1005_v10  ;;  %v1026_v10 = vrot.slane %v6809_v14, 2 }
 0x158   : > { %v1124_v33 = vpop.permute.xlu1 %1123 }
 0x159   : > { %v1008_v26 = vsel %vm9589_vm7, %v1003_v2, %v1007_v20  ;;  %v1012_v35 = vsel %vm9591_vm9, %v1007_v20, %v1011_v41  ;;  %vm9601_vm7 = vmmov %vm9511_vm1  ;;  %v1027_v25 = vor.u32 %v1026_v10, %v1025_v62  ;;  %v1030_v20 = vrot.slane %v6837_v0, 2 }
 0x15a   : > { %v1466_v59 = vsel %vm9590_vm4, %v1008_v26, %v1120_v60  ;;  %v1470_v38 = vsel %vm9592_vm13, %v1012_v35, %v1122_v31  ;;  %vm9602_vm4 = vmmov %vm9511_vm1  ;;  %v1037_v31 = vrot.slane %v6932_v15, 1  ;;  %v1038_v35 = vrot.slane %v6898_v12, 2 }
 0x15b   : > { %vm9603_vm1 = vmmov %vm9597_vm3 }
 0x15c   : > { %2159 = vmatmul.mubr.bf16.gmra.mrb[4].mxu0 %v1454_v8  ;;  %v1259_v8 = vpop.permute.xlu0 %1258  ;;  %vm9604_vm9 = vmmov %vm9598_vm2 }
 0x15d   : > { %2166 = vmatprep.mubr.bf16.mxu0 %v1530_v32  ;;  %v1546_v29 = vsel %vm9593_vm11, %v7079_v42, %v1259_v8  ;;  %v1015_v32 = vor.u32 %v1014_v48, %v1013_v28  ;;  %v1126_v42 = vpop.permute.xlu1 %1125  ;;  %vm9605_vm13 = vmmov %vm9598_vm2  ;;  %v1039_v48 = vor.u32 %v1038_v35, %v1037_v31 }
 0x15e   : > { %vm9606_vm11 = vmmov %vm9603_vm1 }
 0x15f   : > { %v1016_v39 = vsel %vm9594_vm15, %v1011_v41, %v1015_v32  ;;  %v1020_v13 = vsel %vm9597_vm3, %v1015_v32, %v1019_v24  ;;  %vm9607_vm15 = vmmov %vm9598_vm2  ;;  %v1041_v32 = vrot.slane %v6962_v49, 1  ;;  %v1046_v49 = vrot.slane %v6944_v21, 2 }
 0x160   : > { %v1261_v18 = vpop.permute.xlu0 %1260  ;;  %v1474_v40 = vsel %vm9595_vm8, %v1016_v39, %v1124_v33  ;;  %v1478_v56 = vsel %vm9598_vm2, %v1020_v13, %v1126_v42  ;;  %vm9608_vm8 = vmmov %vm9598_vm2  ;;  %v1042_v33 = vrot.slane %v6935_v43, 2 }
 0x161   : > { %v1550_v37 = vsel %vm9596_vm5, %v7089_v6, %v1261_v18  ;;  %v1128_v6 = vpop.permute.xlu1 %1127  ;;  %vm9609_vm5 = vmmov %vm9603_vm1 }
 0x162   : > { %vm9610_vm3 = vmmov %vm9598_vm2  ;;  %v1043_v23 = vor.u32 %v1042_v33, %v1041_v32  ;;  %v6031_v33 = vld [vmem:[%s9298_s3 + $0x108] sm:$0xff]  }
 0x164   : > { %2167 = vmatmul.mubr.bf16.gmra.mrb[8].mxu0 %v1458_v3  ;;  %v1022_v3 = vrot.slane %v6774_v36, 2 }
 0x165   : > { %2174 = vmatprep.mubr.bf16.mxu0 %v1534_v53  ;;  %v1263_v53 = vpop.permute.xlu0 %1262 }
 0x166   : > { %v1554_v54 = vsel %vm9599_vm6, %v7099_v17, %v1263_v53  ;;  %v1023_v2 = vor.u32 %v1022_v3, %v1021_v16  ;;  %v1130_v17 = vpop.permute.xlu1 %1129  ;;  %vm9611_vm6 = vmmov %vm9603_vm1  ;;  %v9616_v3 = vld [vmem:[#allocation17_spill] sm:$0xff] }
 0x168   : > { %v1024_v9 = vsel %vm9600_vm14, %v1019_v24, %v1023_v2  ;;  %vm9612_vm14 = vmmov %vm9598_vm2  ;;  %v1045_v24 = vrot.slane %v6970_v63, 1 }
 0x169   : > { %v1265_v55 = vpop.permute.xlu0 %1264  ;;  %v1482_v57 = vsel %vm9601_vm7, %v1024_v9, %v1128_v6  ;;  %vm9613_vm7 = vmmov %vm9598_vm2  ;;  %v9620_v6 = vld [vmem:[#allocation34_spill] sm:$0xff] }
 0x16a   : > { %v1558_v36 = vsel %vm9602_vm4, %v7109_v47, %v1265_v55  ;;  %v1132_v47 = vpop.permute.xlu1 %1131  ;;  %vm9614_vm4 = vmmov %vm9603_vm1  ;;  %v1050_v9 = vrot.slane %v9620_v6, 2  ;;  %v9622_v55 = vld [vmem:[#allocation12_spill] sm:$0xff] }
 0x16b   : > { %v6034_v6 = vld [vmem:[%s9298_s3] sm:$0xff]  }
 0x16c   : > { %2175 = vmatmul.mubr.bf16.gmra.mrb[12].mxu0 %v1462_v11  ;;  %v1028_v11 = vsel %vm9603_vm1, %v1023_v2, %v1027_v25  ;;  %vm9615_vm1 = vmmov %vm9598_vm2  ;;  %v9619_v2 = vld [vmem:[#allocation37_spill] sm:$0xff]  ;;  %4350 = vmatpush1.bf16.msra.mxu1 %v6034_v6 }
 0x16d   : > { %2182 = vmatprep.mubr.bf16.mxu0 %v1538_v44  ;;  %v1029_v44 = vrot.slane %v6853_v58, 1  ;;  %v1267_v60 = vpop.permute.xlu0 %1266  ;;  %v1486_v19 = vsel %vm9604_vm9, %v1028_v11, %v1130_v17  ;;  %vm9617_vm9 = vmmov %vm9615_vm1  ;;  %v1049_v21 = vrot.slane %v9619_v2, 1 }
 0x16e   : > { %v1562_v14 = vsel %vm9605_vm13, %v7128_v50, %v1267_v60  ;;  %v1134_v50 = vpop.permute.xlu1 %1133  ;;  %vm9618_vm13 = vmmov %vm9614_vm4 }
 0x16f   : > { %v1031_v26 = vor.u32 %v1030_v20, %v1029_v44  ;;  %v9625_v20 = vld [vmem:[#allocation32_spill] sm:$0xff] }
 0x170   : > { %v9626_v60 = vshrl.u32 %v9625_v20, 16 }
 0x171   : > { %v1032_v45 = vsel %vm9606_vm11, %v1027_v25, %v1031_v26  ;;  %vm9621_vm11 = vmmov %vm9615_vm1  ;;  %v1152_v25 = vrot.slane %v7219_v34, 2 }
 0x172   : > { %v1490_v58 = vsel %vm9607_vm15, %v1032_v45, %v1132_v47  ;;  %v1136_v15 = vpop.permute.xlu1 %1135  ;;  %vm9623_vm15 = vmmov %vm9615_vm1 }
 0x174   : > { %2183 = vmatmul.mubr.bf16.gmra.mrb[16].mxu0 %v1466_v59  ;;  %v1269_v59 = vpop.permute.xlu0 %1268 }
 0x175   : > { %2190 = vmatprep.mubr.bf16.mxu0 %v1542_v22  ;;  %v1566_v0 = vsel %vm9608_vm8, %v7149_v4, %v1269_v59  ;;  %v1035_v22 = vor.u32 %v1034_v27, %v1033_v46  ;;  %vm9624_vm8 = vmmov %vm9614_vm4  ;;  %v1153_v46 = vsel %vm1073_vm10, %v7234_v61, %v1152_v25  ;;  %v692_v27 = vld [vmem:[#allocation2 + $0xa0] sm:$0x3] }
 0x176   : > { %v1154_v31 = vrot.slane %v692_v27, 2  ;;  %v6030_v61 = vld [vmem:[%s9298_s3 + $0x100] sm:$0xff]  }
 0x177   : > { %v1036_v41 = vsel %vm9609_vm5, %v1031_v26, %v1035_v22  ;;  %v1040_v12 = vsel %vm9611_vm6, %v1035_v22, %v1039_v48  ;;  %vm9628_vm5 = vmmov %vm9615_vm1  ;;  %v1066_v22 = vshll.u32 %v7263_v52, 16  ;;  %5670 = vmatprep.subr.bf16.mxu0 %v6030_v61  ;;  %v7664_v27 = vld [vmem:[%s9297_s2] ss:$0 sm:$0xff] }
 0x178   : > { %v1271_v28 = vpop.permute.xlu0 %1270  ;;  %v1494_v51 = vsel %vm9610_vm3, %v1036_v41, %v1134_v50  ;;  %vm9629_vm3 = vmmov %vm9615_vm1  ;;  %5671 = vmatpush3.bf16.msra.mxu0 %v6030_v61  ;;  %v7673_v61 = vstv %s664_s29  ;;  %s5447_s29 = sld [smem:[#allocation4 + $0x1]] }
 0x179   : > { %v1570_v30 = vsel %vm9598_vm2, %v7164_v1, %v1271_v28  ;;  %v1498_v1 = vsel %vm9612_vm14, %v1040_v12, %v1136_v15  ;;  %vm9630_vm2 = vmmov %vm9614_vm4  ;;  %v1155_v15 = vsel %vm1073_vm10, %v1152_v25, %v1154_v31  ;;  %5672 = vmatprep.subr.bf16.mxu0 %v6031_v33  ;;  %v6036_v25 = vld [vmem:[%s9298_s3 + $0x10] sm:$0xff]  }
 0x17a   : > { %vm9631_vm6 = vmmov %vm9615_vm1 }
 0x17b   : > { %vm9632_vm14 = vmmov %vm9615_vm1 }
 0x17c   : > { %2191 = vmatmul.mubr.bf16.gmra.mrb[20].mxu0 %v1470_v38  ;;  %v1273_v39 = vpop.permute.xlu0 %1272 }
 0x17d   : > { %2198 = vmatprep.mubr.bf16.mxu0 %v1546_v29  ;;  %v1574_v5 = vsel %vm9613_vm7, %v7188_v7, %v1273_v39  ;;  %vm9633_vm7 = vmmov %vm9630_vm2  ;;  %5673 = vmatpush3.bf16.msra.mxu0 %v6031_v33 }
 0x180   : > { %v1275_v43 = vpop.permute.xlu0 %1274 }
 0x181   : > { %v1578_v53 = vsel %vm9617_vm9, %v9616_v3, %v1275_v43  ;;  %v6033_v43 = vld [vmem:[%s9298_s3 + $0x118] sm:$0xff]  }
 0x184   : > { %2199 = vmatmul.mubr.bf16.gmra.mrb[24].mxu0 %v1474_v40  ;;  %v1138_v40 = vpop.permute.xlu1 %1137  ;;  %v1277_v62 = vpop.permute.xlu0 %1276 }
 0x185   : > { %2206 = vmatprep.mubr.bf16.mxu0 %v1550_v37  ;;  %v1044_v37 = vsel %vm9614_vm4, %v1039_v48, %v1043_v23  ;;  %vm9634_vm4 = vmmov %vm9615_vm1 }
 0x186   : > { %v1502_v7 = vsel %vm9615_vm1, %v1044_v37, %v1138_v40  ;;  %v6032_v40 = vld [vmem:[%s9298_s3 + $0x110] sm:$0xff]  }
 0x187   : > { %5674 = vmatprep.subr.bf16.mxu0 %v6032_v40 }
 0x188   : > { %v1279_v45 = vpop.permute.xlu0 %1278  ;;  %5675 = vmatpush3.bf16.msra.mxu0 %v6032_v40 }
 0x189   : > { %v1586_v50 = vsel %vm9629_vm3, %v1153_v46, %v1279_v45  ;;  %5676 = vmatprep.subr.bf16.mxu0 %v6033_v43  ;;  %v6040_v45 = vld [vmem:[%s9298_s3 + $0x30] sm:$0xff]   ;;  %v6041_v46 = vld [vmem:[%s9298_s3 + $0x38] sm:$0xff]   ;;  %vm9638_vm3 = vsmask.f32 1280 }
 0x18c   : > { %2207 = vmatmul.mubr.bf16.gmra.mrb[28].mxu0 %v1478_v56  ;;  %v1047_v56 = vor.u32 %v1046_v49, %v1045_v24  ;;  %v1281_v48 = vpop.permute.xlu0 %1280 }
 0x18d   : > { %2214 = vmatprep.mubr.bf16.mxu0 %v1554_v54  ;;  %v1140_v54 = vpop.permute.xlu1 %1139  ;;  %v1590_v12 = vsel %vm9632_vm14, %v1155_v15, %v1281_v48  ;;  %5677 = vmatpush3.bf16.msra.mxu0 %v6033_v43  ;;  %v6043_v48 = vld [vmem:[%s9298_s3 + $0x48] sm:$0xff]  }
 0x18e   : > { %v1048_v63 = vsel %vm9618_vm13, %v1043_v23, %v1047_v56 }
 0x18f   : > { %v1506_v10 = vsel %vm9621_vm11, %v1048_v63, %v1140_v54 }
 0x191   : > { %v1142_v11 = vpop.permute.xlu1 %1141 }
 0x194   : > { %2215 = vmatmul.mubr.bf16.gmra.mrb[32].mxu0 %v1482_v57  ;;  %v1582_v57 = vsel %vm9623_vm15, %v9622_v55, %v1277_v62  ;;  %v6035_v62 = vld [vmem:[%s9298_s3 + $0x8] sm:$0xff]  }
 0x195   : > { %2222 = vmatprep.mubr.bf16.mxu0 %v1558_v36  ;;  %v1051_v36 = vor.u32 %v1050_v9, %v1049_v21  ;;  %v1144_v35 = vpop.permute.xlu1 %1143  ;;  %v9635_v9 = vmov 0  }
 0x196   : > { %4351 = vmatprep.subr.bf16.mxu1 %v9635_v9 }
 0x197   : > { %v1052_v44 = vsel %vm9624_vm8, %v1047_v56, %v1051_v36  ;;  %4352 = vmatpush1.bf16.msra.mxu1 %v6035_v62 }
 0x198   : > { %4353 = vmatprep.subr.bf16.mxu1 %v9635_v9 }
 0x199   : > { %v1146_v39 = vpop.permute.xlu1 %1145 }
 0x19b   : > { %4354 = vmatpush1.bf16.msra.mxu1 %v6036_v25 }
 0x19c   : > { %2223 = vmatmul.mubr.bf16.gmra.mrb[36].mxu0 %v1486_v19  ;;  %v1056_v19 = vrot.slane %v9626_v60, 1  ;;  %4355 = vmatprep.subr.bf16.mxu1 %v9635_v9 }
 0x19d   : > { %2230 = vmatprep.mubr.bf16.mxu0 %v1562_v14  ;;  %v9627_v14 = vshll.u32 %v9625_v20, 16  ;;  %v2646_v40 = vpop.permute.xlu1 %2645 }
 0x19f   : > { %v1059_v26 = vrot.slane %v9627_v14, 2 }
 0x1a1   : > { %v1060_v41 = vor.u32 %v1059_v26, %v1056_v19  ;;  %v6039_v19 = vld [vmem:[%s9298_s3 + $0x28] sm:$0xff]  }
 0x1a3   : > { %v1061_v28 = vsel %vm9630_vm2, %v1051_v36, %v1060_v41  ;;  %vm9639_vm2 = vmmov %vm9634_vm4 }
 0x1a4   : > { %2231 = vmatmul.mubr.bf16.gmra.mrb[40].mxu0 %v1490_v58  ;;  %v1510_v58 = vsel %vm9628_vm5, %v1052_v44, %v1142_v11  ;;  %v6037_v11 = vld [vmem:[%s9298_s3 + $0x18] sm:$0xff]   ;;  %v6038_v44 = vld [vmem:[%s9298_s3 + $0x20] sm:$0xff]  }
 0x1a5   : > { %2238 = vmatprep.mubr.bf16.mxu0 %v1566_v0  ;;  %v1063_v0 = vshrl.u32 %v7263_v52, 16  ;;  %v1514_v52 = vsel %vm9631_vm6, %v1061_v28, %v1144_v35  ;;  %4356 = vmatpush1.bf16.msra.mxu1 %v6037_v11 }
 0x1a6   : > { %v7518_v8 = vpop.f32.mrb[0].mxu1  ;;  %4357 = vmatprep.subr.bf16.mxu1 %v9635_v9 }
 0x1a7   : > { %v7520_v4 = vpop.f32.mrb[1].mxu1 }
 0x1a8   : > { %v7522_v38 = vpop.f32.mrb[2].mxu1 }
 0x1a9   : > { %v7524_v29 = vpop.f32.mrb[3].mxu1  ;;  %4358 = vmatpush1.bf16.msra.mxu1 %v6038_v44 }
 0x1aa   : > { %4359 = vmatprep.subr.bf16.mxu1 %v9635_v9 }
 0x1ac   : > { %2239 = vmatmul.mubr.bf16.gmra.mrb[44].mxu0 %v1494_v51  ;;  %v1065_v51 = vrot.slane %v1063_v0, 1 }
 0x1ad   : > { %2246 = vmatprep.mubr.bf16.mxu0 %v1570_v30  ;;  %v1068_v30 = vrot.slane %v1066_v22, 2  ;;  %4360 = vmatpush1.bf16.msra.mxu1 %v6039_v19 }
 0x1ae   : > { %4361 = vmatprep.subr.bf16.mxu1 %v9635_v9 }
 0x1af   : > { %v1069_v32 = vor.u32 %v1068_v30, %v1065_v51 }
 0x1b1   : > { %4362 = vmatpush1.bf16.msra.mxu1 %v6040_v45 }
 0x1b2   : > { %4363 = vmatprep.subr.bf16.mxu1 %v9635_v9 }
 0x1b3   : > { %v7532_v18 = vpop.f32.mrb[4].mxu1 }
 0x1b4   : > { %2247 = vmatmul.mubr.bf16.gmra.mrb[48].mxu0 %v1498_v1  ;;  %v7537_v42 = vpop.f32.mrb[5].mxu1  ;;  %v1070_v1 = vsel %vm9633_vm7, %v1060_v41, %v1069_v32  ;;  %vm9640_vm7 = vsmask.f32 7424 }
 0x1b5   : > { %2254 = vmatprep.mubr.bf16.mxu0 %v1574_v5  ;;  %v7539_v13 = vpop.f32.mrb[6].mxu1  ;;  %v1518_v5 = vsel %vm9634_vm4, %v1070_v1, %v1146_v39  ;;  %4364 = vmatpush1.bf16.msra.mxu1 %v6041_v46  ;;  %v6044_v39 = vld [vmem:[%s9298_s3 + $0x50] sm:$0xff]   ;;  %v2641_v1 = vpop.permute.xlu0 %2640  ;;  %vm9641_vm4 = vmmov %vm9638_vm3 }
 0x1b6   : > { %v7541_v16 = vpop.f32.mrb[7].mxu1  ;;  %4365 = vmatprep.subr.bf16.mxu1 %v9635_v9 }
 0x1bc   : > { %2255 = vmatmul.mubr.bf16.gmra.mrb[52].mxu0 %v1502_v7 }
 0x1bd   : > { %2262 = vmatprep.mubr.bf16.mxu0 %v1578_v53 }
 0x1be   : > { %v7553_v17 = vpop.f32.mrb[8].mxu1 }
 0x1bf   : > { %v7560_v47 = vpop.f32.mrb[9].mxu1 }
 0x1c0   : > { %v7564_v34 = vpop.f32.mrb[10].mxu1 }
 0x1c1   : > { %v7566_v59 = vpop.f32.mrb[11].mxu1 }
 0x1c4   : > { %2263 = vmatmul.mubr.bf16.gmra.mrb[56].mxu0 %v1506_v10 }
 0x1c5   : > { %2270 = vmatprep.mubr.bf16.mxu0 %v1582_v57 }
 0x1ca   : > { %v7584_v23 = vpop.f32.mrb[12].mxu1 }
 0x1cb   : > { %v7589_v37 = vpop.f32.mrb[13].mxu1 }
 0x1cc   : > { %2271 = vmatmul.mubr.bf16.gmra.mrb[60].mxu0 %v1510_v58  ;;  %v7591_v24 = vpop.f32.mrb[14].mxu1  ;;  %v6042_v58 = vld [vmem:[%s9298_s3 + $0x40] sm:$0xff]  }
 0x1cd   : > { %2278 = vmatprep.mubr.bf16.mxu0 %v1586_v50  ;;  %v7593_v49 = vpop.f32.mrb[15].mxu1  ;;  %4366 = vmatpush1.bf16.msra.mxu1 %v6042_v58  ;;  %v6045_v58 = vld [vmem:[%s9298_s3 + $0x58] sm:$0xff]  }
 0x1ce   : > { %4367 = vmatprep.subr.bf16.mxu1 %v9635_v9 }
 0x1d1   : > { %4368 = vmatpush1.bf16.msra.mxu1 %v6043_v48 }
 0x1d2   : > { %4369 = vmatprep.subr.bf16.mxu1 %v9635_v9 }
 0x1d4   : > { %2279 = vmatmul.mubr.bf16.gmra.mrb[64].mxu0 %v1514_v52 }
 0x1d5   : > { %2286 = vmatprep.mubr.bf16.mxu0 %v1590_v12  ;;  %4370 = vmatpush1.bf16.msra.mxu1 %v6044_v39 }
 0x1d6   : > { %4371 = vmatprep.subr.bf16.mxu1 %v9635_v9 }
 0x1d9   : > { %4372 = vmatpush1.bf16.msra.mxu1 %v6045_v58 }
 0x1da   : > { %4373 = vmatprep.subr.bf16.mxu1 %v9635_v9 }
 0x1dc   : > { %2287 = vmatmul.mubr.bf16.gmra.mrb[68].mxu0 %v1518_v5 }
 0x1e1   : > { %v7598_v7 = vpop.f32.mrb[16].mxu1 }
 0x1e2   : > { %v7600_v3 = vpop.f32.mrb[17].mxu1 }
 0x1e3   : > { %v7602_v53 = vpop.f32.mrb[18].mxu1 }
 0x1e4   : > { %v7604_v56 = vpop.f32.mrb[19].mxu1 }
 0x1f1   : > { %v7606_v54 = vpop.f32.mrb[20].mxu1 }
 0x1f2   : > { %v7608_v63 = vpop.f32.mrb[21].mxu1 }
 0x1f3   : > { %v7610_v2 = vpop.f32.mrb[22].mxu1 }
 0x1f4   : > { %v7612_v21 = vpop.f32.mrb[23].mxu1 }
 0x201   : > { %v7621_v10 = vpop.f32.mrb[24].mxu1 }
 0x202   : > { %v7623_v55 = vpop.f32.mrb[25].mxu1 }
 0x203   : > { %v7625_v57 = vpop.f32.mrb[26].mxu1 }
 0x204   : > { %v7628_v36 = vpop.f32.mrb[27].mxu1 }
 0x209   : > { %v7641_v20 = vpop.f32.mrb[28].mxu1 }
 0x20a   : > { %v7644_v60 = vpop.f32.mrb[29].mxu1 }
 0x20b   : > { %v7649_v14 = vpop.f32.mrb[30].mxu1 }
 0x20c   : > { %v7651_v26 = vpop.f32.mrb[31].mxu1 }
 0x21a   : > { %v7671_v41 = vpop.f32.mrb[32].mxu1 }
 0x21b   : > { %v7678_v30 = vpop.f32.mrb[33].mxu1 }
 0x21c   : > { %v7685_v12 = vpop.f32.mrb[34].mxu1 }
 0x21d   : > { %v7687_v32 = vpop.f32.mrb[35].mxu1 }
 0x227   : > { %v2152_v0 = vpop.f32.mrb[0].mxu0 }
 0x228   : > { %v5722_v22 = vadd.f32 %v7664_v27, %v2152_v0  ;;  %v2154_v50 = vpop.f32.mrb[1].mxu0 }
 0x229   : > { %v2155_v31 = vpop.f32.mrb[2].mxu0 }
 0x22a   : > { %v5723_v35 = vadd.f32 %v7664_v27, %v2155_v31  ;;  %v2330_v28 = vadd.f32 %v5722_v22, %v7520_v4  ;;  %v2157_v51 = vpop.f32.mrb[3].mxu0 }
 0x22b   : > { %v2656_v51 = vpop.permute.xlu0 %2655 }
 0x22c   : > { %vm2472_vm1 = vcmp.gt.f32.partialorder %v2330_v28, 0.0  ;;  %v2509_v15 = vmul.f32 %v7673_v61, %v2330_v28  ;;  %v2333_v52 = vadd.f32 %v5723_v35, %v7524_v29 }
 0x22e   : > { %v2545_v4 = vsel %vm2472_vm1, %v2330_v28, %v2509_v15  ;;  %vm2473_vm9 = vcmp.gt.f32.partialorder %v2333_v52, 0.0  ;;  %v2510_v33 = vmul.f32 %v7673_v61, %v2333_v52  ;;  %vm9643_vm1 = vmmov %vm9639_vm2 }
 0x22f   : > { %v2160_v5 = vpop.f32.mrb[4].mxu0  ;;  %v2818_v62 = vmul.f32 %v2641_v1, %v2545_v4  ;;  %v2651_v4 = vpop.permute.xlu1 %2650 }
 0x230   : > { %v2546_v43 = vsel %vm2473_vm9, %v2333_v52, %v2510_v33  ;;  %v5724_v29 = vadd.f32 %v7664_v27, %v2160_v5  ;;  %v2162_v6 = vpop.f32.mrb[5].mxu0  ;;  %v3052_v33 = vld [vmem:[#allocation3 + $0x8] sm:$0xfe]  ;;  %v3076_v5 = vld [vmem:[#allocation3] sm:$0xff] }
 0x231   : > { %v2819_v25 = vmul.f32 %v2646_v40, %v2546_v43  ;;  %v2163_v11 = vpop.f32.mrb[6].mxu0  ;;  %v3109_v58 = vshll.u32 %v3076_v5, 16 }
 0x232   : > { %v2338_v44 = vadd.f32 %v5724_v29, %v7518_v8  ;;  %v5725_v19 = vadd.f32 %v7664_v27, %v2163_v11  ;;  %v2165_v45 = vpop.f32.mrb[7].mxu0  ;;  %v6046_v8 = vld [vmem:[%s9298_s3 + $0x60] sm:$0xff]  }
 0x233   : > { %v2854_v46 = vpack.c.bf16 %v2819_v25, %v2818_v62  ;;  %4374 = vmatpush1.bf16.msra.mxu1 %v6046_v8  ;;  %v6047_v62 = vld [vmem:[%s9298_s3 + $0x68] sm:$0xff]  }
 0x234   : > { %vm2474_vm13 = vcmp.gt.f32.partialorder %v2338_v44, 0.0  ;;  %v2511_v0 = vmul.f32 %v7673_v61, %v2338_v44  ;;  %v2341_v22 = vadd.f32 %v5725_v19, %v7522_v38  ;;  %4375 = vmatprep.subr.bf16.mxu1 %v9635_v9  ;;  %v9636_v19 = vld [vmem:[#allocation10_spill] sm:$0xff] }
 0x235   : > { %v2873_v50 = vshrl.u32 %v2854_v46, 16  ;;  %v2876_v31 = vshll.u32 %v2854_v46, 16  ;;  %vm9637_vm15 = vnez %v9636_v19 }
 0x236   : > { %v2547_v35 = vsel %vm2474_vm13, %v2338_v44, %v2511_v0  ;;  %vm2475_vm11 = vcmp.gt.f32.partialorder %v2341_v22, 0.0  ;;  %v2512_v28 = vmul.f32 %v7673_v61, %v2341_v22 }
 0x237   : > { %v2875_v48 = vrot.slane %v2873_v50, 6  ;;  %v2878_v15 = vrot.slane %v2876_v31, 7  ;;  %v2168_v52 = vpop.f32.mrb[8].mxu0  ;;  %v2820_v43 = vmul.f32 %v2651_v4, %v2547_v35  ;;  %4376 = vmatpush1.bf16.msra.mxu1 %v6047_v62  ;;  %v3111_v4 = vrot.slane %v3109_v58, 1  ;;  %v6049_v62 = vld [vmem:[%s9298_s3 + $0x78] sm:$0xff]  }
 0x238   : > { %v2548_v38 = vsel %vm2475_vm11, %v2341_v22, %v2512_v28  ;;  %v5726_v39 = vadd.f32 %v7664_v27, %v2168_v52  ;;  %v2170_v1 = vpop.f32.mrb[9].mxu0  ;;  %4377 = vmatprep.subr.bf16.mxu1 %v9635_v9  ;;  %v2666_v28 = vpop.permute.xlu0 %2665  ;;  %v3107_v52 = vshrl.u32 %v3076_v5, 16  ;;  %vm9644_vm11 = vcmask 1046528  }
 0x239   : > { %v2879_v40 = vor.u32 %v2878_v15, %v2875_v48  ;;  %v2821_v29 = vmul.f32 %v2656_v51, %v2548_v38  ;;  %v2171_v6 = vpop.f32.mrb[10].mxu0 }
 0x23a   : > { %v2346_v25 = vadd.f32 %v5726_v39, %v7537_v42  ;;  %v5727_v11 = vadd.f32 %v7664_v27, %v2171_v6  ;;  %v2173_v44 = vpop.f32.mrb[11].mxu0  ;;  %v6048_v42 = vld [vmem:[%s9298_s3 + $0x70] sm:$0xff]  }
 0x23b   : > { %v3053_v45 = vsel %vm9637_vm15, %v2879_v40, %v3052_v33  ;;  %v2855_v46 = vpack.c.bf16 %v2821_v29, %v2820_v43  ;;  %4378 = vmatpush1.bf16.msra.mxu1 %v6048_v42  ;;  %vm9645_vm15 = vmmov %vm9640_vm7 }
 0x23c   : > { %3054 = vst [vmem:[#allocation3 + $0x8] sm:$0xfe] %v3053_v45  ;;  %vm2476_vm8 = vcmp.gt.f32.partialorder %v2346_v25, 0.0  ;;  %v2513_v0 = vmul.f32 %v7673_v61, %v2346_v25  ;;  %v2349_v22 = vadd.f32 %v5727_v11, %v7541_v16  ;;  %v2661_v16 = vpop.permute.xlu1 %2660  ;;  %4379 = vmatprep.subr.bf16.mxu1 %v9635_v9 }
 0x23d   : > { %v2881_v50 = vshrl.u32 %v2855_v46, 16  ;;  %v2884_v31 = vshll.u32 %v2855_v46, 16  ;;  %v3112_v46 = vor.u32 %v3111_v4, %v3107_v52 }
 0x23e   : > { %v2549_v8 = vsel %vm2476_vm8, %v2346_v25, %v2513_v0  ;;  %vm2477_vm5 = vcmp.gt.f32.partialorder %v2349_v22, 0.0  ;;  %v2514_v35 = vmul.f32 %v7673_v61, %v2349_v22  ;;  %vm9646_vm8 = vmmov %vm9638_vm3 }
 0x23f   : > { %v2883_v51 = vrot.slane %v2881_v50, 6  ;;  %v2886_v48 = vrot.slane %v2884_v31, 7  ;;  %v2176_v15 = vpop.f32.mrb[12].mxu0  ;;  %v2822_v43 = vmul.f32 %v2661_v16, %v2549_v8  ;;  %4380 = vmatpush1.bf16.msra.mxu1 %v6049_v62 }
 0x240   : > { %v2550_v33 = vsel %vm2477_vm5, %v2349_v22, %v2514_v35  ;;  %v5728_v38 = vadd.f32 %v7664_v27, %v2176_v15  ;;  %v2178_v39 = vpop.f32.mrb[13].mxu0  ;;  %4526 = vmatprep.subr.bf16.mxu1 %v9635_v9  ;;  %vm9647_vm5 = vmmov %vm9643_vm1 }
 0x241   : > { %v2887_v1 = vor.u32 %v2886_v48, %v2883_v51  ;;  %v2823_v29 = vmul.f32 %v2666_v28, %v2550_v33  ;;  %v2179_v6 = vpop.f32.mrb[14].mxu0  ;;  %v2671_v48 = vpop.permute.xlu1 %2670 }
 0x242   : > { %v2354_v25 = vadd.f32 %v5728_v38, %v7532_v18  ;;  %v5729_v11 = vadd.f32 %v7664_v27, %v2179_v6  ;;  %v2181_v5 = vpop.f32.mrb[15].mxu0 }
 0x243   : > { %v2888_v44 = vsel %vm9638_vm3, %v2879_v40, %v2887_v1  ;;  %v2856_v19 = vpack.c.bf16 %v2823_v29, %v2822_v43  ;;  %v3077_v45 = vld [vmem:[#allocation3 + $0x8] sm:$0xff]  ;;  %v2676_v40 = vpop.permute.xlu0 %2675 }
 0x244   : > { %3055 = vst.msk [vmem:[#allocation3 + $0x10] sm:$0xff] %vm9639_vm2, %v2888_v44  ;;  %vm2478_vm6 = vcmp.gt.f32.partialorder %v2354_v25, 0.0  ;;  %v2515_v58 = vmul.f32 %v7673_v61, %v2354_v25  ;;  %v2357_v0 = vadd.f32 %v5729_v11, %v7539_v13  ;;  %v3114_v22 = vshll.u32 %v3077_v45, 16  ;;  %v3096_v16 = vld [vmem:[#allocation3 + $0x8] sm:$0xfe] }
 0x245   : > { %v2890_v50 = vshrl.u32 %v2856_v19, 16  ;;  %v2893_v18 = vshll.u32 %v2856_v19, 16  ;;  %v3349_v19 = vrot.slane %v3096_v16, 1 }
 0x246   : > { %v2551_v31 = vsel %vm2478_vm6, %v2354_v25, %v2515_v58  ;;  %vm2479_vm14 = vcmp.gt.f32.partialorder %v2357_v0, 0.0  ;;  %v2516_v42 = vmul.f32 %v7673_v61, %v2357_v0  ;;  %v3116_v8 = vrot.slane %v3114_v22, 1  ;;  %v2628_v25 = vld [vmem:[%s9300_s5 + $0xd0] sm:$0xff]  ;;  %vm9648_vm6 = vmmov %vm9643_vm1 }
 0x247   : > { %v2892_v35 = vrot.slane %v2890_v50, 6  ;;  %v2895_v28 = vrot.slane %v2893_v18, 7  ;;  %v2184_v51 = vpop.f32.mrb[16].mxu0  ;;  %v2824_v38 = vmul.f32 %v2671_v48, %v2551_v31  ;;  %v3118_v50 = vshrl.u32 %v3077_v45, 16  ;;  %v2681_v45 = vpop.permute.xlu1 %2680 }
 0x248   : > { %v2552_v15 = vsel %vm2479_vm14, %v2357_v0, %v2516_v42  ;;  %v5730_v52 = vadd.f32 %v7664_v27, %v2184_v51  ;;  %v2186_v13 = vpop.f32.mrb[17].mxu0  ;;  %v3117_v4 = vsel %vm9640_vm7, %v3112_v46, %v3116_v8  ;;  %vm9649_vm14 = vmmov %vm9644_vm11 }
 0x249   : > { %v2896_v33 = vor.u32 %v2895_v28, %v2892_v35  ;;  %v2825_v39 = vmul.f32 %v2676_v40, %v2552_v15  ;;  %v2187_v43 = vpop.f32.mrb[18].mxu0  ;;  %3254 = vrot.lane.b32.xlu0 %v3117_v4, %s6192_s16  ;;  %v2686_v40 = vpop.permute.xlu0 %2685  ;;  %v3120_v51 = vor.u32 %v3118_v50, %v3116_v8  ;;  %v2627_v4 = vld [vmem:[%s9300_s5 + $0xc8] sm:$0xff] }
 0x24a   : > { %v2362_v29 = vadd.f32 %v5730_v52, %v7560_v47  ;;  %v5731_v6 = vadd.f32 %v7664_v27, %v2187_v43  ;;  %v2189_v62 = vpop.f32.mrb[19].mxu0 }
 0x24b   : > { %v2897_v11 = vsel %vm9641_vm4, %v2887_v1, %v2896_v33  ;;  %v2857_v5 = vpack.c.bf16 %v2825_v39, %v2824_v38  ;;  %v7746_v44 = vld [vmem:[#allocation3 + $0x10] sm:$0xff] }
 0x24c   : > { %9642 = vst [vmem:[#allocation14_spill] sm:$0xff] %v7746_v44  ;;  %3056 = vst.msk [vmem:[#allocation3 + $0x18] sm:$0xff] %vm9643_vm1, %v2897_v11  ;;  %vm2480_vm9 = vcmp.gt.f32.partialorder %v2362_v29, 0.0  ;;  %v2517_v46 = vmul.f32 %v7673_v61, %v2362_v29  ;;  %v2365_v47 = vadd.f32 %v5731_v6, %v7566_v59  ;;  %v7752_v58 = vrot.slane %v7746_v44, 1  ;;  %v3105_v16 = vld [vmem:[#allocation3 + $0x10] sm:$0xf8] }
 0x24d   : > { %v2899_v0 = vshrl.u32 %v2857_v5, 16  ;;  %v2902_v22 = vshll.u32 %v2857_v5, 16  ;;  %2770 = vperm.xlu0 %5992, %v2628_v25   ;;  %v9352_v1 = vshll.u32 %v7746_v44, 16 }
 0x24e   : > { %v2553_v18 = vsel %vm2480_vm9, %v2362_v29, %v2517_v46  ;;  %vm2481_vm13 = vcmp.gt.f32.partialorder %v2365_v47, 0.0  ;;  %v2518_v31 = vmul.f32 %v7673_v61, %v2365_v47  ;;  %v3350_v42 = vsel %vm9644_vm11, %v3349_v19, %v7752_v58  ;;  %v2630_v19 = vld [vmem:[%s9300_s5 + $0xe0] sm:$0xff]  ;;  %vm9650_vm11 = vmmov %vm9643_vm1 }
 0x24f   : > { %v2901_v35 = vrot.slane %v2899_v0, 6  ;;  %v2904_v28 = vrot.slane %v2902_v22, 7  ;;  %v2192_v59 = vpop.f32.mrb[20].mxu0  ;;  %3355 = vrot.lane.b32.xlu1 %v3350_v42, %s6192_s16  ;;  %v3124_v48 = vrot.slane %v9352_v1, 1  ;;  %v2826_v39 = vmul.f32 %v2681_v45, %v2553_v18 }
 0x250   : > { %v2554_v15 = vsel %vm2481_vm13, %v2365_v47, %v2518_v31  ;;  %v5732_v52 = vadd.f32 %v7664_v27, %v2192_v59  ;;  %v2194_v13 = vpop.f32.mrb[21].mxu0  ;;  %v3693_v47 = vrot.slane %v3105_v16, 3  ;;  %v9353_v0 = vshrl.u32 %v7746_v44, 16  ;;  %v2696_v59 = vpop.permute.xlu0 %2695 }
 0x251   : > { %v2905_v38 = vor.u32 %v2904_v28, %v2901_v35  ;;  %v2827_v43 = vmul.f32 %v2686_v40, %v2554_v15  ;;  %v2195_v29 = vpop.f32.mrb[22].mxu0  ;;  %v3125_v6 = vsel %vm9645_vm15, %v3120_v51, %v3124_v48  ;;  %vm9651_vm15 = vmmov %vm9649_vm14 }
 0x252   : > { %v2370_v8 = vadd.f32 %v5732_v52, %v7553_v17  ;;  %v5733_v62 = vadd.f32 %v7664_v27, %v2195_v29  ;;  %3256 = vrot.lane.b32.xlu0 %v3125_v6, %s6192_s16  ;;  %v2197_v25 = vpop.f32.mrb[23].mxu0  ;;  %v2691_v52 = vpop.permute.xlu1 %2690 }
 0x253   : > { %v2906_v11 = vsel %vm9646_vm8, %v2896_v33, %v2905_v38  ;;  %v2858_v5 = vpack.c.bf16 %v2827_v43, %v2826_v39  ;;  %2765 = vperm.xlu1 %5993, %v2627_v4   ;;  %v7773_v46 = vld [vmem:[#allocation3 + $0x18] sm:$0xff]  ;;  %v3128_v39 = vor.u32 %v9353_v0, %v3124_v48  ;;  %v2629_v25 = vld [vmem:[%s9300_s5 + $0xd8] sm:$0xff]  ;;  %vm9652_vm8 = vmmov %vm9640_vm7 }
 0x254   : > { %3057 = vst.msk [vmem:[#allocation3 + $0x20] sm:$0xff] %vm9647_vm5, %v2906_v11  ;;  %vm2482_vm3 = vcmp.gt.f32.partialorder %v2370_v8, 0.0  ;;  %v2519_v17 = vmul.f32 %v7673_v61, %v2370_v8  ;;  %v2373_v22 = vadd.f32 %v5733_v62, %v7564_v34  ;;  %v3694_v33 = vrot.slane %v7773_v46, 3  ;;  %vm9653_vm5 = vmmov %vm9641_vm4 }
 0x255   : > { %v2908_v50 = vshrl.u32 %v2858_v5, 16  ;;  %v2911_v18 = vshll.u32 %v2858_v5, 16  ;;  %v3314_v31 = vrot.slane %v7773_v46, 1  ;;  %v7782_v42 = vshll.u32 %v7773_v46, 16 }
 0x256   : > { %v2555_v40 = vsel %vm2482_vm3, %v2370_v8, %v2519_v17  ;;  %vm2483_vm2 = vcmp.gt.f32.partialorder %v2373_v22, 0.0  ;;  %v2520_v35 = vmul.f32 %v7673_v61, %v2373_v22  ;;  %2780 = vperm.xlu0 %5992, %v2630_v19   ;;  %v3695_v28 = vsel %vm1284_vm12, %v3693_v47, %v3694_v33  ;;  %vm9654_vm3 = vmmov %vm9643_vm1 }
 0x257   : > { %v2910_v51 = vrot.slane %v2908_v50, 6  ;;  %v2913_v45 = vrot.slane %v2911_v18, 7  ;;  %v2200_v34 = vpop.f32.mrb[24].mxu0  ;;  %5678 = vmatprep.mubr.msk.bf16.mxu0 %vm9648_vm6, %v3695_v28  ;;  %v7789_v15 = vsel %vm9649_vm14, %v7752_v58, %v3314_v31  ;;  %v3132_v43 = vrot.slane %v7782_v42, 1  ;;  %vm9655_vm14 = vmmov %vm9643_vm1 }
 0x258   : > { %v2556_v13 = vsel %vm2483_vm2, %v2373_v22, %v2520_v35  ;;  %v5734_v4 = vadd.f32 %v7664_v27, %v2200_v34  ;;  %3357 = vrot.lane.b32.xlu1 %v7789_v15, %s6192_s16  ;;  %v2202_v16 = vpop.f32.mrb[25].mxu0  ;;  %v2828_v6 = vmul.f32 %v2691_v52, %v2555_v40  ;;  %v7808_v50 = vshrl.u32 %v7773_v46, 16  ;;  %v2706_v34 = vpop.permute.xlu0 %2705 }
 0x259   : > { %v2914_v29 = vor.u32 %v2913_v45, %v2910_v51  ;;  %v2829_v8 = vmul.f32 %v2696_v59, %v2556_v13  ;;  %v2203_v62 = vpop.f32.mrb[26].mxu0  ;;  %v3133_v19 = vsel %vm9640_vm7, %v3128_v39, %v3132_v43  ;;  %v2701_v39 = vpop.permute.xlu1 %2700  ;;  %vm9656_vm7 = vmmov %vm9651_vm15 }
 0x25a   : > { %v2378_v11 = vadd.f32 %v5734_v4, %v7589_v37  ;;  %v5735_v5 = vadd.f32 %v7664_v27, %v2203_v62  ;;  %v2205_v47 = vpop.f32.mrb[27].mxu0  ;;  %3258 = vrot.lane.b32.xlu0 %v3133_v19, %s6192_s16 }
 0x25b   : > { %v2915_v17 = vsel %vm9641_vm4, %v2905_v38, %v2914_v29  ;;  %v2859_v48 = vpack.c.bf16 %v2829_v8, %v2828_v6  ;;  %v7805_v22 = vld [vmem:[#allocation3 + $0x20] sm:$0xff]  ;;  %v2632_v38 = vld [vmem:[%s9300_s5 + $0xf0] sm:$0xff]  ;;  %vm9657_vm4 = vmmov %vm9652_vm8 }
 0x25c   : > { %3058 = vst.msk [vmem:[#allocation3 + $0x28] sm:$0xff] %vm9643_vm1, %v2915_v17  ;;  %vm2484_vm9 = vcmp.gt.f32.partialorder %v2378_v11, 0.0  ;;  %v2521_v37 = vmul.f32 %v7673_v61, %v2378_v11  ;;  %v2381_v18 = vadd.f32 %v5735_v5, %v7593_v49  ;;  %2775 = vperm.xlu1 %5993, %v2629_v25   ;;  %v3696_v40 = vrot.slane %v7805_v22, 3  ;;  %vm9658_vm1 = vmmov %vm9653_vm5 }
 0x25d   : > { %v2917_v35 = vshrl.u32 %v2859_v48, 16  ;;  %v2920_v28 = vshll.u32 %v2859_v48, 16  ;;  %v3316_v59 = vrot.slane %v7805_v22, 1  ;;  %v7819_v46 = vshll.u32 %v7805_v22, 16 }
 0x25e   : > { %v2557_v51 = vsel %vm2484_vm9, %v2378_v11, %v2521_v37  ;;  %vm2485_vm13 = vcmp.gt.f32.partialorder %v2381_v18, 0.0  ;;  %v2522_v45 = vmul.f32 %v7673_v61, %v2381_v18  ;;  %v3697_v49 = vsel %vm1284_vm12, %v3694_v33, %v3696_v40  ;;  %2790 = vperm.xlu0 %5992, %v2632_v38   ;;  %vm9659_vm9 = vmmov %vm9654_vm3 }
 0x25f   : > { %v2919_v52 = vrot.slane %v2917_v35, 6  ;;  %v2922_v13 = vrot.slane %v2920_v28, 7  ;;  %v2208_v4 = vpop.f32.mrb[28].mxu0  ;;  %5679 = vmatmul.mubr.msk.bf16.vlgmr.msra.gmra.mrb[72].mxu0 %vm9650_vm11, %v3697_v49  ;;  %v7825_v16 = vsel %vm9651_vm15, %v3314_v31, %v3316_v59  ;;  %v3136_v33 = vor.u32 %v7808_v50, %v3132_v43  ;;  %v2631_v31 = vld [vmem:[%s9300_s5 + $0xe8] sm:$0xff]  ;;  %vm9660_vm15 = vmmov %vm9654_vm3 }
 0x260   : > { %v2558_v6 = vsel %vm2485_vm13, %v2381_v18, %v2522_v45  ;;  %v5736_v8 = vadd.f32 %v7664_v27, %v2208_v4  ;;  %3359 = vrot.lane.b32.xlu1 %v7825_v16, %s6192_s16  ;;  %v2210_v62 = vpop.f32.mrb[29].mxu0  ;;  %v3140_v25 = vrot.slane %v7819_v46, 1  ;;  %v2830_v5 = vmul.f32 %v2701_v39, %v2557_v51  ;;  %v2716_v39 = vpop.permute.xlu0 %2715 }
 0x261   : > { %v2923_v11 = vor.u32 %v2922_v13, %v2919_v52  ;;  %v2831_v19 = vmul.f32 %v2706_v34, %v2558_v6  ;;  %v2211_v47 = vpop.f32.mrb[30].mxu0  ;;  %v7843_v28 = vshrl.u32 %v7805_v22, 16 }
 0x262   : > { %v2386_v17 = vadd.f32 %v5736_v8, %v7584_v23  ;;  %v5737_v48 = vadd.f32 %v7664_v27, %v2211_v47  ;;  %v3141_v37 = vsel %vm9652_vm8, %v3136_v33, %v3140_v25  ;;  %v2213_v18 = vpop.f32.mrb[31].mxu0  ;;  %vm9661_vm8 = vmmov %vm9656_vm7 }
 0x263   : > { %v2924_v38 = vsel %vm9653_vm5, %v2914_v29, %v2923_v11  ;;  %v2860_v43 = vpack.c.bf16 %v2831_v19, %v2830_v5  ;;  %3260 = vrot.lane.b32.xlu0 %v3141_v37, %s6192_s16  ;;  %v7840_v35 = vld [vmem:[#allocation3 + $0x28] sm:$0xff]  ;;  %v2634_v29 = vld [vmem:[%s9300_s5 + $0x100] sm:$0xff]  ;;  %v2711_v5 = vpop.permute.xlu1 %2710  ;;  %vm9662_vm5 = vmmov %vm9657_vm4 }
 0x264   : > { %3059 = vst.msk [vmem:[#allocation3 + $0x30] sm:$0xff] %vm9654_vm3, %v2924_v38  ;;  %vm2486_vm2 = vcmp.gt.f32.partialorder %v2386_v17, 0.0  ;;  %v2523_v23 = vmul.f32 %v7673_v61, %v2386_v17  ;;  %v2389_v51 = vadd.f32 %v5737_v48, %v7591_v24  ;;  %2785 = vperm.xlu1 %5993, %v2631_v31   ;;  %v3698_v45 = vrot.slane %v7840_v35, 3  ;;  %vm9663_vm3 = vmmov %vm9658_vm1 }
 0x265   : > { %v2926_v49 = vshrl.u32 %v2860_v43, 16  ;;  %v2929_v34 = vshll.u32 %v2860_v43, 16  ;;  %v3318_v52 = vrot.slane %v7840_v35, 1  ;;  %v7854_v22 = vshll.u32 %v7840_v35, 16 }
 0x266   : > { %v2559_v13 = vsel %vm2486_vm2, %v2386_v17, %v2523_v23  ;;  %vm2487_vm6 = vcmp.gt.f32.partialorder %v2389_v51, 0.0  ;;  %v2524_v4 = vmul.f32 %v7673_v61, %v2389_v51  ;;  %v3699_v24 = vsel %vm1284_vm12, %v3696_v40, %v3698_v45  ;;  %vm9664_vm2 = vmmov %vm9659_vm9 }
 0x267   : > { %v2928_v6 = vrot.slane %v2926_v49, 6  ;;  %v2931_v8 = vrot.slane %v2929_v34, 7  ;;  %2800 = vperm.xlu0 %5992, %v2634_v29   ;;  %v2216_v62 = vpop.f32.mrb[32].mxu0  ;;  %5682 = vmatprep.mubr.msk.bf16.mxu0 %vm9655_vm14, %v3699_v24  ;;  %v7860_v33 = vsel %vm9656_vm7, %v3316_v59, %v3318_v52  ;;  %v3144_v40 = vor.u32 %v7843_v28, %v3140_v25  ;;  %v2633_v59 = vld [vmem:[%s9300_s5 + $0xf8] sm:$0xff]  ;;  %vm9665_vm7 = vmmov %vm9664_vm2 }
 0x268   : > { %v2560_v19 = vsel %vm2487_vm6, %v2389_v51, %v2524_v4  ;;  %v5738_v47 = vadd.f32 %v7664_v27, %v2216_v62  ;;  %3361 = vrot.lane.b32.xlu1 %v7860_v33, %s6192_s16  ;;  %v2218_v31 = vpop.f32.mrb[33].mxu0  ;;  %v3148_v17 = vrot.slane %v7854_v22, 1  ;;  %v2832_v37 = vmul.f32 %v2711_v5, %v2559_v13 }
 0x269   : > { %v2932_v48 = vor.u32 %v2931_v8, %v2928_v6  ;;  %v2833_v18 = vmul.f32 %v2716_v39, %v2560_v19  ;;  %v2219_v38 = vpop.f32.mrb[34].mxu0  ;;  %v7878_v13 = vshrl.u32 %v7840_v35, 16  ;;  %v2726_v19 = vpop.permute.xlu0 %2725 }
 0x26a   : > { %v5739_v43 = vadd.f32 %v7664_v27, %v2219_v38  ;;  %v2394_v23 = vadd.f32 %v5738_v47, %v7600_v3  ;;  %v3149_v51 = vsel %vm9657_vm4, %v3144_v40, %v3148_v17  ;;  %v2221_v29 = vpop.f32.mrb[35].mxu0  ;;  %vm9666_vm4 = vmmov %vm9661_vm8 }
 0x26b   : > { %v2933_v49 = vsel %vm9658_vm1, %v2923_v11, %v2932_v48  ;;  %v2861_v25 = vpack.c.bf16 %v2833_v18, %v2832_v37  ;;  %3262 = vrot.lane.b32.xlu0 %v3149_v51, %s6192_s16  ;;  %v7875_v34 = vld [vmem:[#allocation3 + $0x30] sm:$0xff]  ;;  %v2636_v11 = vld [vmem:[%s9300_s5 + $0x110] sm:$0xff]  ;;  %v2721_v18 = vpop.permute.xlu1 %2720  ;;  %vm9667_vm1 = vmmov %vm9662_vm5 }
 0x26c   : > { %3060 = vst.msk [vmem:[#allocation3 + $0x38] sm:$0xff] %vm9659_vm9, %v2933_v49  ;;  %vm2488_vm13 = vcmp.gt.f32.partialorder %v2394_v23, 0.0  ;;  %v2525_v4 = vmul.f32 %v7673_v61, %v2394_v23  ;;  %v2397_v3 = vadd.f32 %v5739_v43, %v7604_v56  ;;  %2795 = vperm.xlu1 %5993, %v2633_v59   ;;  %v3700_v24 = vrot.slane %v7875_v34, 3  ;;  %vm9668_vm9 = vmmov %vm9663_vm3 }
 0x26d   : > { %v2935_v39 = vshrl.u32 %v2861_v25, 16  ;;  %v2938_v6 = vshll.u32 %v2861_v25, 16  ;;  %v3320_v8 = vrot.slane %v7875_v34, 1  ;;  %v7889_v35 = vshll.u32 %v7875_v34, 16 }
 0x26e   : > { %v2561_v62 = vsel %vm2488_vm13, %v2394_v23, %v2525_v4  ;;  %vm2489_vm11 = vcmp.gt.f32.partialorder %v2397_v3, 0.0  ;;  %v2526_v5 = vmul.f32 %v7673_v61, %v2397_v3  ;;  %v3701_v56 = vsel %vm1284_vm12, %v3698_v45, %v3700_v24  ;;  %vm9669_vm13 = vmmov %vm9664_vm2 }
 0x26f   : > { %v2937_v47 = vrot.slane %v2935_v39, 6  ;;  %v2940_v31 = vrot.slane %v2938_v6, 7  ;;  %2810 = vperm.xlu0 %5992, %v2636_v11   ;;  %v2224_v40 = vpop.f32.mrb[36].mxu0  ;;  %5683 = vmatmul.mubr.msk.bf16.gmra.mrb[76].mxu0 %vm9660_vm15, %v3701_v56  ;;  %v7895_v37 = vsel %vm9661_vm8, %v3318_v52, %v3320_v8  ;;  %v3152_v45 = vor.u32 %v7878_v13, %v3148_v17  ;;  %v2635_v52 = vld [vmem:[%s9300_s5 + $0x108] sm:$0xff]  ;;  %vm9670_vm8 = vmmov %vm9664_vm2 }
 0x270   : > { %v2562_v38 = vsel %vm2489_vm11, %v2397_v3, %v2526_v5  ;;  %v5740_v59 = vadd.f32 %v7664_v27, %v2224_v40  ;;  %3363 = vrot.lane.b32.xlu1 %v7895_v37, %s6192_s16  ;;  %v2226_v43 = vpop.f32.mrb[37].mxu0  ;;  %v3156_v23 = vrot.slane %v7889_v35, 1  ;;  %v2834_v29 = vmul.f32 %v2721_v18, %v2561_v62 }
 0x271   : > { %v2941_v51 = vor.u32 %v2940_v31, %v2937_v47  ;;  %v2835_v49 = vmul.f32 %v2726_v19, %v2562_v38  ;;  %v2227_v25 = vpop.f32.mrb[38].mxu0  ;;  %v7913_v62 = vshrl.u32 %v7875_v34, 16 }
 0x272   : > { %v2402_v4 = vadd.f32 %v5740_v59, %v7598_v7  ;;  %v5741_v3 = vadd.f32 %v7664_v27, %v2227_v25  ;;  %v3157_v11 = vsel %vm9662_vm5, %v3152_v45, %v3156_v23  ;;  %v2229_v39 = vpop.f32.mrb[39].mxu0  ;;  %v2736_v59 = vpop.permute.xlu0 %2735  ;;  %vm9671_vm5 = vmmov %vm9666_vm4 }
 0x273   : > { %v2942_v6 = vsel %vm9663_vm3, %v2932_v48, %v2941_v51  ;;  %v2862_v17 = vpack.c.bf16 %v2835_v49, %v2834_v29  ;;  %3264 = vrot.lane.b32.xlu0 %v3157_v11, %s6192_s16  ;;  %v7910_v5 = vld [vmem:[#allocation3 + $0x38] sm:$0xff]  ;;  %v2731_v49 = vpop.permute.xlu1 %2730  ;;  %vm9672_vm3 = vmmov %vm9667_vm1 }
 0x274   : > { %3061 = vst.msk [vmem:[#allocation3 + $0x40] sm:$0xff] %vm9664_vm2, %v2942_v6  ;;  %vm2490_vm6 = vcmp.gt.f32.partialorder %v2402_v4, 0.0  ;;  %v2527_v7 = vmul.f32 %v7673_v61, %v2402_v4  ;;  %v2405_v56 = vadd.f32 %v5741_v3, %v7602_v53  ;;  %2805 = vperm.xlu1 %5993, %v2635_v52   ;;  %v3702_v19 = vrot.slane %v7910_v5, 3  ;;  %vm9673_vm2 = vmmov %vm9668_vm9 }
 0x275   : > { %v2944_v47 = vshrl.u32 %v2862_v17, 16  ;;  %v2947_v48 = vshll.u32 %v2862_v17, 16  ;;  %v3322_v31 = vrot.slane %v7910_v5, 1  ;;  %v7921_v40 = vshll.u32 %v7910_v5, 16 }
 0x276   : > { %v2563_v18 = vsel %vm2490_vm6, %v2402_v4, %v2527_v7  ;;  %vm2491_vm14 = vcmp.gt.f32.partialorder %v2405_v56, 0.0  ;;  %v2528_v34 = vmul.f32 %v7673_v61, %v2405_v56  ;;  %v3703_v38 = vsel %vm1284_vm12, %v3700_v24, %v3702_v19  ;;  %vm9674_vm6 = vmmov %vm9665_vm7 }
 0x277   : > { %v2946_v43 = vrot.slane %v2944_v47, 6  ;;  %v2949_v45 = vrot.slane %v2947_v48, 7  ;;  %v2232_v53 = vpop.f32.mrb[40].mxu0  ;;  %5686 = vmatprep.mubr.msk.bf16.mxu0 %vm9665_vm7, %v3703_v38  ;;  %v7927_v29 = vsel %vm9666_vm4, %v3320_v8, %v3322_v31  ;;  %v3160_v3 = vor.u32 %v7913_v62, %v3156_v23  ;;  %v2637_v8 = vld [vmem:[%s9300_s5 + $0x118] sm:$0xff]  ;;  %vm9675_vm4 = vmmov %vm9674_vm6 }
 0x278   : > { %v2564_v25 = vsel %vm2491_vm14, %v2405_v56, %v2528_v34  ;;  %v5742_v52 = vadd.f32 %v7664_v27, %v2232_v53  ;;  %3365 = vrot.lane.b32.xlu1 %v7927_v29, %s6192_s16  ;;  %v2234_v4 = vpop.f32.mrb[41].mxu0  ;;  %v3164_v24 = vrot.slane %v7921_v40, 1  ;;  %v2836_v39 = vmul.f32 %v2731_v49, %v2563_v18 }
 0x279   : > { %v2950_v11 = vor.u32 %v2949_v45, %v2946_v43  ;;  %v2837_v6 = vmul.f32 %v2736_v59, %v2564_v25  ;;  %v2235_v17 = vpop.f32.mrb[42].mxu0  ;;  %v7945_v18 = vshrl.u32 %v7910_v5, 16  ;;  %v2746_v4 = vpop.permute.xlu0 %2745 }
 0x27a   : > { %v5743_v7 = vadd.f32 %v7664_v27, %v2235_v17  ;;  %v2410_v56 = vadd.f32 %v5742_v52, %v7608_v63  ;;  %v3165_v47 = vsel %vm9667_vm1, %v3160_v3, %v3164_v24  ;;  %v2237_v48 = vpop.f32.mrb[43].mxu0  ;;  %v3581_v17 = vrot.slane %v7878_v13, 2  ;;  %vm9676_vm1 = vmmov %vm9671_vm5 }
 0x27b   : > { %v2951_v34 = vsel %vm9668_vm9, %v2941_v51, %v2950_v11  ;;  %v2863_v23 = vpack.c.bf16 %v2837_v6, %v2836_v39  ;;  %3266 = vrot.lane.b32.xlu0 %v3165_v47, %s6192_s16  ;;  %v7942_v38 = vld [vmem:[#allocation3 + $0x40] sm:$0xff]  ;;  %vm9678_vm9 = vmmov %vm9672_vm3 }
 0x27c   : > { %3062 = vst.msk [vmem:[#allocation3 + $0x48] sm:$0xff] %vm9669_vm13, %v2951_v34  ;;  %vm2492_vm11 = vcmp.gt.f32.partialorder %v2410_v56, 0.0  ;;  %v2529_v59 = vmul.f32 %v7673_v61, %v2410_v56  ;;  %v2413_v63 = vadd.f32 %v5743_v7, %v7612_v21  ;;  %2815 = vperm.xlu1 %5993, %v2637_v8   ;;  %v3704_v43 = vrot.slane %v7942_v38, 3  ;;  %v2741_v8 = vpop.permute.xlu1 %2740  ;;  %vm9679_vm13 = vmmov %vm9673_vm2 }
 0x27d   : > { %v2953_v45 = vshrl.u32 %v2863_v23, 16  ;;  %v2956_v51 = vshll.u32 %v2863_v23, 16  ;;  %v3324_v53 = vrot.slane %v7942_v38, 1  ;;  %v7953_v49 = vshll.u32 %v7942_v38, 16 }
 0x27e   : > { %v2565_v25 = vsel %vm2492_vm11, %v2410_v56, %v2529_v59  ;;  %vm2493_vm15 = vcmp.gt.f32.partialorder %v2413_v63, 0.0  ;;  %v2530_v5 = vmul.f32 %v7673_v61, %v2413_v63  ;;  %v3705_v52 = vsel %vm1284_vm12, %v3702_v19, %v3704_v43 }
 0x27f   : > { %v2955_v3 = vrot.slane %v2953_v45, 6  ;;  %v2958_v39 = vrot.slane %v2956_v51, 7  ;;  %v2240_v21 = vpop.f32.mrb[44].mxu0  ;;  %5687 = vmatmul.mubr.msk.bf16.gmra.mrb[80].mxu0 %vm9670_vm8, %v3705_v52  ;;  %v7959_v6 = vsel %vm9671_vm5, %v3322_v31, %v3324_v53  ;;  %v3168_v19 = vor.u32 %v7945_v18, %v3164_v24  ;;  %vm9683_vm8 = vmmov %vm9675_vm4 }
 0x280   : > { %v2566_v7 = vsel %vm2493_vm15, %v2413_v63, %v2530_v5  ;;  %v5744_v56 = vadd.f32 %v7664_v27, %v2240_v21  ;;  %3367 = vrot.lane.b32.xlu1 %v7959_v6, %s6192_s16  ;;  %v2242_v47 = vpop.f32.mrb[45].mxu0  ;;  %v3172_v48 = vrot.slane %v7953_v49, 1  ;;  %v2838_v23 = vmul.f32 %v2741_v8, %v2565_v25  ;;  %vm9682_vm15 = vmmov %vm9675_vm4 }
 0x281   : > { %v2959_v34 = vor.u32 %v2958_v39, %v2955_v3  ;;  %v2839_v59 = vmul.f32 %v2746_v4, %v2566_v7  ;;  %v2243_v45 = vpop.f32.mrb[46].mxu0  ;;  %v3582_v31 = vrot.slane %v7854_v22, 3  ;;  %v7972_v21 = vshrl.u32 %v7942_v38, 16  ;;  %vm9684_vm5 = vmmov %vm9676_vm1 }
 0x282   : > { %v2418_v51 = vadd.f32 %v5744_v56, %v7606_v54  ;;  %v5745_v63 = vadd.f32 %v7664_v27, %v2243_v45  ;;  %v3173_v5 = vsel %vm9672_vm3, %v3168_v19, %v3172_v48  ;;  %v2245_v52 = vpop.f32.mrb[47].mxu0  ;;  %v3585_v4 = vrot.slane %v7913_v62, 2  ;;  %v2756_v45 = vpop.permute.xlu0 %2755 }
 0x283   : > { %v2960_v24 = vsel %vm9673_vm2, %v2950_v11, %v2959_v34  ;;  %v2864_v47 = vpack.c.bf16 %v2839_v59, %v2838_v23  ;;  %3268 = vrot.lane.b32.xlu0 %v3173_v5, %s6192_s16  ;;  %v3085_v25 = vld [vmem:[#allocation3 + $0x48] sm:$0xff]  ;;  %v3586_v3 = vrot.slane %v7889_v35, 3  ;;  %vm9680_vm11 = vsmask.f32 5376 }
 0x284   : > { %3063 = vst.msk [vmem:[#allocation3 + $0x50] sm:$0xff] %vm9674_vm6, %v2960_v24  ;;  %vm2494_vm14 = vcmp.gt.f32.partialorder %v2418_v51, 0.0  ;;  %v2531_v54 = vmul.f32 %v7673_v61, %v2418_v51  ;;  %v2421_v39 = vadd.f32 %v5745_v63, %v7610_v2  ;;  %v3706_v8 = vrot.slane %v3085_v25, 3  ;;  %vm9685_vm6 = vmmov %vm9675_vm4 }
 0x285   : > { %v2962_v38 = vshrl.u32 %v2864_v47, 16  ;;  %v2965_v7 = vshll.u32 %v2864_v47, 16  ;;  %v3326_v56 = vrot.slane %v3085_v25, 1  ;;  %v7981_v11 = vshll.u32 %v3085_v25, 16  ;;  %v2751_v47 = vpop.permute.xlu1 %2750 }
 0x286   : > { %v2567_v19 = vsel %vm2494_vm14, %v2418_v51, %v2531_v54  ;;  %vm2495_vm7 = vcmp.gt.f32.partialorder %v2421_v39, 0.0  ;;  %v2532_v23 = vmul.f32 %v7673_v61, %v2421_v39  ;;  %v3707_v59 = vsel %vm1284_vm12, %v3704_v43, %v3706_v8  ;;  %vm9686_vm14 = vmmov %vm9680_vm11 }
 0x287   : > { %v2964_v5 = vrot.slane %v2962_v38, 6  ;;  %v2967_v52 = vrot.slane %v2965_v7, 7  ;;  %v2248_v24 = vpop.f32.mrb[48].mxu0  ;;  %5690 = vmatprep.mubr.msk.bf16.mxu0 %vm9675_vm4, %v3707_v59  ;;  %v7987_v2 = vsel %vm9676_vm1, %v3324_v53, %v3326_v56  ;;  %v7989_v63 = vor.u32 %v3582_v31, %v3581_v17 }
 0x288   : > { %v2568_v1 = vsel %vm2495_vm7, %v2421_v39, %v2532_v23  ;;  %v5746_v51 = vadd.f32 %v7664_v27, %v2248_v24  ;;  %3369 = vrot.lane.b32.xlu1 %v7987_v2, %s6192_s16  ;;  %v2250_v54 = vpop.f32.mrb[49].mxu0  ;;  %v3176_v43 = vor.u32 %v7972_v21, %v3172_v48  ;;  %v3180_v38 = vrot.slane %v7981_v11, 1  ;;  %vm9688_vm7 = vmmov %vm9676_vm1 }
 0x289   : > { %9677 = vst [vmem:[#allocation31_spill] sm:$0xff] %v7989_v63  ;;  %v2968_v7 = vor.u32 %v2967_v52, %v2964_v5  ;;  %v2840_v0 = vmul.f32 %v2751_v47, %v2567_v19  ;;  %v2841_v59 = vmul.f32 %v2756_v45, %v2568_v1  ;;  %v2251_v44 = vpop.f32.mrb[50].mxu0  ;;  %v3587_v53 = vor.u32 %v3586_v3, %v3585_v4  ;;  %vm9689_vm1 = vmmov %vm9672_vm3 }
 0x28a   : > { %v5747_v17 = vadd.f32 %v7664_v27, %v2251_v44  ;;  %v7998_v31 = vadd.f32 %v5746_v51, %v7623_v55  ;;  %v3181_v39 = vsel %vm9678_vm9, %v3176_v43, %v3180_v38  ;;  %v2253_v23 = vpop.f32.mrb[51].mxu0  ;;  %v8011_v1 = vshrl.u32 %v3085_v25, 16  ;;  %vm9690_vm9 = vmmov %vm9680_vm11 }
 0x28b   : > { %v2969_v24 = vsel %vm9679_vm13, %v2959_v34, %v2968_v7  ;;  %v2865_v54 = vpack.c.bf16 %v2841_v59, %v2840_v0  ;;  %3270 = vrot.lane.b32.xlu0 %v3181_v39, %s6192_s16  ;;  %v3086_v48 = vld [vmem:[#allocation3 + $0x50] sm:$0xff]  ;;  %v8005_v19 = vsel %vm9680_vm11, %v7989_v63, %v3587_v53  ;;  %v3589_v52 = vrot.slane %v7945_v18, 2  ;;  %vm9692_vm13 = vmmov %vm9690_vm9 }
 0x28c   : > { %9681 = vst [vmem:[#allocation16_spill] sm:$0xff] %v8005_v19  ;;  %3064 = vst.msk [vmem:[#allocation3 + $0x58] sm:$0xff] %vm9682_vm15, %v2969_v24  ;;  %v8009_v44 = vadd.f32 %v5747_v17, %v7628_v36  ;;  %v3708_v55 = vrot.slane %v3086_v48, 3  ;;  %v3328_v45 = vrot.slane %v3086_v48, 1  ;;  %v8013_v34 = vshll.u32 %v3086_v48, 16 }
 0x28d   : > { %v2971_v4 = vshrl.u32 %v2865_v54, 16  ;;  %v2974_v3 = vshll.u32 %v2865_v54, 16  ;;  %v3184_v5 = vor.u32 %v8011_v1, %v3180_v38  ;;  %v3590_v38 = vrot.slane %v7921_v40, 3  ;;  %vm9694_vm11 = vmmov %vm9684_vm5 }
 0x28e   : > { %v3709_v0 = vsel %vm1284_vm12, %v3706_v8, %v3708_v55  ;;  %v8020_v36 = vsel %vm9684_vm5, %v3326_v56, %v3328_v45  ;;  %v3188_v25 = vrot.slane %v8013_v34, 1  ;;  %v8036_v56 = vld [vmem:[%s9297_s2] ss:$0 sm:$0xff]  ;;  %vm9696_vm15 = vmmov %vm9675_vm4 }
 0x28f   : > { %v2973_v47 = vrot.slane %v2971_v4, 6  ;;  %v2976_v51 = vrot.slane %v2974_v3, 7  ;;  %v2256_v43 = vpop.f32.mrb[52].mxu0  ;;  %5691 = vmatmul.mubr.msk.bf16.gmra.mrb[84].mxu0 %vm9683_vm8, %v3709_v0  ;;  %3371 = vrot.lane.b32.xlu1 %v8020_v36, %s6192_s16  ;;  %v3591_v4 = vor.u32 %v3590_v38, %v3589_v52  ;;  %vm9697_vm8 = vmmov %vm9689_vm1 }
 0x290   : > { %v5748_v59 = vadd.f32 %v7664_v27, %v2256_v43  ;;  %v2258_v8 = vpop.f32.mrb[53].mxu0  ;;  %v3189_v23 = vsel %vm9672_vm3, %v3184_v5, %v3188_v25  ;;  %v3594_v5 = vrot.slane %v7953_v49, 3  ;;  %vm9698_vm5 = vmmov %vm9690_vm9 }
 0x291   : > { %v8027_v17 = vor.u32 %v2976_v51, %v2973_v47  ;;  %v2259_v39 = vpop.f32.mrb[54].mxu0  ;;  %3272 = vrot.lane.b32.xlu0 %v3189_v23, %s6192_s16  ;;  %v8042_v47 = vshrl.u32 %v3086_v48, 16  ;;  %v8053_v52 = vsel %vm9686_vm14, %v3587_v53, %v3591_v4  ;;  %vm9699_vm3 = vmmov %vm9698_vm5 }
 0x292   : > { %v8031_v24 = vadd.f32 %v5748_v59, %v7621_v10  ;;  %v5749_v27 = vadd.f32 %v8036_v56, %v2259_v39  ;;  %v2261_v54 = vpop.f32.mrb[55].mxu0  ;;  %v3593_v10 = vrot.slane %v7972_v21, 2  ;;  %9687 = vst [vmem:[#allocation28_spill] sm:$0xff] %v8053_v52 }
 0x293   : > { %v2978_v3 = vsel %vm9673_vm2, %v2968_v7, %v8027_v17  ;;  %v3087_v0 = vld [vmem:[#allocation3 + $0x58] sm:$0xff]  ;;  %v3192_v38 = vor.u32 %v8042_v47, %v3188_v25  ;;  %v3598_v25 = vrot.slane %v7981_v11, 3  ;;  %vm9700_vm2 = vmmov %vm9699_vm3 }
 0x294   : > { %3065 = vst.msk [vmem:[#allocation3 + $0x60] sm:$0xff] %vm9685_vm6, %v2978_v3  ;;  %v8048_v51 = vadd.f32 %v5749_v27, %v7625_v57  ;;  %v3710_v43 = vrot.slane %v3087_v0, 3  ;;  %v3330_v59 = vrot.slane %v3087_v0, 1  ;;  %v8050_v8 = vshll.u32 %v3087_v0, 16 }
 0x295   : > { %v3597_v57 = vrot.slane %v8011_v1, 2  ;;  %v3595_v54 = vor.u32 %v3594_v5, %v3593_v10  ;;  %v3602_v10 = vrot.slane %v8013_v34, 3  ;;  %vm9702_vm6 = vsmask.f32 6400 }
 0x296   : > { %v3711_v7 = vsel %vm1284_vm12, %v3708_v55, %v3710_v43  ;;  %v8057_v48 = vsel %vm9688_vm7, %v3328_v45, %v3330_v59  ;;  %v3196_v39 = vrot.slane %v8050_v8, 1  ;;  %vm9704_vm14 = vmmov %vm9702_vm6 }
 0x297   : > { %v2264_v23 = vpop.f32.mrb[56].mxu0  ;;  %5694 = vmatprep.mubr.msk.bf16.mxu0 %vm9675_vm4, %v3711_v7  ;;  %3373 = vrot.lane.b32.xlu1 %v8057_v48, %s6192_s16  ;;  %v8074_v19 = vsel %vm9690_vm9, %v3591_v4, %v3595_v54  ;;  %vm9706_vm7 = vmmov %vm9702_vm6 }
 0x298   : > { %v5750_v53 = vadd.f32 %v8036_v56, %v2264_v23  ;;  %v2266_v27 = vpop.f32.mrb[57].mxu0  ;;  %v3197_v55 = vsel %vm9689_vm1, %v3192_v38, %v3196_v39  ;;  %9691 = vst [vmem:[#allocation19_spill] sm:$0xff] %v8074_v19  ;;  %v3599_v23 = vor.u32 %v3598_v25, %v3597_v57  ;;  %v3601_v38 = vrot.slane %v8042_v47, 2  ;;  %vm9708_vm4 = vmmov %vm9702_vm6 }
 0x299   : > { %v2267_v45 = vpop.f32.mrb[58].mxu0  ;;  %3274 = vrot.lane.b32.xlu0 %v3197_v55, %s6192_s16  ;;  %vm9710_vm1 = vmmov %vm9708_vm4 }
 0x29a   : > { %v5751_v3 = vadd.f32 %v8036_v56, %v2267_v45  ;;  %v8071_v7 = vadd.f32 %v5750_v53, %v7644_v60  ;;  %v2269_v52 = vpop.f32.mrb[59].mxu0  ;;  %v8085_v60 = vshrl.u32 %v3087_v0, 16  ;;  %v8091_v4 = vsel %vm9692_vm13, %v3595_v54, %v3599_v23  ;;  %vm9712_vm9 = vmmov %vm9710_vm1 }
 0x29b   : > { %v8076_v63 = vld [vmem:[#allocation3 + $0x60] sm:$0xff]  ;;  %9693 = vst [vmem:[#allocation21_spill] sm:$0xff] %v8091_v4  ;;  %v3603_v25 = vor.u32 %v3602_v10, %v3601_v38  ;;  %vm9714_vm13 = vmmov %vm9710_vm1 }
 0x29c   : > { %v8081_v5 = vadd.f32 %v5751_v3, %v7651_v26  ;;  %v9358_v27 = vrot.slane %v8076_v63, 3  ;;  %v9357_v55 = vrot.slane %v8076_v63, 1  ;;  %v8088_v52 = vshll.u32 %v8076_v63, 16 }
 0x29d   : > { %v8102_v53 = vshrl.u32 %v8076_v63, 16  ;;  %v3200_v54 = vor.u32 %v8085_v60, %v3196_v39  ;;  %v8116_v4 = vsel %vm9698_vm5, %v3599_v23, %v3603_v25  ;;  %vm2496_vm5 = vcmp.gt.f32.partialorder %v7998_v31, 0.0 }
 0x29e   : > { %v3713_v57 = vsel %vm1284_vm12, %v3710_v43, %v9358_v27  ;;  %v8099_v26 = vsel %vm9694_vm11, %v3330_v59, %v9357_v55  ;;  %v3204_v45 = vrot.slane %v8088_v52, 1  ;;  %v3605_v59 = vrot.slane %v8085_v60, 2 }
 0x29f   : > { %9695 = vst [vmem:[#allocation22_spill] sm:$0xff] %v8099_v26  ;;  %v2272_v0 = vpop.f32.mrb[60].mxu0  ;;  %5695 = vmatmul.mubr.msk.bf16.gmra.mrb[88].mxu0 %vm9696_vm15, %v3713_v57  ;;  %3375 = vrot.lane.b32.xlu1 %v8099_v26, %s6192_s16  ;;  %v3606_v55 = vrot.slane %v8050_v8, 3  ;;  %v3610_v26 = vrot.slane %v8088_v52, 3 }
 0x2a0   : > { %v5752_v43 = vadd.f32 %v8036_v56, %v2272_v0  ;;  %v2274_v3 = vpop.f32.mrb[61].mxu0  ;;  %v3205_v57 = vsel %vm9697_vm8, %v3200_v54, %v3204_v45  ;;  %vm9716_vm8 = vmmov %vm9696_vm15 }
 0x2a1   : > { %v2275_v27 = vpop.f32.mrb[62].mxu0  ;;  %3276 = vrot.lane.b32.xlu0 %v3205_v57, %s6192_s16  ;;  %v3607_v0 = vor.u32 %v3606_v55, %v3605_v59  ;;  %v3609_v3 = vrot.slane %v8102_v53, 2  ;;  %v3411_v57 = vrot.slane %v7878_v13, 1 }
 0x2a2   : > { %v8119_v39 = vadd.f32 %v5752_v43, %v7641_v20  ;;  %v5753_v38 = vadd.f32 %v8036_v56, %v2275_v27  ;;  %v2277_v10 = vpop.f32.mrb[63].mxu0 }
 0x2a3   : > { %v8129_v54 = vsel %vm9699_vm3, %v3603_v25, %v3607_v0  ;;  %v8131_v23 = vor.u32 %v3610_v26, %v3609_v3  ;;  %v3412_v26 = vrot.slane %v7854_v22, 2  ;;  %v3416_v3 = vrot.slane %v7889_v35, 2 }
 0x2a4   : > { %v8126_v19 = vadd.f32 %v5753_v38, %v7649_v14  ;;  %v3415_v38 = vrot.slane %v7913_v62, 1  ;;  %vm2497_vm3 = vcmp.gt.f32.partialorder %v8009_v44, 0.0 }
 0x2a5   : > { %v8135_v27 = vsel %vm9700_vm2, %v3607_v0, %v8131_v23  ;;  %v3419_v0 = vrot.slane %v7945_v18, 1  ;;  %v3424_v18 = vrot.slane %v7953_v49, 2  ;;  %v3432_v49 = vrot.slane %v8013_v34, 2  ;;  %vm9717_vm2 = vmmov %vm9694_vm11 }
 0x2a6   : > { %v3417_v13 = vor.u32 %v3416_v3, %v3415_v38 }
 0x2a7   : > { %v2280_v20 = vpop.f32.mrb[64].mxu0 }
 0x2a8   : > { %v5754_v43 = vadd.f32 %v8036_v56, %v2280_v20  ;;  %v2282_v55 = vpop.f32.mrb[65].mxu0 }
 0x2a9   : > { %v2283_v59 = vpop.f32.mrb[66].mxu0  ;;  %v8150_v55 = vor.u32 %v3412_v26, %v3411_v57 }
 0x2aa   : > { %v5755_v10 = vadd.f32 %v8036_v56, %v2283_v59  ;;  %v8141_v14 = vadd.f32 %v5754_v43, %v7678_v30  ;;  %v2285_v25 = vpop.f32.mrb[67].mxu0  ;;  %v3420_v59 = vrot.slane %v7921_v40, 2  ;;  %v3423_v30 = vrot.slane %v7972_v21, 1 }
 0x2ab   : > { %9701 = vst [vmem:[#allocation23_spill] sm:$0xff] %v8150_v55  ;;  %v8156_v22 = vsel %vm9702_vm6, %v8150_v55, %v3417_v13  ;;  %v3428_v40 = vrot.slane %v7981_v11, 2  ;;  %vm9718_vm6 = vmmov %vm9716_vm8 }
 0x2ac   : > { %v8148_v20 = vadd.f32 %v5755_v10, %v7687_v32  ;;  %9703 = vst [vmem:[#allocation24_spill] sm:$0xff] %v8156_v22  ;;  %v3421_v62 = vor.u32 %v3420_v59, %v3419_v0  ;;  %v3427_v32 = vrot.slane %v8011_v1, 1  ;;  %v3425_v3 = vor.u32 %v3424_v18, %v3423_v30  ;;  %v2761_v18 = vpop.permute.xlu0 %2760 }
 0x2ad   : > { %v3431_v0 = vrot.slane %v8042_v47, 1  ;;  %v3435_v1 = vrot.slane %v8085_v60, 1  ;;  %v3439_v30 = vrot.slane %v8102_v53, 1  ;;  %v3440_v47 = vrot.slane %v8088_v52, 2 }
 0x2ae   : > { %v8162_v10 = vsel %vm9704_vm14, %v3417_v13, %v3421_v62  ;;  %v3429_v59 = vor.u32 %v3428_v40, %v3427_v32  ;;  %v8176_v13 = vsel %vm9706_vm7, %v3421_v62, %v3425_v3  ;;  %v3095_v62 = vld [vmem:[#allocation3] sm:$0xfe]  ;;  %v6089_v32 = vld [vmem:[#allocation3 + $0x8] sm:$0xff]  ;;  %vm2498_vm14 = vcmp.gt.f32.partialorder %v8031_v24, 0.0  ;;  %vm9719_vm7 = vmmov %vm9718_vm6 }
 0x2af   : > { %v2288_v43 = vpop.f32.mrb[68].mxu0  ;;  %9705 = vst [vmem:[#allocation25_spill] sm:$0xff] %v8162_v10  ;;  %9707 = vst [vmem:[#allocation26_spill] sm:$0xff] %v8176_v13  ;;  %v3433_v11 = vor.u32 %v3432_v49, %v3431_v0  ;;  %v2540_v52 = vmul.f32 %v7673_v61, %v8126_v19  ;;  %v8553_v13 = vld [vmem:[#allocation3 + $0x40] sm:$0xff] }
 0x2b0   : > { %v5756_v35 = vadd.f32 %v8036_v56, %v2288_v43  ;;  %v2290_v25 = vpop.f32.mrb[69].mxu0  ;;  %v8563_v10 = vld [vmem:[#allocation3 + $0xa0] sm:$0x7] }
 0x2b1   : > { %v2291_v57 = vpop.f32.mrb[70].mxu0  ;;  %v8185_v34 = vsel %vm9710_vm1, %v3429_v59, %v3433_v11  ;;  %vm9720_vm1 = vsmask.f32 1280 }
 0x2b2   : > { %v8166_v21 = vadd.f32 %v5756_v35, %v7671_v41  ;;  %v5757_v26 = vadd.f32 %v8036_v56, %v2291_v57  ;;  %v2293_v38 = vpop.f32.mrb[71].mxu0  ;;  %v8179_v41 = vsel %vm9708_vm4, %v3425_v3, %v3429_v59  ;;  %v3436_v56 = vrot.slane %v8050_v8, 2  ;;  %9711 = vst [vmem:[#allocation29_spill] sm:$0xff] %v8185_v34  ;;  %v6050_v3 = vld [vmem:[%s9298_s3 + $0x80] sm:$0xff]   ;;  %v6090_v59 = vld [vmem:[#allocation3] sm:$0xff] }
 0x2b3   : > { %9709 = vst [vmem:[#allocation27_spill] sm:$0xff] %v8179_v41  ;;  %v8187_v35 = vor.u32 %v3440_v47, %v3439_v30  ;;  %v3309_v8 = vrot.slane %v3095_v62, 1  ;;  %v3310_v57 = vrot.slane %v6089_v32, 1  ;;  %v6053_v47 = vld [vmem:[%s9298_s3 + $0x98] sm:$0xff]   ;;  %vm2499_vm4 = vcmp.gt.f32.partialorder %v8048_v51, 0.0 }
 0x2b4   : > { %v8173_v43 = vadd.f32 %v5757_v26, %v7685_v12  ;;  %v3437_v60 = vor.u32 %v3436_v56, %v3435_v1  ;;  %v6051_v1 = vld [vmem:[%s9298_s3 + $0x88] sm:$0xff]   ;;  %v2533_v56 = vmul.f32 %v7673_v61, %v7998_v31 }
 0x2b5   : > { %v3311_v38 = vsel %vm9694_vm11, %v3309_v8, %v3310_v57  ;;  %vm9722_vm11 = vmmov %vm9718_vm6 }
 0x2b6   : > { %v8190_v12 = vsel %vm9712_vm9, %v3433_v11, %v3437_v60  ;;  %v8194_v25 = vsel %vm9714_vm13, %v3437_v60, %v8187_v35  ;;  %v6052_v11 = vld [vmem:[%s9298_s3 + $0x90] sm:$0xff]   ;;  %v2534_v60 = vmul.f32 %v7673_v61, %v8009_v44  ;;  %v2569_v62 = vsel %vm2496_vm5, %v7998_v31, %v2533_v56  ;;  %vm9721_vm9 = vmmov %vm9718_vm6 }
 0x2b7   : > { %9713 = vst [vmem:[#allocation30_spill] sm:$0xff] %v8190_v12  ;;  %9715 = vst [vmem:[#allocation33_spill] sm:$0xff] %v8194_v25  ;;  %vm2500_vm13 = vcmp.gt.f32.partialorder %v8071_v7, 0.0  ;;  %vm2502_vm5 = vcmp.gt.f32.partialorder %v8119_v39, 0.0 }
 0x2bb   : > { %v3255_v40 = vpop.permute.xlu0 %3254 }
 0x2bc   : > { %v3731_v49 = vsel %vm9716_vm8, %v6090_v59, %v3255_v40  ;;  %v6054_v40 = vld [vmem:[%s9298_s3 + $0xa0] sm:$0xff]   ;;  %vm9723_vm8 = vmmov %vm9718_vm6 }
 0x2c1   : > { %v3356_v26 = vpop.permute.xlu1 %3355 }
 0x2c2   : > { %v3786_v0 = vsel %vm9696_vm15, %v3311_v38, %v3356_v26  ;;  %v2570_v26 = vsel %vm2497_vm3, %v8009_v44, %v2534_v60  ;;  %v6055_v44 = vld [vmem:[%s9298_s3 + $0xa8] sm:$0xff]   ;;  %v2536_v60 = vmul.f32 %v7673_v61, %v8048_v51  ;;  %vm2501_vm15 = vcmp.gt.f32.partialorder %v8081_v5, 0.0 }
 0x2c3   : > { %4381 = vmatprep.mubr.bf16.mxu1 %v3786_v0  ;;  %vm2503_vm3 = vcmp.gt.f32.partialorder %v8126_v19, 0.0 }
 0x2c4   : > { %4382 = vmatmul.mubr.bf16.vlgmr.msra.gmra.mrb[36].mxu1 %v3731_v49 }
 0x2c5   : > { %4527 = vmatpush1.bf16.msra.mxu1 %v6050_v3  ;;  %v2842_v3 = vmul.f32 %v2761_v18, %v2569_v62 }
 0x2c6   : > { %4528 = vmatprep.subr.bf16.mxu1 %v9635_v9 }
 0x2c9   : > { %4529 = vmatpush1.bf16.msra.mxu1 %v6051_v1  ;;  %v2535_v1 = vmul.f32 %v7673_v61, %v8031_v24 }
 0x2ca   : > { %4530 = vmatprep.subr.bf16.mxu1 %v9635_v9 }
 0x2cc   : > { %v2771_v30 = vpop.permute.xlu0 %2770 }
 0x2cd   : > { %4531 = vmatpush1.bf16.msra.mxu1 %v6052_v11  ;;  %v3313_v11 = vsel %vm9717_vm2, %v3310_v57, %v7752_v58  ;;  %vm9724_vm2 = vmmov %vm9720_vm1 }
 0x2ce   : > { %4532 = vmatprep.subr.bf16.mxu1 %v9635_v9 }
 0x2d0   : > { %v3257_v8 = vpop.permute.xlu0 %3256 }
 0x2d1   : > { %4533 = vmatpush1.bf16.msra.mxu1 %v6053_v47  ;;  %v3734_v62 = vsel %vm9719_vm7, %v6089_v32, %v3257_v8  ;;  %vm9726_vm7 = vmmov %vm9718_vm6 }
 0x2d2   : > { %v2766_v38 = vpop.permute.xlu1 %2765  ;;  %4534 = vmatprep.subr.bf16.mxu1 %v9635_v9 }
 0x2d3   : > { %v2843_v0 = vmul.f32 %v2766_v38, %v2570_v26  ;;  %v6056_v26 = vld [vmem:[%s9298_s3 + $0xb0] sm:$0xff]   ;;  %v2571_v38 = vsel %vm2498_vm14, %v8031_v24, %v2535_v1  ;;  %v2537_v24 = vmul.f32 %v7673_v61, %v8071_v7  ;;  %vm9725_vm14 = vmmov %vm9718_vm6 }
 0x2d4   : > { %v2844_v32 = vmul.f32 %v2771_v30, %v2571_v38 }
 0x2d5   : > { %v2866_v59 = vpack.c.bf16 %v2843_v0, %v2842_v3  ;;  %v2781_v49 = vpop.permute.xlu0 %2780  ;;  %4535 = vmatpush1.bf16.msra.mxu1 %v6054_v40  ;;  %v2572_v0 = vsel %vm2499_vm4, %v8048_v51, %v2536_v60  ;;  %v2538_v51 = vmul.f32 %v7673_v61, %v8081_v5  ;;  %vm9728_vm4 = vmmov %vm9718_vm6 }
 0x2d6   : > { %v3358_v31 = vpop.permute.xlu1 %3357  ;;  %4536 = vmatprep.subr.bf16.mxu1 %v9635_v9 }
 0x2d7   : > { %v2980_v56 = vshrl.u32 %v2866_v59, 16  ;;  %v2983_v47 = vshll.u32 %v2866_v59, 16  ;;  %v3790_v18 = vsel %vm9718_vm6, %v3313_v11, %v3358_v31  ;;  %v2574_v38 = vsel %vm2501_vm15, %v8081_v5, %v2538_v51  ;;  %vm9733_vm15 = vmmov %vm9724_vm2 }
 0x2d8   : > { %4389 = vmatprep.mubr.bf16.mxu1 %v3790_v18  ;;  %v8263_v18 = vld [vmem:[#allocation3 + $0x10] sm:$0xff] }
 0x2d9   : > { %v2982_v58 = vrot.slane %v2980_v56, 6  ;;  %v2985_v57 = vrot.slane %v2983_v47, 7  ;;  %v3259_v40 = vpop.permute.xlu0 %3258  ;;  %4390 = vmatmul.mubr.bf16.gmra.mrb[40].mxu1 %v3734_v62 }
 0x2da   : > { %4537 = vmatpush1.bf16.msra.mxu1 %v6055_v44  ;;  %v3737_v60 = vsel %vm9723_vm8, %v8263_v18, %v3259_v40  ;;  %v2539_v40 = vmul.f32 %v7673_v61, %v8119_v39  ;;  %vm2505_vm8 = vcmp.gt.f32.partialorder %v8148_v20, 0.0 }
 0x2db   : > { %v2986_v3 = vor.u32 %v2985_v57, %v2982_v58  ;;  %v2776_v59 = vpop.permute.xlu1 %2775  ;;  %4538 = vmatprep.subr.bf16.mxu1 %v9635_v9 }
 0x2dc   : > { %v2845_v8 = vmul.f32 %v2776_v59, %v2572_v0 }
 0x2dd   : > { %v2987_v31 = vsel %vm9720_vm1, %v8027_v17, %v2986_v3  ;;  %v8249_v44 = vpop.permute.xlu0 %2790  ;;  %v6057_v17 = vld [vmem:[%s9298_s3 + $0xb8] sm:$0xff]   ;;  %vm9730_vm1 = vcmask 1046528  }
 0x2de   : > { %3066 = vst.msk [vmem:[#allocation3 + $0x68] sm:$0xff] %vm9721_vm9, %v2987_v31  ;;  %v2867_v11 = vpack.c.bf16 %v2845_v8, %v2844_v32  ;;  %4539 = vmatpush1.bf16.msra.mxu1 %v6056_v26  ;;  %v2573_v26 = vsel %vm2500_vm13, %v8071_v7, %v2537_v24  ;;  %v3208_v7 = vor.u32 %v8102_v53, %v3204_v45  ;;  %vm9731_vm9 = vsmask.f32 7424 }
 0x2df   : > { %v3360_v1 = vpop.permute.xlu1 %3359  ;;  %4540 = vmatprep.subr.bf16.mxu1 %v9635_v9  ;;  %v2846_v59 = vmul.f32 %v2781_v49, %v2573_v26  ;;  %vm2504_vm13 = vcmp.gt.f32.partialorder %v8141_v14, 0.0 }
 0x2e0   : > { %v2989_v30 = vshrl.u32 %v2867_v11, 16  ;;  %v2992_v56 = vshll.u32 %v2867_v11, 16  ;;  %v3794_v47 = vsel %vm9722_vm11, %v7789_v15, %v3360_v1  ;;  %v6058_v15 = vld [vmem:[%s9298_s3 + $0xc0] sm:$0xff]   ;;  %vm9732_vm11 = vsmask.f32 5376 }
 0x2e1   : > { %4397 = vmatprep.mubr.bf16.mxu1 %v3794_v47  ;;  %v3261_v57 = vpop.permute.xlu0 %3260 }
 0x2e2   : > { %v2991_v62 = vrot.slane %v2989_v30, 6  ;;  %v2994_v58 = vrot.slane %v2992_v56, 7  ;;  %4398 = vmatmul.mubr.bf16.gmra.mrb[44].mxu1 %v3737_v60 }
 0x2e3   : > { %v2786_v0 = vpop.permute.xlu1 %2785  ;;  %4541 = vmatpush1.bf16.msra.mxu1 %v6057_v17  ;;  %v8288_v17 = vld [vmem:[#allocation3 + $0x18] sm:$0xff] }
 0x2e4   : > { %v2995_v32 = vor.u32 %v2994_v58, %v2991_v62  ;;  %v2847_v8 = vmul.f32 %v2786_v0, %v2574_v38  ;;  %4542 = vmatprep.subr.bf16.mxu1 %v9635_v9  ;;  %v3740_v30 = vsel %vm9725_vm14, %v8288_v17, %v3261_v57  ;;  %v9727_v62 = vrot.slane %v8076_v63, 3 }
 0x2e5   : > { %v8276_v31 = vld [vmem:[#allocation3 + $0x68] sm:$0xff]  ;;  %v9729_v57 = vrot.slane %v8076_v63, 1  ;;  %v2576_v63 = vsel %vm2503_vm3, %v8126_v19, %v2540_v52  ;;  %v2541_v19 = vmul.f32 %v7673_v61, %v8141_v14  ;;  %vm9735_vm3 = vmmov %vm9728_vm4 }
 0x2e6   : > { %v2996_v5 = vsel %vm9724_vm2, %v2986_v3, %v2995_v32  ;;  %v2868_v49 = vpack.c.bf16 %v2847_v8, %v2846_v59  ;;  %v8283_v11 = vpop.permute.xlu0 %2800  ;;  %v3714_v24 = vrot.slane %v8276_v31, 3  ;;  %v3334_v51 = vrot.slane %v8276_v31, 1  ;;  %v6059_v3 = vld [vmem:[%s9298_s3 + $0xc8] sm:$0xff]   ;;  %vm9736_vm2 = vmmov %vm9730_vm1 }
 0x2e7   : > { %3067 = vst.msk [vmem:[#allocation3 + $0x70] sm:$0xff] %vm9718_vm6, %v2996_v5  ;;  %v3362_v1 = vpop.permute.xlu1 %3361  ;;  %v3210_v53 = vshll.u32 %v8276_v31, 16  ;;  %v3214_v45 = vshrl.u32 %v8276_v31, 16  ;;  %4543 = vmatpush1.bf16.msra.mxu1 %v6058_v15  ;;  %v2575_v5 = vsel %vm2502_vm5, %v8119_v39, %v2539_v40  ;;  %v2542_v40 = vmul.f32 %v7673_v61, %v8148_v20  ;;  %vm9734_vm5 = vmmov %vm9728_vm4 }
 0x2e8   : > { %v2998_v56 = vshrl.u32 %v2868_v49, 16  ;;  %v3001_v47 = vshll.u32 %v2868_v49, 16  ;;  %v3798_v60 = vsel %vm9726_vm7, %v7825_v16, %v3362_v1  ;;  %v3715_v58 = vsel %vm1284_vm12, %v9727_v62, %v3714_v24  ;;  %4544 = vmatprep.subr.bf16.mxu1 %v9635_v9  ;;  %vm9737_vm6 = vmmov %vm9735_vm3 }
 0x2e9   : > { %4405 = vmatprep.mubr.bf16.mxu1 %v3798_v60  ;;  %5698 = vmatprep.mubr.msk.bf16.mxu0 %vm9728_vm4, %v3715_v58  ;;  %v8313_v26 = vsel %vm9730_vm1, %v9729_v57, %v3334_v51  ;;  %v3212_v38 = vrot.slane %v3210_v53, 1  ;;  %v3613_v16 = vrot.slane %v3214_v45, 2  ;;  %v3614_v0 = vrot.slane %v3210_v53, 3  ;;  %vm9738_vm14 = vmmov %vm9735_vm3 }
 0x2ea   : > { %v3000_v15 = vrot.slane %v2998_v56, 6  ;;  %v3003_v59 = vrot.slane %v3001_v47, 7  ;;  %3377 = vrot.lane.b32.xlu1 %v8313_v26, %s6192_s16  ;;  %4406 = vmatmul.mubr.bf16.gmra.mrb[48].mxu1 %v3740_v30  ;;  %v3443_v8 = vrot.slane %v3214_v45, 1  ;;  %v3263_v49 = vpop.permute.xlu0 %3262  ;;  %v6060_v30 = vld [vmem:[%s9298_s3 + $0xd0] sm:$0xff]   ;;  %v2848_v56 = vmul.f32 %v8249_v44, %v2575_v5  ;;  %vm9739_vm7 = vmmov %vm9731_vm9 }
 0x2eb   : > { %v2796_v1 = vpop.permute.xlu1 %2795  ;;  %v3213_v60 = vsel %vm9731_vm9, %v3208_v7, %v3212_v38  ;;  %v8324_v62 = vor.u32 %v3614_v0, %v3613_v16  ;;  %4545 = vmatpush1.bf16.msra.mxu1 %v6059_v3  ;;  %v3444_v39 = vrot.slane %v3210_v53, 2  ;;  %vm9740_vm4 = vsmask.f32 6400 }
 0x2ec   : > { %v3004_v47 = vor.u32 %v3003_v59, %v3000_v15  ;;  %v2849_v58 = vmul.f32 %v2796_v1, %v2576_v63  ;;  %3278 = vrot.lane.b32.xlu0 %v3213_v60, %s6192_s16  ;;  %4546 = vmatprep.subr.bf16.mxu1 %v9635_v9  ;;  %v3216_v15 = vor.u32 %v3214_v45, %v3212_v38  ;;  %v6061_v60 = vld [vmem:[%s9298_s3 + $0xd8] sm:$0xff]   ;;  %vm2506_vm1 = vcmp.gt.f32.partialorder %v8166_v21, 0.0 }
 0x2ed   : > { %v8340_v7 = vsel %vm9732_vm11, %v8131_v23, %v8324_v62  ;;  %v8346_v53 = vor.u32 %v3444_v39, %v3443_v8  ;;  %v2577_v39 = vsel %vm2504_vm13, %v8141_v14, %v2541_v19  ;;  %vm2507_vm9 = vcmp.gt.f32.partialorder %v8173_v43, 0.0  ;;  %vm9742_vm13 = vmmov %vm9733_vm15 }
 0x2ee   : > { %v3005_v44 = vsel %vm9733_vm15, %v2995_v32, %v3004_v47  ;;  %v2869_v52 = vpack.c.bf16 %v2849_v58, %v2848_v56  ;;  %v8343_v3 = vld [vmem:[#allocation3 + $0x70] sm:$0xff]  ;;  %v8360_v63 = vpop.permute.xlu0 %2810  ;;  %vm9743_vm15 = vmmov %vm9735_vm3 }
 0x2ef   : > { %3068 = vst.msk [vmem:[#allocation3 + $0x78] sm:$0xff] %vm9734_vm5, %v3005_v44  ;;  %v3364_v57 = vpop.permute.xlu1 %3363  ;;  %v9360_v16 = vrot.slane %v8343_v3, 3  ;;  %v3336_v0 = vrot.slane %v8343_v3, 1  ;;  %v8352_v23 = vshll.u32 %v8343_v3, 16  ;;  %4547 = vmatpush1.bf16.msra.mxu1 %v6060_v30  ;;  %v8357_v8 = vshrl.u32 %v8343_v3, 16  ;;  %vm9745_vm5 = vmmov %vm9736_vm2 }
 0x2f0   : > { %v3007_v32 = vshrl.u32 %v2869_v52, 16  ;;  %v3010_v59 = vshll.u32 %v2869_v52, 16  ;;  %v3802_v5 = vsel %vm9735_vm3, %v7860_v33, %v3364_v57  ;;  %4548 = vmatprep.subr.bf16.mxu1 %v9635_v9  ;;  %v2578_v44 = vsel %vm2505_vm8, %v8148_v20, %v2542_v40  ;;  %vm9744_vm8 = vmmov %vm9735_vm3 }
 0x2f1   : > { %4413 = vmatprep.mubr.bf16.mxu1 %v3802_v5  ;;  %v3717_v45 = vsel %vm1284_vm12, %v3714_v24, %v9360_v16  ;;  %v8370_v38 = vsel %vm9736_vm2, %v3334_v51, %v3336_v0  ;;  %v3220_v33 = vrot.slane %v8352_v23, 1  ;;  %v3618_v1 = vrot.slane %v8352_v23, 3  ;;  %v8380_v24 = vld [vmem:[#allocation3 + $0x20] sm:$0xff]  ;;  %vm9746_vm2 = vmmov %vm9739_vm7 }
 0x2f2   : > { %v3009_v30 = vrot.slane %v3007_v32, 6  ;;  %v3012_v56 = vrot.slane %v3010_v59, 7  ;;  %5699 = vmatmul.mubr.msk.bf16.gmra.mrb[92].mxu0 %vm9737_vm6, %v3717_v45  ;;  %3379 = vrot.lane.b32.xlu1 %v8370_v38, %s6192_s16  ;;  %v3743_v51 = vsel %vm9738_vm14, %v8380_v24, %v3263_v49  ;;  %v3617_v58 = vrot.slane %v8357_v8, 2  ;;  %vm9747_vm6 = vmmov %vm9740_vm4 }
 0x2f3   : > { %4414 = vmatmul.mubr.bf16.gmra.mrb[52].mxu1 %v3743_v51  ;;  %v2806_v52 = vpop.permute.xlu1 %2805  ;;  %v3221_v57 = vsel %vm9739_vm7, %v3216_v15, %v3220_v33  ;;  %v8395_v32 = vsel %vm9740_vm4, %v8187_v35, %v8346_v53  ;;  %v2850_v49 = vmul.f32 %v8283_v11, %v2577_v39  ;;  %v2543_v20 = vmul.f32 %v7673_v61, %v8166_v21  ;;  %v6062_v35 = vld [vmem:[%s9298_s3 + $0xe0] sm:$0xff]   ;;  %vm9749_vm14 = vmmov %vm9732_vm11 }
 0x2f4   : > { %9741 = vst [vmem:[#allocation35_spill] sm:$0xff] %v8395_v32  ;;  %v3013_v59 = vor.u32 %v3012_v56, %v3009_v30  ;;  %v2851_v5 = vmul.f32 %v2806_v52, %v2578_v44  ;;  %3280 = vrot.lane.b32.xlu0 %v3221_v57, %s6192_s16  ;;  %v3619_v14 = vor.u32 %v3618_v1, %v3617_v58  ;;  %v3447_v19 = vrot.slane %v8357_v8, 1  ;;  %vm9750_vm7 = vmmov %vm9742_vm13 }
 0x2f5   : > { %4549 = vmatpush1.bf16.msra.mxu1 %v6061_v60  ;;  %v3448_v1 = vrot.slane %v8352_v23, 2  ;;  %v3265_v60 = vpop.permute.xlu0 %3264  ;;  %v3224_v23 = vor.u32 %v8357_v8, %v3220_v33  ;;  %v2579_v33 = vsel %vm2506_vm1, %v8166_v21, %v2543_v20  ;;  %vm9751_vm4 = vmmov %vm9735_vm3 }
 0x2f6   : > { %v3014_v11 = vsel %vm9742_vm13, %v3004_v47, %v3013_v59  ;;  %v2870_v40 = vpack.c.bf16 %v2851_v5, %v2850_v49  ;;  %v8408_v15 = vld [vmem:[#allocation3 + $0x78] sm:$0xff]  ;;  %v8412_v45 = vsel %vm9732_vm11, %v8324_v62, %v3619_v14  ;;  %4550 = vmatprep.subr.bf16.mxu1 %v9635_v9  ;;  %v2544_v47 = vmul.f32 %v7673_v61, %v8173_v43  ;;  %v6063_v61 = vld [vmem:[%s9298_s3 + $0xe8] sm:$0xff]   ;;  %vm9752_vm1 = vmmov %vm9735_vm3 }
 0x2f7   : > { %3069 = vst.msk [vmem:[#allocation3 + $0x80] sm:$0xff] %vm9743_vm15, %v3014_v11  ;;  %v3366_v30 = vpop.permute.xlu1 %3365  ;;  %v3338_v56 = vrot.slane %v8408_v15, 1  ;;  %v3226_v51 = vshll.u32 %v8408_v15, 16  ;;  %v3230_v58 = vshrl.u32 %v8408_v15, 16  ;;  %vm9754_vm13 = vmmov %vm9752_vm1 }
 0x2f8   : > { %v3016_v39 = vshrl.u32 %v2870_v40, 16  ;;  %v3019_v62 = vshll.u32 %v2870_v40, 16  ;;  %v3806_v44 = vsel %vm9744_vm8, %v7895_v37, %v3366_v30  ;;  %v8433_v37 = vld [vmem:[#allocation3 + $0x28] sm:$0xff]  ;;  %vm9755_vm11 = vmmov %vm9746_vm2 }
 0x2f9   : > { %4421 = vmatprep.mubr.bf16.mxu1 %v3806_v44  ;;  %v8426_v52 = vsel %vm9745_vm5, %v3336_v0, %v3338_v56  ;;  %v3228_v57 = vrot.slane %v3226_v51, 1  ;;  %v3621_v49 = vrot.slane %v3230_v58, 2  ;;  %v3622_v5 = vrot.slane %v3226_v51, 3  ;;  %4551 = vmatpush1.bf16.msra.mxu1 %v6062_v35  ;;  %vm9756_vm15 = vmmov %vm9752_vm1 }
 0x2fa   : > { %v3018_v11 = vrot.slane %v3016_v39, 6  ;;  %v3021_v16 = vrot.slane %v3019_v62, 7  ;;  %3381 = vrot.lane.b32.xlu1 %v8426_v52, %s6192_s16  ;;  %v3746_v8 = vsel %vm9735_vm3, %v8433_v37, %v3265_v60  ;;  %4552 = vmatprep.subr.bf16.mxu1 %v9635_v9  ;;  %v3449_v0 = vor.u32 %v3448_v1, %v3447_v19  ;;  %vm9757_vm8 = vmmov %vm9747_vm6 }
 0x2fb   : > { %4422 = vmatmul.mubr.bf16.gmra.mrb[56].mxu1 %v3746_v8  ;;  %v2580_v35 = vsel %vm2507_vm9, %v8173_v43, %v2544_v47  ;;  %v2816_v40 = vpop.permute.xlu1 %2815  ;;  %v3229_v30 = vsel %vm9746_vm2, %v3224_v23, %v3228_v57  ;;  %v3623_v39 = vor.u32 %v3622_v5, %v3621_v49  ;;  %v2852_v62 = vmul.f32 %v8360_v63, %v2579_v33  ;;  %v3267_v47 = vpop.permute.xlu0 %3266  ;;  %vm9753_vm9 = vmmov %vm9745_vm5 }
 0x2fc   : > { %v3022_v44 = vor.u32 %v3021_v16, %v3018_v11  ;;  %v2853_v60 = vmul.f32 %v2816_v40, %v2580_v35  ;;  %3282 = vrot.lane.b32.xlu0 %v3229_v30, %s6192_s16  ;;  %v8449_v19 = vsel %vm9747_vm6, %v8346_v53, %v3449_v0  ;;  %v3451_v63 = vrot.slane %v3230_v58, 1  ;;  %vm9759_vm5 = vmmov %vm9749_vm14 }
 0x2fd   : > { %9748 = vst [vmem:[#allocation36_spill] sm:$0xff] %v8449_v19  ;;  %v8452_v21 = vsel %vm9749_vm14, %v3619_v14, %v3623_v39  ;;  %4553 = vmatpush1.bf16.msra.mxu1 %v6063_v61  ;;  %v3452_v16 = vrot.slane %v3226_v51, 2  ;;  %v3232_v11 = vor.u32 %v3230_v58, %v3228_v57  ;;  %vm9760_vm3 = vmmov %vm9750_vm7 }
 0x2fe   : > { %v3023_v43 = vsel %vm9750_vm7, %v3013_v59, %v3022_v44  ;;  %v2871_v20 = vpack.c.bf16 %v2853_v60, %v2852_v62  ;;  %v8455_v1 = vld [vmem:[#allocation3 + $0x80] sm:$0xff]  ;;  %4554 = vmatprep.subr.bf16.mxu1 %v9635_v9  ;;  %v8469_v62 = vld [vmem:[#allocation3 + $0x30] sm:$0xff]  ;;  %vm9762_vm2 = vmmov %vm9752_vm1 }
 0x2ff   : > { %3070 = vst.msk [vmem:[#allocation3 + $0x88] sm:$0xff] %vm9751_vm4, %v3023_v43  ;;  %v3368_v23 = vpop.permute.xlu1 %3367  ;;  %v3340_v53 = vrot.slane %v8455_v1, 1  ;;  %v3234_v49 = vshll.u32 %v8455_v1, 16  ;;  %v3238_v14 = vshrl.u32 %v8455_v1, 16  ;;  %v3749_v60 = vsel %vm9754_vm13, %v8469_v62, %v3267_v47  ;;  %vm9766_vm14 = vmmov %vm9752_vm1 }
 0x300   : > { %v3025_v5 = vshrl.u32 %v2871_v20, 16  ;;  %v3028_v61 = vshll.u32 %v2871_v20, 16  ;;  %v3810_v59 = vsel %vm9752_vm1, %v7927_v29, %v3368_v23  ;;  %v3453_v43 = vor.u32 %v3452_v16, %v3451_v63  ;;  %v3072_v29 = vld [vmem:[#allocation3 + $0x98] sm:$0x3]  ;;  %vm9767_vm7 = vmmov %vm9752_vm1 }
 0x301   : > { %4429 = vmatprep.mubr.bf16.mxu1 %v3810_v59  ;;  %v8465_v8 = vsel %vm9753_vm9, %v3338_v56, %v3340_v53  ;;  %v3236_v51 = vrot.slane %v3234_v49, 1  ;;  %v3625_v33 = vrot.slane %v3238_v14, 2  ;;  %v3626_v35 = vrot.slane %v3234_v49, 3  ;;  %vm9768_vm4 = vmmov %vm9755_vm11 }
 0x302   : > { %v3027_v40 = vrot.slane %v3025_v5, 6  ;;  %v3030_v30 = vrot.slane %v3028_v61, 7  ;;  %3383 = vrot.lane.b32.xlu1 %v8465_v8, %s6192_s16  ;;  %v3455_v20 = vrot.slane %v3238_v14, 1  ;;  %v6064_v61 = vld [vmem:[%s9298_s3 + $0xf0] sm:$0xff]   ;;  %v8481_v47 = vsel %vm9757_vm8, %v3449_v0, %v3453_v43  ;;  %vm9769_vm1 = vmmov %vm9759_vm5 }
 0x303   : > { %4430 = vmatmul.mubr.bf16.gmra.mrb[60].mxu1 %v3749_v60  ;;  %v3370_v58 = vpop.permute.xlu1 %3369  ;;  %v3237_v56 = vsel %vm9755_vm11, %v3232_v11, %v3236_v51  ;;  %v3627_v57 = vor.u32 %v3626_v35, %v3625_v33  ;;  %9758 = vst [vmem:[#allocation13_spill] sm:$0xff] %v8481_v47  ;;  %v3456_v63 = vrot.slane %v3234_v49, 2  ;;  %vm9775_vm11 = vmmov %vm9762_vm2 }
 0x304   : > { %v3031_v23 = vor.u32 %v3030_v30, %v3027_v40  ;;  %3284 = vrot.lane.b32.xlu0 %v3237_v56, %s6192_s16  ;;  %v3814_v5 = vsel %vm9756_vm15, %v7959_v6, %v3370_v58  ;;  %4555 = vmatpush1.bf16.msra.mxu1 %v6064_v61  ;;  %v3269_v40 = vpop.permute.xlu0 %3268  ;;  %v3240_v30 = vor.u32 %v3238_v14, %v3236_v51  ;;  %v8505_v56 = vld [vmem:[#allocation3 + $0x10] sm:$0xfc]  ;;  %v3100_v14 = vld [vmem:[#allocation3 + $0x8] sm:$0xfc]  ;;  %vm9776_vm15 = vmmov %vm9762_vm2 }
 0x305   : > { %4437 = vmatprep.mubr.bf16.mxu1 %v3814_v5  ;;  %v8484_v16 = vsel %vm9759_vm5, %v3623_v39, %v3627_v57  ;;  %v3457_v6 = vor.u32 %v3456_v63, %v3455_v20  ;;  %4556 = vmatprep.subr.bf16.mxu1 %v9635_v9  ;;  %v8509_v5 = vld [vmem:[#allocation3 + $0x38] sm:$0xff]  ;;  %v3566_v11 = vshrl.u32 %v8505_v56, 16  ;;  %vm9777_vm8 = vmmov %vm9768_vm4 }
 0x306   : > { %v3032_v59 = vsel %vm9760_vm3, %v3022_v44, %v3031_v23  ;;  %v3073_v33 = vsel %vm6412_vm0, %v3031_v23, %v3072_v29  ;;  %v8489_v35 = vld [vmem:[#allocation3 + $0x88] sm:$0xff]  ;;  %vm9763_vm0 = vmmov %vm9747_vm6  ;;  %v3752_v9 = vsel %vm9766_vm14, %v8509_v5, %v3269_v40 }
 0x307   : > { %3071 = vst.msk [vmem:[#allocation3 + $0x90] sm:$0xff] %vm9762_vm2, %v3032_v59  ;;  %3074 = vst [vmem:[#allocation3 + $0x98] sm:$0x3] %v3073_v33  ;;  %v8493_v0 = vrot.slane %v8489_v35, 1  ;;  %v3242_v49 = vshll.u32 %v8489_v35, 16  ;;  %v3246_v39 = vshrl.u32 %v8489_v35, 16  ;;  %v3372_v44 = vpop.permute.xlu1 %3371  ;;  %v8499_v60 = vsel %vm9763_vm0, %v3453_v43, %v3457_v6 }
 0x308   : > { %9764 = vst [vmem:[#allocation18_spill] sm:$0xff] %v8499_v60  ;;  %vm9765_vm6 = vmmov %vm9753_vm9  ;;  %v6065_v33 = vld [vmem:[%s9298_s3 + $0xf8] sm:$0xff]   ;;  %v8541_v59 = vld [vmem:[%s9298_s3 + $0x100] sm:$0xff]   ;;  %v3568_v47 = vrot.slane %v3566_v11, 2 }
 0x309   : > { %v8503_v29 = vsel %vm9765_vm6, %v3340_v53, %v8493_v0  ;;  %v3244_v58 = vrot.slane %v3242_v49, 1  ;;  %v3629_v20 = vrot.slane %v3246_v39, 2  ;;  %v3630_v23 = vrot.slane %v3242_v49, 3  ;;  %4557 = vmatpush1.bf16.msra.mxu1 %v6065_v33  ;;  %vm9770_vm9 = vmmov %vm9763_vm0  ;;  %9772 = vst [vmem:[#allocation20_spill] sm:$0xff] %v8541_v59 }
 0x30a   : > { %3385 = vrot.lane.b32.xlu1 %v8503_v29, %s6192_s16  ;;  %v3459_v51 = vrot.slane %v3246_v39, 1  ;;  %v3460_v43 = vrot.slane %v3242_v49, 2  ;;  %v3818_v53 = vsel %vm9767_vm7, %v7987_v2, %v3372_v44  ;;  %v3483_v49 = vrot.slane %v3100_v14, 2  ;;  %5714 = vmatprep.subr.bf16.mxu1 %v8541_v59  ;;  %vm9774_vm13 = vmmov %vm9765_vm6 }
 0x30b   : > { %4438 = vmatmul.mubr.bf16.gmra.mrb[64].mxu1 %v3752_v9  ;;  %v3245_v61 = vsel %vm9768_vm4, %v3240_v30, %v3244_v58  ;;  %v3631_v63 = vor.u32 %v3630_v23, %v3629_v20  ;;  %v3569_v9 = vshll.u32 %v8505_v56, 16  ;;  %v3573_v23 = vrot.slane %v7808_v50, 2  ;;  %v3374_v33 = vpop.permute.xlu1 %3373  ;;  %vm9778_vm5 = vmmov %vm9765_vm6 }
 0x30c   : > { %4445 = vmatprep.mubr.bf16.mxu1 %v3818_v53  ;;  %3286 = vrot.lane.b32.xlu0 %v3245_v61, %s6192_s16  ;;  %v8522_v40 = vor.u32 %v3460_v43, %v3459_v51  ;;  %v3271_v61 = vpop.permute.xlu0 %3270  ;;  %v3574_v43 = vrot.slane %v7782_v42, 3  ;;  %v3248_v60 = vor.u32 %v3246_v39, %v3244_v58  ;;  %vm9779_vm3 = vmmov %vm9778_vm5 }
 0x30d   : > { %v8526_v2 = vsel %vm9769_vm1, %v3627_v57, %v3631_v63  ;;  %v3755_v39 = vsel %vm9775_vm11, %v8553_v13, %v3271_v61  ;;  %v3571_v58 = vrot.slane %v3569_v9, 3  ;;  %vm9780_vm2 = vmmov %vm9769_vm1 }
 0x30e   : > { %v8528_v44 = vld [vmem:[#allocation3 + $0x90] sm:$0xff]  ;;  %v3098_v20 = vld [vmem:[#allocation3 + $0x98] sm:$0x1]  ;;  %v8533_v53 = vsel %vm9770_vm9, %v3457_v6, %v8522_v40  ;;  %v9773_v6 = vrot.slane %v8263_v18, 2  ;;  %vm9781_vm6 = vmmov %vm9769_vm1 }
 0x30f   : > { %v3094_v30 = vld [vmem:[#allocation3 + $0x90] sm:$0x1]  ;;  %9771 = vst [vmem:[#allocation15_spill] sm:$0xff] %v8533_v53  ;;  %v3351_v51 = vrot.slane %v8528_v44, 1  ;;  %v3464_v57 = vshrl.u32 %v8528_v44, 16  ;;  %v3467_v19 = vshll.u32 %v8528_v44, 16  ;;  %vm9782_vm14 = vmmov %vm9767_vm7 }
 0x310   : > { %v3250_v14 = vshll.u32 %v3094_v30, 16  ;;  %v3485_v53 = vsel %vm1073_vm10, %v3483_v49, %v9773_v6  ;;  %v3353_v12 = vrot.slane %v3098_v20, 1  ;;  %v8550_v41 = vld [vmem:[#allocation3 + $0x98] sm:$0xff]  ;;  %v8558_v11 = vrot.slane %v8528_v44, 2  ;;  %vm9784_vm4 = vmmov %vm9769_vm1 }
 0x311   : > { %v3352_v32 = vsel %vm9774_vm13, %v8493_v0, %v3351_v51  ;;  %v3633_v34 = vrot.slane %v3464_v57, 2  ;;  %v3634_v49 = vrot.slane %v3467_v19, 3  ;;  %v3575_v6 = vor.u32 %v3574_v43, %v3573_v23  ;;  %v8568_v9 = vld [vmem:[#allocation3 + $0x98] sm:$0x3]  ;;  %v3273_v23 = vpop.permute.xlu0 %3272  ;;  %vm9785_vm1 = vmmov %vm9763_vm0 }
 0x312   : > { %v3252_v25 = vrot.slane %v3250_v14, 1  ;;  %3387 = vrot.lane.b32.xlu1 %v3352_v32, %s6192_s16  ;;  %v3822_v14 = vsel %vm9776_vm15, %v8020_v36, %v3374_v33  ;;  %v3344_v32 = vrot.slane %v3094_v30, 1  ;;  %v9364_v61 = vrot.slane %v8550_v41, 2  ;;  %vm9787_vm9 = vmmov %vm9780_vm2 }
 0x313   : > { %4446 = vmatmul.mubr.bf16.gmra.mrb[68].mxu1 %v3755_v39  ;;  %v8566_v22 = vor.u32 %v3634_v49, %v3633_v34  ;;  %v3466_v55 = vrot.slane %v3464_v57, 1  ;;  %v3469_v39 = vrot.slane %v3467_v19, 2  ;;  %v3354_v59 = vsel %vm9778_vm5, %v3351_v51, %v3353_v12  ;;  %vm9788_vm13 = vmmov %vm9767_vm7 }
 0x314   : > { %v3253_v20 = vsel %vm9777_vm8, %v3248_v60, %v3252_v25  ;;  %4453 = vmatprep.mubr.bf16.mxu1 %v3822_v14  ;;  %v3577_v36 = vrot.slane %v7843_v28, 2  ;;  %v3578_v25 = vrot.slane %v7819_v46, 3  ;;  %v8576_v60 = vsel %vm9779_vm3, %v8493_v0, %v3344_v32  ;;  %v6099_v14 = vld [vmem:[#allocation3 + $0x48] sm:$0xff]  ;;  %vm9797_vm11 = vmmov %vm9780_vm2 }
 0x315   : > { %3288 = vrot.lane.b32.xlu0 %v3253_v20, %s6192_s16  ;;  %v8581_v34 = vsel %vm9780_vm2, %v3631_v63, %v8566_v22  ;;  %v8587_v19 = vsel %vm1073_vm10, %v8558_v11, %v9364_v61  ;;  %v3470_v12 = vor.u32 %v3469_v39, %v3466_v55  ;;  %v3728_v30 = vrot.slane %v8563_v10, 3  ;;  %v3376_v63 = vpop.permute.xlu1 %3375  ;;  %vm9798_vm15 = vmmov %vm9780_vm2 }
 0x316   : > { %3389 = vrot.lane.b32.xlu1 %v3354_v59, %s6192_s16  ;;  %v3572_v51 = vor.u32 %v3571_v58, %v3568_v47  ;;  %v8591_v0 = vrot.slane %v8288_v17, 2  ;;  %v3473_v59 = vshrl.u32 %v8568_v9, 16  ;;  %v3476_v43 = vshll.u32 %v8568_v9, 16  ;;  %vm9800_vm8 = vmmov %vm9767_vm7 }
 0x317   : > { %v8598_v57 = vsel %vm9763_vm0, %v8522_v40, %v3470_v12  ;;  %v9363_v55 = vrot.slane %v8528_v44, 3  ;;  %v3726_v33 = vrot.slane %v8550_v41, 3  ;;  %v3579_v58 = vor.u32 %v3578_v25, %v3577_v36  ;;  %vm9801_vm5 = vmmov %vm9767_vm7 }
 0x318   : > { %v3576_v47 = vsel %vm9781_vm6, %v3572_v51, %v3575_v6  ;;  %v3475_v17 = vrot.slane %v3473_v59, 1  ;;  %v3478_v49 = vrot.slane %v3476_v43, 2  ;;  %v3758_v20 = vsel %vm9782_vm14, %v6099_v14, %v3273_v23  ;;  %v3275_v59 = vpop.permute.xlu0 %3274  ;;  %vm9802_vm3 = vmmov %vm9801_vm5 }
 0x319   : > { %3520 = vrot.lane.b32.xlu0 %v3485_v53, %s6192_s16  ;;  %v8608_v53 = vsel %vm1284_vm12, %v9363_v55, %v3726_v33  ;;  %v8611_v40 = vsel %vm1284_vm12, %v3726_v33, %v3728_v30  ;;  %v3826_v32 = vsel %vm9767_vm7, %v8057_v48, %v3376_v63  ;;  %v9783_v39 = vrot.slane %v8263_v18, 2  ;;  %vm9803_vm2 = vmmov %vm9802_vm3 }
 0x31a   : > { %3655 = vrot.lane.b32.xlu1 %v3576_v47, %s6192_s16  ;;  %v3488_v25 = vrot.slane %v8380_v24, 2  ;;  %v3479_v23 = vor.u32 %v3478_v49, %v3475_v17  ;;  %v3580_v51 = vsel %vm9784_vm4, %v3575_v6, %v3579_v58  ;;  %v3490_v18 = vrot.slane %v8433_v37, 2  ;;  %v9786_v24 = vld [vmem:[#allocation31_spill] sm:$0xff]  ;;  %v9789_v37 = vld [vmem:[#allocation16_spill] sm:$0xff]  ;;  %vm9804_vm0 = vmmov %vm9803_vm2 }
 0x31b   : > { %4454 = vmatmul.mubr.bf16.gmra.mrb[72].mxu1 %v3758_v20  ;;  %v3487_v36 = vsel %vm1073_vm10, %v9783_v39, %v8591_v0  ;;  %v3584_v43 = vsel %vm9787_vm9, %v3579_v58, %v9786_v24  ;;  %v6100_v6 = vld [vmem:[#allocation3 + $0x50] sm:$0xff]  ;;  %v3492_v33 = vrot.slane %v8469_v62, 2  ;;  %v3494_v58 = vrot.slane %v8509_v5, 2  ;;  %v9790_v17 = vld [vmem:[#allocation28_spill] sm:$0xff]  ;;  %v9792_v39 = vld [vmem:[#allocation21_spill] sm:$0xff] }
 0x31c   : > { %4461 = vmatprep.mubr.bf16.mxu1 %v3826_v32  ;;  %v8623_v30 = vsel %vm9785_vm1, %v3470_v12, %v3479_v23  ;;  %v8628_v48 = vsel %vm1073_vm10, %v8591_v0, %v3488_v25  ;;  %v3761_v12 = vsel %vm9788_vm13, %v6100_v6, %v3275_v59  ;;  %v8638_v63 = vsel %vm1073_vm10, %v3488_v25, %v3490_v18  ;;  %v9791_v20 = vld [vmem:[#allocation19_spill] sm:$0xff]  ;;  %vm9805_vm6 = vmmov %vm9804_vm0 }
 0x31d   : > { %3522 = vrot.lane.b32.xlu0 %v3487_v36, %s6192_s16  ;;  %v8646_v47 = vsel %vm1073_vm10, %v3490_v18, %v3492_v33  ;;  %v8654_v49 = vsel %vm1073_vm10, %v3492_v33, %v3494_v58  ;;  %v3496_v62 = vrot.slane %v8553_v13, 2  ;;  %v3498_v5 = vrot.slane %v6099_v14, 2  ;;  %v8686_v18 = vld [vmem:[#allocation3 + $0x58] sm:$0xff]  ;;  %vm9808_vm14 = vmmov %vm9804_vm0 }
 0x31e   : > { %3657 = vrot.lane.b32.xlu1 %v3580_v51, %s6192_s16  ;;  %v3500_v23 = vrot.slane %v6100_v6, 2  ;;  %v3502_v24 = vrot.slane %v8686_v18, 2  ;;  %v8696_v6 = vld [vmem:[#allocation3 + $0x60] sm:$0xff]  ;;  %v3506_v33 = vrot.slane %v8276_v31, 2  ;;  %v3650_v55 = vshll.u32 %v8563_v10, 16  ;;  %vm9809_vm7 = vmmov %vm9804_vm0 }
 0x31f   : > { %v8662_v32 = vsel %vm1073_vm10, %v3494_v58, %v3496_v62  ;;  %v8673_v13 = vsel %vm1073_vm10, %v3496_v62, %v3498_v5  ;;  %vm9810_vm4 = vmmov %vm9804_vm0 }
 0x320   : > { %v8684_v59 = vsel %vm1073_vm10, %v3498_v5, %v3500_v23  ;;  %vm9811_vm1 = vmmov %vm9804_vm0 }
 0x321   : > { %3524 = vrot.lane.b32.xlu0 %v8628_v48, %s6192_s16  ;;  %vm9812_vm9 = vmmov %vm9804_vm0 }
 0x322   : > { %3659 = vrot.lane.b32.xlu1 %v3584_v43, %s6192_s16  ;;  %v8694_v43 = vsel %vm1073_vm10, %v3500_v23, %v3502_v24  ;;  %v3641_v23 = vshll.u32 %v8550_v41, 16  ;;  %vm9813_vm13 = vmmov %vm9804_vm0 }
 0x323   : > { %4462 = vmatmul.mubr.bf16.gmra.mrb[76].mxu1 %v3761_v12 }
 0x325   : > { %3526 = vrot.lane.b32.xlu0 %v8638_v63, %s6192_s16 }
 0x326   : > { %3661 = vrot.lane.b32.xlu1 %v9789_v37, %s6192_s16 }
 0x329   : > { %3528 = vrot.lane.b32.xlu0 %v8646_v47, %s6192_s16 }
 0x32a   : > { %3663 = vrot.lane.b32.xlu1 %v9790_v17, %s6192_s16 }
 0x32d   : > { %3530 = vrot.lane.b32.xlu0 %v8654_v49, %s6192_s16 }
 0x32e   : > { %3665 = vrot.lane.b32.xlu1 %v9791_v20, %s6192_s16  ;;  %v3510_v20 = vrot.slane %v8408_v15, 2 }
 0x331   : > { %3532 = vrot.lane.b32.xlu0 %v8662_v32, %s6192_s16 }
 0x332   : > { %3667 = vrot.lane.b32.xlu1 %v9792_v39, %s6192_s16  ;;  %v8668_v36 = vpop.f32.mrb[72].mxu0  ;;  %v3512_v39 = vrot.slane %v8455_v1, 2 }
 0x333   : > { %v8670_v25 = vpop.f32.mrb[73].mxu0 }
 0x334   : > { %v8677_v51 = vpop.f32.mrb[74].mxu0 }
 0x335   : > { %3534 = vrot.lane.b32.xlu0 %v8673_v13, %s6192_s16  ;;  %v8679_v14 = vpop.f32.mrb[75].mxu0 }
 0x336   : > { %3669 = vrot.lane.b32.xlu1 %v8116_v4, %s6192_s16  ;;  %v3504_v4 = vrot.slane %v8696_v6, 2 }
 0x338   : > { %v8704_v12 = vsel %vm1073_vm10, %v3502_v24, %v3504_v4  ;;  %v8716_v58 = vsel %vm1073_vm10, %v3504_v4, %v3506_v33  ;;  %v8746_v24 = vsel %vm1073_vm10, %v3510_v20, %v3512_v39 }
 0x339   : > { %3536 = vrot.lane.b32.xlu0 %v8684_v59, %s6192_s16 }
 0x33a   : > { %3671 = vrot.lane.b32.xlu1 %v8129_v54, %s6192_s16 }
 0x33d   : > { %3538 = vrot.lane.b32.xlu0 %v8694_v43, %s6192_s16 }
 0x33e   : > { %3673 = vrot.lane.b32.xlu1 %v8135_v27, %s6192_s16  ;;  %v3508_v27 = vrot.slane %v8343_v3, 2 }
 0x340   : > { %v8736_v5 = vsel %vm1073_vm10, %v3508_v27, %v3510_v20 }
 0x341   : > { %3540 = vrot.lane.b32.xlu0 %v8704_v12, %s6192_s16 }
 0x342   : > { %3675 = vrot.lane.b32.xlu1 %v8340_v7, %s6192_s16  ;;  %v8711_v54 = vpop.f32.mrb[76].mxu0  ;;  %v8728_v7 = vsel %vm1073_vm10, %v3506_v33, %v3508_v27  ;;  %v3643_v33 = vrot.slane %v3641_v23, 3  ;;  %v3647_v27 = vshrl.u32 %v8563_v10, 16  ;;  %v3652_v10 = vrot.slane %v3650_v55, 3 }
 0x343   : > { %9793 = vst [vmem:[#allocation17_spill] sm:$0xff] %v8711_v54  ;;  %v8713_v37 = vpop.f32.mrb[77].mxu0 }
 0x344   : > { %v8721_v17 = vpop.f32.mrb[78].mxu0  ;;  %v3649_v54 = vrot.slane %v3647_v27, 2 }
 0x345   : > { %3542 = vrot.lane.b32.xlu0 %v8716_v58, %s6192_s16  ;;  %9794 = vst [vmem:[#allocation37_spill] sm:$0xff] %v8721_v17  ;;  %v8723_v62 = vpop.f32.mrb[79].mxu0 }
 0x346   : > { %3677 = vrot.lane.b32.xlu1 %v8412_v45, %s6192_s16  ;;  %v3638_v45 = vshrl.u32 %v8550_v41, 16 }
 0x348   : > { %v3640_v4 = vrot.slane %v3638_v45, 2 }
 0x349   : > { %3544 = vrot.lane.b32.xlu0 %v8728_v7, %s6192_s16 }
 0x34a   : > { %3679 = vrot.lane.b32.xlu1 %v8452_v21, %s6192_s16  ;;  %v3514_v21 = vrot.slane %v8489_v35, 2  ;;  %v3644_v23 = vor.u32 %v3643_v33, %v3640_v4  ;;  %v3277_v4 = vpop.permute.xlu0 %3276  ;;  %v9799_v33 = vld [vmem:[#allocation22_spill] sm:$0xff] }
 0x34c   : > { %v8760_v20 = vsel %vm1073_vm10, %v3512_v39, %v3514_v21  ;;  %v3518_v39 = vrot.slane %v8568_v9, 2 }
 0x34d   : > { %3546 = vrot.lane.b32.xlu0 %v8736_v5, %s6192_s16 }
 0x34e   : > { %3681 = vrot.lane.b32.xlu1 %v8484_v16, %s6192_s16  ;;  %v3519_v55 = vsel %vm1073_vm10, %v8558_v11, %v3518_v39 }
 0x351   : > { %3548 = vrot.lane.b32.xlu0 %v8746_v24, %s6192_s16 }
 0x352   : > { %3683 = vrot.lane.b32.xlu1 %v8526_v2, %s6192_s16  ;;  %v8755_v61 = vpop.f32.mrb[80].mxu0  ;;  %v8772_v2 = vsel %vm1073_vm10, %v3514_v21, %v8558_v11 }
 0x353   : > { %9795 = vst [vmem:[#allocation34_spill] sm:$0xff] %v8755_v61  ;;  %v8757_v16 = vpop.f32.mrb[81].mxu0  ;;  %v3653_v61 = vor.u32 %v3652_v10, %v3649_v54 }
 0x354   : > { %v8764_v17 = vpop.f32.mrb[82].mxu0 }
 0x355   : > { %3550 = vrot.lane.b32.xlu0 %v8760_v20, %s6192_s16  ;;  %9796 = vst [vmem:[#allocation12_spill] sm:$0xff] %v8764_v17  ;;  %v8766_v45 = vpop.f32.mrb[83].mxu0  ;;  %v3645_v17 = vsel %vm9797_vm11, %v8566_v22, %v3644_v23  ;;  %v3654_v21 = vsel %vm9798_vm15, %v3644_v23, %v3653_v61  ;;  %v3764_v22 = vsel %vm9801_vm5, %v8686_v18, %v3277_v4  ;;  %vm9814_vm11 = vmmov %vm9804_vm0  ;;  %vm9820_vm5 = vsmask.f32 6400 }
 0x356   : > { %3685 = vrot.lane.b32.xlu1 %v8581_v34, %s6192_s16  ;;  %vm9818_vm15 = vmmov %vm9804_vm0 }
 0x359   : > { %3552 = vrot.lane.b32.xlu0 %v8772_v2, %s6192_s16 }
 0x35a   : > { %3687 = vrot.lane.b32.xlu1 %v3645_v17, %s6192_s16 }
 0x35c   : > { %v3378_v34 = vpop.permute.xlu1 %3377 }
 0x35d   : > { %3554 = vrot.lane.b32.xlu0 %v3519_v55, %s6192_s16  ;;  %v3830_v9 = vsel %vm9800_vm8, %v9799_v33, %v3378_v34  ;;  %vm9819_vm8 = vmmov %vm9804_vm0 }
 0x35e   : > { %3689 = vrot.lane.b32.xlu1 %v3654_v21, %s6192_s16  ;;  %4469 = vmatprep.mubr.bf16.mxu1 %v3830_v9  ;;  %v3279_v17 = vpop.permute.xlu0 %3278 }
 0x35f   : > { %4470 = vmatmul.mubr.bf16.gmra.mrb[80].mxu1 %v3764_v22  ;;  %v3767_v39 = vsel %vm9803_vm2, %v8696_v6, %v3279_v17  ;;  %vm9822_vm2 = vmmov %vm9804_vm0 }
 0x362   : > { %v8789_v54 = vpop.f32.mrb[84].mxu0 }
 0x363   : > { %v8791_v27 = vpop.f32.mrb[85].mxu0 }
 0x364   : > { %v3380_v11 = vpop.permute.xlu1 %3379  ;;  %v8793_v10 = vpop.f32.mrb[86].mxu0 }
 0x365   : > { %v3834_v61 = vsel %vm9802_vm3, %v8313_v26, %v3380_v11  ;;  %v8797_v23 = vpop.f32.mrb[87].mxu0  ;;  %vm9821_vm3 = vmmov %vm9804_vm0 }
 0x366   : > { %4477 = vmatprep.mubr.bf16.mxu1 %v3834_v61  ;;  %v3281_v18 = vpop.permute.xlu0 %3280 }
 0x367   : > { %4478 = vmatmul.mubr.bf16.gmra.mrb[84].mxu1 %v3767_v39  ;;  %v3770_v34 = vsel %vm9805_vm6, %v8276_v31, %v3281_v18  ;;  %vm9825_vm6 = vmmov %vm9811_vm1 }
 0x36c   : > { %v3382_v4 = vpop.permute.xlu1 %3381 }
 0x36d   : > { %v3838_v55 = vsel %vm9804_vm0, %v8370_v38, %v3382_v4  ;;  %vm9824_vm0 = vmmov %vm9820_vm5 }
 0x36e   : > { %4485 = vmatprep.mubr.bf16.mxu1 %v3838_v55  ;;  %v3283_v26 = vpop.permute.xlu0 %3282 }
 0x36f   : > { %4486 = vmatmul.mubr.bf16.gmra.mrb[88].mxu1 %v3770_v34  ;;  %v3773_v38 = vsel %vm9809_vm7, %v8343_v3, %v3283_v26  ;;  %vm9827_vm7 = vmmov %vm9824_vm0 }
 0x372   : > { %v8805_v21 = vpop.f32.mrb[88].mxu0 }
 0x373   : > { %9806 = vst [vmem:[#allocation32_spill] sm:$0xff] %v8805_v21  ;;  %v8807_v33 = vpop.f32.mrb[89].mxu0 }
 0x374   : > { %v3384_v9 = vpop.permute.xlu1 %3383  ;;  %v8809_v22 = vpop.f32.mrb[90].mxu0 }
 0x375   : > { %9807 = vst [vmem:[#allocation10_spill] sm:$0xff] %v8809_v22  ;;  %v3842_v6 = vsel %vm9808_vm14, %v8426_v52, %v3384_v9  ;;  %v8813_v17 = vpop.f32.mrb[91].mxu0  ;;  %vm9826_vm14 = vmmov %vm9811_vm1 }
 0x376   : > { %4493 = vmatprep.mubr.bf16.mxu1 %v3842_v6  ;;  %v3285_v31 = vpop.permute.xlu0 %3284 }
 0x377   : > { %4494 = vmatmul.mubr.bf16.gmra.mrb[92].mxu1 %v3773_v38  ;;  %v3776_v39 = vsel %vm9811_vm1, %v8408_v15, %v3285_v31 }
 0x37c   : > { %v3386_v11 = vpop.permute.xlu1 %3385 }
 0x37d   : > { %v3846_v61 = vsel %vm9810_vm4, %v8465_v8, %v3386_v11  ;;  %v6103_v8 = vld [vmem:[#allocation3 + $0x8] sm:$0xfe]  ;;  %v3559_v11 = vrot.slane %v8505_v56, 2  ;;  %vm9828_vm4 = vmmov %vm9811_vm1 }
 0x37e   : > { %4501 = vmatprep.mubr.bf16.mxu1 %v3846_v61  ;;  %v3287_v18 = vpop.permute.xlu0 %3286  ;;  %v3392_v9 = vshrl.u32 %v6103_v8, 16  ;;  %v3395_v6 = vshll.u32 %v6103_v8, 16  ;;  %v9815_v61 = vld [vmem:[#allocation14_spill] sm:$0xff] }
 0x37f   : > { %4502 = vmatmul.mubr.bf16.gmra.mrb[96].mxu1 %v3776_v39  ;;  %v3779_v55 = vsel %vm9813_vm13, %v8455_v1, %v3287_v18  ;;  %v9816_v39 = vshrl.u32 %v9815_v61, 16  ;;  %vm9831_vm13 = vmmov %vm9811_vm1 }
 0x384   : > { %v3388_v4 = vpop.permute.xlu1 %3387 }
 0x385   : > { %v3850_v52 = vsel %vm9812_vm9, %v8503_v29, %v3388_v4  ;;  %v3399_v29 = vrot.slane %v9816_v39, 1  ;;  %v9817_v4 = vshll.u32 %v9815_v61, 16  ;;  %v3403_v61 = vrot.slane %v7808_v50, 1  ;;  %vm9830_vm9 = vmmov %vm9824_vm0 }
 0x386   : > { %4509 = vmatprep.mubr.bf16.mxu1 %v3850_v52  ;;  %v3407_v50 = vrot.slane %v7843_v28, 1  ;;  %v6106_v28 = vld [vmem:[%s9298_s3 + $0x118] sm:$0xff]  }
 0x387   : > { %4510 = vmatmul.mubr.bf16.gmra.mrb[100].mxu1 %v3779_v55  ;;  %v3289_v38 = vpop.permute.xlu0 %3288  ;;  %v3400_v52 = vrot.slane %v9817_v4, 2  ;;  %v3394_v55 = vrot.slane %v3392_v9, 1  ;;  %v3404_v4 = vrot.slane %v7782_v42, 2  ;;  %v9823_v9 = vld [vmem:[#allocation20_spill] sm:$0xff] }
 0x388   : > { %v3390_v34 = vpop.permute.xlu1 %3389  ;;  %v3782_v18 = vsel %vm9818_vm15, %v8489_v35, %v3289_v38  ;;  %vm9834_vm15 = vmmov %vm9811_vm1 }
 0x389   : > { %v3854_v26 = vsel %vm9814_vm11, %v8576_v60, %v3390_v34  ;;  %v3560_v60 = vsel %vm1073_vm10, %v3559_v11, %v8591_v0  ;;  %v3397_v34 = vrot.slane %v3395_v6, 2  ;;  %v3401_v8 = vor.u32 %v3400_v52, %v3399_v29  ;;  %vm9832_vm11 = vmmov %vm9811_vm1 }
 0x38a   : > { %4517 = vmatprep.mubr.bf16.mxu1 %v3854_v26  ;;  %v3405_v6 = vor.u32 %v3404_v4, %v3403_v61 }
 0x38b   : > { %v3398_v56 = vor.u32 %v3397_v34, %v3394_v55  ;;  %v3521_v22 = vpop.permute.xlu0 %3520 }
 0x38c   : > { %v3656_v31 = vpop.permute.xlu1 %3655  ;;  %v3406_v42 = vsel %vm9824_vm0, %v3401_v8, %v3405_v6  ;;  %vm9841_vm0 = vmmov %vm9811_vm1 }
 0x38d   : > { %v3930_v26 = vsel %vm9819_vm8, %v3560_v60, %v3656_v31  ;;  %v3402_v39 = vsel %vm9820_vm5, %v3398_v56, %v3401_v8  ;;  %v6104_v31 = vld [vmem:[%s9298_s3 + $0x108] sm:$0xff]   ;;  %v9829_v56 = vld [vmem:[#allocation23_spill] sm:$0xff]  ;;  %vm9835_vm8 = vmmov %vm9811_vm1 }
 0x38e   : > { %v3858_v38 = vsel %vm9821_vm3, %v3402_v39, %v3521_v22  ;;  %v3408_v22 = vrot.slane %v7819_v46, 2  ;;  %vm9837_vm5 = vmmov %vm9811_vm1 }
 0x38f   : > { %4518 = vmatmul.mubr.bf16.gmra.mrb[104].mxu1 %v3782_v18  ;;  %v3523_v11 = vpop.permute.xlu0 %3522  ;;  %vm9838_vm3 = vmmov %vm9811_vm1 }
 0x390   : > { %4558 = vmatprep.mubr.bf16.mxu1 %v3930_v26  ;;  %v3658_v21 = vpop.permute.xlu1 %3657  ;;  %v3409_v18 = vor.u32 %v3408_v22, %v3407_v50 }
 0x391   : > { %v3934_v0 = vsel %vm9822_vm2, %v8628_v48, %v3658_v21  ;;  %v6105_v48 = vld [vmem:[%s9298_s3 + $0x110] sm:$0xff]   ;;  %v3862_v21 = vsel %vm9825_vm6, %v3406_v42, %v3523_v11  ;;  %vm9840_vm2 = vmmov %vm9811_vm1 }
 0x392   : > { %v3410_v55 = vsel %vm9827_vm7, %v3405_v6, %v3409_v18  ;;  %v3414_v39 = vsel %vm9830_vm9, %v3409_v18, %v9829_v56  ;;  %vm9843_vm6 = vmmov %vm9841_vm0  ;;  %v9845_v56 = vld [vmem:[#allocation29_spill] sm:$0xff] }
 0x393   : > { %v3525_v46 = vpop.permute.xlu0 %3524  ;;  %vm9846_vm7 = vmmov %vm9841_vm0 }
 0x394   : > { %v3660_v29 = vpop.permute.xlu1 %3659  ;;  %v3866_v34 = vsel %vm9828_vm4, %v3410_v55, %v3525_v46  ;;  %v9842_v55 = vld [vmem:[#allocation27_spill] sm:$0xff]  ;;  %vm9847_vm4 = vmmov %vm9841_vm0 }
 0x395   : > { %v3938_v52 = vsel %vm9826_vm14, %v8638_v63, %v3660_v29  ;;  %v9836_v29 = vld [vmem:[#allocation25_spill] sm:$0xff]  ;;  %vm9844_vm14 = vmmov %vm9841_vm0 }
 0x396   : > { %vm9850_vm9 = vmmov %vm9841_vm0 }
 0x397   : > { %4559 = vmatmul.mubr.bf16.vlgmr.msra.gmra.mrb[36].mxu1 %v3858_v38  ;;  %v3527_v63 = vpop.permute.xlu0 %3526 }
 0x398   : > { %5718 = vmatpush3.bf16.msra.mxu1 %v9823_v9  ;;  %4566 = vmatprep.mubr.bf16.mxu1 %v3934_v0  ;;  %v3662_v60 = vpop.permute.xlu1 %3661  ;;  %v3870_v61 = vsel %vm9831_vm13, %v3414_v39, %v3527_v63  ;;  %v9833_v9 = vld [vmem:[#allocation24_spill] sm:$0xff]  ;;  %vm9852_vm13 = vmmov %vm9841_vm0 }
 0x399   : > { %5715 = vmatprep.subr.bf16.mxu1 %v6104_v31  ;;  %v3942_v26 = vsel %vm9811_vm1, %v8646_v47, %v3662_v60  ;;  %vm9849_vm1 = vmmov %vm9841_vm0 }
 0x39b   : > { %v3529_v38 = vpop.permute.xlu0 %3528 }
 0x39c   : > { %5719 = vmatpush3.bf16.msra.mxu1 %v6104_v31  ;;  %v3664_v8 = vpop.permute.xlu1 %3663  ;;  %v3874_v6 = vsel %vm9834_vm15, %v9833_v9, %v3529_v38  ;;  %v9848_v38 = vld [vmem:[#allocation30_spill] sm:$0xff]  ;;  %vm9855_vm15 = vmmov %vm9841_vm0 }
 0x39d   : > { %5716 = vmatprep.subr.bf16.mxu1 %v6105_v48  ;;  %v3946_v4 = vsel %vm9832_vm11, %v8654_v49, %v3664_v8  ;;  %vm9853_vm11 = vmmov %vm9841_vm0 }
 0x39f   : > { %4567 = vmatmul.mubr.bf16.gmra.mrb[40].mxu1 %v3862_v21  ;;  %v3531_v31 = vpop.permute.xlu0 %3530 }
 0x3a0   : > { %4574 = vmatprep.mubr.bf16.mxu1 %v3938_v52  ;;  %5720 = vmatpush3.bf16.msra.mxu1 %v6105_v48  ;;  %v3666_v0 = vpop.permute.xlu1 %3665  ;;  %v3878_v42 = vsel %vm9837_vm5, %v9836_v29, %v3531_v31  ;;  %v9839_v52 = vld [vmem:[#allocation26_spill] sm:$0xff]  ;;  %vm9858_vm5 = vmmov %vm9841_vm0 }
 0x3a1   : > { %5717 = vmatprep.subr.bf16.mxu1 %v6106_v28  ;;  %v3950_v47 = vsel %vm9835_vm8, %v8662_v32, %v3666_v0  ;;  %vm9856_vm8 = vmmov %vm9841_vm0 }
 0x3a3   : > { %v3533_v50 = vpop.permute.xlu0 %3532 }
 0x3a4   : > { %5721 = vmatpush3.bf16.msra.mxu1 %v6106_v28  ;;  %v3668_v11 = vpop.permute.xlu1 %3667  ;;  %v3882_v32 = vsel %vm9840_vm2, %v9839_v52, %v3533_v50  ;;  %v9857_v52 = vld [vmem:[#allocation36_spill] sm:$0xff]  ;;  %vm9861_vm2 = vmmov %vm9841_vm0 }
 0x3a5   : > { %v3954_v49 = vsel %vm9838_vm3, %v8673_v13, %v3668_v11  ;;  %vm9859_vm3 = vmmov %vm9841_vm0 }
 0x3a7   : > { %4575 = vmatmul.mubr.bf16.gmra.mrb[44].mxu1 %v3866_v34  ;;  %v3535_v13 = vpop.permute.xlu0 %3534 }
 0x3a8   : > { %4582 = vmatprep.mubr.bf16.mxu1 %v3942_v26  ;;  %v3670_v22 = vpop.permute.xlu1 %3669  ;;  %v3886_v34 = vsel %vm9843_vm6, %v9842_v55, %v3535_v13  ;;  %vm9863_vm6 = vmmov %vm9841_vm0 }
 0x3a9   : > { %v3958_v28 = vsel %vm9841_vm0, %v8684_v59, %v3670_v22 }
 0x3ab   : > { %v3537_v63 = vpop.permute.xlu0 %3536 }
 0x3ac   : > { %v3672_v60 = vpop.permute.xlu1 %3671  ;;  %v3890_v39 = vsel %vm9846_vm7, %v9845_v56, %v3537_v63  ;;  %v9862_v63 = vld [vmem:[#allocation18_spill] sm:$0xff]  ;;  %vm9866_vm7 = vmmov %vm9841_vm0 }
 0x3ad   : > { %v3962_v26 = vsel %vm9844_vm14, %v8694_v43, %v3672_v60  ;;  %v9860_v60 = vld [vmem:[#allocation13_spill] sm:$0xff]  ;;  %vm9864_vm14 = vmmov %vm9841_vm0 }
 0x3af   : > { %4583 = vmatmul.mubr.bf16.gmra.mrb[48].mxu1 %v3870_v61  ;;  %v3539_v61 = vpop.permute.xlu0 %3538 }
 0x3b0   : > { %4590 = vmatprep.mubr.bf16.mxu1 %v3946_v4  ;;  %v3674_v8 = vpop.permute.xlu1 %3673  ;;  %v3894_v0 = vsel %vm9849_vm1, %v9848_v38, %v3539_v61  ;;  %vm9868_vm1 = vmmov %vm9841_vm0 }
 0x3b1   : > { %v3966_v59 = vsel %vm9847_vm4, %v8704_v12, %v3674_v8  ;;  %vm9867_vm4 = vmmov %vm9841_vm0 }
 0x3b3   : > { %v3541_v9 = vpop.permute.xlu0 %3540 }
 0x3b4   : > { %v3676_v4 = vpop.permute.xlu1 %3675 }
 0x3b5   : > { %v3970_v43 = vsel %vm9850_vm9, %v8716_v58, %v3676_v4  ;;  %v3103_v4 = vld [vmem:[#allocation3 + $0xa0] sm:$0x3]  ;;  %vm9870_vm9 = vmmov %vm9841_vm0 }
 0x3b6   : > { %v3563_v38 = vrot.slane %v3103_v4, 2 }
 0x3b7   : > { %4591 = vmatmul.mubr.bf16.gmra.mrb[52].mxu1 %v3874_v6  ;;  %v3543_v11 = vpop.permute.xlu0 %3542 }
 0x3b8   : > { %4598 = vmatprep.mubr.bf16.mxu1 %v3950_v47  ;;  %v3678_v6 = vpop.permute.xlu1 %3677  ;;  %v9851_v47 = vld [vmem:[#allocation33_spill] sm:$0xff] }
 0x3b9   : > { %v3898_v31 = vsel %vm9852_vm13, %v9851_v47, %v3541_v9  ;;  %v3974_v12 = vsel %vm9853_vm11, %v8728_v7, %v3678_v6  ;;  %vm9871_vm13 = vmmov %vm9841_vm0 }
 0x3ba   : > { %vm9873_vm11 = vmmov %vm9841_vm0 }
 0x3bb   : > { %v3545_v50 = vpop.permute.xlu0 %3544 }
 0x3bc   : > { %v3680_v29 = vpop.permute.xlu1 %3679 }
 0x3bd   : > { %v3978_v58 = vsel %vm9856_vm8, %v8736_v5, %v3680_v29  ;;  %vm9875_vm8 = vmmov %vm9841_vm0 }
 0x3bf   : > { %4599 = vmatmul.mubr.bf16.gmra.mrb[56].mxu1 %v3878_v42  ;;  %v9854_v42 = vld [vmem:[#allocation35_spill] sm:$0xff] }
 0x3c0   : > { %4606 = vmatprep.mubr.bf16.mxu1 %v3954_v49  ;;  %v3902_v49 = vsel %vm9855_vm15, %v9854_v42, %v3543_v11  ;;  %v3682_v22 = vpop.permute.xlu1 %3681  ;;  %v9872_v11 = vrot.slane %v8343_v3, 3  ;;  %vm9874_vm15 = vmmov %vm9841_vm0 }
 0x3c1   : > { %v3982_v7 = vsel %vm9859_vm3, %v8746_v24, %v3682_v22  ;;  %vm9878_vm3 = vmmov %vm9841_vm0 }
 0x3c4   : > { %v3684_v13 = vpop.permute.xlu1 %3683 }
 0x3c5   : > { %v8876_v48 = vpop.f32.mrb[92].mxu0  ;;  %v3986_v5 = vsel %vm9841_vm0, %v8760_v20, %v3684_v13 }
 0x3c6   : > { %v8878_v21 = vpop.f32.mrb[93].mxu0 }
 0x3c7   : > { %4607 = vmatmul.mubr.bf16.gmra.mrb[60].mxu1 %v3882_v32  ;;  %v8882_v18 = vpop.f32.mrb[94].mxu0  ;;  %v3906_v32 = vsel %vm9858_vm5, %v9857_v52, %v3545_v50  ;;  %vm9877_vm5 = vmmov %vm9841_vm0 }
 0x3c8   : > { %v8886_v46 = vpop.f32.mrb[95].mxu0  ;;  %4614 = vmatprep.mubr.bf16.mxu1 %v3958_v28  ;;  %v3547_v28 = vpop.permute.xlu0 %3546 }
 0x3c9   : > { %v3910_v55 = vsel %vm9861_vm2, %v9860_v60, %v3547_v28  ;;  %vm9879_vm2 = vmmov %vm9841_vm0  ;;  %v4991_v28 = vld [vmem:[%s6396_s23] sm:$0xff] }
 0x3cf   : > { %4615 = vmatmul.mubr.bf16.gmra.mrb[64].mxu1 %v3886_v34  ;;  %v3549_v34 = vpop.permute.xlu0 %3548 }
 0x3d0   : > { %4622 = vmatprep.mubr.bf16.mxu1 %v3962_v26  ;;  %v3686_v26 = vpop.permute.xlu1 %3685  ;;  %v3914_v8 = vsel %vm9863_vm6, %v9862_v63, %v3549_v34  ;;  %vm9880_vm6 = vmmov %vm9868_vm1 }
 0x3d1   : > { %v3990_v24 = vsel %vm9864_vm14, %v8772_v2, %v3686_v26  ;;  %v9869_v2 = vrot.slane %v8550_v41, 2  ;;  %v3720_v41 = vrot.slane %v8455_v1, 3  ;;  %v8954_v1 = vld [vmem:[%s9299_s4] ss:$0 sm:$0xff]  ;;  %v5503_v26 = vld [vmem:[%s6396_s23 + $0x10] sm:$0xff] }
 0x3d2   : > { %v5005_v4 = vrot.slane %v5503_v26, 6 }
 0x3d3   : > { %v3551_v56 = vpop.permute.xlu0 %3550  ;;  %v3564_v6 = vsel %vm1073_vm10, %v9869_v2, %v3563_v38 }
 0x3d7   : > { %4623 = vmatmul.mubr.bf16.gmra.mrb[68].mxu1 %v3890_v39  ;;  %v3688_v39 = vpop.permute.xlu1 %3687 }
 0x3d8   : > { %4630 = vmatprep.mubr.bf16.mxu1 %v3966_v59  ;;  %v9865_v59 = vld [vmem:[#allocation15_spill] sm:$0xff]  ;;  %v3994_v20 = vsel %vm9867_vm4, %v8587_v19, %v3688_v39  ;;  %vm5004_vm4 = vcmask 1041408  }
 0x3d9   : > { %v3918_v61 = vsel %vm9866_vm7, %v9865_v59, %v3551_v56  ;;  %vm9881_vm7 = vmmov %vm9868_vm1 }
 0x3df   : > { %4631 = vmatmul.mubr.bf16.gmra.mrb[72].mxu1 %v3894_v0  ;;  %v3553_v0 = vpop.permute.xlu0 %3552 }
 0x3e0   : > { %4638 = vmatprep.mubr.bf16.mxu1 %v3970_v43  ;;  %v3690_v43 = vpop.permute.xlu1 %3689  ;;  %v3922_v9 = vsel %vm9868_vm1, %v8598_v57, %v3553_v0  ;;  %v3722_v57 = vrot.slane %v8489_v35, 3 }
 0x3e1   : > { %v3998_v47 = vsel %vm9870_vm9, %v3564_v6, %v3690_v43  ;;  %vm9882_vm9 = vcmask 523266  }
 0x3e7   : > { %4639 = vmatmul.mubr.bf16.gmra.mrb[76].mxu1 %v3898_v31  ;;  %v3555_v31 = vpop.permute.xlu0 %3554 }
 0x3e8   : > { %4646 = vmatprep.mubr.bf16.mxu1 %v3974_v12  ;;  %v3718_v12 = vrot.slane %v8408_v15, 3  ;;  %v3926_v19 = vsel %vm9871_vm13, %v8623_v30, %v3555_v31  ;;  %v3723_v15 = vsel %vm1284_vm12, %v3720_v41, %v3722_v57  ;;  %v9876_v30 = vrot.slane %v8528_v44, 3 }
 0x3ea   : > { %v3719_v29 = vsel %vm1284_vm12, %v9872_v11, %v3718_v12  ;;  %v3721_v42 = vsel %vm1284_vm12, %v3718_v12, %v3720_v41  ;;  %v3725_v3 = vsel %vm1284_vm12, %v3722_v57, %v9876_v30  ;;  %v5509_v57 = vld [vmem:[%s6396_s23 + $0x28] sm:$0xff] }
 0x3ef   : > { %4647 = vmatmul.mubr.bf16.gmra.mrb[80].mxu1 %v3902_v49 }
 0x3f0   : > { %4654 = vmatprep.mubr.bf16.mxu1 %v3978_v58  ;;  %v8957_v58 = vstv %s5447_s29  ;;  %s6128_s29 = scalar_lea.vmem %s6127_s22, 8192 }
 0x3f1   : > { %p6130_p0 = scmp.lt.s32.totalorder %s6128_s29, %s6122_s20 }
 0x3f3   : > { %p6131_p1 = por %p6130_p0, %p6129_p13 }
 0x3f5   : > { %p6132_p2 = pnand %p6131_p1, %p6125_p12 }
 0x3f7   : > { %4655 = vmatmul.mubr.bf16.gmra.mrb[84].mxu1 %v3906_v32 }
 0x3f8   : > { %4662 = vmatprep.mubr.bf16.mxu1 %v3982_v7 }
 0x3ff   : > { %4663 = vmatmul.mubr.bf16.gmra.mrb[88].mxu1 %v3910_v55 }
 0x400   : > { %4670 = vmatprep.mubr.bf16.mxu1 %v3986_v5  ;;  %v4992_v5 = vld [vmem:[%s6396_s23 + $0x8] sm:$0xff] }
 0x407   : > { %4671 = vmatmul.mubr.bf16.gmra.mrb[92].mxu1 %v3914_v8 }
 0x408   : > { %4678 = vmatprep.mubr.bf16.mxu1 %v3990_v24 }
 0x40f   : > { %4679 = vmatmul.mubr.bf16.gmra.mrb[96].mxu1 %v3918_v61 }
 0x410   : > { %4686 = vmatprep.mubr.bf16.mxu1 %v3994_v20 }
 0x417   : > { %4687 = vmatmul.mubr.bf16.gmra.mrb[100].mxu1 %v3922_v9 }
 0x418   : > { %4694 = vmatprep.mubr.bf16.mxu1 %v3998_v47 }
 0x41f   : > { %4695 = vmatmul.mubr.bf16.gmra.mrb[104].mxu1 %v3926_v19  ;;  %v5508_v19 = vld [vmem:[%s6396_s23 + $0x20] sm:$0xff] }
 0x420   : > { %5702 = vmatprep.mubr.msk.bf16.mxu1 %vm9873_vm11, %v3719_v29  ;;  %vm9883_vm11 = vmmov %vm9879_vm2 }
 0x427   : > { %5703 = vmatmul.mubr.msk.bf16.vlgmr.msra.gmra.mrb[108].mxu1 %vm9874_vm15, %v3721_v42  ;;  %vm5026_vm15 = vcmask 1043456  }
 0x428   : > { %5706 = vmatprep.mubr.msk.bf16.mxu1 %vm9875_vm8, %v3723_v15 }
 0x42f   : > { %5707 = vmatmul.mubr.msk.bf16.gmra.mrb[112].mxu1 %vm9877_vm5, %v3725_v3  ;;  %vm9885_vm5 = vcmask 517120  }
 0x430   : > { %5710 = vmatprep.mubr.msk.bf16.mxu1 %vm9878_vm3, %v8608_v53  ;;  %vm9886_vm3 = vcmask 523268  }
 0x437   : > { %5711 = vmatmul.mubr.msk.bf16.gmra.mrb[116].mxu1 %vm9879_vm2, %v8611_v40 }
 0x46a   : > { %v4560_v35 = vpop.f32.mrb[36].mxu1 }
 0x46b   : > { %v5758_v44 = vadd.f32 %v8954_v1, %v4560_v35  ;;  %v4562_v49 = vpop.f32.mrb[37].mxu1  ;;  %v5027_v35 = vrot.slane %v5508_v19, 4 }
 0x46c   : > { %v4563_v50 = vpop.f32.mrb[38].mxu1 }
 0x46d   : > { %v4738_v53 = vadd.f32 %v5758_v44, %v8670_v25  ;;  %v5759_v40 = vadd.f32 %v8954_v1, %v4563_v50  ;;  %v4565_v22 = vpop.f32.mrb[39].mxu1  ;;  %v5028_v50 = vrot.slane %v5509_v57, 4 }
 0x46f   : > { %vm4880_vm12 = vcmp.gt.f32.partialorder %v4738_v53, 0.0  ;;  %v4917_v52 = vmul.f32 %v8957_v58, %v4738_v53  ;;  %v4741_v32 = vadd.f32 %v5759_v40, %v8679_v14  ;;  %v5504_v14 = vld [vmem:[%s6396_s23 + $0x18] sm:$0xff] }
 0x470   : > { %v5006_v43 = vrot.slane %v5504_v14, 6 }
 0x471   : > { %v4953_v7 = vsel %vm4880_vm12, %v4738_v53, %v4917_v52  ;;  %vm4881_vm0 = vcmp.gt.f32.partialorder %v4741_v32, 0.0  ;;  %v4918_v13 = vmul.f32 %v8957_v58, %v4741_v32  ;;  %vm9888_vm12 = vmmov %vm9880_vm6 }
 0x472   : > { %v4989_v60 = vmul.f32 0.01, %v4953_v7  ;;  %v4568_v55 = vpop.f32.mrb[40].mxu1  ;;  %v5007_v31 = vsel %vm5004_vm4, %v5005_v4, %v5006_v43 }
 0x473   : > { %v4954_v25 = vsel %vm4881_vm0, %v4741_v32, %v4918_v13  ;;  %v5760_v34 = vadd.f32 %v8954_v1, %v4568_v55  ;;  %v4570_v63 = vpop.f32.mrb[41].mxu1  ;;  %v5029_v32 = vsel %vm5026_vm15, %v5027_v35, %v5028_v50 }
 0x474   : > { %v4993_v8 = vadd.f32 %v4991_v28, %v4989_v60  ;;  %v4990_v24 = vmul.f32 0.01, %v4954_v25  ;;  %v4571_v56 = vpop.f32.mrb[42].mxu1  ;;  %v5513_v28 = vld [vmem:[%s6396_s23 + $0x30] sm:$0xff] }
 0x475   : > { %v4746_v39 = vadd.f32 %v5760_v34, %v8668_v36  ;;  %v5761_v59 = vadd.f32 %v8954_v1, %v4571_v56  ;;  %v4573_v61 = vpop.f32.mrb[43].mxu1  ;;  %v9884_v34 = vld [vmem:[#allocation17_spill] sm:$0xff]  ;;  %v5049_v56 = vrot.slane %v5513_v28, 2  ;;  %v9894_v28 = vld [vmem:[#allocation12_spill] sm:$0xff] }
 0x476   : > { %4995 = vst.msk [vmem:[%s8974_s15] sm:$0xff] %vm9880_vm6, %v4993_v8  ;;  %v4994_v20 = vadd.f32 %v4992_v5, %v4990_v24  ;;  %v5514_v5 = vld [vmem:[%s6396_s23 + $0x38] sm:$0xff]  ;;  %vm9889_vm6 = vcmask 519168  }
 0x477   : > { %vm4882_vm14 = vcmp.gt.f32.partialorder %v4746_v39, 0.0  ;;  %v4919_v38 = vmul.f32 %v8957_v58, %v4746_v39  ;;  %v4749_v0 = vadd.f32 %v5761_v59, %v8677_v51  ;;  %v5050_v61 = vrot.slane %v5514_v5, 2 }
 0x478   : > { %4996 = vst.msk [vmem:[%s8974_s15 + $0x8] sm:$0xff] %vm9881_vm7, %v4994_v20 }
 0x479   : > { %v4955_v36 = vsel %vm4882_vm14, %v4746_v39, %v4919_v38  ;;  %vm4883_vm1 = vcmp.gt.f32.partialorder %v4749_v0, 0.0  ;;  %v4920_v9 = vmul.f32 %v8957_v58, %v4749_v0  ;;  %v9887_v39 = vld [vmem:[#allocation37_spill] sm:$0xff]  ;;  %vm9890_vm14 = vcmask 523270  }
 0x47a   : > { %v4997_v2 = vmul.f32 0.01, %v4955_v36  ;;  %v4576_v6 = vpop.f32.mrb[44].mxu1  ;;  %v5051_v36 = vsel %vm1073_vm10, %v5049_v56, %v5050_v61 }
 0x47b   : > { %v4956_v47 = vsel %vm4883_vm1, %v4749_v0, %v4920_v9  ;;  %v5762_v12 = vadd.f32 %v8954_v1, %v4576_v6  ;;  %v4578_v51 = vpop.f32.mrb[45].mxu1  ;;  %vm9891_vm1 = vmmov %vm9883_vm11 }
 0x47c   : > { %v5011_v11 = vadd.f32 %v5005_v4, %v4997_v2  ;;  %v4998_v29 = vmul.f32 0.01, %v4956_v47  ;;  %v4579_v41 = vpop.f32.mrb[46].mxu1 }
 0x47d   : > { %v4754_v42 = vadd.f32 %v5762_v12, %v8713_v37  ;;  %v5763_v15 = vadd.f32 %v8954_v1, %v4579_v41  ;;  %v4581_v30 = vpop.f32.mrb[47].mxu1 }
 0x47e   : > { %5505 = vst.msk [vmem:[%s8974_s15 + $0xe] sm:$0xfc] %vm9882_vm9, %v5011_v11  ;;  %v5012_v3 = vadd.f32 %v5007_v31, %v4998_v29 }
 0x47f   : > { %vm4884_vm13 = vcmp.gt.f32.partialorder %v4754_v42, 0.0  ;;  %v4921_v44 = vmul.f32 %v8957_v58, %v4754_v42  ;;  %v4757_v49 = vadd.f32 %v5763_v15, %v8723_v62 }
 0x480   : > { %5506 = vst.msk [vmem:[%s8974_s15 + $0x16] sm:$0xff] %vm9883_vm11, %v5012_v3 }
 0x481   : > { %v4957_v53 = vsel %vm4884_vm13, %v4754_v42, %v4921_v44  ;;  %vm4885_vm8 = vcmp.gt.f32.partialorder %v4757_v49, 0.0  ;;  %v4922_v37 = vmul.f32 %v8957_v58, %v4757_v49  ;;  %vm9893_vm13 = vcmask 521216  }
 0x482   : > { %v4999_v40 = vmul.f32 0.01, %v4957_v53  ;;  %v4584_v22 = vpop.f32.mrb[48].mxu1 }
 0x483   : > { %v4958_v52 = vsel %vm4885_vm8, %v4757_v49, %v4922_v37  ;;  %v5764_v7 = vadd.f32 %v8954_v1, %v4584_v22  ;;  %v4586_v62 = vpop.f32.mrb[49].mxu1  ;;  %v9892_v37 = vld [vmem:[#allocation34_spill] sm:$0xff]  ;;  %vm9895_vm8 = vmmov %vm9891_vm1 }
 0x484   : > { %v5013_v13 = vadd.f32 %v5006_v43, %v4999_v40  ;;  %v5033_v60 = vadd.f32 %v5027_v35, %v4999_v40  ;;  %v5020_v55 = vmul.f32 0.01, %v4958_v52  ;;  %v4587_v25 = vpop.f32.mrb[50].mxu1  ;;  %v5518_v35 = vld [vmem:[%s6396_s23 + $0x40] sm:$0xff] }
 0x485   : > { %v4762_v26 = vadd.f32 %v5764_v7, %v9884_v34  ;;  %v5765_v63 = vadd.f32 %v8954_v1, %v4587_v25  ;;  %v4589_v8 = vpop.f32.mrb[51].mxu1 }
 0x486   : > { %5507 = vst.msk [vmem:[%s8974_s15 + $0x1e] sm:$0x3] %vm9885_vm5, %v5013_v13  ;;  %v5034_v24 = vadd.f32 %v5029_v32, %v5020_v55  ;;  %v5522_v13 = vld [vmem:[%s6396_s23 + $0x50] sm:$0xff]  ;;  %v5519_v55 = vld [vmem:[%s6396_s23 + $0x48] sm:$0xff] }
 0x487   : > { %5510 = vst.msk [vmem:[%s8974_s15 + $0x1c] sm:$0xf0] %vm9886_vm3, %v5033_v60  ;;  %vm4886_vm2 = vcmp.gt.f32.partialorder %v4762_v26, 0.0  ;;  %v4923_v14 = vmul.f32 %v8957_v58, %v4762_v26  ;;  %v4765_v59 = vadd.f32 %v5765_v63, %v9887_v39  ;;  %v5080_v34 = vrot.slane %v5522_v13, 6  ;;  %v5523_v63 = vld [vmem:[%s6396_s23 + $0x58] sm:$0xff]  ;;  %vm9896_vm3 = vmmov %vm9891_vm1 }
 0x488   : > { %5511 = vst.msk [vmem:[%s8974_s15 + $0x24] sm:$0xff] %vm9888_vm12, %v5034_v24  ;;  %vm9897_vm12 = vcmask 523266  }
 0x489   : > { %v4959_v20 = vsel %vm4886_vm2, %v4762_v26, %v4923_v14  ;;  %vm4887_vm0 = vcmp.gt.f32.partialorder %v4765_v59, 0.0  ;;  %v4924_v4 = vmul.f32 %v8957_v58, %v4765_v59 }
 0x48a   : > { %v5021_v38 = vmul.f32 0.01, %v4959_v20  ;;  %v4592_v0 = vpop.f32.mrb[52].mxu1  ;;  %v5081_v20 = vrot.slane %v5523_v63, 6 }
 0x48b   : > { %v4960_v43 = vsel %vm4887_vm0, %v4765_v59, %v4924_v4  ;;  %v5766_v9 = vadd.f32 %v8954_v1, %v4592_v0  ;;  %v4594_v2 = vpop.f32.mrb[53].mxu1 }
 0x48c   : > { %v5035_v6 = vadd.f32 %v5028_v50, %v5021_v38  ;;  %v5055_v47 = vadd.f32 %v5049_v56, %v5021_v38  ;;  %v5042_v31 = vmul.f32 0.01, %v4960_v43  ;;  %v4595_v12 = vpop.f32.mrb[54].mxu1 }
 0x48d   : > { %v4770_v19 = vadd.f32 %v5766_v9, %v8757_v16  ;;  %v5767_v51 = vadd.f32 %v8954_v1, %v4595_v12  ;;  %v4597_v11 = vpop.f32.mrb[55].mxu1  ;;  %v5527_v9 = vld [vmem:[%s6396_s23 + $0x60] sm:$0xff] }
 0x48e   : > { %5512 = vst.msk [vmem:[%s8974_s15 + $0x2c] sm:$0xf] %vm9889_vm6, %v5035_v6  ;;  %v5056_v29 = vadd.f32 %v5051_v36, %v5042_v31  ;;  %v5082_v6 = vsel %vm5004_vm4, %v5080_v34, %v5081_v20  ;;  %v5099_v31 = vrot.slane %v5527_v9, 4  ;;  %vm9898_vm6 = vmmov %vm9891_vm1 }
 0x48f   : > { %5515 = vst.msk [vmem:[%s8974_s15 + $0x2a] sm:$0xc0] %vm9890_vm14, %v5055_v47  ;;  %vm4888_vm7 = vcmp.gt.f32.partialorder %v4770_v19, 0.0  ;;  %v4925_v41 = vmul.f32 %v8957_v58, %v4770_v19  ;;  %v4773_v57 = vadd.f32 %v5767_v51, %v8766_v45 }
 0x490   : > { %5516 = vst.msk [vmem:[%s8974_s15 + $0x32] sm:$0xff] %vm9891_vm1, %v5056_v29  ;;  %vm9900_vm1 = vcmask 523268  }
 0x491   : > { %v4961_v42 = vsel %vm4888_vm7, %v4770_v19, %v4925_v41  ;;  %vm4889_vm9 = vcmp.gt.f32.partialorder %v4773_v57, 0.0  ;;  %v4926_v16 = vmul.f32 %v8957_v58, %v4773_v57  ;;  %v5528_v19 = vld [vmem:[%s6396_s23 + $0x68] sm:$0xff]  ;;  %vm9899_vm7 = vcmask 517120  }
 0x492   : > { %v5043_v15 = vmul.f32 0.01, %v4961_v42  ;;  %v4600_v30 = vpop.f32.mrb[56].mxu1 }
 0x493   : > { %v4962_v3 = vsel %vm4889_vm9, %v4773_v57, %v4926_v16  ;;  %v5768_v44 = vadd.f32 %v8954_v1, %v4600_v30  ;;  %v4602_v49 = vpop.f32.mrb[57].mxu1  ;;  %v5100_v16 = vrot.slane %v5528_v19, 4 }
 0x494   : > { %v5057_v50 = vadd.f32 %v5050_v61, %v5043_v15  ;;  %v5064_v53 = vmul.f32 0.01, %v4962_v3  ;;  %v4603_v45 = vpop.f32.mrb[58].mxu1 }
 0x495   : > { %v4778_v40 = vadd.f32 %v5768_v44, %v9892_v37  ;;  %v5769_v22 = vadd.f32 %v8954_v1, %v4603_v45  ;;  %v4605_v52 = vpop.f32.mrb[59].mxu1 }
 0x496   : > { %5517 = vst.msk [vmem:[%s8974_s15 + $0x3a] sm:$0x3f] %vm9893_vm13, %v5057_v50  ;;  %v5068_v32 = vadd.f32 %v5518_v35, %v5064_v53  ;;  %v5532_v50 = vld [vmem:[%s6396_s23 + $0x70] sm:$0xff]  ;;  %v5101_v53 = vsel %vm5026_vm15, %v5099_v31, %v5100_v16  ;;  %v5533_v52 = vld [vmem:[%s6396_s23 + $0x78] sm:$0xff]  ;;  %vm9901_vm13 = vmmov %vm9896_vm3 }
 0x497   : > { %vm4890_vm11 = vcmp.gt.f32.partialorder %v4778_v40, 0.0  ;;  %v4927_v7 = vmul.f32 %v8957_v58, %v4778_v40  ;;  %v4781_v62 = vadd.f32 %v5769_v22, %v9894_v28 }
 0x498   : > { %5520 = vst.msk [vmem:[%s8974_s15 + $0x40] sm:$0xff] %vm9895_vm8, %v5068_v32  ;;  %vm9902_vm8 = vcmask 519168  }
 0x499   : > { %v4963_v60 = vsel %vm4890_vm11, %v4778_v40, %v4927_v7  ;;  %vm4891_vm5 = vcmp.gt.f32.partialorder %v4781_v62, 0.0  ;;  %v4928_v25 = vmul.f32 %v8957_v58, %v4781_v62  ;;  %v5118_v40 = vrot.slane %v5532_v50, 2 }
 0x49a   : > { %v5065_v5 = vmul.f32 0.01, %v4963_v60  ;;  %v4608_v26 = vpop.f32.mrb[60].mxu1 }
 0x49b   : > { %v4964_v8 = vsel %vm4891_vm5, %v4781_v62, %v4928_v25  ;;  %v5770_v24 = vadd.f32 %v8954_v1, %v4608_v26  ;;  %v4610_v56 = vpop.f32.mrb[61].mxu1  ;;  %vm9903_vm5 = vcmask 523270  }
 0x49c   : > { %v5069_v14 = vadd.f32 %v5519_v55, %v5065_v5  ;;  %v5073_v39 = vmul.f32 0.01, %v4964_v8  ;;  %v4611_v59 = vpop.f32.mrb[62].mxu1  ;;  %v5119_v55 = vrot.slane %v5533_v52, 2 }
 0x49d   : > { %v4786_v61 = vadd.f32 %v5770_v24, %v8791_v27  ;;  %v5771_v4 = vadd.f32 %v8954_v1, %v4611_v59  ;;  %v4613_v38 = vpop.f32.mrb[63].mxu1 }
 0x49e   : > { %5521 = vst.msk [vmem:[%s8974_s15 + $0x48] sm:$0xff] %vm9896_vm3, %v5069_v14  ;;  %v5086_v0 = vadd.f32 %v5080_v34, %v5073_v39 }
 0x49f   : > { %vm4892_vm2 = vcmp.gt.f32.partialorder %v4786_v61, 0.0  ;;  %v4929_v43 = vmul.f32 %v8957_v58, %v4786_v61  ;;  %v4789_v36 = vadd.f32 %v5771_v4, %v8797_v23 }
 0x4a0   : > { %5524 = vst.msk [vmem:[%s8974_s15 + $0x4e] sm:$0xfc] %vm9897_vm12, %v5086_v0  ;;  %v9904_v0 = vld [vmem:[#allocation32_spill] sm:$0xff] }
 0x4a1   : > { %v4965_v2 = vsel %vm4892_vm2, %v4786_v61, %v4929_v43  ;;  %vm4893_vm0 = vcmp.gt.f32.partialorder %v4789_v36, 0.0  ;;  %v4930_v27 = vmul.f32 %v8957_v58, %v4789_v36  ;;  %vm9905_vm2 = vmmov %vm9898_vm6 }
 0x4a2   : > { %v5074_v47 = vmul.f32 0.01, %v4965_v2  ;;  %v4616_v12 = vpop.f32.mrb[64].mxu1 }
 0x4a3   : > { %v4966_v51 = vsel %vm4893_vm0, %v4789_v36, %v4930_v27  ;;  %v5772_v11 = vadd.f32 %v8954_v1, %v4616_v12  ;;  %v4618_v23 = vpop.f32.mrb[65].mxu1  ;;  %v9906_v27 = vld [vmem:[#allocation10_spill] sm:$0xff]  ;;  %vm9907_vm0 = vcmask 521216   ;;  %v5537_v12 = vld [vmem:[%s6396_s23 + $0x80] sm:$0xff] }
 0x4a4   : > { %v5087_v29 = vadd.f32 %v5082_v6, %v5074_v47  ;;  %v5075_v41 = vmul.f32 0.01, %v4966_v51  ;;  %v4619_v57 = vpop.f32.mrb[66].mxu1 }
 0x4a5   : > { %v4794_v42 = vadd.f32 %v5772_v11, %v8789_v54  ;;  %v5773_v15 = vadd.f32 %v8954_v1, %v4619_v57  ;;  %v4621_v30 = vpop.f32.mrb[67].mxu1  ;;  %v5541_v57 = vld [vmem:[%s6396_s23 + $0x90] sm:$0xff] }
 0x4a6   : > { %5525 = vst.msk [vmem:[%s8974_s15 + $0x56] sm:$0xff] %vm9898_vm6, %v5087_v29  ;;  %v5088_v3 = vadd.f32 %v5081_v20, %v5075_v41  ;;  %v5105_v35 = vadd.f32 %v5099_v31, %v5075_v41  ;;  %v5538_v29 = vld [vmem:[%s6396_s23 + $0x88] sm:$0xff] }
 0x4a7   : > { %vm4894_vm14 = vcmp.gt.f32.partialorder %v4794_v42, 0.0  ;;  %v4931_v44 = vmul.f32 %v8957_v58, %v4794_v42  ;;  %v4797_v49 = vadd.f32 %v5773_v15, %v8793_v10 }
 0x4a8   : > { %5526 = vst.msk [vmem:[%s8974_s15 + $0x5e] sm:$0x3] %vm9899_vm7, %v5088_v3  ;;  %v5542_v3 = vld [vmem:[%s6396_s23 + $0x98] sm:$0xff] }
 0x4a9   : > { %5529 = vst.msk [vmem:[%s8974_s15 + $0x5c] sm:$0xf0] %vm9900_vm1, %v5105_v35  ;;  %v4967_v54 = vsel %vm4894_vm14, %v4794_v42, %v4931_v44  ;;  %vm4895_vm9 = vcmp.gt.f32.partialorder %v4797_v49, 0.0  ;;  %v4932_v45 = vmul.f32 %v8957_v58, %v4797_v49  ;;  %vm9908_vm14 = vmmov %vm9905_vm2 }
 0x4aa   : > { %v5093_v37 = vmul.f32 0.01, %v4967_v54  ;;  %v4624_v22 = vpop.f32.mrb[68].mxu1  ;;  %v5147_v54 = vrot.slane %v5541_v57, 6  ;;  %vm9909_vm1 = vmmov %vm9905_vm2 }
 0x4ab   : > { %v4968_v32 = vsel %vm4895_vm9, %v4797_v49, %v4932_v45  ;;  %v5774_v10 = vadd.f32 %v8954_v1, %v4624_v22  ;;  %v4626_v7 = vpop.f32.mrb[69].mxu1 }
 0x4ac   : > { %v5106_v28 = vadd.f32 %v5101_v53, %v5093_v37  ;;  %v5094_v62 = vmul.f32 0.01, %v4968_v32  ;;  %v4627_v13 = vpop.f32.mrb[70].mxu1  ;;  %v5148_v37 = vrot.slane %v5542_v3, 6 }
 0x4ad   : > { %v4802_v60 = vadd.f32 %v5774_v10, %v8807_v33  ;;  %v5775_v25 = vadd.f32 %v8954_v1, %v4627_v13  ;;  %v4629_v5 = vpop.f32.mrb[71].mxu1  ;;  %v5120_v33 = vsel %vm1073_vm10, %v5118_v40, %v5119_v55 }
 0x4ae   : > { %5530 = vst.msk [vmem:[%s8974_s15 + $0x64] sm:$0xff] %vm9901_vm13, %v5106_v28  ;;  %v5107_v34 = vadd.f32 %v5100_v16, %v5094_v62  ;;  %v5124_v26 = vadd.f32 %v5118_v40, %v5094_v62  ;;  %v5149_v10 = vsel %vm5004_vm4, %v5147_v54, %v5148_v37  ;;  %v5546_v28 = vld [vmem:[%s6396_s23 + $0xa0] sm:$0xff]  ;;  %vm9910_vm13 = vcmask 523266  }
 0x4af   : > { %vm4896_vm11 = vcmp.gt.f32.partialorder %v4802_v60, 0.0  ;;  %v4933_v63 = vmul.f32 %v8957_v58, %v4802_v60  ;;  %v4805_v8 = vadd.f32 %v5775_v25, %v8813_v17 }
 0x4b0   : > { %5531 = vst.msk [vmem:[%s8974_s15 + $0x6c] sm:$0xf] %vm9902_vm8, %v5107_v34  ;;  %vm9911_vm8 = vmmov %vm9909_vm1 }
 0x4b1   : > { %5534 = vst.msk [vmem:[%s8974_s15 + $0x6a] sm:$0xc0] %vm9903_vm5, %v5124_v26  ;;  %v4969_v24 = vsel %vm4896_vm11, %v4802_v60, %v4933_v63  ;;  %vm4897_vm3 = vcmp.gt.f32.partialorder %v4805_v8, 0.0  ;;  %v4934_v56 = vmul.f32 %v8957_v58, %v4805_v8  ;;  %v5166_v63 = vrot.slane %v5546_v28, 4 }
 0x4b2   : > { %v5112_v14 = vmul.f32 0.01, %v4969_v24  ;;  %v4632_v39 = vpop.f32.mrb[72].mxu1 }
 0x4b3   : > { %v4970_v59 = vsel %vm4897_vm3, %v4805_v8, %v4934_v56  ;;  %v5776_v61 = vadd.f32 %v8954_v1, %v4632_v39  ;;  %v4634_v20 = vpop.f32.mrb[73].mxu1  ;;  %vm9912_vm3 = vcmask 517120  }
 0x4b4   : > { %v5125_v17 = vadd.f32 %v5120_v33, %v5112_v14  ;;  %v5113_v4 = vmul.f32 0.01, %v4970_v59  ;;  %v4635_v38 = vpop.f32.mrb[74].mxu1 }
 0x4b5   : > { %v4810_v43 = vadd.f32 %v5776_v61, %v9904_v0  ;;  %v5777_v36 = vadd.f32 %v8954_v1, %v4635_v38  ;;  %v4637_v9 = vpop.f32.mrb[75].mxu1 }
 0x4b6   : > { %5535 = vst.msk [vmem:[%s8974_s15 + $0x72] sm:$0xff] %vm9905_vm2, %v5125_v17  ;;  %v5126_v2 = vadd.f32 %v5119_v55, %v5113_v4  ;;  %v9107_v55 = vld [vmem:[%s6396_s23 + $0xa8] sm:$0xff]  ;;  %vm9913_vm2 = vcmask 523268  }
 0x4b7   : > { %vm4898_vm12 = vcmp.gt.f32.partialorder %v4810_v43, 0.0  ;;  %v4935_v6 = vmul.f32 %v8957_v58, %v4810_v43  ;;  %v4813_v47 = vadd.f32 %v5777_v36, %v9906_v27  ;;  %v5167_v33 = vrot.slane %v9107_v55, 4 }
 0x4b8   : > { %5536 = vst.msk [vmem:[%s8974_s15 + $0x7a] sm:$0x3f] %vm9907_vm0, %v5126_v2 }
 0x4b9   : > { %v4971_v31 = vsel %vm4898_vm12, %v4810_v43, %v4935_v6  ;;  %vm4899_vm6 = vcmp.gt.f32.partialorder %v4813_v47, 0.0  ;;  %v4936_v19 = vmul.f32 %v8957_v58, %v4813_v47  ;;  %v5168_v61 = vsel %vm5026_vm15, %v5166_v63, %v5167_v33  ;;  %vm9914_vm12 = vmmov %vm9909_vm1 }
 0x4ba   : > { %v5131_v51 = vmul.f32 0.01, %v4971_v31  ;;  %v4640_v11 = vpop.f32.mrb[76].mxu1 }
 0x4bb   : > { %v4972_v23 = vsel %vm4899_vm6, %v4813_v47, %v4936_v19  ;;  %v5778_v41 = vadd.f32 %v8954_v1, %v4640_v11  ;;  %v4642_v42 = vpop.f32.mrb[77].mxu1 }
 0x4bc   : > { %v5135_v16 = vadd.f32 %v5537_v12, %v5131_v51  ;;  %v5132_v15 = vmul.f32 0.01, %v4972_v23  ;;  %v4643_v30 = vpop.f32.mrb[78].mxu1 }
 0x4bd   : > { %v4818_v35 = vadd.f32 %v5778_v41, %v8878_v21  ;;  %v5779_v44 = vadd.f32 %v8954_v1, %v4643_v30  ;;  %v4645_v49 = vpop.f32.mrb[79].mxu1 }
 0x4be   : > { %5539 = vst.msk [vmem:[%s8974_s15 + $0x80] sm:$0xff] %vm9908_vm14, %v5135_v16  ;;  %v5136_v50 = vadd.f32 %v5538_v29, %v5132_v15  ;;  %v9143_v49 = vld [vmem:[%s6396_s23 + $0xd8] sm:$0xff] }
 0x4bf   : > { %vm4900_vm7 = vcmp.gt.f32.partialorder %v4818_v35, 0.0  ;;  %v4937_v53 = vmul.f32 %v8957_v58, %v4818_v35  ;;  %v4821_v45 = vadd.f32 %v5779_v44, %v8886_v46  ;;  %v9140_v44 = vld [vmem:[%s6396_s23 + $0xd0] sm:$0xff] }
 0x4c0   : > { %5540 = vst.msk [vmem:[%s8974_s15 + $0x88] sm:$0xff] %vm9909_vm1, %v5136_v50  ;;  %vm9916_vm1 = vcmask 519168  }
 0x4c1   : > { %v4973_v40 = vsel %vm4900_vm7, %v4818_v35, %v4937_v53  ;;  %vm4901_vm9 = vcmp.gt.f32.partialorder %v4821_v45, 0.0  ;;  %v4938_v21 = vmul.f32 %v8957_v58, %v4821_v45  ;;  %v5551_v35 = vld [vmem:[%s6396_s23 + $0xb0] sm:$0xff] }
 0x4c2   : > { %v5140_v22 = vmul.f32 0.01, %v4973_v40  ;;  %v4648_v52 = vpop.f32.mrb[80].mxu1 }
 0x4c3   : > { %v4974_v32 = vsel %vm4901_vm9, %v4821_v45, %v4938_v21  ;;  %v5780_v7 = vadd.f32 %v8954_v1, %v4648_v52  ;;  %v4650_v62 = vpop.f32.mrb[81].mxu1  ;;  %v5214_v52 = vrot.slane %v9140_v44, 6  ;;  %vm9917_vm9 = vcmask 523270  }
 0x4c4   : > { %v5153_v46 = vadd.f32 %v5147_v54, %v5140_v22  ;;  %v5141_v13 = vmul.f32 0.01, %v4974_v32  ;;  %v4651_v60 = vpop.f32.mrb[82].mxu1  ;;  %v5552_v54 = vld [vmem:[%s6396_s23 + $0xb8] sm:$0xff]  ;;  %v5215_v32 = vrot.slane %v9143_v49, 6 }
 0x4c5   : > { %v4826_v25 = vadd.f32 %v5780_v7, %v8876_v48  ;;  %v5781_v5 = vadd.f32 %v8954_v1, %v4651_v60  ;;  %v4653_v34 = vpop.f32.mrb[83].mxu1  ;;  %v5186_v7 = vrot.slane %v5552_v54, 2 }
 0x4c6   : > { %5543 = vst.msk [vmem:[%s8974_s15 + $0x8e] sm:$0xfc] %vm9910_vm13, %v5153_v46  ;;  %v5154_v26 = vadd.f32 %v5149_v10, %v5141_v13 }
 0x4c7   : > { %vm4902_vm11 = vcmp.gt.f32.partialorder %v4826_v25, 0.0  ;;  %v4939_v8 = vmul.f32 %v8957_v58, %v4826_v25  ;;  %v4829_v24 = vadd.f32 %v5781_v5, %v8882_v18 }
 0x4c8   : > { %5544 = vst.msk [vmem:[%s8974_s15 + $0x96] sm:$0xff] %vm9911_vm8, %v5154_v26 }
 0x4c9   : > { %v4975_v56 = vsel %vm4902_vm11, %v4826_v25, %v4939_v8  ;;  %vm4903_vm5 = vcmp.gt.f32.partialorder %v4829_v24, 0.0  ;;  %v4940_v48 = vmul.f32 %v8957_v58, %v4829_v24  ;;  %v5216_v8 = vsel %vm5004_vm4, %v5214_v52, %v5215_v32  ;;  %vm9918_vm11 = vmmov %vm9911_vm8 }
 0x4ca   : > { %v5142_v14 = vmul.f32 0.01, %v4975_v56  ;;  %v4656_v39 = vpop.f32.mrb[84].mxu1  ;;  %vm9915_vm4 = vcmask 521216  }
 0x4cb   : > { %v4976_v59 = vsel %vm4903_vm5, %v4829_v24, %v4940_v48  ;;  %v4658_v20 = vpop.f32.mrb[85].mxu1  ;;  %v5782_v53 = vadd.f32 %v8954_v1, %v4656_v39  ;;  %vm9919_vm5 = vmmov %vm9918_vm11 }
 0x4cc   : > { %v5155_v18 = vadd.f32 %v5148_v37, %v5142_v14  ;;  %v5172_v17 = vadd.f32 %v5166_v63, %v5142_v14  ;;  %v5160_v4 = vmul.f32 0.01, %v4976_v59  ;;  %v4659_v38 = vpop.f32.mrb[86].mxu1  ;;  %v5185_v37 = vrot.slane %v5551_v35, 2  ;;  %v5556_v20 = vld [vmem:[%s6396_s23 + $0xc0] sm:$0xff] }
 0x4cd   : > { %v4661_v0 = vpop.f32.mrb[87].mxu1  ;;  %v5783_v10 = vadd.f32 %v8954_v1, %v4659_v38 }
 0x4ce   : > { %5545 = vst.msk [vmem:[%s8974_s15 + $0x9e] sm:$0x3] %vm9912_vm3, %v5155_v18  ;;  %v5173_v43 = vadd.f32 %v5168_v61, %v5160_v4  ;;  %v5187_v34 = vsel %vm1073_vm10, %v5185_v37, %v5186_v7  ;;  %v9166_v18 = vld [vmem:[%s6396_s23 + $0xe0] sm:$0xff] }
 0x4cf   : > { %5548 = vst.msk [vmem:[%s8974_s15 + $0x9c] sm:$0xf0] %vm9913_vm2, %v5172_v17  ;;  %v5233_v55 = vrot.slane %v9166_v18, 4 }
 0x4d0   : > { %5549 = vst.msk [vmem:[%s8974_s15 + $0xa4] sm:$0xff] %vm9914_vm12, %v5173_v43  ;;  %vm9920_vm12 = vmmov %vm9919_vm5 }
 0x4d2   : > { %v4664_v36 = vpop.f32.mrb[88].mxu1 }
 0x4d3   : > { %v4666_v9 = vpop.f32.mrb[89].mxu1  ;;  %v5784_v50 = vadd.f32 %v8954_v1, %v4664_v36 }
 0x4d4   : > { %v4667_v2 = vpop.f32.mrb[90].mxu1 }
 0x4d5   : > { %v4669_v6 = vpop.f32.mrb[91].mxu1  ;;  %v5785_v40 = vadd.f32 %v8954_v1, %v4667_v2 }
 0x4da   : > { %v4672_v27 = vpop.f32.mrb[92].mxu1 }
 0x4db   : > { %v4674_v47 = vpop.f32.mrb[93].mxu1  ;;  %v5786_v14 = vadd.f32 %v8954_v1, %v4672_v27 }
 0x4dc   : > { %v9128_v31 = vpop.f32.mrb[94].mxu1  ;;  %v9172_v47 = vld [vmem:[%s6396_s23 + $0xf0] sm:$0xff] }
 0x4dd   : > { %v4677_v12 = vpop.f32.mrb[95].mxu1  ;;  %v5252_v35 = vrot.slane %v9172_v47, 2 }
 0x4de   : > { %v5787_v12 = vadd.f32 %v8954_v1, %v9128_v31 }
 0x4e2   : > { %v4680_v19 = vpop.f32.mrb[96].mxu1 }
 0x4e3   : > { %v4682_v51 = vpop.f32.mrb[97].mxu1  ;;  %v5788_v39 = vadd.f32 %v8954_v1, %v4680_v19 }
 0x4e4   : > { %v4683_v11 = vpop.f32.mrb[98].mxu1 }
 0x4e5   : > { %v4685_v23 = vpop.f32.mrb[99].mxu1  ;;  %v5789_v17 = vadd.f32 %v8954_v1, %v4683_v11 }
 0x4ea   : > { %v9130_v29 = vpop.f32.mrb[100].mxu1 }
 0x4eb   : > { %v4690_v41 = vpop.f32.mrb[101].mxu1 }
 0x4ec   : > { %v9132_v57 = vpop.f32.mrb[102].mxu1 }
 0x4ed   : > { %v4693_v42 = vpop.f32.mrb[103].mxu1 }
 0x4f2   : > { %v9134_v16 = vpop.f32.mrb[104].mxu1 }
 0x4f3   : > { %v4698_v15 = vpop.f32.mrb[105].mxu1 }
 0x4f4   : > { %v9136_v30 = vpop.f32.mrb[106].mxu1 }
 0x4f5   : > { %v4701_v3 = vpop.f32.mrb[107].mxu1 }
 0x4fa   : > { %v5704_v45 = vpop.f32.mrb[108].mxu1 }
 0x4fb   : > { %v4842_v21 = vadd.f32 %v5784_v50, %v5704_v45  ;;  %v4833_v22 = vpop.f32.mrb[109].mxu1  ;;  %v9192_v50 = vld [vmem:[%s6396_s23 + $0xe8] sm:$0xff] }
 0x4fc   : > { %v4834_v28 = vadd.f32 %v5782_v53, %v4833_v22  ;;  %v5705_v62 = vpop.f32.mrb[110].mxu1 }
 0x4fd   : > { %vm4906_vm0 = vcmp.gt.f32.partialorder %v4842_v21, 0.0  ;;  %v4943_v46 = vmul.f32 %v8957_v58, %v4842_v21  ;;  %v4845_v13 = vadd.f32 %v5785_v40, %v5705_v62  ;;  %v4836_v60 = vpop.f32.mrb[111].mxu1  ;;  %v5234_v62 = vrot.slane %v9192_v50, 4 }
 0x4fe   : > { %vm4904_vm6 = vcmp.gt.f32.partialorder %v4834_v28, 0.0  ;;  %v4941_v25 = vmul.f32 %v8957_v58, %v4834_v28  ;;  %v4837_v5 = vadd.f32 %v5783_v10, %v4836_v60  ;;  %v5792_v10 = vadd.f32 %v8954_v1, %v9134_v16 }
 0x4ff   : > { %v4979_v26 = vsel %vm4906_vm0, %v4842_v21, %v4943_v46  ;;  %vm4907_vm14 = vcmp.gt.f32.partialorder %v4845_v13, 0.0  ;;  %v4944_v63 = vmul.f32 %v8957_v58, %v4845_v13  ;;  %v5557_v21 = vld [vmem:[%s6396_s23 + $0xc8] sm:$0xff]  ;;  %v5790_v46 = vadd.f32 %v8954_v1, %v9130_v29  ;;  %vm9921_vm0 = vmmov %vm9919_vm5 }
 0x500   : > { %v5180_v24 = vmul.f32 0.01, %v4979_v26  ;;  %v4977_v56 = vsel %vm4904_vm6, %v4834_v28, %v4941_v25  ;;  %vm4905_vm7 = vcmp.gt.f32.partialorder %v4837_v5, 0.0  ;;  %v4942_v48 = vmul.f32 %v8957_v58, %v4837_v5 }
 0x501   : > { %v5161_v59 = vmul.f32 0.01, %v4977_v56  ;;  %v4980_v61 = vsel %vm4907_vm14, %v4845_v13, %v4944_v63  ;;  %v5791_v56 = vadd.f32 %v8954_v1, %v9132_v57  ;;  %vm9922_vm14 = vcmask 517120  }
 0x502   : > { %v5193_v4 = vadd.f32 %v5186_v7, %v5180_v24  ;;  %v5198_v38 = vmul.f32 0.01, %v4980_v61  ;;  %v4978_v0 = vsel %vm4905_vm7, %v4837_v5, %v4942_v48  ;;  %v5708_v43 = vpop.f32.mrb[112].mxu1  ;;  %vm9923_vm7 = vcmask 523268  }
 0x503   : > { %v5174_v36 = vadd.f32 %v5167_v33, %v5161_v59  ;;  %v5191_v9 = vadd.f32 %v5185_v37, %v5161_v59  ;;  %v5179_v2 = vmul.f32 0.01, %v4978_v0  ;;  %v4858_v6 = vadd.f32 %v5788_v39, %v5708_v43  ;;  %v4849_v27 = vpop.f32.mrb[113].mxu1  ;;  %v9180_v33 = vld [vmem:[%s6396_s23 + $0xf8] sm:$0xff]  ;;  %s5581_s23 = sshll.u32 %s6257_s28, 12  ;;  %s9254_s28 = scalar_lea.sflag [#allocation5], %s283_s13 }
 0x504   : > { %5555 = vst.msk [vmem:[%s8974_s15 + $0xba] sm:$0x3f] %vm9915_vm4, %v5193_v4  ;;  %v5202_v19 = vadd.f32 %v5556_v20, %v5198_v38  ;;  %v4850_v51 = vadd.f32 %v5786_v14, %v4849_v27  ;;  %v5709_v11 = vpop.f32.mrb[114].mxu1  ;;  %v5253_v45 = vrot.slane %v9180_v33, 2  ;;  %s9238_s19 = scalar_lea.hbm %s9302_s7, %s5581_s23 }
 0x505   : > { %5550 = vst.msk [vmem:[%s8974_s15 + $0xac] sm:$0xf] %vm9916_vm1, %v5174_v36  ;;  %v5192_v23 = vadd.f32 %v5187_v34, %v5179_v2  ;;  %vm4910_vm13 = vcmp.gt.f32.partialorder %v4858_v6, 0.0  ;;  %v4947_v41 = vmul.f32 %v8957_v58, %v4858_v6  ;;  %v4861_v31 = vadd.f32 %v5789_v17, %v5709_v11  ;;  %v4852_v42 = vpop.f32.mrb[115].mxu1 }
 0x506   : > { %5553 = vst.msk [vmem:[%s8974_s15 + $0xaa] sm:$0xc0] %vm9917_vm9, %v5191_v9  ;;  %vm4908_vm8 = vcmp.gt.f32.partialorder %v4850_v51, 0.0  ;;  %v4945_v15 = vmul.f32 %v8957_v58, %v4850_v51  ;;  %v4853_v3 = vadd.f32 %v5787_v12, %v4852_v42  ;;  %v5793_v34 = vadd.f32 %v8954_v1, %v9136_v30 }
 0x507   : > { %5558 = vst.msk [vmem:[%s8974_s15 + $0xc0] sm:$0xff] %vm9918_vm11, %v5202_v19  ;;  %v4983_v54 = vsel %vm4910_vm13, %v4858_v6, %v4947_v41  ;;  %vm4911_vm3 = vcmp.gt.f32.partialorder %v4861_v31, 0.0  ;;  %v4948_v53 = vmul.f32 %v8957_v58, %v4861_v31  ;;  %v5254_v1 = vsel %vm1073_vm10, %v5252_v35, %v5253_v45  ;;  %vm9925_vm10 = vmmov %vm9921_vm0 }
 0x508   : > { %5554 = vst.msk [vmem:[%s8974_s15 + $0xb2] sm:$0xff] %vm9919_vm5, %v5192_v23  ;;  %v5208_v37 = vmul.f32 0.01, %v4983_v54  ;;  %v4981_v40 = vsel %vm4908_vm8, %v4850_v51, %v4945_v15  ;;  %vm4909_vm2 = vcmp.gt.f32.partialorder %v4853_v3, 0.0  ;;  %v4946_v22 = vmul.f32 %v8957_v58, %v4853_v3 }
 0x509   : > { %v5199_v7 = vmul.f32 0.01, %v4981_v40  ;;  %v4984_v28 = vsel %vm4911_vm3, %v4861_v31, %v4948_v53  ;;  %vm9924_vm1 = vcmask 523266   ;;  %vm9927_vm11 = vcmask 521216  }
 0x50a   : > { %v5221_v13 = vadd.f32 %v5216_v8, %v5208_v37  ;;  %v5209_v60 = vmul.f32 0.01, %v4984_v28  ;;  %v4982_v25 = vsel %vm4909_vm2, %v4853_v3, %v4946_v22  ;;  %v5712_v5 = vpop.f32.mrb[116].mxu1  ;;  %vm9928_vm8 = vcmask 519168  }
 0x50b   : > { %v5203_v26 = vadd.f32 %v5557_v21, %v5199_v7  ;;  %v5207_v63 = vmul.f32 0.01, %v4982_v25  ;;  %v4874_v16 = vadd.f32 %v5792_v10, %v5712_v5  ;;  %v4865_v24 = vpop.f32.mrb[117].mxu1  ;;  %vm9929_vm5 = vcmask 523270  }
 0x50c   : > { %5563 = vst.msk [vmem:[%s8974_s15 + $0xd6] sm:$0xff] %vm9920_vm12, %v5221_v13  ;;  %v5222_v29 = vadd.f32 %v5215_v32, %v5209_v60  ;;  %v5239_v8 = vadd.f32 %v5233_v55, %v5209_v60  ;;  %v4866_v48 = vadd.f32 %v5790_v46, %v4865_v24  ;;  %v5713_v14 = vpop.f32.mrb[118].mxu1 }
 0x50d   : > { %5559 = vst.msk [vmem:[%s8974_s15 + $0xc8] sm:$0xff] %vm9921_vm0, %v5203_v26  ;;  %v5220_v30 = vadd.f32 %v5214_v52, %v5207_v63  ;;  %vm4914_vm6 = vcmp.gt.f32.partialorder %v4874_v16, 0.0  ;;  %v4951_v39 = vmul.f32 %v8957_v58, %v4874_v16  ;;  %v4877_v59 = vadd.f32 %v5793_v34, %v5713_v14  ;;  %v4868_v61 = vpop.f32.mrb[119].mxu1 }
 0x50e   : > { %5564 = vst.msk [vmem:[%s8974_s15 + $0xde] sm:$0x3] %vm9922_vm14, %v5222_v29  ;;  %vm4912_vm4 = vcmp.gt.f32.partialorder %v4866_v48, 0.0  ;;  %v4949_v57 = vmul.f32 %v8957_v58, %v4866_v48  ;;  %v4869_v44 = vadd.f32 %v5791_v56, %v4868_v61  ;;  %v5235_v52 = vsel %vm5026_vm15, %v5233_v55, %v5234_v62  ;;  %vm9926_vm15 = vmmov %vm9921_vm0 }
 0x50f   : > { %5567 = vst.msk [vmem:[%s8974_s15 + $0xdc] sm:$0xf0] %vm9923_vm7, %v5239_v8  ;;  %v4987_v49 = vsel %vm4914_vm6, %v4874_v16, %v4951_v39  ;;  %vm4915_vm9 = vcmp.gt.f32.partialorder %v4877_v59, 0.0  ;;  %v4952_v32 = vmul.f32 %v8957_v58, %v4877_v59 }
 0x510   : > { %5562 = vst.msk [vmem:[%s8974_s15 + $0xce] sm:$0xfc] %vm9924_vm1, %v5220_v30  ;;  %v5246_v20 = vmul.f32 0.01, %v4987_v49  ;;  %v4985_v18 = vsel %vm4912_vm4, %v4866_v48, %v4949_v57  ;;  %vm4913_vm13 = vcmp.gt.f32.partialorder %v4869_v44, 0.0  ;;  %v4950_v17 = vmul.f32 %v8957_v58, %v4869_v44 }
 0x511   : > { %v5227_v4 = vmul.f32 0.01, %v4985_v18  ;;  %v4988_v38 = vsel %vm4915_vm9, %v4877_v59, %v4952_v32 }
 0x512   : > { %v5259_v0 = vadd.f32 %v5254_v1, %v5246_v20  ;;  %v5247_v43 = vmul.f32 0.01, %v4988_v38  ;;  %v4986_v36 = vsel %vm4913_vm13, %v4869_v44, %v4950_v17 }
 0x513   : > { %v5240_v9 = vadd.f32 %v5235_v52, %v5227_v4  ;;  %v5228_v2 = vmul.f32 0.01, %v4986_v36 }
 0x514   : > { %5573 = vst.msk [vmem:[%s8974_s15 + $0xf2] sm:$0xff] %vm9925_vm10, %v5259_v0  ;;  %v5260_v6 = vadd.f32 %v5253_v45, %v5247_v43 }
 0x515   : > { %5568 = vst.msk [vmem:[%s8974_s15 + $0xe4] sm:$0xff] %vm9926_vm15, %v5240_v9  ;;  %v5241_v58 = vadd.f32 %v5234_v62, %v5228_v2  ;;  %v5258_v27 = vadd.f32 %v5252_v35, %v5228_v2 }
 0x516   : > { %5574 = vst.msk [vmem:[%s8974_s15 + $0xfa] sm:$0x3f] %vm9927_vm11, %v5260_v6 }
 0x517   : > { %5569 = vst.msk [vmem:[%s8974_s15 + $0xec] sm:$0xf] %vm9928_vm8, %v5241_v58 }
 0x518   : > { %5572 = vst.msk [vmem:[%s8974_s15 + $0xea] sm:$0xc0] %vm9929_vm5, %v5258_v27 }
 0x519   : > { %6135 = shalt.err (!%p6132_p2)
}
 0x51a   : > { %s6136_s8 = scalar_lea.hbm %s9238_s19, 4096  ;;  %s6140_s14 = scalar_lea.hbm %s9302_s7, 8192 }
 0x51b   : > { %p6137_p3 = scmp.ne.s32.totalorder %s9238_s19, %s6136_s8  ;;  %p6141_p8 = scmp.lt.u32.totalorder %s9238_s19, %s9302_s7 }
 0x51c   : > { %p6142_p11 = scmp.lt.u32.totalorder %s6140_s14, %s6136_s8  ;;  %p6144_p10 = scmp.lt.u32.totalorder %s6136_s8, %s9238_s19 }
 0x51d   : > { %p6138_p4 = pnand %p6137_p3, %p6274_p5 }
 0x51e   : > { %p6143_p9 = por %p6142_p11, %p6141_p8 }
 0x51f   : > { %p6139_p7 = pneg %p6138_p4 }
 0x520   : > { %p6145_p12 = por %p6144_p10, %p6143_p9 }
 0x522   : > { %p6146_p13 = pnand %p6145_p12, %p6139_p7 }
 0x524   : > { %6149 = shalt.err (!%p6146_p13)
}
 0x525   : > { %s6194_s16 = smov 128   ;;  %s6195_s18 = smov 8  }
 0x526   : > { %5942 = dma.vmem_to_hbm [thread:$0]  (%p6274_p5), %s9240_s17, 4096, %s9238_s19, %s9254_s28, %s6194_s16, %s6194_s16, %s6195_s18  }
 0x527 PF: > { %p5954_p0 = scmp.ge.s32.totalorder %s6188_s27, 2  ;;  %s5294_s20 = sand.u32 1, %s6176_s24  }
 0x528   : > { %s5295_s21 = scalar_lea.sflag [#allocation5], %s5294_s20 }
 0x529   : > { %p5949_p1 = pnand %p5954_p0, %p6278_p6 }
 0x52b   : > { %6171 = dma.done.wait (!%p5949_p1), %s5295_s21, 4096  }
 0x52c   : > { %6173 = vsyncadd (!%p5949_p1), %s5295_s21, 4294963200  ;;  %p18_p2 = scmp.ge.s32.totalorder %s6261_s30, 4   ;;  %s9930_s24 = smov %s6180_s25 }
 0x52d   : > { %s9931_s25 = smov %s6184_s26  ;;  %s9932_s26 = smov %s6272_s10 }
 0x52e   : > { %s9933_s27 = smov %s6261_s30  ;;  %20 = sbr.rel (!%p18_p2) target bundleno = 4 (0x4), region = 118 }
 0x535   :  { %5300 = vsyncpa [#allocation5], 1 }
 0x536   :  { %5302 = vsyncpa [#allocation5 + $0x1], 1 }
 0x537   :  { %5303 = vsyncpa [#allocation6], 1 }
 0x538   :  { %5305 = vsyncpa [#allocation6 + $0x1], 1 }

</bundles_post_ra>
